<compile_context>
chip_gen: v7x
topology: tpu7x:2x2x1
jax: 0.10.0
libtpu: 0.0.40
codegen_flags: <defaults>
</compile_context>

<pallas_src>
import functools

import jax
import jax.numpy as jnp
from jax.experimental import pallas as pl
from jax.experimental.pallas import tpu as pltpu

F32 = jnp.float32
BF16 = jnp.bfloat16
EPS = 1e-5  # PyTorch LayerNorm default eps

ENC_KEYS = ("wqkv", "bqkv", "wo", "bo", "w1", "b1", "w2", "b2",
            "g1", "be1", "g2", "be2")
CO_KEYS = ("wq", "bq", "wkv", "bkv", "red", "expd", "g", "be",
           "w4", "b4", "w5", "b5", "w6p", "b6p")
HEAD_KEYS = ("wh1", "bh1", "wh2p", "bh2p")


# ----------------------------------------------------------------------------
# helpers
# ----------------------------------------------------------------------------
def _cparams(*sem):
    return pltpu.CompilerParams(dimension_semantics=sem,
                                vmem_limit_bytes=64 * 1024 * 1024)


def _weight_spec(arr):
    """Full-array block, same block index every grid step (fetched once)."""
    nd = arr.ndim
    return pl.BlockSpec(arr.shape, lambda *idx, nd=nd: (0,) * nd)


def _row_tile(n, max_tile=256):
    """Pad a row count to a sublane-aligned multiple of the tile size."""
    n_pad = -(-n // 8) * 8
    if n_pad <= max_tile:
        return n_pad, n_pad
    n_pad = -(-n // max_tile) * max_tile
    return n_pad, max_tile


def _pad_rows(x, n_pad):
    n = x.shape[0]
    if n == n_pad:
        return x
    return jnp.pad(x, ((0, n_pad - n),) + ((0, 0),) * (x.ndim - 1))


def _dot(a, b):
    # MXU matmul: bf16 operands, f32 accumulation.  Weights are already bf16
    # (hoisted at init), so only the activation cast remains.
    return jnp.dot(a.astype(BF16), b.astype(BF16), preferred_element_type=F32)


def _layernorm(x, g, b):
    mean = jnp.mean(x, axis=-1, keepdims=True)
    var = jnp.mean((x - mean) ** 2, axis=-1, keepdims=True)
    return (x - mean) * jax.lax.rsqrt(var + EPS) * g + b


def _softmax_last(x):
    m = jnp.max(x, axis=-1, keepdims=True)
    e = jnp.exp(x - m)
    return e / jnp.sum(e, axis=-1, keepdims=True)


# ----------------------------------------------------------------------------
# transformer encoder layer (grid=(B,), block-local attention)
# ----------------------------------------------------------------------------
def _encoder_core(x, wqkv, bqkv, wo, bo, w1, b1, w2, b2, g1, be1, g2, be2,
                  *, nhead):
    """nn.TransformerEncoderLayer (batch_first, relu, norm_first=False) on one
    (L, D) block.  Attention is block-local because the grid carries the batch
    axis; per-head PV outputs are concatenated so W_o is applied once (K=d)."""
    d = x.shape[-1]
    dh = d // nhead
    scale = 1.0 / (dh ** 0.5)

    qkv = _dot(x, wqkv) + bqkv                        # fused Q|K|V projection
    q, k, v = qkv[:, :d], qkv[:, d:2 * d], qkv[:, 2 * d:]

    heads = []
    for h in range(nhead):                            # static, tiny head count
        sl = slice(h * dh, (h + 1) * dh)
        s = _dot(q[:, sl], k[:, sl].T) * scale
        p = _softmax_last(s)
        heads.append(_dot(p, v[:, sl]))
    attn = _dot(jnp.concatenate(heads, axis=-1), wo) + bo   # single K=d matmul

    # TODO(synk): dropout(p=0.1) treated as identity (eval-mode semantics).
    x1 = _layernorm(x + attn, g1, be1)
    ff = jnp.maximum(_dot(x1, w1) + b1, 0.0)
    ff = _dot(ff, w2) + b2
    return _layernorm(x1 + ff, g2, be2)


def encoder_kernel(x_ref, wqkv_ref, bqkv_ref, wo_ref, bo_ref, w1_ref, b1_ref,
                   w2_ref, b2_ref, g1_ref, be1_ref, g2_ref, be2_ref, o_ref,
                   *, nhead):
    o_ref[...] = _encoder_core(
        x_ref[...], wqkv_ref[...], bqkv_ref[...], wo_ref[...], bo_ref[...],
        w1_ref[...], b1_ref[...], w2_ref[...], b2_ref[...],
        g1_ref[...], be1_ref[...], g2_ref[...], be2_ref[...], nhead=nhead)


def encoder_head_kernel(x_ref, wqkv_ref, bqkv_ref, wo_ref, bo_ref, w1_ref,
                        b1_ref, w2_ref, b2_ref, g1_ref, be1_ref, g2_ref,
                        be2_ref, wh1_ref, bh1_ref, wh2_ref, bh2_ref, o_ref,
                        *, nhead):
    """encoder_layer2 fused with tanh(linear1) -> linear2; head weights are
    pre-padded so the store is a lane-dense 128-wide slab."""
    y = _encoder_core(
        x_ref[...], wqkv_ref[...], bqkv_ref[...], wo_ref[...], bo_ref[...],
        w1_ref[...], b1_ref[...], w2_ref[...], b2_ref[...],
        g1_ref[...], be1_ref[...], g2_ref[...], be2_ref[...], nhead=nhead)
    h = jnp.tanh(_dot(y, wh1_ref[...]) + bh1_ref[...])
    o_ref[...] = _dot(h, wh2_ref[...]) + bh2_ref[...]


def encoder_layer(x, p, *, nhead):
    B, L, D = x.shape
    ws = tuple(p[k] for k in ENC_KEYS)
    return pl.pallas_call(
        functools.partial(encoder_kernel, nhead=nhead),
        out_shape=jax.ShapeDtypeStruct((B, L, D), F32),
        grid=(B,),
        in_specs=[pl.BlockSpec((None, L, D), lambda b: (b, 0, 0))]
                 + [_weight_spec(a) for a in ws],
        out_specs=pl.BlockSpec((None, L, D), lambda b: (b, 0, 0)),
        compiler_params=_cparams("parallel"),
    )(x, *ws)


def encoder_layer_with_head(x, enc_p, head_p, *, nhead):
    B, L, D = x.shape
    ws = tuple(enc_p[k] for k in ENC_KEYS) + tuple(head_p[k] for k in HEAD_KEYS)
    out = pl.pallas_call(
        functools.partial(encoder_head_kernel, nhead=nhead),
        out_shape=jax.ShapeDtypeStruct((B, L, 128), F32),
        grid=(B,),
        in_specs=[pl.BlockSpec((None, L, D), lambda b: (b, 0, 0))]
                 + [_weight_spec(a) for a in ws],
        out_specs=pl.BlockSpec((None, L, 128), lambda b: (b, 0, 0)),
        compiler_params=_cparams("parallel"),
    )(x, *ws)
    return out[:, :, :1]


# ----------------------------------------------------------------------------
# co-attention edge classifier (row-tiled over edges)
# ----------------------------------------------------------------------------
def coattention_edge_kernel(xs_ref, xe_ref, wq_ref, bq_ref, wkv_ref, bkv_ref,
                            red_ref, exp_ref, g_ref, be_ref, w4_ref, b4_ref,
                            w5_ref, b5_ref, w6_ref, b6_ref, o_ref, *, nheads):
    """Co_attention_head + relu(linear4) + relu(linear5) + linear6 batched
    over a tile of edges.  Per-head scalar score sum(q_h*k_h) is computed in
    f32 via a precomputed (D,H) reducer matmul and broadcast back with a
    (H,D) expander (replaces the old (D,D) block-diagonal selector)."""
    xs = xs_ref[...]                    # (tE, D)  node1 (edge start)
    xe = xe_ref[...]                    # (tE, D)  node2 (edge end)
    d = xs.shape[-1]
    scale = 1.0 / ((d / nheads) ** 0.5)

    q = _dot(xs, wq_ref[...]) + bq_ref[...]            # (tE, D)
    kv = _dot(xe, wkv_ref[...]) + bkv_ref[...]         # fused K|V projection
    k, v = kv[:, :d], kv[:, d:]

    qk = q * k                                         # f32 products
    scores = jnp.dot(qk, red_ref[...], preferred_element_type=F32,
                     precision=jax.lax.Precision.HIGHEST)      # (tE, H)
    s = jnp.dot(scores, exp_ref[...], preferred_element_type=F32,
                precision=jax.lax.Precision.HIGHEST)           # (tE, D)
    r = _layernorm(s * scale * v, g_ref[...], be_ref[...])

    t = jnp.maximum(r, 0.0)
    t = jnp.maximum(_dot(t, w4_ref[...]) + b4_ref[...], 0.0)
    t = jnp.maximum(_dot(t, w5_ref[...]) + b5_ref[...], 0.0)
    o_ref[...] = _dot(t, w6_ref[...]) + b6_ref[...]    # (tE, 128) lane-dense


def coattention_edges(xs_p, xe_p, p, *, nheads, tile_e):
    E_pad, D = xs_p.shape
    ws = tuple(p[k] for k in CO_KEYS)
    return pl.pallas_call(
        functools.partial(coattention_edge_kernel, nheads=nheads),
        out_shape=jax.ShapeDtypeStruct((E_pad, 128), F32),
        grid=(E_pad // tile_e,),
        in_specs=[pl.BlockSpec((tile_e, D), lambda i: (i, 0)),
                  pl.BlockSpec((tile_e, D), lambda i: (i, 0))]
                 + [_weight_spec(a) for a in ws],
        out_specs=pl.BlockSpec((tile_e, 128), lambda i: (i, 0)),
        compiler_params=_cparams("parallel"),
    )(xs_p, xe_p, *ws)


# ----------------------------------------------------------------------------
# RGCN (relation-tiled contraction) and GraphConv kernels
# ----------------------------------------------------------------------------
def rgcn_kernel(x_ref, agg_ref, root_ref, wrel_ref, b_ref, o_ref, acc_ref):
    """RGCNConv dense part: accumulate one relation per grid step.
    out = x @ root + bias + sum_r mean_r(msg) @ W_r."""
    r = pl.program_id(1)

    @pl.when(r == 0)
    def _():
        acc_ref[...] = _dot(x_ref[...], root_ref[...]) + b_ref[...]

    acc_ref[...] += _dot(agg_ref[...], wrel_ref[...])

    @pl.when(r == pl.num_programs(1) - 1)
    def _():
        o_ref[...] = acc_ref[...]


def rgcn_conv(nodes_p, agg, p, *, tile_n):
    N_pad, D = nodes_p.shape
    num_rel = agg.shape[0]
    return pl.pallas_call(
        rgcn_kernel,
        out_shape=jax.ShapeDtypeStruct((N_pad, 768), F32),
        grid=(N_pad // tile_n, num_rel),
        in_specs=[pl.BlockSpec((tile_n, D), lambda i, r: (i, 0)),
                  pl.BlockSpec((None, tile_n, D), lambda i, r: (r, i, 0)),
                  _weight_spec(p["root"]),
                  pl.BlockSpec((None, D, 768), lambda i, r: (r, 0, 0)),
                  _weight_spec(p["bias"])],
        out_specs=pl.BlockSpec((tile_n, 768), lambda i, r: (i, 0)),
        scratch_shapes=[pltpu.VMEM((tile_n, 768), F32)],
        compiler_params=_cparams("parallel", "arbitrary"),
    )(nodes_p, agg, p["root"], p["wrel"], p["bias"])


def graphconv_kernel(x_ref, agg_ref, wrel_ref, brel_ref, wroot_ref, o_ref):
    """GraphConv dense part: out = sum_agg @ W_rel + b_rel + x @ W_root
    (weights lane-padded to 128 so the store is unmasked)."""
    o_ref[...] = (_dot(agg_ref[...], wrel_ref[...]) + brel_ref[...]
                  + _dot(x_ref[...], wroot_ref[...]))


def graph_conv(x_p, agg_p, p, *, tile_n):
    N_pad = x_p.shape[0]
    return pl.pallas_call(
        graphconv_kernel,
        out_shape=jax.ShapeDtypeStruct((N_pad, 128), F32),
        grid=(N_pad // tile_n,),
        in_specs=[pl.BlockSpec((tile_n, 768), lambda i: (i, 0)),
                  pl.BlockSpec((tile_n, 768), lambda i: (i, 0)),
                  _weight_spec(p["wrelp"]), _weight_spec(p["brelp"]),
                  _weight_spec(p["wrootp"])],
        out_specs=pl.BlockSpec((tile_n, 128), lambda i: (i, 0)),
        compiler_params=_cparams("parallel"),
    )(x_p, agg_p, p["wrelp"], p["brelp"], p["wrootp"])


# ----------------------------------------------------------------------------
# forward pass
# ----------------------------------------------------------------------------
def mutual_forward(params, input_ids, input_mask, segment_ids, cls_pos,
                   h_dim, num_options):
    B, S = input_ids.shape
    D = h_dim

    # TODO(synk): pretrained AutoModel backbone replaced by a deterministic
    # embedding lookup (no checkpoint); input_mask / segment_ids unused here.
    sequence_output = params["emb"][input_ids]                   # (B, S, D)

    # TODO(synk): batch_graphify is not defined in the reference; synthetic
    # version: nodes = all tokens flattened, chain edges inside each example,
    # option nodes located at cls_pos.
    nodes = sequence_output.reshape(B * S, D)
    N = B * S
    N_pad, tile_n = _row_tile(N)
    src = jnp.concatenate(
        [jnp.arange(S - 1, dtype=jnp.int32) + b * S for b in range(B)])
    dst = src + 1
    E = int(src.shape[0])
    options_cls = (cls_pos + jnp.arange(B, dtype=jnp.int32)[:, None] * S).reshape(-1)

    # options -> encoder_layer1 (Pallas, grid=(B,)) -> scatter back
    # TODO(synk): option/edge gathers stay in plain JAX; a PrefetchScalarGridSpec
    # DMA gather would fold them into the kernels at production sizes.
    opts_raw = nodes[options_cls].reshape(B, num_options, D)
    opts_mutual = encoder_layer(opts_raw, params["enc1"], nhead=2)
    nodes = nodes.at[options_cls].set(opts_mutual.reshape(B * num_options, D))

    # per-edge co-attention + edge-type classifier (Pallas, row-tiled over edges)
    xs = nodes[src]
    xe = nodes[dst]
    E_pad, tile_e = _row_tile(E)
    xs_p = _pad_rows(xs, E_pad).astype(BF16)
    xe_p = _pad_rows(xe, E_pad).astype(BF16)
    edge_logits = coattention_edges(xs_p, xe_p, params["coattn"],
                                    nheads=4, tile_e=tile_e)[:E, :8]
    # Faithful to the reference: Softmax(dim=0) over a per-edge (1, 8) row
    # normalizes a singleton axis -> all ones -> argmax(dim=1) is always 0.
    edge_probs = jax.nn.softmax(edge_logits[:, None, :], axis=1)[:, 0, :]
    edge_type = jnp.argmax(edge_probs, axis=1).astype(jnp.int32)

    # RGCNConv(h_dim, 768, 8): per-relation mean aggregation.  No (E, 8D)
    # one-hot slab, no jnp.repeat divisor: segment ids = relation * N_pad + dst
    # give an (8, N_pad, D) aggregate directly, divided by per-relation counts.
    msgs = xs                                                    # nodes[src]
    seg = edge_type * N_pad + dst
    agg_sum = jax.ops.segment_sum(msgs, seg,
                                  num_segments=8 * N_pad).reshape(8, N_pad, D)
    cnt = jax.ops.segment_sum(jnp.ones((E,), F32), seg,
                              num_segments=8 * N_pad).reshape(8, N_pad, 1)
    agg = (agg_sum / jnp.maximum(cnt, 1.0)).astype(BF16)         # (8, N_pad, D)
    nodes_p = _pad_rows(nodes, N_pad).astype(BF16)
    rgcn_out = rgcn_conv(nodes_p, agg, params["rgcn"], tile_n=tile_n)  # (N_pad,768)

    # GraphConv(768, 64): sum aggregation (glue) + Pallas matmuls, lane-dense out
    agg2 = jax.ops.segment_sum(rgcn_out[src], dst, num_segments=N_pad)
    gout = graph_conv(rgcn_out.astype(BF16), agg2.astype(BF16),
                      params["gconv"], tile_n=tile_n)            # (N_pad, 128)

    # gather options, encoder_layer2 fused with tanh(linear1) -> linear2
    opts = gout[options_cls][:, :64].reshape(B, num_options, 64)
    logits = encoder_layer_with_head(opts, params["enc2"], params["head"],
                                     nhead=2)
    return logits                                                # (B, opt, 1)


# ----------------------------------------------------------------------------
# deterministic parameter init (synthetic, no checkpoint).  All weight fusion,
# lane padding, bf16 casts and score reducer/expander constants live here so
# the per-forward path does no weight reshaping.
# ----------------------------------------------------------------------------
def init_params(key, h_dim, vocab=100, ff=2048, nheads_co=4):
    keys = iter(jax.random.split(key, 64))

    def w(shape, scale=0.02):
        return jax.random.normal(next(keys), shape, dtype=F32) * scale

    zeros = lambda s: jnp.zeros(s, F32)
    ones = lambda s: jnp.ones(s, F32)

    def enc(dm):
        wq, wk, wv, wo = w((dm, dm)), w((dm, dm)), w((dm, dm)), w((dm, dm))
        return dict(
            wqkv=jnp.concatenate([wq, wk, wv], axis=1).astype(BF16),
            bqkv=zeros((1, 3 * dm)),
            wo=wo.astype(BF16), bo=zeros((1, dm)),
            w1=w((dm, ff)).astype(BF16), b1=zeros((1, ff)),
            w2=w((ff, dm)).astype(BF16), b2=zeros((1, dm)),
            g1=ones((1, dm)), be1=zeros((1, dm)),
            g2=ones((1, dm)), be2=zeros((1, dm)))

    d = h_dim
    hid = jnp.arange(d, dtype=jnp.int32) // (d // nheads_co)
    red = (hid[:, None] == jnp.arange(nheads_co, dtype=jnp.int32)[None, :]
           ).astype(F32)                                         # (d, H) reducer
    coattn = dict(
        wq=w((d, d)).astype(BF16), bq=zeros((1, d)),
        wkv=jnp.concatenate([w((d, d)), w((d, d))], axis=1).astype(BF16),
        bkv=zeros((1, 2 * d)),
        red=red, expd=red.T,                                     # (H, d) expander
        g=ones((1, d)), be=zeros((1, d)),
        w4=w((d, d)).astype(BF16), b4=zeros((1, d)),
        w5=w((d, 64)).astype(BF16), b5=zeros((1, 64)),
        w6p=jnp.pad(w((64, 8)), ((0, 0), (0, 120))).astype(BF16),
        b6p=zeros((1, 128)))

    params = {
        "emb": w((vocab, d), 0.1),
        "enc1": enc(d),
        "enc2": enc(64),
        "coattn": coattn,
        "rgcn": dict(root=w((d, 768)).astype(BF16),
                     wrel=w((8, d, 768)).astype(BF16),
                     bias=zeros((1, 768))),
        "gconv": dict(wrelp=jnp.pad(w((768, 64)), ((0, 0), (0, 64))).astype(BF16),
                      brelp=zeros((1, 128)),
                      wrootp=jnp.pad(w((768, 64)), ((0, 0), (0, 64))).astype(BF16)),
        "head": dict(wh1=w((64, 64)).astype(BF16), bh1=zeros((1, 64)),
                     wh2p=jnp.pad(w((64, 1)), ((0, 0), (0, 127))).astype(BF16),
                     bh2p=zeros((1, 128))),
    }
    return params


# ----------------------------------------------------------------------------
# main
# ----------------------------------------------------------------------------
if __name__ == "__main__":
    H_DIM = 32          # cfg.h_dim (divisible by 4 for the co-attention heads)
    NUM_OPTIONS = 4     # cfg.num_options
    B, S = 2, 16
    VOCAB = 100

    key = jax.random.PRNGKey(0)
    kp, ki = jax.random.split(key)
    params = init_params(kp, H_DIM, vocab=VOCAB)

    input_ids = jax.random.randint(ki, (B, S), 0, VOCAB, dtype=jnp.int32)
    input_mask = jnp.ones((B, S), dtype=jnp.int32)
    segment_ids = jnp.zeros((B, S), dtype=jnp.int32)
    cls_pos = jnp.array([[1, 5, 9, 13], [2, 6, 10, 14]], dtype=jnp.int32)

    fwd = jax.jit(functools.partial(mutual_forward,
                                    h_dim=H_DIM, num_options=NUM_OPTIONS))
    logits = fwd(params, input_ids, input_mask, segment_ids, cls_pos)
    jax.block_until_ready(logits)
    assert logits.shape == (B, NUM_OPTIONS, 1)
    print("KERNEL_OK")
</pallas_src>

<mosaic_0001>
module attributes {stable_mosaic.version = 11 : i64} {
  func.func @encoder_kernel(%arg0: i32, %arg1: memref<1x4x32xf32, #tpu.memory_space<vmem>>, %arg2: memref<32x96xbf16, #tpu.memory_space<vmem>>, %arg3: memref<1x96xf32, #tpu.memory_space<vmem>>, %arg4: memref<32x32xbf16, #tpu.memory_space<vmem>>, %arg5: memref<1x32xf32, #tpu.memory_space<vmem>>, %arg6: memref<32x2048xbf16, #tpu.memory_space<vmem>>, %arg7: memref<1x2048xf32, #tpu.memory_space<vmem>>, %arg8: memref<2048x32xbf16, #tpu.memory_space<vmem>>, %arg9: memref<1x32xf32, #tpu.memory_space<vmem>>, %arg10: memref<1x32xf32, #tpu.memory_space<vmem>>, %arg11: memref<1x32xf32, #tpu.memory_space<vmem>>, %arg12: memref<1x32xf32, #tpu.memory_space<vmem>>, %arg13: memref<1x32xf32, #tpu.memory_space<vmem>>, %arg14: memref<1x4x32xf32, #tpu.memory_space<vmem>>) attributes {dimension_semantics = [#tpu.dimension_semantics<parallel>], iteration_bounds = array<i64: 2>, scalar_prefetch = 0 : i64, scratch_operands = 0 : i64, tpu.core_type = #tpu.core_type<tc>, window_params = [{transform_indices = @transform_0, window_bounds = array<i64: 1, 4, 32>}, {pipeline_mode = #tpu.pipeline_mode<synchronous>, transform_indices = @transform_1, window_bounds = array<i64: 32, 96>}, {pipeline_mode = #tpu.pipeline_mode<synchronous>, transform_indices = @transform_2, window_bounds = array<i64: 1, 96>}, {pipeline_mode = #tpu.pipeline_mode<synchronous>, transform_indices = @transform_3, window_bounds = array<i64: 32, 32>}, {pipeline_mode = #tpu.pipeline_mode<synchronous>, transform_indices = @transform_4, window_bounds = array<i64: 1, 32>}, {pipeline_mode = #tpu.pipeline_mode<synchronous>, transform_indices = @transform_5, window_bounds = array<i64: 32, 2048>}, {pipeline_mode = #tpu.pipeline_mode<synchronous>, transform_indices = @transform_6, window_bounds = array<i64: 1, 2048>}, {pipeline_mode = #tpu.pipeline_mode<synchronous>, transform_indices = @transform_7, window_bounds = array<i64: 2048, 32>}, {pipeline_mode = #tpu.pipeline_mode<synchronous>, transform_indices = @transform_8, window_bounds = array<i64: 1, 32>}, {pipeline_mode = #tpu.pipeline_mode<synchronous>, transform_indices = @transform_9, window_bounds = array<i64: 1, 32>}, {pipeline_mode = #tpu.pipeline_mode<synchronous>, transform_indices = @transform_10, window_bounds = array<i64: 1, 32>}, {pipeline_mode = #tpu.pipeline_mode<synchronous>, transform_indices = @transform_11, window_bounds = array<i64: 1, 32>}, {pipeline_mode = #tpu.pipeline_mode<synchronous>, transform_indices = @transform_12, window_bounds = array<i64: 1, 32>}, {transform_indices = @transform_13, window_bounds = array<i64: 1, 4, 32>}]} {
    %c0 = arith.constant 0 : index
    %c0_0 = arith.constant 0 : index
    %c0_1 = arith.constant 0 : index
    %0 = vector.load %arg1[%c0, %c0_0, %c0_1] : memref<1x4x32xf32, #tpu.memory_space<vmem>>, vector<1x4x32xf32>
    %1 = vector.shape_cast %0 : vector<1x4x32xf32> to vector<4x32xf32>
    %c0_2 = arith.constant 0 : index
    %c0_3 = arith.constant 0 : index
    %2 = vector.load %arg2[%c0_2, %c0_3] : memref<32x96xbf16, #tpu.memory_space<vmem>>, vector<32x96xbf16>
    %c0_4 = arith.constant 0 : index
    %c0_5 = arith.constant 0 : index
    %3 = vector.load %arg3[%c0_4, %c0_5] : memref<1x96xf32, #tpu.memory_space<vmem>>, vector<1x96xf32>
    %c0_6 = arith.constant 0 : index
    %c0_7 = arith.constant 0 : index
    %4 = vector.load %arg4[%c0_6, %c0_7] : memref<32x32xbf16, #tpu.memory_space<vmem>>, vector<32x32xbf16>
    %c0_8 = arith.constant 0 : index
    %c0_9 = arith.constant 0 : index
    %5 = vector.load %arg5[%c0_8, %c0_9] : memref<1x32xf32, #tpu.memory_space<vmem>>, vector<1x32xf32>
    %c0_10 = arith.constant 0 : index
    %c0_11 = arith.constant 0 : index
    %6 = vector.load %arg6[%c0_10, %c0_11] : memref<32x2048xbf16, #tpu.memory_space<vmem>>, vector<32x2048xbf16>
    %c0_12 = arith.constant 0 : index
    %c0_13 = arith.constant 0 : index
    %7 = vector.load %arg7[%c0_12, %c0_13] : memref<1x2048xf32, #tpu.memory_space<vmem>>, vector<1x2048xf32>
    %c0_14 = arith.constant 0 : index
    %c0_15 = arith.constant 0 : index
    %8 = vector.load %arg8[%c0_14, %c0_15] : memref<2048x32xbf16, #tpu.memory_space<vmem>>, vector<2048x32xbf16>
    %c0_16 = arith.constant 0 : index
    %c0_17 = arith.constant 0 : index
    %9 = vector.load %arg9[%c0_16, %c0_17] : memref<1x32xf32, #tpu.memory_space<vmem>>, vector<1x32xf32>
    %c0_18 = arith.constant 0 : index
    %c0_19 = arith.constant 0 : index
    %10 = vector.load %arg10[%c0_18, %c0_19] : memref<1x32xf32, #tpu.memory_space<vmem>>, vector<1x32xf32>
    %c0_20 = arith.constant 0 : index
    %c0_21 = arith.constant 0 : index
    %11 = vector.load %arg11[%c0_20, %c0_21] : memref<1x32xf32, #tpu.memory_space<vmem>>, vector<1x32xf32>
    %c0_22 = arith.constant 0 : index
    %c0_23 = arith.constant 0 : index
    %12 = vector.load %arg12[%c0_22, %c0_23] : memref<1x32xf32, #tpu.memory_space<vmem>>, vector<1x32xf32>
    %c0_24 = arith.constant 0 : index
    %c0_25 = arith.constant 0 : index
    %13 = vector.load %arg13[%c0_24, %c0_25] : memref<1x32xf32, #tpu.memory_space<vmem>>, vector<1x32xf32>
    %14 = arith.truncf %1 : vector<4x32xf32> to vector<4x32xbf16>
    %cst = arith.constant dense<0.000000e+00> : vector<4x96xf32>
    %15 = tpu.matmul %14, %2, %cst {dimension_numbers = #tpu.dot_dimension_numbers<[1], [0], [0], [1], [0, 0, 1, 1], [], []>} : vector<4x32xbf16>, vector<32x96xbf16>, vector<4x96xf32> -> vector<4x96xf32>
    %16 = vector.broadcast %3 : vector<1x96xf32> to vector<4x96xf32>
    %17 = arith.addf %15, %16 : vector<4x96xf32>
    %18 = vector.extract_strided_slice %17 {offsets = [0, 0], sizes = [4, 32], strides = [1, 1]} : vector<4x96xf32> to vector<4x32xf32>
    %19 = vector.extract_strided_slice %17 {offsets = [0, 32], sizes = [4, 32], strides = [1, 1]} : vector<4x96xf32> to vector<4x32xf32>
    %20 = vector.extract_strided_slice %17 {offsets = [0, 64], sizes = [4, 32], strides = [1, 1]} : vector<4x96xf32> to vector<4x32xf32>
    %21 = vector.extract_strided_slice %18 {offsets = [0, 0], sizes = [4, 16], strides = [1, 1]} : vector<4x32xf32> to vector<4x16xf32>
    %22 = vector.extract_strided_slice %19 {offsets = [0, 0], sizes = [4, 16], strides = [1, 1]} : vector<4x32xf32> to vector<4x16xf32>
    %23 = tpu.transpose %22, [1, 0] : vector<4x16xf32> -> vector<16x4xf32>
    %24 = arith.truncf %21 : vector<4x16xf32> to vector<4x16xbf16>
    %25 = arith.truncf %23 : vector<16x4xf32> to vector<16x4xbf16>
    %cst_26 = arith.constant dense<0.000000e+00> : vector<4x4xf32>
    %26 = tpu.matmul %24, %25, %cst_26 {dimension_numbers = #tpu.dot_dimension_numbers<[1], [0], [0], [1], [0, 0, 1, 1], [], []>} : vector<4x16xbf16>, vector<16x4xbf16>, vector<4x4xf32> -> vector<4x4xf32>
    %cst_27 = arith.constant 2.500000e-01 : f32
    %27 = vector.broadcast %cst_27 : f32 to vector<4x4xf32>
    %28 = arith.mulf %26, %27 : vector<4x4xf32>
    %cst_28 = arith.constant dense<0xFF800000> : vector<4xf32>
    %29 = vector.multi_reduction <maximumf>, %28, %cst_28 [1] : vector<4x4xf32> to vector<4xf32>
    %30 = vector.shape_cast %29 : vector<4xf32> to vector<4x1xf32>
    %31 = vector.broadcast %30 : vector<4x1xf32> to vector<4x4xf32>
    %32 = arith.subf %28, %31 : vector<4x4xf32>
    %33 = math.exp %32 : vector<4x4xf32>
    %cst_29 = arith.constant dense<0.000000e+00> : vector<4xf32>
    %34 = vector.multi_reduction <add>, %33, %cst_29 [1] : vector<4x4xf32> to vector<4xf32>
    %35 = vector.shape_cast %34 : vector<4xf32> to vector<4x1xf32>
    %36 = vector.broadcast %35 : vector<4x1xf32> to vector<4x4xf32>
    %37 = arith.divf %33, %36 : vector<4x4xf32>
    %38 = vector.extract_strided_slice %20 {offsets = [0, 0], sizes = [4, 16], strides = [1, 1]} : vector<4x32xf32> to vector<4x16xf32>
    %39 = arith.truncf %37 : vector<4x4xf32> to vector<4x4xbf16>
    %40 = arith.truncf %38 : vector<4x16xf32> to vector<4x16xbf16>
    %cst_30 = arith.constant dense<0.000000e+00> : vector<4x16xf32>
    %41 = tpu.matmul %39, %40, %cst_30 {dimension_numbers = #tpu.dot_dimension_numbers<[1], [0], [0], [1], [0, 0, 1, 1], [], []>} : vector<4x4xbf16>, vector<4x16xbf16>, vector<4x16xf32> -> vector<4x16xf32>
    %42 = vector.extract_strided_slice %18 {offsets = [0, 16], sizes = [4, 16], strides = [1, 1]} : vector<4x32xf32> to vector<4x16xf32>
    %43 = vector.extract_strided_slice %19 {offsets = [0, 16], sizes = [4, 16], strides = [1, 1]} : vector<4x32xf32> to vector<4x16xf32>
    %44 = tpu.transpose %43, [1, 0] : vector<4x16xf32> -> vector<16x4xf32>
    %45 = arith.truncf %42 : vector<4x16xf32> to vector<4x16xbf16>
    %46 = arith.truncf %44 : vector<16x4xf32> to vector<16x4xbf16>
    %cst_31 = arith.constant dense<0.000000e+00> : vector<4x4xf32>
    %47 = tpu.matmul %45, %46, %cst_31 {dimension_numbers = #tpu.dot_dimension_numbers<[1], [0], [0], [1], [0, 0, 1, 1], [], []>} : vector<4x16xbf16>, vector<16x4xbf16>, vector<4x4xf32> -> vector<4x4xf32>
    %cst_32 = arith.constant 2.500000e-01 : f32
    %48 = vector.broadcast %cst_32 : f32 to vector<4x4xf32>
    %49 = arith.mulf %47, %48 : vector<4x4xf32>
    %cst_33 = arith.constant dense<0xFF800000> : vector<4xf32>
    %50 = vector.multi_reduction <maximumf>, %49, %cst_33 [1] : vector<4x4xf32> to vector<4xf32>
    %51 = vector.shape_cast %50 : vector<4xf32> to vector<4x1xf32>
    %52 = vector.broadcast %51 : vector<4x1xf32> to vector<4x4xf32>
    %53 = arith.subf %49, %52 : vector<4x4xf32>
    %54 = math.exp %53 : vector<4x4xf32>
    %cst_34 = arith.constant dense<0.000000e+00> : vector<4xf32>
    %55 = vector.multi_reduction <add>, %54, %cst_34 [1] : vector<4x4xf32> to vector<4xf32>
    %56 = vector.shape_cast %55 : vector<4xf32> to vector<4x1xf32>
    %57 = vector.broadcast %56 : vector<4x1xf32> to vector<4x4xf32>
    %58 = arith.divf %54, %57 : vector<4x4xf32>
    %59 = vector.extract_strided_slice %20 {offsets = [0, 16], sizes = [4, 16], strides = [1, 1]} : vector<4x32xf32> to vector<4x16xf32>
    %60 = arith.truncf %58 : vector<4x4xf32> to vector<4x4xbf16>
    %61 = arith.truncf %59 : vector<4x16xf32> to vector<4x16xbf16>
    %cst_35 = arith.constant dense<0.000000e+00> : vector<4x16xf32>
    %62 = tpu.matmul %60, %61, %cst_35 {dimension_numbers = #tpu.dot_dimension_numbers<[1], [0], [0], [1], [0, 0, 1, 1], [], []>} : vector<4x4xbf16>, vector<4x16xbf16>, vector<4x16xf32> -> vector<4x16xf32>
    %63 = tpu.concatenate %41, %62 in 1 : vector<4x16xf32>, vector<4x16xf32> -> vector<4x32xf32>
    %64 = arith.truncf %63 : vector<4x32xf32> to vector<4x32xbf16>
    %cst_36 = arith.constant dense<0.000000e+00> : vector<4x32xf32>
    %65 = tpu.matmul %64, %4, %cst_36 {dimension_numbers = #tpu.dot_dimension_numbers<[1], [0], [0], [1], [0, 0, 1, 1], [], []>} : vector<4x32xbf16>, vector<32x32xbf16>, vector<4x32xf32> -> vector<4x32xf32>
    %66 = vector.broadcast %5 : vector<1x32xf32> to vector<4x32xf32>
    %67 = arith.addf %65, %66 : vector<4x32xf32>
    %68 = arith.addf %1, %67 : vector<4x32xf32>
    %cst_37 = arith.constant dense<0.000000e+00> : vector<4xf32>
    %69 = vector.multi_reduction <add>, %68, %cst_37 [1] : vector<4x32xf32> to vector<4xf32>
    %70 = vector.shape_cast %69 : vector<4xf32> to vector<4x1xf32>
    %cst_38 = arith.constant 3.200000e+01 : f32
    %71 = vector.broadcast %cst_38 : f32 to vector<4x1xf32>
    %72 = arith.divf %70, %71 : vector<4x1xf32>
    %73 = vector.broadcast %72 : vector<4x1xf32> to vector<4x32xf32>
    %74 = arith.subf %68, %73 : vector<4x32xf32>
    %75 = arith.mulf %74, %74 : vector<4x32xf32>
    %cst_39 = arith.constant dense<0.000000e+00> : vector<4xf32>
    %76 = vector.multi_reduction <add>, %75, %cst_39 [1] : vector<4x32xf32> to vector<4xf32>
    %77 = vector.shape_cast %76 : vector<4xf32> to vector<4x1xf32>
    %cst_40 = arith.constant 3.200000e+01 : f32
    %78 = vector.broadcast %cst_40 : f32 to vector<4x1xf32>
    %79 = arith.divf %77, %78 : vector<4x1xf32>
    %80 = vector.broadcast %72 : vector<4x1xf32> to vector<4x32xf32>
    %81 = arith.subf %68, %80 : vector<4x32xf32>
    %cst_41 = arith.constant 9.99999974E-6 : f32
    %82 = vector.broadcast %cst_41 : f32 to vector<4x1xf32>
    %83 = arith.addf %79, %82 : vector<4x1xf32>
    %84 = math.rsqrt %83 : vector<4x1xf32>
    %85 = vector.broadcast %84 : vector<4x1xf32> to vector<4x32xf32>
    %86 = arith.mulf %81, %85 : vector<4x32xf32>
    %87 = vector.broadcast %10 : vector<1x32xf32> to vector<4x32xf32>
    %88 = arith.mulf %86, %87 : vector<4x32xf32>
    %89 = vector.broadcast %11 : vector<1x32xf32> to vector<4x32xf32>
    %90 = arith.addf %88, %89 : vector<4x32xf32>
    %91 = arith.truncf %90 : vector<4x32xf32> to vector<4x32xbf16>
    %cst_42 = arith.constant dense<0.000000e+00> : vector<4x2048xf32>
    %92 = tpu.matmul %91, %6, %cst_42 {dimension_numbers = #tpu.dot_dimension_numbers<[1], [0], [0], [1], [0, 0, 1, 1], [], []>} : vector<4x32xbf16>, vector<32x2048xbf16>, vector<4x2048xf32> -> vector<4x2048xf32>
    %93 = vector.broadcast %7 : vector<1x2048xf32> to vector<4x2048xf32>
    %94 = arith.addf %92, %93 : vector<4x2048xf32>
    %cst_43 = arith.constant 0.000000e+00 : f32
    %95 = vector.broadcast %cst_43 : f32 to vector<4x2048xf32>
    %96 = arith.maximumf %94, %95 : vector<4x2048xf32>
    %97 = arith.truncf %96 : vector<4x2048xf32> to vector<4x2048xbf16>
    %cst_44 = arith.constant dense<0.000000e+00> : vector<4x32xf32>
    %98 = tpu.matmul %97, %8, %cst_44 {dimension_numbers = #tpu.dot_dimension_numbers<[1], [0], [0], [1], [0, 0, 1, 1], [], []>} : vector<4x2048xbf16>, vector<2048x32xbf16>, vector<4x32xf32> -> vector<4x32xf32>
    %99 = vector.broadcast %9 : vector<1x32xf32> to vector<4x32xf32>
    %100 = arith.addf %98, %99 : vector<4x32xf32>
    %101 = arith.addf %90, %100 : vector<4x32xf32>
    %cst_45 = arith.constant dense<0.000000e+00> : vector<4xf32>
    %102 = vector.multi_reduction <add>, %101, %cst_45 [1] : vector<4x32xf32> to vector<4xf32>
    %103 = vector.shape_cast %102 : vector<4xf32> to vector<4x1xf32>
    %cst_46 = arith.constant 3.200000e+01 : f32
    %104 = vector.broadcast %cst_46 : f32 to vector<4x1xf32>
    %105 = arith.divf %103, %104 : vector<4x1xf32>
    %106 = vector.broadcast %105 : vector<4x1xf32> to vector<4x32xf32>
    %107 = arith.subf %101, %106 : vector<4x32xf32>
    %108 = arith.mulf %107, %107 : vector<4x32xf32>
    %cst_47 = arith.constant dense<0.000000e+00> : vector<4xf32>
    %109 = vector.multi_reduction <add>, %108, %cst_47 [1] : vector<4x32xf32> to vector<4xf32>
    %110 = vector.shape_cast %109 : vector<4xf32> to vector<4x1xf32>
    %cst_48 = arith.constant 3.200000e+01 : f32
    %111 = vector.broadcast %cst_48 : f32 to vector<4x1xf32>
    %112 = arith.divf %110, %111 : vector<4x1xf32>
    %113 = vector.broadcast %105 : vector<4x1xf32> to vector<4x32xf32>
    %114 = arith.subf %101, %113 : vector<4x32xf32>
    %cst_49 = arith.constant 9.99999974E-6 : f32
    %115 = vector.broadcast %cst_49 : f32 to vector<4x1xf32>
    %116 = arith.addf %112, %115 : vector<4x1xf32>
    %117 = math.rsqrt %116 : vector<4x1xf32>
    %118 = vector.broadcast %117 : vector<4x1xf32> to vector<4x32xf32>
    %119 = arith.mulf %114, %118 : vector<4x32xf32>
    %120 = vector.broadcast %12 : vector<1x32xf32> to vector<4x32xf32>
    %121 = arith.mulf %119, %120 : vector<4x32xf32>
    %122 = vector.broadcast %13 : vector<1x32xf32> to vector<4x32xf32>
    %123 = arith.addf %121, %122 : vector<4x32xf32>
    %c0_50 = arith.constant 0 : index
    %c0_51 = arith.constant 0 : index
    %c0_52 = arith.constant 0 : index
    %124 = vector.load %arg14[%c0_50, %c0_51, %c0_52] : memref<1x4x32xf32, #tpu.memory_space<vmem>>, vector<1x4x32xf32>
    %125 = vector.shape_cast %124 : vector<1x4x32xf32> to vector<4x32xf32>
    %126 = vector.shape_cast %123 : vector<4x32xf32> to vector<1x4x32xf32>
    tpu.vector_store %arg14[%c0_50, %c0_51, %c0_52], %126 {strides = array<i32>} : memref<1x4x32xf32, #tpu.memory_space<vmem>>, vector<1x4x32xf32>,
    return
  }
  func.func @transform_0(%arg0: i32) -> (i32, i32, i32) {
    %c0_i32 = arith.constant 0 : i32
    %c0_i32_0 = arith.constant 0 : i32
    %c0_i32_1 = arith.constant 0 : i32
    return %arg0, %c0_i32, %c0_i32_0 : i32, i32, i32
  }
  func.func @transform_1(%arg0: i32) -> (i32, i32) {
    %c0_i32 = arith.constant 0 : i32
    %c0_i32_0 = arith.constant 0 : i32
    %c0_i32_1 = arith.constant 0 : i32
    return %c0_i32, %c0_i32_0 : i32, i32
  }
  func.func @transform_2(%arg0: i32) -> (i32, i32) {
    %c0_i32 = arith.constant 0 : i32
    %c0_i32_0 = arith.constant 0 : i32
    %c0_i32_1 = arith.constant 0 : i32
    return %c0_i32, %c0_i32_0 : i32, i32
  }
  func.func @transform_3(%arg0: i32) -> (i32, i32) {
    %c0_i32 = arith.constant 0 : i32
    %c0_i32_0 = arith.constant 0 : i32
    %c0_i32_1 = arith.constant 0 : i32
    return %c0_i32, %c0_i32_0 : i32, i32
  }
  func.func @transform_4(%arg0: i32) -> (i32, i32) {
    %c0_i32 = arith.constant 0 : i32
    %c0_i32_0 = arith.constant 0 : i32
    %c0_i32_1 = arith.constant 0 : i32
    return %c0_i32, %c0_i32_0 : i32, i32
  }
  func.func @transform_5(%arg0: i32) -> (i32, i32) {
    %c0_i32 = arith.constant 0 : i32
    %c0_i32_0 = arith.constant 0 : i32
    %c0_i32_1 = arith.constant 0 : i32
    return %c0_i32, %c0_i32_0 : i32, i32
  }
  func.func @transform_6(%arg0: i32) -> (i32, i32) {
    %c0_i32 = arith.constant 0 : i32
    %c0_i32_0 = arith.constant 0 : i32
    %c0_i32_1 = arith.constant 0 : i32
    return %c0_i32, %c0_i32_0 : i32, i32
  }
  func.func @transform_7(%arg0: i32) -> (i32, i32) {
    %c0_i32 = arith.constant 0 : i32
    %c0_i32_0 = arith.constant 0 : i32
    %c0_i32_1 = arith.constant 0 : i32
    return %c0_i32, %c0_i32_0 : i32, i32
  }
  func.func @transform_8(%arg0: i32) -> (i32, i32) {
    %c0_i32 = arith.constant 0 : i32
    %c0_i32_0 = arith.constant 0 : i32
    %c0_i32_1 = arith.constant 0 : i32
    return %c0_i32, %c0_i32_0 : i32, i32
  }
  func.func @transform_9(%arg0: i32) -> (i32, i32) {
    %c0_i32 = arith.constant 0 : i32
    %c0_i32_0 = arith.constant 0 : i32
    %c0_i32_1 = arith.constant 0 : i32
    return %c0_i32, %c0_i32_0 : i32, i32
  }
  func.func @transform_10(%arg0: i32) -> (i32, i32) {
    %c0_i32 = arith.constant 0 : i32
    %c0_i32_0 = arith.constant 0 : i32
    %c0_i32_1 = arith.constant 0 : i32
    return %c0_i32, %c0_i32_0 : i32, i32
  }
  func.func @transform_11(%arg0: i32) -> (i32, i32) {
    %c0_i32 = arith.constant 0 : i32
    %c0_i32_0 = arith.constant 0 : i32
    %c0_i32_1 = arith.constant 0 : i32
    return %c0_i32, %c0_i32_0 : i32, i32
  }
  func.func @transform_12(%arg0: i32) -> (i32, i32) {
    %c0_i32 = arith.constant 0 : i32
    %c0_i32_0 = arith.constant 0 : i32
    %c0_i32_1 = arith.constant 0 : i32
    return %c0_i32, %c0_i32_0 : i32, i32
  }
  func.func @transform_13(%arg0: i32) -> (i32, i32, i32) {
    %c0_i32 = arith.constant 0 : i32
    %c0_i32_0 = arith.constant 0 : i32
    %c0_i32_1 = arith.constant 0 : i32
    return %arg0, %c0_i32, %c0_i32_0 : i32, i32, i32
  }
}

module attributes {stable_mosaic.version = 11 : i64} {
  func.func @coattention_edge_kernel(%arg0: i32, %arg1: memref<32x32xbf16, #tpu.memory_space<vmem>>, %arg2: memref<32x32xbf16, #tpu.memory_space<vmem>>, %arg3: memref<32x32xbf16, #tpu.memory_space<vmem>>, %arg4: memref<1x32xf32, #tpu.memory_space<vmem>>, %arg5: memref<32x64xbf16, #tpu.memory_space<vmem>>, %arg6: memref<1x64xf32, #tpu.memory_space<vmem>>, %arg7: memref<32x4xf32, #tpu.memory_space<vmem>>, %arg8: memref<4x32xf32, #tpu.memory_space<vmem>>, %arg9: memref<1x32xf32, #tpu.memory_space<vmem>>, %arg10: memref<1x32xf32, #tpu.memory_space<vmem>>, %arg11: memref<32x32xbf16, #tpu.memory_space<vmem>>, %arg12: memref<1x32xf32, #tpu.memory_space<vmem>>, %arg13: memref<32x64xbf16, #tpu.memory_space<vmem>>, %arg14: memref<1x64xf32, #tpu.memory_space<vmem>>, %arg15: memref<64x128xbf16, #tpu.memory_space<vmem>>, %arg16: memref<1x128xf32, #tpu.memory_space<vmem>>, %arg17: memref<32x128xf32, #tpu.memory_space<vmem>>) attributes {dimension_semantics = [#tpu.dimension_semantics<parallel>], iteration_bounds = array<i64: 1>, scalar_prefetch = 0 : i64, scratch_operands = 0 : i64, tpu.core_type = #tpu.core_type<tc>, window_params = [{transform_indices = @transform_0, window_bounds = array<i64: 32, 32>}, {transform_indices = @transform_1, window_bounds = array<i64: 32, 32>}, {pipeline_mode = #tpu.pipeline_mode<synchronous>, transform_indices = @transform_2, window_bounds = array<i64: 32, 32>}, {pipeline_mode = #tpu.pipeline_mode<synchronous>, transform_indices = @transform_3, window_bounds = array<i64: 1, 32>}, {pipeline_mode = #tpu.pipeline_mode<synchronous>, transform_indices = @transform_4, window_bounds = array<i64: 32, 64>}, {pipeline_mode = #tpu.pipeline_mode<synchronous>, transform_indices = @transform_5, window_bounds = array<i64: 1, 64>}, {pipeline_mode = #tpu.pipeline_mode<synchronous>, transform_indices = @transform_6, window_bounds = array<i64: 32, 4>}, {pipeline_mode = #tpu.pipeline_mode<synchronous>, transform_indices = @transform_7, window_bounds = array<i64: 4, 32>}, {pipeline_mode = #tpu.pipeline_mode<synchronous>, transform_indices = @transform_8, window_bounds = array<i64: 1, 32>}, {pipeline_mode = #tpu.pipeline_mode<synchronous>, transform_indices = @transform_9, window_bounds = array<i64: 1, 32>}, {pipeline_mode = #tpu.pipeline_mode<synchronous>, transform_indices = @transform_10, window_bounds = array<i64: 32, 32>}, {pipeline_mode = #tpu.pipeline_mode<synchronous>, transform_indices = @transform_11, window_bounds = array<i64: 1, 32>}, {pipeline_mode = #tpu.pipeline_mode<synchronous>, transform_indices = @transform_12, window_bounds = array<i64: 32, 64>}, {pipeline_mode = #tpu.pipeline_mode<synchronous>, transform_indices = @transform_13, window_bounds = array<i64: 1, 64>}, {pipeline_mode = #tpu.pipeline_mode<synchronous>, transform_indices = @transform_14, window_bounds = array<i64: 64, 128>}, {pipeline_mode = #tpu.pipeline_mode<synchronous>, transform_indices = @transform_15, window_bounds = array<i64: 1, 128>}, {transform_indices = @transform_16, window_bounds = array<i64: 32, 128>}]} {
    %c0 = arith.constant 0 : index
    %c0_0 = arith.constant 0 : index
    %0 = vector.load %arg1[%c0, %c0_0] : memref<32x32xbf16, #tpu.memory_space<vmem>>, vector<32x32xbf16>
    %c0_1 = arith.constant 0 : index
    %c0_2 = arith.constant 0 : index
    %1 = vector.load %arg2[%c0_1, %c0_2] : memref<32x32xbf16, #tpu.memory_space<vmem>>, vector<32x32xbf16>
    %c0_3 = arith.constant 0 : index
    %c0_4 = arith.constant 0 : index
    %2 = vector.load %arg3[%c0_3, %c0_4] : memref<32x32xbf16, #tpu.memory_space<vmem>>, vector<32x32xbf16>
    %cst = arith.constant dense<0.000000e+00> : vector<32x32xf32>
    %3 = tpu.matmul %0, %2, %cst {dimension_numbers = #tpu.dot_dimension_numbers<[1], [0], [0], [1], [0, 0, 1, 1], [], []>} : vector<32x32xbf16>, vector<32x32xbf16>, vector<32x32xf32> -> vector<32x32xf32>
    %c0_5 = arith.constant 0 : index
    %c0_6 = arith.constant 0 : index
    %4 = vector.load %arg4[%c0_5, %c0_6] : memref<1x32xf32, #tpu.memory_space<vmem>>, vector<1x32xf32>
    %5 = vector.broadcast %4 : vector<1x32xf32> to vector<32x32xf32>
    %6 = arith.addf %3, %5 : vector<32x32xf32>
    %c0_7 = arith.constant 0 : index
    %c0_8 = arith.constant 0 : index
    %7 = vector.load %arg5[%c0_7, %c0_8] : memref<32x64xbf16, #tpu.memory_space<vmem>>, vector<32x64xbf16>
    %cst_9 = arith.constant dense<0.000000e+00> : vector<32x64xf32>
    %8 = tpu.matmul %1, %7, %cst_9 {dimension_numbers = #tpu.dot_dimension_numbers<[1], [0], [0], [1], [0, 0, 1, 1], [], []>} : vector<32x32xbf16>, vector<32x64xbf16>, vector<32x64xf32> -> vector<32x64xf32>
    %c0_10 = arith.constant 0 : index
    %c0_11 = arith.constant 0 : index
    %9 = vector.load %arg6[%c0_10, %c0_11] : memref<1x64xf32, #tpu.memory_space<vmem>>, vector<1x64xf32>
    %10 = vector.broadcast %9 : vector<1x64xf32> to vector<32x64xf32>
    %11 = arith.addf %8, %10 : vector<32x64xf32>
    %12 = vector.extract_strided_slice %11 {offsets = [0, 0], sizes = [32, 32], strides = [1, 1]} : vector<32x64xf32> to vector<32x32xf32>
    %13 = vector.extract_strided_slice %11 {offsets = [0, 32], sizes = [32, 32], strides = [1, 1]} : vector<32x64xf32> to vector<32x32xf32>
    %14 = arith.mulf %6, %12 : vector<32x32xf32>
    %c0_12 = arith.constant 0 : index
    %c0_13 = arith.constant 0 : index
    %15 = vector.load %arg7[%c0_12, %c0_13] : memref<32x4xf32, #tpu.memory_space<vmem>>, vector<32x4xf32>
    %cst_14 = arith.constant dense<0.000000e+00> : vector<32x4xf32>
    %16 = tpu.matmul %14, %15, %cst_14 {dimension_numbers = #tpu.dot_dimension_numbers<[1], [0], [0], [1], [0, 0, 1, 1], [], []>, precision = #tpu.contract_precision<fp32>} : vector<32x32xf32>, vector<32x4xf32>, vector<32x4xf32> -> vector<32x4xf32>
    %c0_15 = arith.constant 0 : index
    %c0_16 = arith.constant 0 : index
    %17 = vector.load %arg8[%c0_15, %c0_16] : memref<4x32xf32, #tpu.memory_space<vmem>>, vector<4x32xf32>
    %cst_17 = arith.constant dense<0.000000e+00> : vector<32x32xf32>
    %18 = tpu.matmul %16, %17, %cst_17 {dimension_numbers = #tpu.dot_dimension_numbers<[1], [0], [0], [1], [0, 0, 1, 1], [], []>, precision = #tpu.contract_precision<fp32>} : vector<32x4xf32>, vector<4x32xf32>, vector<32x32xf32> -> vector<32x32xf32>
    %cst_18 = arith.constant 0.353553385 : f32
    %19 = vector.broadcast %cst_18 : f32 to vector<32x32xf32>
    %20 = arith.mulf %18, %19 : vector<32x32xf32>
    %21 = arith.mulf %20, %13 : vector<32x32xf32>
    %c0_19 = arith.constant 0 : index
    %c0_20 = arith.constant 0 : index
    %22 = vector.load %arg9[%c0_19, %c0_20] : memref<1x32xf32, #tpu.memory_space<vmem>>, vector<1x32xf32>
    %c0_21 = arith.constant 0 : index
    %c0_22 = arith.constant 0 : index
    %23 = vector.load %arg10[%c0_21, %c0_22] : memref<1x32xf32, #tpu.memory_space<vmem>>, vector<1x32xf32>
    %cst_23 = arith.constant dense<0.000000e+00> : vector<32xf32>
    %24 = vector.multi_reduction <add>, %21, %cst_23 [1] : vector<32x32xf32> to vector<32xf32>
    %25 = vector.shape_cast %24 : vector<32xf32> to vector<32x1xf32>
    %cst_24 = arith.constant 3.200000e+01 : f32
    %26 = vector.broadcast %cst_24 : f32 to vector<32x1xf32>
    %27 = arith.divf %25, %26 : vector<32x1xf32>
    %28 = vector.broadcast %27 : vector<32x1xf32> to vector<32x32xf32>
    %29 = arith.subf %21, %28 : vector<32x32xf32>
    %30 = arith.mulf %29, %29 : vector<32x32xf32>
    %cst_25 = arith.constant dense<0.000000e+00> : vector<32xf32>
    %31 = vector.multi_reduction <add>, %30, %cst_25 [1] : vector<32x32xf32> to vector<32xf32>
    %32 = vector.shape_cast %31 : vector<32xf32> to vector<32x1xf32>
    %cst_26 = arith.constant 3.200000e+01 : f32
    %33 = vector.broadcast %cst_26 : f32 to vector<32x1xf32>
    %34 = arith.divf %32, %33 : vector<32x1xf32>
    %35 = vector.broadcast %27 : vector<32x1xf32> to vector<32x32xf32>
    %36 = arith.subf %21, %35 : vector<32x32xf32>
    %cst_27 = arith.constant 9.99999974E-6 : f32
    %37 = vector.broadcast %cst_27 : f32 to vector<32x1xf32>
    %38 = arith.addf %34, %37 : vector<32x1xf32>
    %39 = math.rsqrt %38 : vector<32x1xf32>
    %40 = vector.broadcast %39 : vector<32x1xf32> to vector<32x32xf32>
    %41 = arith.mulf %36, %40 : vector<32x32xf32>
    %42 = vector.broadcast %22 : vector<1x32xf32> to vector<32x32xf32>
    %43 = arith.mulf %41, %42 : vector<32x32xf32>
    %44 = vector.broadcast %23 : vector<1x32xf32> to vector<32x32xf32>
    %45 = arith.addf %43, %44 : vector<32x32xf32>
    %cst_28 = arith.constant 0.000000e+00 : f32
    %46 = vector.broadcast %cst_28 : f32 to vector<32x32xf32>
    %47 = arith.maximumf %45, %46 : vector<32x32xf32>
    %c0_29 = arith.constant 0 : index
    %c0_30 = arith.constant 0 : index
    %48 = vector.load %arg11[%c0_29, %c0_30] : memref<32x32xbf16, #tpu.memory_space<vmem>>, vector<32x32xbf16>
    %49 = arith.truncf %47 : vector<32x32xf32> to vector<32x32xbf16>
    %cst_31 = arith.constant dense<0.000000e+00> : vector<32x32xf32>
    %50 = tpu.matmul %49, %48, %cst_31 {dimension_numbers = #tpu.dot_dimension_numbers<[1], [0], [0], [1], [0, 0, 1, 1], [], []>} : vector<32x32xbf16>, vector<32x32xbf16>, vector<32x32xf32> -> vector<32x32xf32>
    %c0_32 = arith.constant 0 : index
    %c0_33 = arith.constant 0 : index
    %51 = vector.load %arg12[%c0_32, %c0_33] : memref<1x32xf32, #tpu.memory_space<vmem>>, vector<1x32xf32>
    %52 = vector.broadcast %51 : vector<1x32xf32> to vector<32x32xf32>
    %53 = arith.addf %50, %52 : vector<32x32xf32>
    %cst_34 = arith.constant 0.000000e+00 : f32
    %54 = vector.broadcast %cst_34 : f32 to vector<32x32xf32>
    %55 = arith.maximumf %53, %54 : vector<32x32xf32>
    %c0_35 = arith.constant 0 : index
    %c0_36 = arith.constant 0 : index
    %56 = vector.load %arg13[%c0_35, %c0_36] : memref<32x64xbf16, #tpu.memory_space<vmem>>, vector<32x64xbf16>
    %57 = arith.truncf %55 : vector<32x32xf32> to vector<32x32xbf16>
    %cst_37 = arith.constant dense<0.000000e+00> : vector<32x64xf32>
    %58 = tpu.matmul %57, %56, %cst_37 {dimension_numbers = #tpu.dot_dimension_numbers<[1], [0], [0], [1], [0, 0, 1, 1], [], []>} : vector<32x32xbf16>, vector<32x64xbf16>, vector<32x64xf32> -> vector<32x64xf32>
    %c0_38 = arith.constant 0 : index
    %c0_39 = arith.constant 0 : index
    %59 = vector.load %arg14[%c0_38, %c0_39] : memref<1x64xf32, #tpu.memory_space<vmem>>, vector<1x64xf32>
    %60 = vector.broadcast %59 : vector<1x64xf32> to vector<32x64xf32>
    %61 = arith.addf %58, %60 : vector<32x64xf32>
    %cst_40 = arith.constant 0.000000e+00 : f32
    %62 = vector.broadcast %cst_40 : f32 to vector<32x64xf32>
    %63 = arith.maximumf %61, %62 : vector<32x64xf32>
    %c0_41 = arith.constant 0 : index
    %c0_42 = arith.constant 0 : index
    %64 = vector.load %arg15[%c0_41, %c0_42] : memref<64x128xbf16, #tpu.memory_space<vmem>>, vector<64x128xbf16>
    %65 = arith.truncf %63 : vector<32x64xf32> to vector<32x64xbf16>
    %cst_43 = arith.constant dense<0.000000e+00> : vector<32x128xf32>
    %66 = tpu.matmul %65, %64, %cst_43 {dimension_numbers = #tpu.dot_dimension_numbers<[1], [0], [0], [1], [0, 0, 1, 1], [], []>} : vector<32x64xbf16>, vector<64x128xbf16>, vector<32x128xf32> -> vector<32x128xf32>
    %c0_44 = arith.constant 0 : index
    %c0_45 = arith.constant 0 : index
    %67 = vector.load %arg16[%c0_44, %c0_45] : memref<1x128xf32, #tpu.memory_space<vmem>>, vector<1x128xf32>
    %68 = vector.broadcast %67 : vector<1x128xf32> to vector<32x128xf32>
    %69 = arith.addf %66, %68 : vector<32x128xf32>
    %c0_46 = arith.constant 0 : index
    %c0_47 = arith.constant 0 : index
    %70 = vector.load %arg17[%c0_46, %c0_47] : memref<32x128xf32, #tpu.memory_space<vmem>>, vector<32x128xf32>
    tpu.vector_store %arg17[%c0_46, %c0_47], %69 {strides = array<i32>} : memref<32x128xf32, #tpu.memory_space<vmem>>, vector<32x128xf32>,
    return
  }
  func.func @transform_0(%arg0: i32) -> (i32, i32) {
    %c0_i32 = arith.constant 0 : i32
    %c0_i32_0 = arith.constant 0 : i32
    return %arg0, %c0_i32 : i32, i32
  }
  func.func @transform_1(%arg0: i32) -> (i32, i32) {
    %c0_i32 = arith.constant 0 : i32
    %c0_i32_0 = arith.constant 0 : i32
    return %arg0, %c0_i32 : i32, i32
  }
  func.func @transform_2(%arg0: i32) -> (i32, i32) {
    %c0_i32 = arith.constant 0 : i32
    %c0_i32_0 = arith.constant 0 : i32
    %c0_i32_1 = arith.constant 0 : i32
    return %c0_i32, %c0_i32_0 : i32, i32
  }
  func.func @transform_3(%arg0: i32) -> (i32, i32) {
    %c0_i32 = arith.constant 0 : i32
    %c0_i32_0 = arith.constant 0 : i32
    %c0_i32_1 = arith.constant 0 : i32
    return %c0_i32, %c0_i32_0 : i32, i32
  }
  func.func @transform_4(%arg0: i32) -> (i32, i32) {
    %c0_i32 = arith.constant 0 : i32
    %c0_i32_0 = arith.constant 0 : i32
    %c0_i32_1 = arith.constant 0 : i32
    return %c0_i32, %c0_i32_0 : i32, i32
  }
  func.func @transform_5(%arg0: i32) -> (i32, i32) {
    %c0_i32 = arith.constant 0 : i32
    %c0_i32_0 = arith.constant 0 : i32
    %c0_i32_1 = arith.constant 0 : i32
    return %c0_i32, %c0_i32_0 : i32, i32
  }
  func.func @transform_6(%arg0: i32) -> (i32, i32) {
    %c0_i32 = arith.constant 0 : i32
    %c0_i32_0 = arith.constant 0 : i32
    %c0_i32_1 = arith.constant 0 : i32
    return %c0_i32, %c0_i32_0 : i32, i32
  }
  func.func @transform_7(%arg0: i32) -> (i32, i32) {
    %c0_i32 = arith.constant 0 : i32
    %c0_i32_0 = arith.constant 0 : i32
    %c0_i32_1 = arith.constant 0 : i32
    return %c0_i32, %c0_i32_0 : i32, i32
  }
  func.func @transform_8(%arg0: i32) -> (i32, i32) {
    %c0_i32 = arith.constant 0 : i32
    %c0_i32_0 = arith.constant 0 : i32
    %c0_i32_1 = arith.constant 0 : i32
    return %c0_i32, %c0_i32_0 : i32, i32
  }
  func.func @transform_9(%arg0: i32) -> (i32, i32) {
    %c0_i32 = arith.constant 0 : i32
    %c0_i32_0 = arith.constant 0 : i32
    %c0_i32_1 = arith.constant 0 : i32
    return %c0_i32, %c0_i32_0 : i32, i32
  }
  func.func @transform_10(%arg0: i32) -> (i32, i32) {
    %c0_i32 = arith.constant 0 : i32
    %c0_i32_0 = arith.constant 0 : i32
    %c0_i32_1 = arith.constant 0 : i32
    return %c0_i32, %c0_i32_0 : i32, i32
  }
  func.func @transform_11(%arg0: i32) -> (i32, i32) {
    %c0_i32 = arith.constant 0 : i32
    %c0_i32_0 = arith.constant 0 : i32
    %c0_i32_1 = arith.constant 0 : i32
    return %c0_i32, %c0_i32_0 : i32, i32
  }
  func.func @transform_12(%arg0: i32) -> (i32, i32) {
    %c0_i32 = arith.constant 0 : i32
    %c0_i32_0 = arith.constant 0 : i32
    %c0_i32_1 = arith.constant 0 : i32
    return %c0_i32, %c0_i32_0 : i32, i32
  }
  func.func @transform_13(%arg0: i32) -> (i32, i32) {
    %c0_i32 = arith.constant 0 : i32
    %c0_i32_0 = arith.constant 0 : i32
    %c0_i32_1 = arith.constant 0 : i32
    return %c0_i32, %c0_i32_0 : i32, i32
  }
  func.func @transform_14(%arg0: i32) -> (i32, i32) {
    %c0_i32 = arith.constant 0 : i32
    %c0_i32_0 = arith.constant 0 : i32
    %c0_i32_1 = arith.constant 0 : i32
    return %c0_i32, %c0_i32_0 : i32, i32
  }
  func.func @transform_15(%arg0: i32) -> (i32, i32) {
    %c0_i32 = arith.constant 0 : i32
    %c0_i32_0 = arith.constant 0 : i32
    %c0_i32_1 = arith.constant 0 : i32
    return %c0_i32, %c0_i32_0 : i32, i32
  }
  func.func @transform_16(%arg0: i32) -> (i32, i32) {
    %c0_i32 = arith.constant 0 : i32
    %c0_i32_0 = arith.constant 0 : i32
    return %arg0, %c0_i32 : i32, i32
  }
}

module attributes {stable_mosaic.version = 11 : i64} {
  func.func @rgcn_kernel(%arg0: i32, %arg1: i32, %arg2: memref<32x32xbf16, #tpu.memory_space<vmem>>, %arg3: memref<1x32x32xbf16, #tpu.memory_space<vmem>>, %arg4: memref<32x768xbf16, #tpu.memory_space<vmem>>, %arg5: memref<1x32x768xbf16, #tpu.memory_space<vmem>>, %arg6: memref<1x768xf32, #tpu.memory_space<vmem>>, %arg7: memref<32x768xf32, #tpu.memory_space<vmem>>, %arg8: memref<32x768xf32, #tpu.memory_space<vmem>>) attributes {dimension_semantics = [#tpu.dimension_semantics<parallel>, #tpu.dimension_semantics<arbitrary>], iteration_bounds = array<i64: 1, 8>, scalar_prefetch = 0 : i64, scratch_operands = 1 : i64, tpu.core_type = #tpu.core_type<tc>, window_params = [{transform_indices = @transform_0, window_bounds = array<i64: 32, 32>}, {transform_indices = @transform_1, window_bounds = array<i64: 1, 32, 32>}, {pipeline_mode = #tpu.pipeline_mode<synchronous>, transform_indices = @transform_2, window_bounds = array<i64: 32, 768>}, {transform_indices = @transform_3, window_bounds = array<i64: 1, 32, 768>}, {pipeline_mode = #tpu.pipeline_mode<synchronous>, transform_indices = @transform_4, window_bounds = array<i64: 1, 768>}, {transform_indices = @transform_5, window_bounds = array<i64: 32, 768>}]} {
    %c0_i32 = arith.constant 0 : i32
    %0 = arith.cmpi eq, %arg1, %c0_i32 : i32
    %1 = arith.extui %0 : i1 to i32
    %c0_i32_0 = arith.constant 0 : i32
    %2 = arith.cmpi ne, %1, %c0_i32_0 : i32
    scf.if %2 {
      %c0_11 = arith.constant 0 : index
      %c0_12 = arith.constant 0 : index
      %14 = vector.load %arg2[%c0_11, %c0_12] : memref<32x32xbf16, #tpu.memory_space<vmem>>, vector<32x32xbf16>
      %c0_13 = arith.constant 0 : index
      %c0_14 = arith.constant 0 : index
      %15 = vector.load %arg4[%c0_13, %c0_14] : memref<32x768xbf16, #tpu.memory_space<vmem>>, vector<32x768xbf16>
      %cst_15 = arith.constant dense<0.000000e+00> : vector<32x768xf32>
      %16 = tpu.matmul %14, %15, %cst_15 {dimension_numbers = #tpu.dot_dimension_numbers<[1], [0], [0], [1], [0, 0, 1, 1], [], []>} : vector<32x32xbf16>, vector<32x768xbf16>, vector<32x768xf32> -> vector<32x768xf32>
      %c0_16 = arith.constant 0 : index
      %c0_17 = arith.constant 0 : index
      %17 = vector.load %arg6[%c0_16, %c0_17] : memref<1x768xf32, #tpu.memory_space<vmem>>, vector<1x768xf32>
      %18 = vector.broadcast %17 : vector<1x768xf32> to vector<32x768xf32>
      %19 = arith.addf %16, %18 : vector<32x768xf32>
      %c0_18 = arith.constant 0 : index
      %c0_19 = arith.constant 0 : index
      %20 = vector.load %arg8[%c0_18, %c0_19] : memref<32x768xf32, #tpu.memory_space<vmem>>, vector<32x768xf32>
      tpu.vector_store %arg8[%c0_18, %c0_19], %19 {strides = array<i32>} : memref<32x768xf32, #tpu.memory_space<vmem>>, vector<32x768xf32>,
    } else {
    }
    %c0 = arith.constant 0 : index
    %c0_1 = arith.constant 0 : index
    %3 = vector.load %arg8[%c0, %c0_1] : memref<32x768xf32, #tpu.memory_space<vmem>>, vector<32x768xf32>
    %c0_2 = arith.constant 0 : index
    %c0_3 = arith.constant 0 : index
    %c0_4 = arith.constant 0 : index
    %4 = vector.load %arg3[%c0_2, %c0_3, %c0_4] : memref<1x32x32xbf16, #tpu.memory_space<vmem>>, vector<1x32x32xbf16>
    %5 = vector.shape_cast %4 : vector<1x32x32xbf16> to vector<32x32xbf16>
    %c0_5 = arith.constant 0 : index
    %c0_6 = arith.constant 0 : index
    %c0_7 = arith.constant 0 : index
    %6 = vector.load %arg5[%c0_5, %c0_6, %c0_7] : memref<1x32x768xbf16, #tpu.memory_space<vmem>>, vector<1x32x768xbf16>
    %7 = vector.shape_cast %6 : vector<1x32x768xbf16> to vector<32x768xbf16>
    %cst = arith.constant dense<0.000000e+00> : vector<32x768xf32>
    %8 = tpu.matmul %5, %7, %cst {dimension_numbers = #tpu.dot_dimension_numbers<[1], [0], [0], [1], [0, 0, 1, 1], [], []>} : vector<32x32xbf16>, vector<32x768xbf16>, vector<32x768xf32> -> vector<32x768xf32>
    %9 = arith.addf %3, %8 : vector<32x768xf32>
    %c0_8 = arith.constant 0 : index
    %c0_9 = arith.constant 0 : index
    %10 = vector.load %arg8[%c0_8, %c0_9] : memref<32x768xf32, #tpu.memory_space<vmem>>, vector<32x768xf32>
    tpu.vector_store %arg8[%c0_8, %c0_9], %9 {strides = array<i32>} : memref<32x768xf32, #tpu.memory_space<vmem>>, vector<32x768xf32>,
    %c7_i32 = arith.constant 7 : i32
    %11 = arith.cmpi eq, %arg1, %c7_i32 : i32
    %12 = arith.extui %11 : i1 to i32
    %c0_i32_10 = arith.constant 0 : i32
    %13 = arith.cmpi ne, %12, %c0_i32_10 : i32
    scf.if %13 {
      %c0_11 = arith.constant 0 : index
      %c0_12 = arith.constant 0 : index
      %14 = vector.load %arg8[%c0_11, %c0_12] : memref<32x768xf32, #tpu.memory_space<vmem>>, vector<32x768xf32>
      %c0_13 = arith.constant 0 : index
      %c0_14 = arith.constant 0 : index
      %15 = vector.load %arg7[%c0_13, %c0_14] : memref<32x768xf32, #tpu.memory_space<vmem>>, vector<32x768xf32>
      tpu.vector_store %arg7[%c0_13, %c0_14], %14 {strides = array<i32>} : memref<32x768xf32, #tpu.memory_space<vmem>>, vector<32x768xf32>,
    } else {
    }
    return
  }
  func.func @transform_0(%arg0: i32, %arg1: i32) -> (i32, i32) {
    %c0_i32 = arith.constant 0 : i32
    %c0_i32_0 = arith.constant 0 : i32
    return %arg0, %c0_i32 : i32, i32
  }
  func.func @transform_1(%arg0: i32, %arg1: i32) -> (i32, i32, i32) {
    %c0_i32 = arith.constant 0 : i32
    %c0_i32_0 = arith.constant 0 : i32
    return %arg1, %arg0, %c0_i32 : i32, i32, i32
  }
  func.func @transform_2(%arg0: i32, %arg1: i32) -> (i32, i32) {
    %c0_i32 = arith.constant 0 : i32
    %c0_i32_0 = arith.constant 0 : i32
    %c0_i32_1 = arith.constant 0 : i32
    return %c0_i32, %c0_i32_0 : i32, i32
  }
  func.func @transform_3(%arg0: i32, %arg1: i32) -> (i32, i32, i32) {
    %c0_i32 = arith.constant 0 : i32
    %c0_i32_0 = arith.constant 0 : i32
    %c0_i32_1 = arith.constant 0 : i32
    return %arg1, %c0_i32, %c0_i32_0 : i32, i32, i32
  }
  func.func @transform_4(%arg0: i32, %arg1: i32) -> (i32, i32) {
    %c0_i32 = arith.constant 0 : i32
    %c0_i32_0 = arith.constant 0 : i32
    %c0_i32_1 = arith.constant 0 : i32
    return %c0_i32, %c0_i32_0 : i32, i32
  }
  func.func @transform_5(%arg0: i32, %arg1: i32) -> (i32, i32) {
    %c0_i32 = arith.constant 0 : i32
    %c0_i32_0 = arith.constant 0 : i32
    return %arg0, %c0_i32 : i32, i32
  }
}

module attributes {stable_mosaic.version = 11 : i64} {
  func.func @graphconv_kernel(%arg0: i32, %arg1: memref<32x768xbf16, #tpu.memory_space<vmem>>, %arg2: memref<32x768xbf16, #tpu.memory_space<vmem>>, %arg3: memref<768x128xbf16, #tpu.memory_space<vmem>>, %arg4: memref<1x128xf32, #tpu.memory_space<vmem>>, %arg5: memref<768x128xbf16, #tpu.memory_space<vmem>>, %arg6: memref<32x128xf32, #tpu.memory_space<vmem>>) attributes {dimension_semantics = [#tpu.dimension_semantics<parallel>], iteration_bounds = array<i64: 1>, scalar_prefetch = 0 : i64, scratch_operands = 0 : i64, tpu.core_type = #tpu.core_type<tc>, window_params = [{transform_indices = @transform_0, window_bounds = array<i64: 32, 768>}, {transform_indices = @transform_1, window_bounds = array<i64: 32, 768>}, {pipeline_mode = #tpu.pipeline_mode<synchronous>, transform_indices = @transform_2, window_bounds = array<i64: 768, 128>}, {pipeline_mode = #tpu.pipeline_mode<synchronous>, transform_indices = @transform_3, window_bounds = array<i64: 1, 128>}, {pipeline_mode = #tpu.pipeline_mode<synchronous>, transform_indices = @transform_4, window_bounds = array<i64: 768, 128>}, {transform_indices = @transform_5, window_bounds = array<i64: 32, 128>}]} {
    %c0 = arith.constant 0 : index
    %c0_0 = arith.constant 0 : index
    %0 = vector.load %arg2[%c0, %c0_0] : memref<32x768xbf16, #tpu.memory_space<vmem>>, vector<32x768xbf16>
    %c0_1 = arith.constant 0 : index
    %c0_2 = arith.constant 0 : index
    %1 = vector.load %arg3[%c0_1, %c0_2] : memref<768x128xbf16, #tpu.memory_space<vmem>>, vector<768x128xbf16>
    %cst = arith.constant dense<0.000000e+00> : vector<32x128xf32>
    %2 = tpu.matmul %0, %1, %cst {dimension_numbers = #tpu.dot_dimension_numbers<[1], [0], [0], [1], [0, 0, 1, 1], [], []>} : vector<32x768xbf16>, vector<768x128xbf16>, vector<32x128xf32> -> vector<32x128xf32>
    %c0_3 = arith.constant 0 : index
    %c0_4 = arith.constant 0 : index
    %3 = vector.load %arg4[%c0_3, %c0_4] : memref<1x128xf32, #tpu.memory_space<vmem>>, vector<1x128xf32>
    %4 = vector.broadcast %3 : vector<1x128xf32> to vector<32x128xf32>
    %5 = arith.addf %2, %4 : vector<32x128xf32>
    %c0_5 = arith.constant 0 : index
    %c0_6 = arith.constant 0 : index
    %6 = vector.load %arg1[%c0_5, %c0_6] : memref<32x768xbf16, #tpu.memory_space<vmem>>, vector<32x768xbf16>
    %c0_7 = arith.constant 0 : index
    %c0_8 = arith.constant 0 : index
    %7 = vector.load %arg5[%c0_7, %c0_8] : memref<768x128xbf16, #tpu.memory_space<vmem>>, vector<768x128xbf16>
    %cst_9 = arith.constant dense<0.000000e+00> : vector<32x128xf32>
    %8 = tpu.matmul %6, %7, %cst_9 {dimension_numbers = #tpu.dot_dimension_numbers<[1], [0], [0], [1], [0, 0, 1, 1], [], []>} : vector<32x768xbf16>, vector<768x128xbf16>, vector<32x128xf32> -> vector<32x128xf32>
    %9 = arith.addf %5, %8 : vector<32x128xf32>
    %c0_10 = arith.constant 0 : index
    %c0_11 = arith.constant 0 : index
    %10 = vector.load %arg6[%c0_10, %c0_11] : memref<32x128xf32, #tpu.memory_space<vmem>>, vector<32x128xf32>
    tpu.vector_store %arg6[%c0_10, %c0_11], %9 {strides = array<i32>} : memref<32x128xf32, #tpu.memory_space<vmem>>, vector<32x128xf32>,
    return
  }
  func.func @transform_0(%arg0: i32) -> (i32, i32) {
    %c0_i32 = arith.constant 0 : i32
    %c0_i32_0 = arith.constant 0 : i32
    return %arg0, %c0_i32 : i32, i32
  }
  func.func @transform_1(%arg0: i32) -> (i32, i32) {
    %c0_i32 = arith.constant 0 : i32
    %c0_i32_0 = arith.constant 0 : i32
    return %arg0, %c0_i32 : i32, i32
  }
  func.func @transform_2(%arg0: i32) -> (i32, i32) {
    %c0_i32 = arith.constant 0 : i32
    %c0_i32_0 = arith.constant 0 : i32
    %c0_i32_1 = arith.constant 0 : i32
    return %c0_i32, %c0_i32_0 : i32, i32
  }
  func.func @transform_3(%arg0: i32) -> (i32, i32) {
    %c0_i32 = arith.constant 0 : i32
    %c0_i32_0 = arith.constant 0 : i32
    %c0_i32_1 = arith.constant 0 : i32
    return %c0_i32, %c0_i32_0 : i32, i32
  }
  func.func @transform_4(%arg0: i32) -> (i32, i32) {
    %c0_i32 = arith.constant 0 : i32
    %c0_i32_0 = arith.constant 0 : i32
    %c0_i32_1 = arith.constant 0 : i32
    return %c0_i32, %c0_i32_0 : i32, i32
  }
  func.func @transform_5(%arg0: i32) -> (i32, i32) {
    %c0_i32 = arith.constant 0 : i32
    %c0_i32_0 = arith.constant 0 : i32
    return %arg0, %c0_i32 : i32, i32
  }
}

module attributes {stable_mosaic.version = 11 : i64} {
  func.func @encoder_head_kernel(%arg0: i32, %arg1: memref<1x4x64xf32, #tpu.memory_space<vmem>>, %arg2: memref<64x192xbf16, #tpu.memory_space<vmem>>, %arg3: memref<1x192xf32, #tpu.memory_space<vmem>>, %arg4: memref<64x64xbf16, #tpu.memory_space<vmem>>, %arg5: memref<1x64xf32, #tpu.memory_space<vmem>>, %arg6: memref<64x2048xbf16, #tpu.memory_space<vmem>>, %arg7: memref<1x2048xf32, #tpu.memory_space<vmem>>, %arg8: memref<2048x64xbf16, #tpu.memory_space<vmem>>, %arg9: memref<1x64xf32, #tpu.memory_space<vmem>>, %arg10: memref<1x64xf32, #tpu.memory_space<vmem>>, %arg11: memref<1x64xf32, #tpu.memory_space<vmem>>, %arg12: memref<1x64xf32, #tpu.memory_space<vmem>>, %arg13: memref<1x64xf32, #tpu.memory_space<vmem>>, %arg14: memref<64x64xbf16, #tpu.memory_space<vmem>>, %arg15: memref<1x64xf32, #tpu.memory_space<vmem>>, %arg16: memref<64x128xbf16, #tpu.memory_space<vmem>>, %arg17: memref<1x128xf32, #tpu.memory_space<vmem>>, %arg18: memref<1x4x128xf32, #tpu.memory_space<vmem>>) attributes {dimension_semantics = [#tpu.dimension_semantics<parallel>], iteration_bounds = array<i64: 2>, scalar_prefetch = 0 : i64, scratch_operands = 0 : i64, tpu.core_type = #tpu.core_type<tc>, window_params = [{transform_indices = @transform_0, window_bounds = array<i64: 1, 4, 64>}, {pipeline_mode = #tpu.pipeline_mode<synchronous>, transform_indices = @transform_1, window_bounds = array<i64: 64, 192>}, {pipeline_mode = #tpu.pipeline_mode<synchronous>, transform_indices = @transform_2, window_bounds = array<i64: 1, 192>}, {pipeline_mode = #tpu.pipeline_mode<synchronous>, transform_indices = @transform_3, window_bounds = array<i64: 64, 64>}, {pipeline_mode = #tpu.pipeline_mode<synchronous>, transform_indices = @transform_4, window_bounds = array<i64: 1, 64>}, {pipeline_mode = #tpu.pipeline_mode<synchronous>, transform_indices = @transform_5, window_bounds = array<i64: 64, 2048>}, {pipeline_mode = #tpu.pipeline_mode<synchronous>, transform_indices = @transform_6, window_bounds = array<i64: 1, 2048>}, {pipeline_mode = #tpu.pipeline_mode<synchronous>, transform_indices = @transform_7, window_bounds = array<i64: 2048, 64>}, {pipeline_mode = #tpu.pipeline_mode<synchronous>, transform_indices = @transform_8, window_bounds = array<i64: 1, 64>}, {pipeline_mode = #tpu.pipeline_mode<synchronous>, transform_indices = @transform_9, window_bounds = array<i64: 1, 64>}, {pipeline_mode = #tpu.pipeline_mode<synchronous>, transform_indices = @transform_10, window_bounds = array<i64: 1, 64>}, {pipeline_mode = #tpu.pipeline_mode<synchronous>, transform_indices = @transform_11, window_bounds = array<i64: 1, 64>}, {pipeline_mode = #tpu.pipeline_mode<synchronous>, transform_indices = @transform_12, window_bounds = array<i64: 1, 64>}, {pipeline_mode = #tpu.pipeline_mode<synchronous>, transform_indices = @transform_13, window_bounds = array<i64: 64, 64>}, {pipeline_mode = #tpu.pipeline_mode<synchronous>, transform_indices = @transform_14, window_bounds = array<i64: 1, 64>}, {pipeline_mode = #tpu.pipeline_mode<synchronous>, transform_indices = @transform_15, window_bounds = array<i64: 64, 128>}, {pipeline_mode = #tpu.pipeline_mode<synchronous>, transform_indices = @transform_16, window_bounds = array<i64: 1, 128>}, {transform_indices = @transform_17, window_bounds = array<i64: 1, 4, 128>}]} {
    %c0 = arith.constant 0 : index
    %c0_0 = arith.constant 0 : index
    %c0_1 = arith.constant 0 : index
    %0 = vector.load %arg1[%c0, %c0_0, %c0_1] : memref<1x4x64xf32, #tpu.memory_space<vmem>>, vector<1x4x64xf32>
    %1 = vector.shape_cast %0 : vector<1x4x64xf32> to vector<4x64xf32>
    %c0_2 = arith.constant 0 : index
    %c0_3 = arith.constant 0 : index
    %2 = vector.load %arg2[%c0_2, %c0_3] : memref<64x192xbf16, #tpu.memory_space<vmem>>, vector<64x192xbf16>
    %c0_4 = arith.constant 0 : index
    %c0_5 = arith.constant 0 : index
    %3 = vector.load %arg3[%c0_4, %c0_5] : memref<1x192xf32, #tpu.memory_space<vmem>>, vector<1x192xf32>
    %c0_6 = arith.constant 0 : index
    %c0_7 = arith.constant 0 : index
    %4 = vector.load %arg4[%c0_6, %c0_7] : memref<64x64xbf16, #tpu.memory_space<vmem>>, vector<64x64xbf16>
    %c0_8 = arith.constant 0 : index
    %c0_9 = arith.constant 0 : index
    %5 = vector.load %arg5[%c0_8, %c0_9] : memref<1x64xf32, #tpu.memory_space<vmem>>, vector<1x64xf32>
    %c0_10 = arith.constant 0 : index
    %c0_11 = arith.constant 0 : index
    %6 = vector.load %arg6[%c0_10, %c0_11] : memref<64x2048xbf16, #tpu.memory_space<vmem>>, vector<64x2048xbf16>
    %c0_12 = arith.constant 0 : index
    %c0_13 = arith.constant 0 : index
    %7 = vector.load %arg7[%c0_12, %c0_13] : memref<1x2048xf32, #tpu.memory_space<vmem>>, vector<1x2048xf32>
    %c0_14 = arith.constant 0 : index
    %c0_15 = arith.constant 0 : index
    %8 = vector.load %arg8[%c0_14, %c0_15] : memref<2048x64xbf16, #tpu.memory_space<vmem>>, vector<2048x64xbf16>
    %c0_16 = arith.constant 0 : index
    %c0_17 = arith.constant 0 : index
    %9 = vector.load %arg9[%c0_16, %c0_17] : memref<1x64xf32, #tpu.memory_space<vmem>>, vector<1x64xf32>
    %c0_18 = arith.constant 0 : index
    %c0_19 = arith.constant 0 : index
    %10 = vector.load %arg10[%c0_18, %c0_19] : memref<1x64xf32, #tpu.memory_space<vmem>>, vector<1x64xf32>
    %c0_20 = arith.constant 0 : index
    %c0_21 = arith.constant 0 : index
    %11 = vector.load %arg11[%c0_20, %c0_21] : memref<1x64xf32, #tpu.memory_space<vmem>>, vector<1x64xf32>
    %c0_22 = arith.constant 0 : index
    %c0_23 = arith.constant 0 : index
    %12 = vector.load %arg12[%c0_22, %c0_23] : memref<1x64xf32, #tpu.memory_space<vmem>>, vector<1x64xf32>
    %c0_24 = arith.constant 0 : index
    %c0_25 = arith.constant 0 : index
    %13 = vector.load %arg13[%c0_24, %c0_25] : memref<1x64xf32, #tpu.memory_space<vmem>>, vector<1x64xf32>
    %14 = arith.truncf %1 : vector<4x64xf32> to vector<4x64xbf16>
    %cst = arith.constant dense<0.000000e+00> : vector<4x192xf32>
    %15 = tpu.matmul %14, %2, %cst {dimension_numbers = #tpu.dot_dimension_numbers<[1], [0], [0], [1], [0, 0, 1, 1], [], []>} : vector<4x64xbf16>, vector<64x192xbf16>, vector<4x192xf32> -> vector<4x192xf32>
    %16 = vector.broadcast %3 : vector<1x192xf32> to vector<4x192xf32>
    %17 = arith.addf %15, %16 : vector<4x192xf32>
    %18 = vector.extract_strided_slice %17 {offsets = [0, 0], sizes = [4, 64], strides = [1, 1]} : vector<4x192xf32> to vector<4x64xf32>
    %19 = vector.extract_strided_slice %17 {offsets = [0, 64], sizes = [4, 64], strides = [1, 1]} : vector<4x192xf32> to vector<4x64xf32>
    %20 = vector.extract_strided_slice %17 {offsets = [0, 128], sizes = [4, 64], strides = [1, 1]} : vector<4x192xf32> to vector<4x64xf32>
    %21 = vector.extract_strided_slice %18 {offsets = [0, 0], sizes = [4, 32], strides = [1, 1]} : vector<4x64xf32> to vector<4x32xf32>
    %22 = vector.extract_strided_slice %19 {offsets = [0, 0], sizes = [4, 32], strides = [1, 1]} : vector<4x64xf32> to vector<4x32xf32>
    %23 = tpu.transpose %22, [1, 0] : vector<4x32xf32> -> vector<32x4xf32>
    %24 = arith.truncf %21 : vector<4x32xf32> to vector<4x32xbf16>
    %25 = arith.truncf %23 : vector<32x4xf32> to vector<32x4xbf16>
    %cst_26 = arith.constant dense<0.000000e+00> : vector<4x4xf32>
    %26 = tpu.matmul %24, %25, %cst_26 {dimension_numbers = #tpu.dot_dimension_numbers<[1], [0], [0], [1], [0, 0, 1, 1], [], []>} : vector<4x32xbf16>, vector<32x4xbf16>, vector<4x4xf32> -> vector<4x4xf32>
    %cst_27 = arith.constant 0.176776692 : f32
    %27 = vector.broadcast %cst_27 : f32 to vector<4x4xf32>
    %28 = arith.mulf %26, %27 : vector<4x4xf32>
    %cst_28 = arith.constant dense<0xFF800000> : vector<4xf32>
    %29 = vector.multi_reduction <maximumf>, %28, %cst_28 [1] : vector<4x4xf32> to vector<4xf32>
    %30 = vector.shape_cast %29 : vector<4xf32> to vector<4x1xf32>
    %31 = vector.broadcast %30 : vector<4x1xf32> to vector<4x4xf32>
    %32 = arith.subf %28, %31 : vector<4x4xf32>
    %33 = math.exp %32 : vector<4x4xf32>
    %cst_29 = arith.constant dense<0.000000e+00> : vector<4xf32>
    %34 = vector.multi_reduction <add>, %33, %cst_29 [1] : vector<4x4xf32> to vector<4xf32>
    %35 = vector.shape_cast %34 : vector<4xf32> to vector<4x1xf32>
    %36 = vector.broadcast %35 : vector<4x1xf32> to vector<4x4xf32>
    %37 = arith.divf %33, %36 : vector<4x4xf32>
    %38 = vector.extract_strided_slice %20 {offsets = [0, 0], sizes = [4, 32], strides = [1, 1]} : vector<4x64xf32> to vector<4x32xf32>
    %39 = arith.truncf %37 : vector<4x4xf32> to vector<4x4xbf16>
    %40 = arith.truncf %38 : vector<4x32xf32> to vector<4x32xbf16>
    %cst_30 = arith.constant dense<0.000000e+00> : vector<4x32xf32>
    %41 = tpu.matmul %39, %40, %cst_30 {dimension_numbers = #tpu.dot_dimension_numbers<[1], [0], [0], [1], [0, 0, 1, 1], [], []>} : vector<4x4xbf16>, vector<4x32xbf16>, vector<4x32xf32> -> vector<4x32xf32>
    %42 = vector.extract_strided_slice %18 {offsets = [0, 32], sizes = [4, 32], strides = [1, 1]} : vector<4x64xf32> to vector<4x32xf32>
    %43 = vector.extract_strided_slice %19 {offsets = [0, 32], sizes = [4, 32], strides = [1, 1]} : vector<4x64xf32> to vector<4x32xf32>
    %44 = tpu.transpose %43, [1, 0] : vector<4x32xf32> -> vector<32x4xf32>
    %45 = arith.truncf %42 : vector<4x32xf32> to vector<4x32xbf16>
    %46 = arith.truncf %44 : vector<32x4xf32> to vector<32x4xbf16>
    %cst_31 = arith.constant dense<0.000000e+00> : vector<4x4xf32>
    %47 = tpu.matmul %45, %46, %cst_31 {dimension_numbers = #tpu.dot_dimension_numbers<[1], [0], [0], [1], [0, 0, 1, 1], [], []>} : vector<4x32xbf16>, vector<32x4xbf16>, vector<4x4xf32> -> vector<4x4xf32>
    %cst_32 = arith.constant 0.176776692 : f32
    %48 = vector.broadcast %cst_32 : f32 to vector<4x4xf32>
    %49 = arith.mulf %47, %48 : vector<4x4xf32>
    %cst_33 = arith.constant dense<0xFF800000> : vector<4xf32>
    %50 = vector.multi_reduction <maximumf>, %49, %cst_33 [1] : vector<4x4xf32> to vector<4xf32>
    %51 = vector.shape_cast %50 : vector<4xf32> to vector<4x1xf32>
    %52 = vector.broadcast %51 : vector<4x1xf32> to vector<4x4xf32>
    %53 = arith.subf %49, %52 : vector<4x4xf32>
    %54 = math.exp %53 : vector<4x4xf32>
    %cst_34 = arith.constant dense<0.000000e+00> : vector<4xf32>
    %55 = vector.multi_reduction <add>, %54, %cst_34 [1] : vector<4x4xf32> to vector<4xf32>
    %56 = vector.shape_cast %55 : vector<4xf32> to vector<4x1xf32>
    %57 = vector.broadcast %56 : vector<4x1xf32> to vector<4x4xf32>
    %58 = arith.divf %54, %57 : vector<4x4xf32>
    %59 = vector.extract_strided_slice %20 {offsets = [0, 32], sizes = [4, 32], strides = [1, 1]} : vector<4x64xf32> to vector<4x32xf32>
    %60 = arith.truncf %58 : vector<4x4xf32> to vector<4x4xbf16>
    %61 = arith.truncf %59 : vector<4x32xf32> to vector<4x32xbf16>
    %cst_35 = arith.constant dense<0.000000e+00> : vector<4x32xf32>
    %62 = tpu.matmul %60, %61, %cst_35 {dimension_numbers = #tpu.dot_dimension_numbers<[1], [0], [0], [1], [0, 0, 1, 1], [], []>} : vector<4x4xbf16>, vector<4x32xbf16>, vector<4x32xf32> -> vector<4x32xf32>
    %63 = tpu.concatenate %41, %62 in 1 : vector<4x32xf32>, vector<4x32xf32> -> vector<4x64xf32>
    %64 = arith.truncf %63 : vector<4x64xf32> to vector<4x64xbf16>
    %cst_36 = arith.constant dense<0.000000e+00> : vector<4x64xf32>
    %65 = tpu.matmul %64, %4, %cst_36 {dimension_numbers = #tpu.dot_dimension_numbers<[1], [0], [0], [1], [0, 0, 1, 1], [], []>} : vector<4x64xbf16>, vector<64x64xbf16>, vector<4x64xf32> -> vector<4x64xf32>
    %66 = vector.broadcast %5 : vector<1x64xf32> to vector<4x64xf32>
    %67 = arith.addf %65, %66 : vector<4x64xf32>
    %68 = arith.addf %1, %67 : vector<4x64xf32>
    %cst_37 = arith.constant dense<0.000000e+00> : vector<4xf32>
    %69 = vector.multi_reduction <add>, %68, %cst_37 [1] : vector<4x64xf32> to vector<4xf32>
    %70 = vector.shape_cast %69 : vector<4xf32> to vector<4x1xf32>
    %cst_38 = arith.constant 6.400000e+01 : f32
    %71 = vector.broadcast %cst_38 : f32 to vector<4x1xf32>
    %72 = arith.divf %70, %71 : vector<4x1xf32>
    %73 = vector.broadcast %72 : vector<4x1xf32> to vector<4x64xf32>
    %74 = arith.subf %68, %73 : vector<4x64xf32>
    %75 = arith.mulf %74, %74 : vector<4x64xf32>
    %cst_39 = arith.constant dense<0.000000e+00> : vector<4xf32>
    %76 = vector.multi_reduction <add>, %75, %cst_39 [1] : vector<4x64xf32> to vector<4xf32>
    %77 = vector.shape_cast %76 : vector<4xf32> to vector<4x1xf32>
    %cst_40 = arith.constant 6.400000e+01 : f32
    %78 = vector.broadcast %cst_40 : f32 to vector<4x1xf32>
    %79 = arith.divf %77, %78 : vector<4x1xf32>
    %80 = vector.broadcast %72 : vector<4x1xf32> to vector<4x64xf32>
    %81 = arith.subf %68, %80 : vector<4x64xf32>
    %cst_41 = arith.constant 9.99999974E-6 : f32
    %82 = vector.broadcast %cst_41 : f32 to vector<4x1xf32>
    %83 = arith.addf %79, %82 : vector<4x1xf32>
    %84 = math.rsqrt %83 : vector<4x1xf32>
    %85 = vector.broadcast %84 : vector<4x1xf32> to vector<4x64xf32>
    %86 = arith.mulf %81, %85 : vector<4x64xf32>
    %87 = vector.broadcast %10 : vector<1x64xf32> to vector<4x64xf32>
    %88 = arith.mulf %86, %87 : vector<4x64xf32>
    %89 = vector.broadcast %11 : vector<1x64xf32> to vector<4x64xf32>
    %90 = arith.addf %88, %89 : vector<4x64xf32>
    %91 = arith.truncf %90 : vector<4x64xf32> to vector<4x64xbf16>
    %cst_42 = arith.constant dense<0.000000e+00> : vector<4x2048xf32>
    %92 = tpu.matmul %91, %6, %cst_42 {dimension_numbers = #tpu.dot_dimension_numbers<[1], [0], [0], [1], [0, 0, 1, 1], [], []>} : vector<4x64xbf16>, vector<64x2048xbf16>, vector<4x2048xf32> -> vector<4x2048xf32>
    %93 = vector.broadcast %7 : vector<1x2048xf32> to vector<4x2048xf32>
    %94 = arith.addf %92, %93 : vector<4x2048xf32>
    %cst_43 = arith.constant 0.000000e+00 : f32
    %95 = vector.broadcast %cst_43 : f32 to vector<4x2048xf32>
    %96 = arith.maximumf %94, %95 : vector<4x2048xf32>
    %97 = arith.truncf %96 : vector<4x2048xf32> to vector<4x2048xbf16>
    %cst_44 = arith.constant dense<0.000000e+00> : vector<4x64xf32>
    %98 = tpu.matmul %97, %8, %cst_44 {dimension_numbers = #tpu.dot_dimension_numbers<[1], [0], [0], [1], [0, 0, 1, 1], [], []>} : vector<4x2048xbf16>, vector<2048x64xbf16>, vector<4x64xf32> -> vector<4x64xf32>
    %99 = vector.broadcast %9 : vector<1x64xf32> to vector<4x64xf32>
    %100 = arith.addf %98, %99 : vector<4x64xf32>
    %101 = arith.addf %90, %100 : vector<4x64xf32>
    %cst_45 = arith.constant dense<0.000000e+00> : vector<4xf32>
    %102 = vector.multi_reduction <add>, %101, %cst_45 [1] : vector<4x64xf32> to vector<4xf32>
    %103 = vector.shape_cast %102 : vector<4xf32> to vector<4x1xf32>
    %cst_46 = arith.constant 6.400000e+01 : f32
    %104 = vector.broadcast %cst_46 : f32 to vector<4x1xf32>
    %105 = arith.divf %103, %104 : vector<4x1xf32>
    %106 = vector.broadcast %105 : vector<4x1xf32> to vector<4x64xf32>
    %107 = arith.subf %101, %106 : vector<4x64xf32>
    %108 = arith.mulf %107, %107 : vector<4x64xf32>
    %cst_47 = arith.constant dense<0.000000e+00> : vector<4xf32>
    %109 = vector.multi_reduction <add>, %108, %cst_47 [1] : vector<4x64xf32> to vector<4xf32>
    %110 = vector.shape_cast %109 : vector<4xf32> to vector<4x1xf32>
    %cst_48 = arith.constant 6.400000e+01 : f32
    %111 = vector.broadcast %cst_48 : f32 to vector<4x1xf32>
    %112 = arith.divf %110, %111 : vector<4x1xf32>
    %113 = vector.broadcast %105 : vector<4x1xf32> to vector<4x64xf32>
    %114 = arith.subf %101, %113 : vector<4x64xf32>
    %cst_49 = arith.constant 9.99999974E-6 : f32
    %115 = vector.broadcast %cst_49 : f32 to vector<4x1xf32>
    %116 = arith.addf %112, %115 : vector<4x1xf32>
    %117 = math.rsqrt %116 : vector<4x1xf32>
    %118 = vector.broadcast %117 : vector<4x1xf32> to vector<4x64xf32>
    %119 = arith.mulf %114, %118 : vector<4x64xf32>
    %120 = vector.broadcast %12 : vector<1x64xf32> to vector<4x64xf32>
    %121 = arith.mulf %119, %120 : vector<4x64xf32>
    %122 = vector.broadcast %13 : vector<1x64xf32> to vector<4x64xf32>
    %123 = arith.addf %121, %122 : vector<4x64xf32>
    %c0_50 = arith.constant 0 : index
    %c0_51 = arith.constant 0 : index
    %124 = vector.load %arg14[%c0_50, %c0_51] : memref<64x64xbf16, #tpu.memory_space<vmem>>, vector<64x64xbf16>
    %125 = arith.truncf %123 : vector<4x64xf32> to vector<4x64xbf16>
    %cst_52 = arith.constant dense<0.000000e+00> : vector<4x64xf32>
    %126 = tpu.matmul %125, %124, %cst_52 {dimension_numbers = #tpu.dot_dimension_numbers<[1], [0], [0], [1], [0, 0, 1, 1], [], []>} : vector<4x64xbf16>, vector<64x64xbf16>, vector<4x64xf32> -> vector<4x64xf32>
    %c0_53 = arith.constant 0 : index
    %c0_54 = arith.constant 0 : index
    %127 = vector.load %arg15[%c0_53, %c0_54] : memref<1x64xf32, #tpu.memory_space<vmem>>, vector<1x64xf32>
    %128 = vector.broadcast %127 : vector<1x64xf32> to vector<4x64xf32>
    %129 = arith.addf %126, %128 : vector<4x64xf32>
    %130 = math.tanh %129 : vector<4x64xf32>
    %c0_55 = arith.constant 0 : index
    %c0_56 = arith.constant 0 : index
    %131 = vector.load %arg16[%c0_55, %c0_56] : memref<64x128xbf16, #tpu.memory_space<vmem>>, vector<64x128xbf16>
    %132 = arith.truncf %130 : vector<4x64xf32> to vector<4x64xbf16>
    %cst_57 = arith.constant dense<0.000000e+00> : vector<4x128xf32>
    %133 = tpu.matmul %132, %131, %cst_57 {dimension_numbers = #tpu.dot_dimension_numbers<[1], [0], [0], [1], [0, 0, 1, 1], [], []>} : vector<4x64xbf16>, vector<64x128xbf16>, vector<4x128xf32> -> vector<4x128xf32>
    %c0_58 = arith.constant 0 : index
    %c0_59 = arith.constant 0 : index
    %134 = vector.load %arg17[%c0_58, %c0_59] : memref<1x128xf32, #tpu.memory_space<vmem>>, vector<1x128xf32>
    %135 = vector.broadcast %134 : vector<1x128xf32> to vector<4x128xf32>
    %136 = arith.addf %133, %135 : vector<4x128xf32>
    %c0_60 = arith.constant 0 : index
    %c0_61 = arith.constant 0 : index
    %c0_62 = arith.constant 0 : index
    %137 = vector.load %arg18[%c0_60, %c0_61, %c0_62] : memref<1x4x128xf32, #tpu.memory_space<vmem>>, vector<1x4x128xf32>
    %138 = vector.shape_cast %137 : vector<1x4x128xf32> to vector<4x128xf32>
    %139 = vector.shape_cast %136 : vector<4x128xf32> to vector<1x4x128xf32>
    tpu.vector_store %arg18[%c0_60, %c0_61, %c0_62], %139 {strides = array<i32>} : memref<1x4x128xf32, #tpu.memory_space<vmem>>, vector<1x4x128xf32>,
    return
  }
  func.func @transform_0(%arg0: i32) -> (i32, i32, i32) {
    %c0_i32 = arith.constant 0 : i32
    %c0_i32_0 = arith.constant 0 : i32
    %c0_i32_1 = arith.constant 0 : i32
    return %arg0, %c0_i32, %c0_i32_0 : i32, i32, i32
  }
  func.func @transform_1(%arg0: i32) -> (i32, i32) {
    %c0_i32 = arith.constant 0 : i32
    %c0_i32_0 = arith.constant 0 : i32
    %c0_i32_1 = arith.constant 0 : i32
    return %c0_i32, %c0_i32_0 : i32, i32
  }
  func.func @transform_2(%arg0: i32) -> (i32, i32) {
    %c0_i32 = arith.constant 0 : i32
    %c0_i32_0 = arith.constant 0 : i32
    %c0_i32_1 = arith.constant 0 : i32
    return %c0_i32, %c0_i32_0 : i32, i32
  }
  func.func @transform_3(%arg0: i32) -> (i32, i32) {
    %c0_i32 = arith.constant 0 : i32
    %c0_i32_0 = arith.constant 0 : i32
    %c0_i32_1 = arith.constant 0 : i32
    return %c0_i32, %c0_i32_0 : i32, i32
  }
  func.func @transform_4(%arg0: i32) -> (i32, i32) {
    %c0_i32 = arith.constant 0 : i32
    %c0_i32_0 = arith.constant 0 : i32
    %c0_i32_1 = arith.constant 0 : i32
    return %c0_i32, %c0_i32_0 : i32, i32
  }
  func.func @transform_5(%arg0: i32) -> (i32, i32) {
    %c0_i32 = arith.constant 0 : i32
    %c0_i32_0 = arith.constant 0 : i32
    %c0_i32_1 = arith.constant 0 : i32
    return %c0_i32, %c0_i32_0 : i32, i32
  }
  func.func @transform_6(%arg0: i32) -> (i32, i32) {
    %c0_i32 = arith.constant 0 : i32
    %c0_i32_0 = arith.constant 0 : i32
    %c0_i32_1 = arith.constant 0 : i32
    return %c0_i32, %c0_i32_0 : i32, i32
  }
  func.func @transform_7(%arg0: i32) -> (i32, i32) {
    %c0_i32 = arith.constant 0 : i32
    %c0_i32_0 = arith.constant 0 : i32
    %c0_i32_1 = arith.constant 0 : i32
    return %c0_i32, %c0_i32_0 : i32, i32
  }
  func.func @transform_8(%arg0: i32) -> (i32, i32) {
    %c0_i32 = arith.constant 0 : i32
    %c0_i32_0 = arith.constant 0 : i32
    %c0_i32_1 = arith.constant 0 : i32
    return %c0_i32, %c0_i32_0 : i32, i32
  }
  func.func @transform_9(%arg0: i32) -> (i32, i32) {
    %c0_i32 = arith.constant 0 : i32
    %c0_i32_0 = arith.constant 0 : i32
    %c0_i32_1 = arith.constant 0 : i32
    return %c0_i32, %c0_i32_0 : i32, i32
  }
  func.func @transform_10(%arg0: i32) -> (i32, i32) {
    %c0_i32 = arith.constant 0 : i32
    %c0_i32_0 = arith.constant 0 : i32
    %c0_i32_1 = arith.constant 0 : i32
    return %c0_i32, %c0_i32_0 : i32, i32
  }
  func.func @transform_11(%arg0: i32) -> (i32, i32) {
    %c0_i32 = arith.constant 0 : i32
    %c0_i32_0 = arith.constant 0 : i32
    %c0_i32_1 = arith.constant 0 : i32
    return %c0_i32, %c0_i32_0 : i32, i32
  }
  func.func @transform_12(%arg0: i32) -> (i32, i32) {
    %c0_i32 = arith.constant 0 : i32
    %c0_i32_0 = arith.constant 0 : i32
    %c0_i32_1 = arith.constant 0 : i32
    return %c0_i32, %c0_i32_0 : i32, i32
  }
  func.func @transform_13(%arg0: i32) -> (i32, i32) {
    %c0_i32 = arith.constant 0 : i32
    %c0_i32_0 = arith.constant 0 : i32
    %c0_i32_1 = arith.constant 0 : i32
    return %c0_i32, %c0_i32_0 : i32, i32
  }
  func.func @transform_14(%arg0: i32) -> (i32, i32) {
    %c0_i32 = arith.constant 0 : i32
    %c0_i32_0 = arith.constant 0 : i32
    %c0_i32_1 = arith.constant 0 : i32
    return %c0_i32, %c0_i32_0 : i32, i32
  }
  func.func @transform_15(%arg0: i32) -> (i32, i32) {
    %c0_i32 = arith.constant 0 : i32
    %c0_i32_0 = arith.constant 0 : i32
    %c0_i32_1 = arith.constant 0 : i32
    return %c0_i32, %c0_i32_0 : i32, i32
  }
  func.func @transform_16(%arg0: i32) -> (i32, i32) {
    %c0_i32 = arith.constant 0 : i32
    %c0_i32_0 = arith.constant 0 : i32
    %c0_i32_1 = arith.constant 0 : i32
    return %c0_i32, %c0_i32_0 : i32, i32
  }
  func.func @transform_17(%arg0: i32) -> (i32, i32, i32) {
    %c0_i32 = arith.constant 0 : i32
    %c0_i32_0 = arith.constant 0 : i32
    %c0_i32_1 = arith.constant 0 : i32
    return %arg0, %c0_i32, %c0_i32_0 : i32, i32, i32
  }
}

</mosaic_0001>

<bundles_post_ra>
// kernel: mutual_forward.6
= control target key start
LH: loop header
LB: loop body
LE: loop exit
PB: predicated region body
PF: predicated region fallthrough
CT: control target
= control target key end

     0   :  { %s3333_s0 = inlined_call_operand.hbm [shape: bf16[32,32], index: 0, kind: input, shape index: {}]   ;;  %s3334_s1 = inlined_call_operand.hbm [shape: bf16[32,32], index: 1, kind: input, shape index: {}]   ;;  %s3335_s2 = inlined_call_operand.hbm [shape: bf16[32,32], index: 2, kind: input, shape index: {}]   ;;  %s3336_s3 = inlined_call_operand.hbm [shape: f32[1,32], index: 3, kind: input, shape index: {}]   ;;  %s3337_s4 = inlined_call_operand.hbm [shape: bf16[32,64], index: 4, kind: input, shape index: {}]   ;;  %s3338_s5 = inlined_call_operand.hbm [shape: f32[1,64], index: 5, kind: input, shape index: {}]   ;;  %s3339_s6 = inlined_call_operand.hbm [shape: f32[32,4], index: 6, kind: input, shape index: {}]   ;;  %s3340_s7 = inlined_call_operand.hbm [shape: f32[4,32], index: 7, kind: input, shape index: {}]   ;;  %s3341_s8 = inlined_call_operand.hbm [shape: f32[1,32], index: 8, kind: input, shape index: {}]   ;;  %s3342_s9 = inlined_call_operand.hbm [shape: f32[1,32], index: 9, kind: input, shape index: {}]   ;;  %s3343_s10 = inlined_call_operand.hbm [shape: bf16[32,32], index: 10, kind: input, shape index: {}]   ;;  %s3344_s11 = inlined_call_operand.hbm [shape: f32[1,32], index: 11, kind: input, shape index: {}]   ;;  %s3345_s12 = inlined_call_operand.hbm [shape: bf16[32,64], index: 12, kind: input, shape index: {}]   ;;  %s3346_s13 = inlined_call_operand.hbm [shape: f32[1,64], index: 13, kind: input, shape index: {}]   ;;  %s3347_s14 = inlined_call_operand.hbm [shape: bf16[64,128], index: 14, kind: input, shape index: {}]   ;;  %s3348_s15 = inlined_call_operand.hbm [shape: f32[1,128], index: 15, kind: input, shape index: {}]   ;;  %s3349_s16 = inlined_call_operand.hbm [shape: f32[32,128], index: 16, kind: output, shape index: {}]  }
   0x1   :  { %3351 = sst [smem:[#allocation39_spill]] %s3333_s0 }
   0x2   :  { %21 = vsyncpa [#allocation3], 0 }
   0x3   :  { %22 = vsyncpa [#allocation6], 0 }
   0x4   :  { %23 = vsyncpa [#allocation9], 0 }
   0x5   :  { %24 = vsyncpa [#allocation12], 0 }
   0x6   :  { %25 = vsyncpa [#allocation15], 0 }
   0x7   :  { %26 = vsyncpa [#allocation18], 0 }
   0x8   :  { %27 = vsyncpa [#allocation21], 0 }
   0x9   :  { %28 = vsyncpa [#allocation24], 0 }
   0xa   :  { %29 = vsyncpa [#allocation27], 0 }
   0xb   :  { %30 = vsyncpa [#allocation4], 0  ;;  %s2902_s21 = smov [#allocation5]   ;;  %s2903_s23 = smov [#allocation8]  }
   0xc   :  { %s48_s22 = sshll.u32 %s2902_s21, 4  ;;  %s73_s24 = sshll.u32 %s2903_s23, 4  ;;  %s49_s22 = int_to_ptr.vmem [resolvable:$true] %s48_s22  ;;  %s3009_s24 = int_to_ptr.vmem [resolvable:$true] %s73_s24 }
   0xd   :  { %s2508_s27 = scalar_lea.hbm %s3334_s1, 256 }
   0xe   :  { %p2509_p0 = scmp.ne.s32.totalorder %s3334_s1, %s2508_s27  ;;  %p2512_p1 = scmp.lt.u32.totalorder %s2508_s27, %s3334_s1 }
  0x10   :  { %p2514_p2 = pnand %p2512_p1, %p2509_p0 }
  0x12   :  { %2517 = shalt.err (!%p2514_p2)
}
  0x13   :  { %s2518_s17 = scalar_lea.vmem %s49_s22, 256  ;;  %p2523_p4 = scmp.lt.s32.totalorder %s49_s22, %s49_s22 }
  0x14   :  { %p2519_p3 = scmp.ne.s32.totalorder %s49_s22, %s2518_s17  ;;  %p2524_p5 = scmp.lt.s32.totalorder %s2518_s17, %s2518_s17 }
  0x16   :  { %p2525_p6 = por %p2524_p5, %p2523_p4 }
  0x18   :  { %p2526_p7 = pnand %p2525_p6, %p2519_p3 }
  0x1a   :  { %2529 = shalt.err (!%p2526_p7)
}
  0x1b   :  { %s2904_s18 = smov 64   ;;  %s2905_s19 = smov 4  }
  0x1c   :  { %54 = dma.hbm_to_vmem [thread:$0]  %s3334_s1, 256, %s49_s22, [#allocation6], %s2904_s18, %s2904_s18, %s2905_s19  }
  0x1d   :  { %s2530_s26 = scalar_lea.hbm %s3336_s3, 16 }
  0x1e   :  { %p2531_p8 = scmp.ne.s32.totalorder %s3336_s3, %s2530_s26  ;;  %p2534_p9 = scmp.lt.u32.totalorder %s2530_s26, %s3336_s3 }
  0x20   :  { %p2536_p10 = pnand %p2534_p9, %p2531_p8 }
  0x22   :  { %2539 = shalt.err (!%p2536_p10)
}
  0x23   :  { %s2540_s0 = scalar_lea.vmem %s3009_s24, 16  ;;  %s2544_s1 = scalar_lea.vmem %s3009_s24, 32 }
  0x24   :  { %p2541_p11 = scmp.ne.s32.totalorder %s3009_s24, %s2540_s0  ;;  %p2545_p12 = scmp.lt.s32.totalorder %s3009_s24, %s3009_s24 }
  0x25   :  { %p2546_p13 = scmp.lt.s32.totalorder %s2544_s1, %s2540_s0 }
  0x27   :  { %p2547_p0 = por %p2546_p13, %p2545_p12 }
  0x29   :  { %p2548_p1 = pnand %p2547_p0, %p2541_p11 }
  0x2b   :  { %2551 = shalt.err (!%p2548_p1)
}
  0x2c   :  { %76 = dma.hbm_to_vmem [thread:$0]  %s3336_s3, 16, %s3009_s24, [#allocation9]  }
  0x2d   :  { %s2906_s20 = smov [#allocation11]   ;;  %s2907_s23 = smov [#allocation14]  }
  0x2e   :  { %s95_s21 = sshll.u32 %s2906_s20, 4  ;;  %s117_s25 = sshll.u32 %s2907_s23, 4  ;;  %s96_s21 = int_to_ptr.vmem [resolvable:$true] %s95_s21  ;;  %s118_s25 = int_to_ptr.vmem [resolvable:$true] %s117_s25 }
  0x2f   :  { %s2552_s28 = scalar_lea.hbm %s3338_s5, 16 }
  0x30   :  { %p2553_p2 = scmp.ne.s32.totalorder %s3338_s5, %s2552_s28  ;;  %p2556_p3 = scmp.lt.u32.totalorder %s2552_s28, %s3338_s5 }
  0x32   :  { %p2558_p4 = pnand %p2556_p3, %p2553_p2 }
  0x34   :  { %2561 = shalt.err (!%p2558_p4)
}
  0x35   :  { %s2562_s3 = scalar_lea.vmem %s96_s21, 16  ;;  %s2566_s24 = scalar_lea.vmem %s96_s21, 32 }
  0x36   :  { %p2563_p5 = scmp.ne.s32.totalorder %s96_s21, %s2562_s3  ;;  %p2567_p6 = scmp.lt.s32.totalorder %s96_s21, %s96_s21 }
  0x37   :  { %p2568_p7 = scmp.lt.s32.totalorder %s2566_s24, %s2562_s3 }
  0x39   :  { %p2569_p8 = por %p2568_p7, %p2567_p6 }
  0x3b   :  { %p2570_p9 = pnand %p2569_p8, %p2563_p5 }
  0x3d   :  { %2573 = shalt.err (!%p2570_p9)
}
  0x3e   :  { %98 = dma.hbm_to_vmem [thread:$0]  %s3338_s5, 16, %s96_s21, [#allocation12]  }
  0x3f   :  { %s2574_s26 = scalar_lea.hbm %s3340_s7, 64 }
  0x40   :  { %p2575_p10 = scmp.ne.s32.totalorder %s3340_s7, %s2574_s26  ;;  %p2578_p11 = scmp.lt.u32.totalorder %s2574_s26, %s3340_s7 }
  0x42   :  { %p2580_p12 = pnand %p2578_p11, %p2575_p10 }
  0x44   :  { %2583 = shalt.err (!%p2580_p12)
}
  0x45   :  { %s2584_s0 = scalar_lea.vmem %s118_s25, 64  ;;  %p2589_p0 = scmp.lt.s32.totalorder %s118_s25, %s118_s25 }
  0x46   :  { %p2585_p13 = scmp.ne.s32.totalorder %s118_s25, %s2584_s0  ;;  %p2590_p1 = scmp.lt.s32.totalorder %s2584_s0, %s2584_s0 }
  0x48   :  { %p2591_p2 = por %p2590_p1, %p2589_p0 }
  0x4a   :  { %p2592_p3 = pnand %p2591_p2, %p2585_p13 }
  0x4c   :  { %2595 = shalt.err (!%p2592_p3)
}
  0x4d   :  { %120 = dma.hbm_to_vmem [thread:$0]  %s3340_s7, 64, %s118_s25, [#allocation15]  }
  0x4e   :  { %s2908_s1 = smov [#allocation17]   ;;  %s2909_s24 = smov [#allocation20]  }
  0x4f   :  { %s137_s3 = sshll.u32 %s2908_s1, 4  ;;  %s159_s22 = sshll.u32 %s2909_s24, 4  ;;  %s138_s3 = int_to_ptr.vmem [resolvable:$true] %s137_s3  ;;  %s160_s22 = int_to_ptr.vmem [resolvable:$true] %s159_s22 }
  0x50   :  { %s2596_s23 = scalar_lea.hbm %s3342_s9, 16 }
  0x51   :  { %p2597_p4 = scmp.ne.s32.totalorder %s3342_s9, %s2596_s23  ;;  %p2600_p5 = scmp.lt.u32.totalorder %s2596_s23, %s3342_s9 }
  0x53   :  { %p2602_p6 = pnand %p2600_p5, %p2597_p4 }
  0x55   :  { %2605 = shalt.err (!%p2602_p6)
}
  0x56   :  { %s2606_s7 = scalar_lea.vmem %s138_s3, 16  ;;  %s2610_s25 = scalar_lea.vmem %s138_s3, 32 }
  0x57   :  { %p2607_p7 = scmp.ne.s32.totalorder %s138_s3, %s2606_s7  ;;  %p2611_p8 = scmp.lt.s32.totalorder %s138_s3, %s138_s3 }
  0x58   :  { %p2612_p9 = scmp.lt.s32.totalorder %s2610_s25, %s2606_s7 }
  0x5a   :  { %p2613_p10 = por %p2612_p9, %p2611_p8 }
  0x5c   :  { %p2614_p11 = pnand %p2613_p10, %p2607_p7 }
  0x5e   :  { %2617 = shalt.err (!%p2614_p11)
}
  0x5f   :  { %140 = dma.hbm_to_vmem [thread:$0]  %s3342_s9, 16, %s138_s3, [#allocation18]  }
  0x60   :  { %s2618_s1 = scalar_lea.hbm %s3344_s11, 16 }
  0x61   :  { %p2619_p12 = scmp.ne.s32.totalorder %s3344_s11, %s2618_s1  ;;  %p2622_p13 = scmp.lt.u32.totalorder %s2618_s1, %s3344_s11 }
  0x63   :  { %p2624_p0 = pnand %p2622_p13, %p2619_p12 }
  0x65   :  { %2627 = shalt.err (!%p2624_p0)
}
  0x66   :  { %s2628_s26 = scalar_lea.vmem %s160_s22, 16  ;;  %s2632_s27 = scalar_lea.vmem %s160_s22, 32 }
  0x67   :  { %p2629_p1 = scmp.ne.s32.totalorder %s160_s22, %s2628_s26  ;;  %p2633_p2 = scmp.lt.s32.totalorder %s160_s22, %s160_s22 }
  0x68   :  { %p2634_p3 = scmp.lt.s32.totalorder %s2632_s27, %s2628_s26 }
  0x6a   :  { %p2635_p4 = por %p2634_p3, %p2633_p2 }
  0x6c   :  { %p2636_p5 = pnand %p2635_p4, %p2629_p1 }
  0x6e   :  { %2639 = shalt.err (!%p2636_p5)
}
  0x6f   :  { %162 = dma.hbm_to_vmem [thread:$0]  %s3344_s11, 16, %s160_s22, [#allocation21]  }
  0x70   :  { %s2910_s28 = smov [#allocation23]   ;;  %s2911_s7 = smov [#allocation2]  }
  0x71   :  { %s181_s29 = sshll.u32 %s2910_s28, 4  ;;  %s36_s25 = sshll.u32 %s2911_s7, 4  ;;  %s182_s29 = int_to_ptr.vmem [resolvable:$true] %s181_s29  ;;  %s3092_s25 = int_to_ptr.vmem [resolvable:$true] %s36_s25 }
  0x72   :  { %s2640_s5 = scalar_lea.hbm %s3346_s13, 16 }
  0x73   :  { %p2641_p6 = scmp.ne.s32.totalorder %s3346_s13, %s2640_s5  ;;  %p2644_p7 = scmp.lt.u32.totalorder %s2640_s5, %s3346_s13 }
  0x75   :  { %p2646_p8 = pnand %p2644_p7, %p2641_p6 }
  0x77   :  { %2649 = shalt.err (!%p2646_p8)
}
  0x78   :  { %s2650_s11 = scalar_lea.vmem %s182_s29, 16  ;;  %s2654_s22 = scalar_lea.vmem %s182_s29, 32 }
  0x79   :  { %p2651_p9 = scmp.ne.s32.totalorder %s182_s29, %s2650_s11  ;;  %p2655_p10 = scmp.lt.s32.totalorder %s182_s29, %s182_s29 }
  0x7a   :  { %p2656_p11 = scmp.lt.s32.totalorder %s2654_s22, %s2650_s11 }
  0x7c   :  { %p2657_p12 = por %p2656_p11, %p2655_p10 }
  0x7e   :  { %p2658_p13 = pnand %p2657_p12, %p2651_p9 }
  0x80   :  { %2661 = shalt.err (!%p2658_p13)
}
  0x81   :  { %184 = dma.hbm_to_vmem [thread:$0]  %s3346_s13, 16, %s182_s29, [#allocation24]  }
  0x82   :  { %s3352_s9 = sld [smem:[#allocation39_spill]] }
  0x88   :  { %s2662_s3 = scalar_lea.hbm %s3352_s9, 256 }
  0x89   :  { %p2663_p0 = scmp.ne.s32.totalorder %s3352_s9, %s2662_s3  ;;  %p2666_p1 = scmp.lt.u32.totalorder %s2662_s3, %s3352_s9 }
  0x8b   :  { %p2668_p2 = pnand %p2666_p1, %p2663_p0 }
  0x8d   :  { %2671 = shalt.err (!%p2668_p2)
}
  0x8e   :  { %s2672_s5 = scalar_lea.vmem %s3092_s25, 256  ;;  %p2677_p4 = scmp.lt.s32.totalorder %s3092_s25, %s3092_s25 }
  0x8f   :  { %p2673_p3 = scmp.ne.s32.totalorder %s3092_s25, %s2672_s5  ;;  %p2678_p5 = scmp.lt.s32.totalorder %s2672_s5, %s2672_s5 }
  0x91   :  { %p2679_p6 = por %p2678_p5, %p2677_p4 }
  0x93   :  { %p2680_p7 = pnand %p2679_p6, %p2673_p3 }
  0x95   :  { %2683 = shalt.err (!%p2680_p7)
}
  0x96   :  { %42 = dma.hbm_to_vmem [thread:$0]  %s3352_s9, 256, %s3092_s25, [#allocation3], %s2904_s18, %s2904_s18, %s2905_s19  }
  0x97   :  { %s2912_s21 = smov [#allocation7]   ;;  %s2913_s24 = smov [#allocation10]  }
  0x98   :  { %s60_s1 = sshll.u32 %s2912_s21, 4  ;;  %s82_s17 = sshll.u32 %s2913_s24, 4  ;;  %s61_s1 = int_to_ptr.vmem [resolvable:$true] %s60_s1  ;;  %s3126_s17 = int_to_ptr.vmem [resolvable:$true] %s82_s17 }
  0x99   :  { %s2684_s20 = scalar_lea.hbm %s3335_s2, 256 }
  0x9a   :  { %p2685_p8 = scmp.ne.s32.totalorder %s3335_s2, %s2684_s20  ;;  %p2688_p9 = scmp.lt.u32.totalorder %s2684_s20, %s3335_s2 }
  0x9c   :  { %p2690_p10 = pnand %p2688_p9, %p2685_p8 }
  0x9e   :  { %2693 = shalt.err (!%p2690_p10)
}
  0x9f   :  { %s2694_s25 = scalar_lea.vmem %s61_s1, 256  ;;  %p2699_p12 = scmp.lt.s32.totalorder %s61_s1, %s61_s1 }
  0xa0   :  { %p2695_p11 = scmp.ne.s32.totalorder %s61_s1, %s2694_s25  ;;  %p2700_p13 = scmp.lt.s32.totalorder %s2694_s25, %s2694_s25 }
  0xa2   :  { %p2701_p0 = por %p2700_p13, %p2699_p12 }
  0xa4   :  { %p2702_p1 = pnand %p2701_p0, %p2695_p11 }
  0xa6   :  { %2705 = shalt.err (!%p2702_p1)
}
  0xa7   :  { %66 = dma.hbm_to_vmem [thread:$0]  %s3335_s2, 256, %s61_s1, [#allocation6], %s2904_s18, %s2904_s18, %s2905_s19  }
  0xa8   :  { %s2706_s0 = scalar_lea.hbm %s3337_s4, 256 }
  0xa9   :  { %p2707_p2 = scmp.ne.s32.totalorder %s3337_s4, %s2706_s0  ;;  %p2710_p3 = scmp.lt.u32.totalorder %s2706_s0, %s3337_s4 }
  0xab   :  { %p2712_p4 = pnand %p2710_p3, %p2707_p2 }
  0xad   :  { %2715 = shalt.err (!%p2712_p4)
}
  0xae   :  { %s2716_s24 = scalar_lea.vmem %s3126_s17, 256  ;;  %p2721_p6 = scmp.lt.s32.totalorder %s3126_s17, %s3126_s17 }
  0xaf   :  { %p2717_p5 = scmp.ne.s32.totalorder %s3126_s17, %s2716_s24  ;;  %p2722_p7 = scmp.lt.s32.totalorder %s2716_s24, %s2716_s24 }
  0xb1   :  { %p2723_p8 = por %p2722_p7, %p2721_p6 }
  0xb3   :  { %p2724_p9 = pnand %p2723_p8, %p2717_p5 }
  0xb5   :  { %2727 = shalt.err (!%p2724_p9)
}
  0xb6   :  { %88 = dma.hbm_to_vmem [thread:$0]  %s3337_s4, 256, %s3126_s17, [#allocation9], %s2904_s18, %s2904_s18, %s2905_s19  }
  0xb7   :  { %s2914_s11 = smov [#allocation13]   ;;  %s2728_s26 = scalar_lea.hbm %s3339_s6, 512 }
  0xb8   :  { %s104_s22 = sshll.u32 %s2914_s11, 4  ;;  %p2729_p10 = scmp.ne.s32.totalorder %s3339_s6, %s2728_s26  ;;  %s105_s22 = int_to_ptr.vmem [resolvable:$true] %s104_s22 }
  0xb9   :  { %p2732_p11 = scmp.lt.u32.totalorder %s2728_s26, %s3339_s6 }
  0xbb   :  { %p2734_p12 = pnand %p2732_p11, %p2729_p10 }
  0xbd   :  { %2737 = shalt.err (!%p2734_p12)
}
  0xbe   :  { %s2738_s28 = scalar_lea.vmem %s105_s22, 512  ;;  %p2743_p0 = scmp.lt.s32.totalorder %s105_s22, %s105_s22 }
  0xbf   :  { %p2739_p13 = scmp.ne.s32.totalorder %s105_s22, %s2738_s28  ;;  %p2744_p1 = scmp.lt.s32.totalorder %s2738_s28, %s2738_s28 }
  0xc1   :  { %p2745_p2 = por %p2744_p1, %p2743_p0 }
  0xc3   :  { %p2746_p3 = pnand %p2745_p2, %p2739_p13 }
  0xc5   :  { %2749 = shalt.err (!%p2746_p3)
}
  0xc6   :  { %s2915_s4 = smov 128   ;;  %s2916_s17 = smov 8  }
  0xc7   :  { %110 = dma.hbm_to_vmem [thread:$0]  %s3339_s6, 512, %s105_s22, [#allocation12], %s2915_s4, %s2915_s4, %s2916_s17  }
  0xc8   :  { %s2917_s0 = smov [#allocation16]   ;;  %s2918_s13 = smov [#allocation19]  }
  0xc9   :  { %s127_s5 = sshll.u32 %s2917_s0, 4  ;;  %s146_s29 = sshll.u32 %s2918_s13, 4  ;;  %s128_s5 = int_to_ptr.vmem [resolvable:$true] %s127_s5  ;;  %s147_s29 = int_to_ptr.vmem [resolvable:$true] %s146_s29 }
  0xca   :  { %s2750_s2 = scalar_lea.hbm %s3341_s8, 16 }
  0xcb   :  { %p2751_p4 = scmp.ne.s32.totalorder %s3341_s8, %s2750_s2  ;;  %p2754_p5 = scmp.lt.u32.totalorder %s2750_s2, %s3341_s8 }
  0xcd   :  { %p2756_p6 = pnand %p2754_p5, %p2751_p4 }
  0xcf   :  { %2759 = shalt.err (!%p2756_p6)
}
  0xd0   :  { %s2760_s6 = scalar_lea.vmem %s128_s5, 16  ;;  %s2764_s22 = scalar_lea.vmem %s128_s5, 32 }
  0xd1   :  { %p2761_p7 = scmp.ne.s32.totalorder %s128_s5, %s2760_s6  ;;  %p2765_p8 = scmp.lt.s32.totalorder %s128_s5, %s128_s5 }
  0xd2   :  { %p2766_p9 = scmp.lt.s32.totalorder %s2764_s22, %s2760_s6 }
  0xd4   :  { %p2767_p10 = por %p2766_p9, %p2765_p8 }
  0xd6   :  { %p2768_p11 = pnand %p2767_p10, %p2761_p7 }
  0xd8   :  { %2771 = shalt.err (!%p2768_p11)
}
  0xd9   :  { %130 = dma.hbm_to_vmem [thread:$0]  %s3341_s8, 16, %s128_s5, [#allocation15]  }
  0xda   :  { %s2772_s9 = scalar_lea.hbm %s3343_s10, 256 }
  0xdb   :  { %p2773_p12 = scmp.ne.s32.totalorder %s3343_s10, %s2772_s9  ;;  %p2776_p13 = scmp.lt.u32.totalorder %s2772_s9, %s3343_s10 }
  0xdd   :  { %p2778_p0 = pnand %p2776_p13, %p2773_p12 }
  0xdf   :  { %2781 = shalt.err (!%p2778_p0)
}
  0xe0   :  { %s2782_s13 = scalar_lea.vmem %s147_s29, 256  ;;  %p2787_p2 = scmp.lt.s32.totalorder %s147_s29, %s147_s29 }
  0xe1   :  { %p2783_p1 = scmp.ne.s32.totalorder %s147_s29, %s2782_s13  ;;  %p2788_p3 = scmp.lt.s32.totalorder %s2782_s13, %s2782_s13 }
  0xe3   :  { %p2789_p4 = por %p2788_p3, %p2787_p2 }
  0xe5   :  { %p2790_p5 = pnand %p2789_p4, %p2783_p1 }
  0xe7   :  { %2793 = shalt.err (!%p2790_p5)
}
  0xe8   :  { %152 = dma.hbm_to_vmem [thread:$0]  %s3343_s10, 256, %s147_s29, [#allocation18], %s2904_s18, %s2904_s18, %s2905_s19  }
  0xe9   :  { %s2919_s21 = smov [#allocation22]   ;;  %s2920_s2 = smov [#allocation25]  }
  0xea   :  { %s168_s24 = sshll.u32 %s2919_s21, 4  ;;  %s190_s1 = sshll.u32 %s2920_s2, 4  ;;  %s169_s24 = int_to_ptr.vmem [resolvable:$true] %s168_s24  ;;  %s191_s1 = int_to_ptr.vmem [resolvable:$true] %s190_s1 }
  0xeb   :  { %s2794_s23 = scalar_lea.hbm %s3345_s12, 256 }
  0xec   :  { %p2795_p6 = scmp.ne.s32.totalorder %s3345_s12, %s2794_s23  ;;  %p2798_p7 = scmp.lt.u32.totalorder %s2794_s23, %s3345_s12 }
  0xee   :  { %p2800_p8 = pnand %p2798_p7, %p2795_p6 }
  0xf0   :  { %2803 = shalt.err (!%p2800_p8)
}
  0xf1   :  { %s2804_s10 = scalar_lea.vmem %s169_s24, 256  ;;  %p2809_p10 = scmp.lt.s32.totalorder %s169_s24, %s169_s24 }
  0xf2   :  { %p2805_p9 = scmp.ne.s32.totalorder %s169_s24, %s2804_s10  ;;  %p2810_p11 = scmp.lt.s32.totalorder %s2804_s10, %s2804_s10 }
  0xf4   :  { %p2811_p12 = por %p2810_p11, %p2809_p10 }
  0xf6   :  { %p2812_p13 = pnand %p2811_p12, %p2805_p9 }
  0xf8   :  { %2815 = shalt.err (!%p2812_p13)
}
  0xf9   :  { %174 = dma.hbm_to_vmem [thread:$0]  %s3345_s12, 256, %s169_s24, [#allocation21], %s2904_s18, %s2904_s18, %s2905_s19  }
  0xfa   :  { %s2816_s28 = scalar_lea.hbm %s3347_s14, 512 }
  0xfb   :  { %p2817_p0 = scmp.ne.s32.totalorder %s3347_s14, %s2816_s28  ;;  %p2820_p1 = scmp.lt.u32.totalorder %s2816_s28, %s3347_s14 }
  0xfd   :  { %p2822_p2 = pnand %p2820_p1, %p2817_p0 }
  0xff   :  { %2825 = shalt.err (!%p2822_p2)
}
 0x100   :  { %s2826_s8 = scalar_lea.vmem %s191_s1, 512  ;;  %p2831_p4 = scmp.lt.s32.totalorder %s191_s1, %s191_s1 }
 0x101   :  { %p2827_p3 = scmp.ne.s32.totalorder %s191_s1, %s2826_s8  ;;  %p2832_p5 = scmp.lt.s32.totalorder %s2826_s8, %s2826_s8 }
 0x103   :  { %p2833_p6 = por %p2832_p5, %p2831_p4 }
 0x105   :  { %p2834_p7 = pnand %p2833_p6, %p2827_p3 }
 0x107   :  { %2837 = shalt.err (!%p2834_p7)
}
 0x108   :  { %196 = dma.hbm_to_vmem [thread:$0]  %s3347_s14, 512, %s191_s1, [#allocation24], %s2904_s18, %s2904_s18, %s2905_s19  }
 0x109   :  { %s2921_s21 = smov [#allocation26]   ;;  %s2838_s20 = scalar_lea.hbm %s3348_s15, 16 }
 0x10a   :  { %s203_s24 = sshll.u32 %s2921_s21, 4  ;;  %p2839_p8 = scmp.ne.s32.totalorder %s3348_s15, %s2838_s20  ;;  %s204_s24 = int_to_ptr.vmem [resolvable:$true] %s203_s24 }
 0x10b   :  { %p2842_p9 = scmp.lt.u32.totalorder %s2838_s20, %s3348_s15 }
 0x10d   :  { %p2844_p10 = pnand %p2842_p9, %p2839_p8 }
 0x10f   :  { %2847 = shalt.err (!%p2844_p10)
}
 0x110   :  { %s2848_s27 = scalar_lea.vmem %s204_s24, 16  ;;  %s2852_s14 = scalar_lea.vmem %s204_s24, 32 }
 0x111   :  { %p2849_p11 = scmp.ne.s32.totalorder %s204_s24, %s2848_s27  ;;  %p2853_p12 = scmp.lt.s32.totalorder %s204_s24, %s204_s24 }
 0x112   :  { %p2854_p13 = scmp.lt.s32.totalorder %s2852_s14, %s2848_s27 }
 0x114   :  { %p2855_p0 = por %p2854_p13, %p2853_p12 }
 0x116   :  { %p2856_p1 = pnand %p2855_p0, %p2849_p11 }
 0x118   :  { %2859 = shalt.err (!%p2856_p1)
}
 0x119   :  { %206 = dma.hbm_to_vmem [thread:$0]  %s3348_s15, 16, %s204_s24, [#allocation27]  }
 0x11a   :  { %2882 = dma.done.wait [#allocation3], 256  }
 0x11b   :  { %2883 = vsyncadd [#allocation3], 4294967040 }
 0x11c   :  { %2884 = dma.done.wait [#allocation6], 512  }
 0x11d   :  { %2885 = vsyncadd [#allocation6], 4294966784 }
 0x11e   :  { %2886 = dma.done.wait [#allocation9], 272  }
 0x11f   :  { %2887 = vsyncadd [#allocation9], 4294967024 }
 0x120   :  { %2888 = dma.done.wait [#allocation12], 528  }
 0x121   :  { %2889 = vsyncadd [#allocation12], 4294966768 }
 0x122   :  { %2890 = dma.done.wait [#allocation15], 80  }
 0x123   :  { %2891 = vsyncadd [#allocation15], 4294967216 }
 0x124   :  { %2892 = dma.done.wait [#allocation18], 272  }
 0x125   :  { %2893 = vsyncadd [#allocation18], 4294967024 }
 0x126   :  { %2894 = dma.done.wait [#allocation21], 272  }
 0x127   :  { %2895 = vsyncadd [#allocation21], 4294967024 }
 0x128   :  { %2896 = dma.done.wait [#allocation24], 528  }
 0x129   :  { %2897 = vsyncadd [#allocation24], 4294966768 }
 0x12a   :  { %2898 = dma.done.wait [#allocation27], 16  }
 0x12b   :  { %2899 = vsyncadd [#allocation27], 4294967280  ;;  %v2484_v0 = vld [vmem:[#allocation7] sm:$0xff]   ;;  %v2485_v1 = vld [vmem:[#allocation7 + $0x8] sm:$0xff]   ;;  %vm297_vm0 = vcmask 261120   ;;  %s2922_s15 = smov 96  }
 0x12c   :  { %2198 = vmatprep.subr.bf16.mxu1 %v2484_v0  ;;  %v2486_v2 = vld [vmem:[#allocation2] sm:$0xff]   ;;  %v2488_v3 = vld [vmem:[#allocation10] sm:$0xff]   ;;  %v2487_v4 = vld [vmem:[#allocation2 + $0x8] sm:$0xff]   ;;  %vm1089_vm1 = vcmask 1043456   ;;  %vm1076_vm2 = vcmask 31744   ;;  %vm1980_vm3 = vcmask 523264  }
 0x12d   :  { %2199 = vmatpush3.bf16.msra.mxu1 %v2484_v0  ;;  %2202 = vmatprep.mubr.msk.bf16.mxu1 %vm297_vm0, %v2486_v2  ;;  %v2489_v5 = vld [vmem:[#allocation10 + $0x8] sm:$0xff]   ;;  %v2490_v6 = vld [vmem:[#allocation5] sm:$0xff]   ;;  %v445_v8 = vld [vmem:[#allocation13] sm:$0xff]  ;;  %s2923_s1 = smov [#allocation28]  }
 0x12e   :  { %2200 = vmatprep.subr.bf16.mxu1 %v2485_v1  ;;  %v2491_v7 = vld [vmem:[#allocation5 + $0x8] sm:$0xff]   ;;  %v446_v9 = vld [vmem:[#allocation13 + $0x8] sm:$0xff]  ;;  %v462_v10 = vand.u32 4294901760, %v445_v8  ;;  %v2072_v45 = vld [vmem:[#allocation11] ss:$0 sm:$0xff]  ;;  %s2045_s10 = sshll.u32 %s2923_s1, 4  ;;  %s2046_s10 = int_to_ptr.vmem [resolvable:$true] %s2045_s10 }
 0x12f   :  { %v465_v11 = vand.u32 4294901760, %v446_v9  ;;  %v447_v15 = vld [vmem:[#allocation13 + $0x10] sm:$0xff]  ;;  %v448_v16 = vld [vmem:[#allocation13 + $0x18] sm:$0xff]  ;;  %v2065_v44 = vld [vmem:[#allocation8] ss:$0 sm:$0xff]  ;;  %s2860_s29 = scalar_lea.vmem %s2046_s10, 512  ;;  %p2865_p3 = scmp.lt.s32.totalorder %s2046_s10, %s2046_s10 }
 0x130   :  { %v572_v13 = vsub.f32 %v445_v8, %v462_v10  ;;  %v468_v17 = vand.u32 4294901760, %v447_v15  ;;  %v471_v18 = vand.u32 4294901760, %v448_v16  ;;  %p2861_p2 = scmp.ne.s32.totalorder %s2046_s10, %s2860_s29  ;;  %p2866_p4 = scmp.lt.s32.totalorder %s2860_s29, %s2860_s29 }
 0x131   :  { %2201 = vmatpush3.bf16.msra.mxu1 %v2485_v1  ;;  %v3251_v12 = vpack.c.bf16 %v465_v11, %v462_v10  ;;  %v579_v14 = vsub.f32 %v446_v9, %v465_v11 }
 0x132   :  { %2206 = vmatprep.subr.bf16.mxu1 %v2488_v3  ;;  %v573_v19 = vand.u32 4294901760, %v572_v13  ;;  %v3255_v21 = vpack.c.bf16 %v471_v18, %v468_v17  ;;  %v586_v24 = vsub.f32 %v447_v15, %v468_v17  ;;  %v593_v25 = vsub.f32 %v448_v16, %v471_v18  ;;  %p2867_p5 = por %p2866_p4, %p2865_p3 }
 0x133   :  { %2375 = vmatprep.subr.bf16.mxu0 %v3251_v12  ;;  %v580_v20 = vand.u32 4294901760, %v579_v14  ;;  %v3262_v36 = vpack.c.bf16 %v579_v14, %v572_v13 }
 0x134   :  { %2203 = vmatmul.mubr.msk.bf16.vlgmr.msra.gmra.mrb[0].mxu1 %vm297_vm0, %v2487_v4  ;;  %2377 = vmatpush3.bf16.msra.mxu0 %v3251_v12  ;;  %v574_v22 = vsub.f32 %v572_v13, %v573_v19  ;;  %v587_v28 = vand.u32 4294901760, %v586_v24  ;;  %v594_v29 = vand.u32 4294901760, %v593_v25  ;;  %v3264_v37 = vpack.c.bf16 %v593_v25, %v586_v24  ;;  %p2868_p6 = pnand %p2867_p5, %p2861_p2 }
 0x135   :  { %2207 = vmatpush3.bf16.msra.mxu1 %v2488_v3  ;;  %2210 = vmatprep.mubr.msk.bf16.mxu1 %vm297_vm0, %v2490_v6  ;;  %v581_v23 = vsub.f32 %v579_v14, %v580_v20  ;;  %v3266_v38 = vpack.c.bf16 %v580_v20, %v573_v19 }
 0x136   :  { %2208 = vmatprep.subr.bf16.mxu1 %v2489_v5  ;;  %2379 = vmatprep.subr.bf16.mxu0 %v3255_v21  ;;  %v575_v26 = vand.u32 4294901760, %v574_v22  ;;  %v588_v31 = vsub.f32 %v586_v24, %v587_v28  ;;  %v595_v32 = vsub.f32 %v593_v25, %v594_v29  ;;  %v3268_v39 = vpack.c.bf16 %v594_v29, %v587_v28  ;;  %v1075_v24 = vld [vmem:[#allocation14] sm:$0xf] }
 0x137   :  { %v582_v27 = vand.u32 4294901760, %v581_v23  ;;  %v1091_v25 = vsel %vm1089_vm1, %v1075_v24, 0 }
 0x138   :  { %2381 = vmatpush3.bf16.msra.mxu0 %v3255_v21  ;;  %v589_v33 = vand.u32 4294901760, %v588_v31  ;;  %v596_v34 = vand.u32 4294901760, %v595_v32 }
 0x139   :  { %2209 = vmatpush3.bf16.msra.mxu1 %v2489_v5  ;;  %v3259_v30 = vpack.c.bf16 %v582_v27, %v575_v26  ;;  %v3297_v26 = vand.u32 4294901760, %v1091_v25 }
 0x13a   :  { %v2386_v35 = vpack.c.bf16 %v596_v34, %v589_v33 }
 0x13b   :  { %2383 = vmatprep.subr.bf16.mxu0 %v3259_v30  ;;  %2298 = vmatprep.subr.mxu1 %v3297_v26  ;;  %v1201_v27 = vsub.f32 %v1091_v25, %v3297_v26 }
 0x13c   :  { %2211 = vmatmul.mubr.msk.bf16.vlgmr.msra.gmra.mrb[4].mxu1 %vm297_vm0, %v2491_v7 }
 0x13d   :  { %2299 = vmatpush3.msra.mxu1 %v3297_v26 }
 0x207   :  { %v2204_v40 = vpop.f32.mrb[0].mxu1 }
 0x208   :  { %v338_v41 = vpop.f32.mrb[1].mxu1  ;;  %v347_v47 = vadd.f32 %v2204_v40, %v2065_v44 }
 0x209   :  { %v2205_v42 = vpop.f32.mrb[2].mxu1  ;;  %v339_v50 = vadd.f32 %v2065_v44, %v338_v41 }
 0x20a   :  { %v341_v43 = vpop.f32.mrb[3].mxu1  ;;  %v350_v53 = vadd.f32 %v2205_v42, %v2065_v44 }
 0x20b   :  { %v342_v57 = vadd.f32 %v2065_v44, %v341_v43 }
 0x20f   :  { %v2212_v46 = vpop.f32.mrb[4].mxu1 }
 0x210   :  { %v435_v48 = vadd.f32 %v2212_v46, %v2072_v45  ;;  %v426_v49 = vpop.f32.mrb[5].mxu1 }
 0x211   :  { %v427_v51 = vadd.f32 %v2072_v45, %v426_v49  ;;  %v2213_v52 = vpop.f32.mrb[6].mxu1 }
 0x212   :  { %v443_v54 = vmul.f32 %v435_v48, %v347_v47  ;;  %v438_v55 = vadd.f32 %v2213_v52, %v2072_v45  ;;  %1680 = vrot.lane.b32.xlu1 %v435_v48, %s2922_s15  ;;  %v429_v56 = vpop.f32.mrb[7].mxu1 }
 0x213   :  { %v441_v58 = vmul.f32 %v427_v51, %v339_v50  ;;  %v430_v59 = vadd.f32 %v2072_v45, %v429_v56  ;;  %1676 = vrot.lane.b32.xlu0 %v427_v51, %s2922_s15 }
 0x214   :  { %v456_v60 = vsel %vm297_vm0, %v443_v54, 0  ;;  %v444_v61 = vmul.f32 %v438_v55, %v350_v53 }
 0x215   :  { %v3271_v62 = vand.u32 4294901760, %v456_v60  ;;  %v450_v63 = vsel %vm297_vm0, %v441_v58, 0  ;;  %v442_v0 = vmul.f32 %v430_v59, %v342_v57 }
 0x216   :  { %v530_v1 = vand.u32 4294901760, %v450_v63  ;;  %v459_v2 = vsel %vm297_vm0, %v444_v61, 0  ;;  %1682 = vrot.lane.b32.xlu1 %v438_v55, %s2922_s15 }
 0x217   :  { %v551_v3 = vsub.f32 %v456_v60, %v3271_v62  ;;  %v560_v4 = vand.u32 4294901760, %v459_v2  ;;  %v453_v5 = vsel %vm297_vm0, %v442_v0, 0  ;;  %1678 = vrot.lane.b32.xlu0 %v430_v59, %s2922_s15 }
 0x218   :  { %v540_v6 = vand.u32 4294901760, %v453_v5  ;;  %v531_v7 = vsub.f32 %v450_v63, %v530_v1 }
 0x219   :  { %v561_v8 = vsub.f32 %v459_v2, %v560_v4  ;;  %v552_v9 = vand.u32 4294901760, %v551_v3 }
 0x21a   :  { %v541_v10 = vsub.f32 %v453_v5, %v540_v6  ;;  %v532_v11 = vand.u32 4294901760, %v531_v7 }
 0x21b   :  { %v562_v15 = vand.u32 4294901760, %v561_v8  ;;  %v553_v16 = vsub.f32 %v551_v3, %v552_v9 }
 0x21c   :  { %v533_v13 = vsub.f32 %v531_v7, %v532_v11  ;;  %v542_v14 = vand.u32 4294901760, %v541_v10 }
 0x21d   :  { %v563_v20 = vsub.f32 %v561_v8, %v562_v15  ;;  %v554_v22 = vand.u32 4294901760, %v553_v16 }
 0x21e   :  { %v534_v17 = vand.u32 4294901760, %v533_v13  ;;  %v543_v18 = vsub.f32 %v541_v10, %v542_v14 }
 0x21f   :  { %v564_v23 = vand.u32 4294901760, %v563_v20 }
 0x220   :  { %2222 = vmatprep.mubr.f32.mxu0 %v534_v17  ;;  %v544_v19 = vand.u32 4294901760, %v543_v18 }
 0x222   :  { %2223 = vmatmul.mubr.f32.vlgmr.msra.gmra.mrb[0].mxu0 %v544_v19 }
 0x223   :  { %2225 = vmatprep.mubr.f32.mxu0 %v554_v22  ;;  %2385 = vmatpush3.bf16.msra.mxu0 %v3259_v30 }
 0x224   :  { %2387 = vmatprep.subr.bf16.mxu0 %v2386_v35 }
 0x226   :  { %2226 = vmatmul.mubr.f32.gmra.mrb[2].mxu0 %v564_v23 }
 0x227   :  { %2389 = vmatpush3.bf16.msra.mxu0 %v2386_v35  ;;  %2236 = vmatprep.mubr.f32.mxu0 %v530_v1 }
 0x228   :  { %2391 = vmatprep.subr.bf16.mxu0 %v3262_v36 }
 0x22a   :  { %2237 = vmatmul.mubr.f32.vlgmr.msra.gmra.mrb[0].mxu0 %v540_v6 }
 0x22b   :  { %2239 = vmatprep.mubr.f32.mxu0 %v3271_v62  ;;  %2393 = vmatpush3.bf16.msra.mxu0 %v3262_v36 }
 0x22c   :  { %2395 = vmatprep.subr.bf16.mxu0 %v3264_v37 }
 0x22e   :  { %2240 = vmatmul.mubr.f32.gmra.mrb[2].mxu0 %v560_v4 }
 0x22f   :  { %2397 = vmatpush3.bf16.msra.mxu0 %v3264_v37  ;;  %2250 = vmatprep.mubr.f32.mxu0 %v531_v7 }
 0x230   :  { %2399 = vmatprep.subr.bf16.mxu0 %v3251_v12 }
 0x232   :  { %2251 = vmatmul.mubr.f32.vlgmr.msra.gmra.mrb[0].mxu0 %v541_v10 }
 0x233   :  { %2253 = vmatprep.mubr.f32.mxu0 %v551_v3  ;;  %2401 = vmatpush3.bf16.msra.mxu0 %v3251_v12 }
 0x234   :  { %2403 = vmatprep.subr.bf16.mxu0 %v3255_v21 }
 0x236   :  { %2254 = vmatmul.mubr.f32.gmra.mrb[2].mxu0 %v561_v8 }
 0x237   :  { %2405 = vmatpush3.bf16.msra.mxu0 %v3255_v21  ;;  %2264 = vmatprep.mubr.f32.mxu0 %v532_v11 }
 0x238   :  { %2407 = vmatprep.subr.bf16.mxu0 %v3266_v38 }
 0x23a   :  { %2265 = vmatmul.mubr.f32.vlgmr.msra.gmra.mrb[0].mxu0 %v542_v14 }
 0x23b   :  { %2267 = vmatprep.mubr.f32.mxu0 %v552_v9  ;;  %2409 = vmatpush3.bf16.msra.mxu0 %v3266_v38 }
 0x23c   :  { %2411 = vmatprep.subr.bf16.mxu0 %v3268_v39 }
 0x23e   :  { %2268 = vmatmul.mubr.f32.gmra.mrb[2].mxu0 %v562_v15 }
 0x23f   :  { %2413 = vmatpush3.bf16.msra.mxu0 %v3268_v39  ;;  %2278 = vmatprep.mubr.f32.mxu0 %v530_v1 }
 0x240   :  { %2415 = vmatprep.subr.bf16.mxu0 %v3251_v12 }
 0x242   :  { %2279 = vmatmul.mubr.f32.vlgmr.msra.gmra.mrb[0].mxu0 %v540_v6 }
 0x243   :  { %2281 = vmatprep.mubr.f32.mxu0 %v3271_v62  ;;  %2417 = vmatpush3.bf16.msra.mxu0 %v3251_v12  ;;  %v1202_v12 = vand.u32 4294901760, %v1201_v27 }
 0x244   :  { %2419 = vmatprep.subr.bf16.mxu0 %v3255_v21 }
 0x245   :  { %v1203_v28 = vsub.f32 %v1201_v27, %v1202_v12 }
 0x246   :  { %2282 = vmatmul.mubr.f32.gmra.mrb[2].mxu0 %v560_v4 }
 0x247   :  { %2421 = vmatpush3.bf16.msra.mxu0 %v3255_v21  ;;  %2292 = vmatprep.mubr.f32.mxu0 %v530_v1  ;;  %v1204_v29 = vand.u32 4294901760, %v1203_v28 }
 0x249   :  { %2306 = vmatprep.subr.mxu1 %v1204_v29 }
 0x24a   :  { %2293 = vmatmul.mubr.f32.vlgmr.msra.gmra.mrb[0].mxu0 %v540_v6 }
 0x24b   :  { %2295 = vmatprep.mubr.f32.mxu0 %v3271_v62 }
 0x24e   :  { %2296 = vmatmul.mubr.f32.gmra.mrb[2].mxu0 %v560_v4 }
 0x284   :  { %v1681_v63 = vpop.permute.xlu1 %1680 }
 0x285   :  { %v1677_v57 = vpop.permute.xlu0 %1676 }
 0x288   :  { %v1683_v9 = vpop.permute.xlu1 %1682 }
 0x289   :  { %v1679_v61 = vpop.permute.xlu0 %1678 }
 0x31d   :  { %v2294_v21 = vpop.f32.mrb[0].mxu0 }
 0x31e   :  { %v1081_v30 = vsel %vm1076_vm2, %v2294_v21, 0  ;;  %v1053_v31 = vpop.f32.mrb[1].mxu0 }
 0x31f   :  { %v1169_v32 = vand.u32 4294901760, %v1081_v30  ;;  %v1078_v33 = vsel %vm1076_vm2, %v1053_v31, 0 }
 0x320   :  { %v1159_v34 = vand.u32 4294901760, %v1078_v33 }
 0x321   :  { %v1170_v35 = vsub.f32 %v1081_v30, %v1169_v32  ;;  %v2297_v36 = vpop.f32.mrb[2].mxu0 }
 0x322   :  { %v1160_v37 = vsub.f32 %v1078_v33, %v1159_v34  ;;  %v1087_v38 = vsel %vm1076_vm2, %v2297_v36, 0  ;;  %v1065_v39 = vpop.f32.mrb[3].mxu0  ;;  %v2492_v33 = vld [vmem:[#allocation19] sm:$0xff]  }
 0x323   :  { %v1171_v40 = vand.u32 4294901760, %v1170_v35  ;;  %v1189_v41 = vand.u32 4294901760, %v1087_v38  ;;  %v1084_v42 = vsel %vm1076_vm2, %v1065_v39, 0  ;;  %2346 = vmatprep.subr.bf16.mxu0 %v2492_v33 }
 0x324   :  { %v1161_v43 = vand.u32 4294901760, %v1160_v37  ;;  %v1179_v44 = vand.u32 4294901760, %v1084_v42  ;;  %2347 = vmatpush3.bf16.msra.mxu0 %v2492_v33 }
 0x325   :  { %v1172_v45 = vsub.f32 %v1170_v35, %v1171_v40  ;;  %v1190_v46 = vsub.f32 %v1087_v38, %v1189_v41 }
 0x326   :  { %v1180_v47 = vsub.f32 %v1084_v42, %v1179_v44  ;;  %v1162_v48 = vsub.f32 %v1160_v37, %v1161_v43 }
 0x327   :  { %v1191_v49 = vand.u32 4294901760, %v1190_v46  ;;  %v1173_v52 = vand.u32 4294901760, %v1172_v45 }
 0x328   :  { %v1181_v50 = vand.u32 4294901760, %v1180_v47  ;;  %v1163_v51 = vand.u32 4294901760, %v1162_v48  ;;  %v2079_v48 = vld [vmem:[#allocation16] ss:$0 sm:$0xff] }
 0x329   :  { %v1192_v53 = vsub.f32 %v1190_v46, %v1191_v49 }
 0x32a   :  { %2300 = vmatprep.mubr.f32.mxu1 %v1163_v51  ;;  %v1182_v54 = vsub.f32 %v1180_v47, %v1181_v50 }
 0x32b   :  { %2301 = vmatmul.mubr.f32.vlgmr.msra.gmra.mrb[8].mxu1 %v1173_v52  ;;  %v1193_v56 = vand.u32 4294901760, %v1192_v53  ;;  %v2080_v52 = vld [vmem:[#allocation17] ss:$0 sm:$0xff] }
 0x32c   :  { %2307 = vmatpush3.msra.mxu1 %v1204_v29  ;;  %v1183_v55 = vand.u32 4294901760, %v1182_v54 }
 0x32d   :  { %2314 = vmatprep.subr.mxu1 %v1201_v27 }
 0x32e   :  { %2303 = vmatprep.mubr.f32.mxu1 %v1183_v55 }
 0x32f   :  { %2304 = vmatmul.mubr.f32.gmra.mrb[10].mxu1 %v1193_v56 }
 0x330   :  { %2308 = vmatprep.mubr.f32.mxu1 %v1159_v34 }
 0x333   :  { %2309 = vmatmul.mubr.f32.vlgmr.msra.gmra.mrb[8].mxu1 %v1169_v32 }
 0x334   :  { %2311 = vmatprep.mubr.f32.mxu1 %v1179_v44  ;;  %2315 = vmatpush3.msra.mxu1 %v1201_v27 }
 0x335   :  { %2322 = vmatprep.subr.mxu1 %v3297_v26 }
 0x337   :  { %2312 = vmatmul.mubr.f32.gmra.mrb[10].mxu1 %v1189_v41 }
 0x338   :  { %2316 = vmatprep.mubr.f32.mxu1 %v1160_v37 }
 0x33b   :  { %2317 = vmatmul.mubr.f32.vlgmr.msra.gmra.mrb[8].mxu1 %v1170_v35 }
 0x33c   :  { %2319 = vmatprep.mubr.f32.mxu1 %v1180_v47  ;;  %2323 = vmatpush3.msra.mxu1 %v3297_v26 }
 0x33d   :  { %2330 = vmatprep.subr.mxu1 %v1202_v12 }
 0x33f   :  { %2320 = vmatmul.mubr.f32.gmra.mrb[10].mxu1 %v1190_v46 }
 0x340   :  { %2324 = vmatprep.mubr.f32.mxu1 %v1161_v43 }
 0x343   :  { %2325 = vmatmul.mubr.f32.vlgmr.msra.gmra.mrb[8].mxu1 %v1171_v40 }
 0x344   :  { %2327 = vmatprep.mubr.f32.mxu1 %v1181_v50  ;;  %2331 = vmatpush3.msra.mxu1 %v1202_v12 }
 0x345   :  { %2338 = vmatprep.subr.mxu1 %v3297_v26 }
 0x347   :  { %2328 = vmatmul.mubr.f32.gmra.mrb[10].mxu1 %v1191_v49 }
 0x348   :  { %2332 = vmatprep.mubr.f32.mxu1 %v1159_v34 }
 0x34b   :  { %2333 = vmatmul.mubr.f32.vlgmr.msra.gmra.mrb[8].mxu1 %v1169_v32 }
 0x34c   :  { %2335 = vmatprep.mubr.f32.mxu1 %v1179_v44  ;;  %2339 = vmatpush3.msra.mxu1 %v3297_v26 }
 0x34f   :  { %2336 = vmatmul.mubr.f32.gmra.mrb[10].mxu1 %v1189_v41 }
 0x350   :  { %2340 = vmatprep.mubr.f32.mxu1 %v1159_v34  ;;  %v2493_v34 = vld [vmem:[#allocation19 + $0x8] sm:$0xff]  }
 0x351   :  { %2348 = vmatprep.subr.bf16.mxu0 %v2493_v34 }
 0x352   :  { %2349 = vmatpush3.bf16.msra.mxu0 %v2493_v34 }
 0x353   :  { %2341 = vmatmul.mubr.f32.vlgmr.msra.gmra.mrb[8].mxu1 %v1169_v32 }
 0x354   :  { %2343 = vmatprep.mubr.f32.mxu1 %v1179_v44 }
 0x357   :  { %2344 = vmatmul.mubr.f32.gmra.mrb[10].mxu1 %v1189_v41 }
 0x426   :  { %v2342_v58 = vpop.f32.mrb[8].mxu1 }
 0x427   :  { %v1669_v59 = vmul.f32 0.35355338, %v2342_v58  ;;  %v1646_v60 = vpop.f32.mrb[9].mxu1 }
 0x428   :  { %v1668_v62 = vmul.f32 0.35355338, %v1646_v60 }
 0x429   :  { %v1689_v0 = vmul.f32 %v1679_v61, %v1669_v59 }
 0x42a   :  { %v2345_v1 = vpop.f32.mrb[10].mxu1  ;;  %v1688_v2 = vmul.f32 %v1677_v57, %v1668_v62 }
 0x42b   :  { %v1658_v3 = vpop.f32.mrb[11].mxu1  ;;  %v1697_v4 = vsel %vm297_vm0, %v1689_v0, 0.0  ;;  %v1671_v5 = vmul.f32 0.35355338, %v2345_v1 }
 0x42c   :  { %v1670_v6 = vmul.f32 0.35355338, %v1658_v3  ;;  %1698 = vadd.xlane.f32.xlu1 %v1697_v4  ;;  %v1694_v7 = vsel %vm297_vm0, %v1688_v2, 0.0 }
 0x42d   :  { %1695 = vadd.xlane.f32.xlu0 %v1694_v7  ;;  %v1691_v11 = vmul.f32 %v1683_v9, %v1671_v5  ;;  %v2494_v7 = vld [vmem:[#allocation22] sm:$0xff]   ;;  %v2496_v9 = vld [vmem:[#allocation25] sm:$0xff]  }
 0x42e   :  { %v1690_v8 = vmul.f32 %v1681_v63, %v1670_v6  ;;  %2354 = vmatprep.subr.bf16.mxu1 %v2494_v7  ;;  %2362 = vmatprep.subr.bf16.mxu0 %v2496_v9 }
 0x42f   :  { %v1703_v13 = vsel %vm297_vm0, %v1691_v11, 0.0  ;;  %2355 = vmatpush3.bf16.msra.mxu1 %v2494_v7 }
 0x430   :  { %v1700_v10 = vsel %vm297_vm0, %v1690_v8, 0.0 }
 0x431   :  { %1701 = vadd.xlane.f32.xlu0 %v1700_v10  ;;  %v2497_v10 = vld [vmem:[#allocation25 + $0x8] sm:$0xff]  }
 0x435   :  { %1704 = vadd.xlane.f32.xlu0 %v1703_v13 }
 0x4b9   :  { %v1699_v14 = vpop.xlane.xlu1 %1698 }
 0x4ba   :  { %v1708_v15 = vmul.f32 0.03125, %v1699_v14  ;;  %v1696_v16 = vpop.xlane.xlu0 %1695 }
 0x4bb   :  { %v1707_v17 = vmul.f32 0.03125, %v1696_v16 }
 0x4bc   :  { %v1712_v18 = vsub.f32 %v1689_v0, %v1708_v15 }
 0x4bd   :  { %v1711_v19 = vsub.f32 %v1688_v2, %v1707_v17 }
 0x4be   :  { %v1702_v20 = vpop.xlane.xlu0 %1701  ;;  %v1716_v22 = vmul.f32 %v1712_v18, %v1712_v18 }
 0x4bf   :  { %v1709_v23 = vmul.f32 0.03125, %v1702_v20  ;;  %v1715_v24 = vmul.f32 %v1711_v19, %v1711_v19 }
 0x4c0   :  { %v1722_v25 = vsel %vm297_vm0, %v1716_v22, 0.0 }
 0x4c1   :  { %v1713_v26 = vsub.f32 %v1690_v8, %v1709_v23  ;;  %1723 = vadd.xlane.f32.xlu0 %v1722_v25  ;;  %v1719_v27 = vsel %vm297_vm0, %v1715_v24, 0.0  ;;  %v2495_v8 = vld [vmem:[#allocation22 + $0x8] sm:$0xff]  }
 0x4c2   :  { %1720 = vadd.xlane.f32.xlu1 %v1719_v27  ;;  %v1705_v12 = vpop.xlane.xlu0 %1704  ;;  %2356 = vmatprep.subr.bf16.mxu1 %v2495_v8 }
 0x4c3   :  { %v1710_v28 = vmul.f32 0.03125, %v1705_v12  ;;  %v1717_v29 = vmul.f32 %v1713_v26, %v1713_v26  ;;  %2357 = vmatpush3.bf16.msra.mxu1 %v2495_v8  ;;  %v2498_v12 = vld [vmem:[#allocation25 + $0x10] sm:$0xff]  }
 0x4c5   :  { %v1714_v21 = vsub.f32 %v1691_v11, %v1710_v28  ;;  %v1725_v30 = vsel %vm297_vm0, %v1717_v29, 0.0  ;;  %v2081_v11 = vld [vmem:[#allocation20] ss:$0 sm:$0xff]  ;;  %v2499_v28 = vld [vmem:[#allocation25 + $0x18] sm:$0xff]  }
 0x4c6   :  { %1726 = vadd.xlane.f32.xlu1 %v1725_v30  ;;  %v2086_v29 = vld [vmem:[#allocation23] ss:$0 sm:$0xff] }
 0x4c7   :  { %v1718_v31 = vmul.f32 %v1714_v21, %v1714_v21 }
 0x4c9   :  { %v1728_v32 = vsel %vm297_vm0, %v1718_v31, 0.0 }
 0x4ca   :  { %1729 = vadd.xlane.f32.xlu0 %v1728_v32 }
 0x54e   :  { %v1724_v35 = vpop.xlane.xlu0 %1723 }
 0x54f   :  { %v1732_v36 = vmul.f32 0.03125, %v1724_v35  ;;  %v1721_v37 = vpop.xlane.xlu1 %1720 }
 0x550   :  { %v1731_v38 = vmul.f32 0.03125, %v1721_v37 }
 0x551   :  { %v1736_v39 = vadd.f32 1e-05, %v1732_v36 }
 0x552   :  { %v1735_v40 = vadd.f32 1e-05, %v1731_v38 }
 0x553   :  { %2500 = vrsqrt.f32 %v1736_v39  ;;  %v1727_v41 = vpop.xlane.xlu1 %1726 }
 0x554   :  { %2502 = vrsqrt.f32 %v1735_v40  ;;  %v1733_v42 = vmul.f32 0.03125, %v1727_v41 }
 0x556   :  { %v1737_v43 = vadd.f32 1e-05, %v1733_v42 }
 0x557   :  { %v1730_v44 = vpop.xlane.xlu0 %1729 }
 0x558   :  { %2504 = vrsqrt.f32 %v1737_v43  ;;  %v1734_v45 = vmul.f32 0.03125, %v1730_v44  ;;  %v2091_v43 = vld [vmem:[#allocation26] ss:$0 sm:$0xff] }
 0x55a   :  { %v1738_v46 = vadd.f32 1e-05, %v1734_v45 }
 0x55c   :  { %2506 = vrsqrt.f32 %v1738_v46 }
 0x55d   :  { %v2501_v47 = vpop.eup %2500 }
 0x55e   :  { %v2503_v49 = vpop.eup %2502  ;;  %v1744_v50 = vmul.f32 %v2501_v47, %v1712_v18 }
 0x55f   :  { %v1743_v51 = vmul.f32 %v2503_v49, %v1711_v19 }
 0x560   :  { %v1754_v53 = vmul.f32 %v2079_v48, %v1744_v50 }
 0x561   :  { %v1753_v54 = vmul.f32 %v2079_v48, %v1743_v51 }
 0x562   :  { %v2505_v55 = vpop.eup %2504  ;;  %v1764_v56 = vadd.f32 %v2080_v52, %v1754_v53 }
 0x563   :  { %v1745_v57 = vmul.f32 %v2505_v55, %v1713_v26  ;;  %v1763_v58 = vadd.f32 %v2080_v52, %v1753_v54 }
 0x564   :  { %v1768_v59 = vmax.f32 %v1764_v56, 0.0 }
 0x565   :  { %v1755_v60 = vmul.f32 %v2079_v48, %v1745_v57  ;;  %v1767_v61 = vmax.f32 %v1763_v58, 0.0 }
 0x566   :  { %v2507_v62 = vpop.eup %2506 }
 0x567   :  { %v1746_v63 = vmul.f32 %v2507_v62, %v1714_v21  ;;  %v1775_v0 = vpack.c.bf16 %v1768_v59, %v1767_v61  ;;  %v1765_v2 = vadd.f32 %v2080_v52, %v1755_v60 }
 0x569   :  { %v1756_v1 = vmul.f32 %v2079_v48, %v1746_v63  ;;  %2350 = vmatprep.mubr.msk.bf16.mxu0 %vm297_vm0, %v1775_v0  ;;  %v1769_v4 = vmax.f32 %v1765_v2, 0.0 }
 0x56b   :  { %v1766_v3 = vadd.f32 %v2080_v52, %v1756_v1 }
 0x56d   :  { %v1770_v5 = vmax.f32 %v1766_v3, 0.0 }
 0x56f   :  { %v1776_v6 = vpack.c.bf16 %v1770_v5, %v1769_v4 }
 0x571   :  { %2351 = vmatmul.mubr.msk.bf16.vlgmr.msra.gmra.mrb[4].mxu0 %vm297_vm0, %v1776_v6 }
 0x572   :  { %2363 = vmatpush3.bf16.msra.mxu0 %v2496_v9 }
 0x573   :  { %2364 = vmatprep.subr.bf16.mxu0 %v2497_v10 }
 0x576   :  { %2365 = vmatpush3.bf16.msra.mxu0 %v2497_v10 }
 0x577   :  { %2366 = vmatprep.subr.bf16.mxu0 %v2498_v12 }
 0x57a   :  { %2367 = vmatpush3.bf16.msra.mxu0 %v2498_v12 }
 0x57b   :  { %2368 = vmatprep.subr.bf16.mxu0 %v2499_v28 }
 0x57e   :  { %2369 = vmatpush3.bf16.msra.mxu0 %v2499_v28 }
 0x644   :  { %v2352_v13 = vpop.f32.mrb[4].mxu0 }
 0x645   :  { %v1845_v14 = vadd.f32 %v2352_v13, %v2081_v11  ;;  %v1836_v15 = vpop.f32.mrb[5].mxu0 }
 0x646   :  { %v1837_v16 = vadd.f32 %v2081_v11, %v1836_v15  ;;  %v2353_v17 = vpop.f32.mrb[6].mxu0 }
 0x647   :  { %v1848_v18 = vadd.f32 %v2353_v17, %v2081_v11  ;;  %v1839_v19 = vpop.f32.mrb[7].mxu0  ;;  %v1853_v22 = vmax.f32 %v1845_v14, 0.0 }
 0x648   :  { %v1840_v20 = vadd.f32 %v2081_v11, %v1839_v19  ;;  %v1851_v24 = vmax.f32 %v1837_v16, 0.0 }
 0x649   :  { %v1854_v23 = vmax.f32 %v1848_v18, 0.0 }
 0x64a   :  { %v1852_v25 = vmax.f32 %v1840_v20, 0.0 }
 0x64b   :  { %v1860_v26 = vpack.c.bf16 %v1854_v23, %v1853_v22 }
 0x64c   :  { %v1859_v27 = vpack.c.bf16 %v1852_v25, %v1851_v24 }
 0x64e   :  { %2358 = vmatprep.mubr.msk.bf16.mxu1 %vm297_vm0, %v1859_v27 }
 0x64f   :  { %2359 = vmatmul.mubr.msk.bf16.vlgmr.msra.gmra.mrb[12].mxu1 %vm297_vm0, %v1860_v26 }
 0x722   :  { %v2360_v21 = vpop.f32.mrb[12].mxu1 }
 0x723   :  { %v1929_v30 = vadd.f32 %v2360_v21, %v2086_v29  ;;  %v1920_v31 = vpop.f32.mrb[13].mxu1 }
 0x724   :  { %v1921_v32 = vadd.f32 %v2086_v29, %v1920_v31  ;;  %v2361_v33 = vpop.f32.mrb[14].mxu1 }
 0x725   :  { %v1932_v34 = vadd.f32 %v2361_v33, %v2086_v29  ;;  %v1923_v35 = vpop.f32.mrb[15].mxu1  ;;  %v1937_v37 = vmax.f32 %v1929_v30, 0.0 }
 0x726   :  { %v1924_v36 = vadd.f32 %v2086_v29, %v1923_v35  ;;  %v1935_v39 = vmax.f32 %v1921_v32, 0.0 }
 0x727   :  { %v1938_v38 = vmax.f32 %v1932_v34, 0.0 }
 0x728   :  { %v1936_v40 = vmax.f32 %v1924_v36, 0.0 }
 0x729   :  { %v1948_v41 = vpack.c.bf16 %v1938_v38, %v1937_v37 }
 0x72a   :  { %v1947_v42 = vpack.c.bf16 %v1936_v40, %v1935_v39 }
 0x72c   :  { %2370 = vmatprep.mubr.msk.bf16.mxu0 %vm1980_vm3, %v1947_v42 }
 0x72d   :  { %2371 = vmatmul.mubr.msk.bf16.vlgmr.msra.gmra.mrb[8].mxu0 %vm1980_vm3, %v1948_v41 }
 0x800   :  { %v2372_v44 = vpop.f32.mrb[8].mxu0 }
 0x801   :  { %v2030_v45 = vadd.f32 %v2372_v44, %v2091_v43  ;;  %v2021_v46 = vpop.f32.mrb[9].mxu0 }
 0x802   :  { %v2022_v47 = vadd.f32 %v2091_v43, %v2021_v46  ;;  %v2373_v48 = vpop.f32.mrb[10].mxu0 }
 0x803   :  { %2038 = vst [vmem:[#allocation28 + $0x10] sm:$0xff] %v2030_v45  ;;  %v2033_v49 = vadd.f32 %v2373_v48, %v2091_v43  ;;  %v2024_v50 = vpop.f32.mrb[11].mxu0 }
 0x804   :  { %2036 = vst [vmem:[#allocation28] sm:$0xff] %v2022_v47  ;;  %v2025_v51 = vadd.f32 %v2091_v43, %v2024_v50 }
 0x805   :  { %2039 = vst [vmem:[#allocation28 + $0x18] sm:$0xff] %v2033_v49 }
 0x806   :  { %2037 = vst [vmem:[#allocation28 + $0x8] sm:$0xff] %v2025_v51 }
 0x807   :  { %2871 = shalt.err (!%p2868_p6)
}
 0x808   :  { %s2872_s9 = scalar_lea.hbm %s3349_s16, 512 }
 0x809   :  { %p2873_p7 = scmp.ne.s32.totalorder %s3349_s16, %s2872_s9  ;;  %p2876_p8 = scmp.lt.u32.totalorder %s2872_s9, %s3349_s16 }
 0x80b   :  { %p2878_p9 = pnand %p2876_p8, %p2873_p7 }
 0x80d   :  { %2881 = shalt.err (!%p2878_p9)
}
 0x80e   :  { %2051 = dma.vmem_to_hbm [thread:$0]  %s2046_s10, 512, %s3349_s16, [#allocation4], %s2915_s4, %s2915_s4, %s2916_s17  }
 0x80f   :  { %2900 = dma.done.wait [#allocation4], 512  }
 0x810   :  { %2901 = vsyncadd [#allocation4], 4294966784 }
 0x811   :  { %2055 = vsyncpa [#allocation3], 1 }
 0x812   :  { %2056 = vsyncpa [#allocation6], 1 }
 0x813   :  { %2057 = vsyncpa [#allocation9], 1 }
 0x814   :  { %2058 = vsyncpa [#allocation12], 1 }
 0x815   :  { %2059 = vsyncpa [#allocation15], 1 }
 0x816   :  { %2060 = vsyncpa [#allocation18], 1 }
 0x817   :  { %2061 = vsyncpa [#allocation21], 1 }
 0x818   :  { %2062 = vsyncpa [#allocation24], 1 }
 0x819   :  { %2063 = vsyncpa [#allocation27], 1 }
 0x81a   :  { %2064 = vsyncpa [#allocation4], 1 }

// kernel: mutual_forward.7
= control target key start
LH: loop header
LB: loop body
LE: loop exit
PB: predicated region body
PF: predicated region fallthrough
CT: control target
= control target key end

     0   :  { %s2014_s0 = inlined_call_operand.hbm [shape: bf16[32,32], index: 0, kind: input, shape index: {}]   ;;  %s2015_s1 = inlined_call_operand.hbm [shape: bf16[8,32,32], index: 1, kind: input, shape index: {}]   ;;  %s2016_s2 = inlined_call_operand.hbm [shape: bf16[32,768], index: 2, kind: input, shape index: {}]   ;;  %s2017_s3 = inlined_call_operand.hbm [shape: bf16[8,32,768], index: 3, kind: input, shape index: {}]   ;;  %s2018_s4 = inlined_call_operand.hbm [shape: f32[1,768], index: 4, kind: input, shape index: {}]   ;;  %s2019_s5 = inlined_call_operand.hbm [shape: f32[32,768], index: 5, kind: output, shape index: {}]  }
   0x1   :  { %2027 = sst [smem:[#allocation19_spill]] %s2014_s0 }
   0x2   :  { %10 = vsyncpa [#allocation4], 0 }
   0x3   :  { %11 = vsyncpa [#allocation7], 0 }
   0x4   :  { %13 = vsyncpa [#allocation7 + $0x1], 0 }
   0x5   :  { %14 = vsyncpa [#allocation10], 0 }
   0x6   :  { %16 = vsyncpa [#allocation10 + $0x1], 0 }
   0x7   :  { %17 = vsyncpa [#allocation5], 0  ;;  %s1670_s18 = smov 0   ;;  %s1672_s19 = smov 0  }
   0x8   :  { %s1674_s20 = smov 0   ;;  %s1676_s21 = smov 0  }
   0x9   :  { %s1678_s22 = smov 0   ;;  %s1680_s23 = smov 0  }
   0xa LB: > { %s1699_s24 = sadd.s32 4294967295, %s1624_s23   ;;  %s70_s25 = sadd.s32 1, %s1612_s20  ;;  %s1624_s23 = sphi %s1680_s23, %s23_s23   ;;  %s1620_s22 = sphi %s1678_s22, %s2051_s22   ;;  %s1616_s21 = sphi %s1676_s21, %s2050_s21   ;;  %s1612_s20 = sphi %s1674_s20, %s2049_s20   ;;  %s1608_s19 = sphi %s1672_s19, %s2048_s19   ;;  %s1604_s18 = sphi %s1670_s18, %s2047_s18  }
   0xb   : > { %p77_p0 = scmp.ne.s32.totalorder %s1612_s20, %s1608_s19  ;;  %p78_p1 = scmp.eq.s32.totalorder %s1624_s23, 0 }
   0xc   : > { %p83_p2 = scmp.ne.s32.totalorder %s1608_s19, %s1604_s18  ;;  %p2020_p3 = scmp.eq.s32.totalorder %s1699_s24, 0 }
   0xd   : > { %p79_p4 = por %p78_p1, %p77_p0  ;;  %p1166_p5 = scmp.ge.s32.totalorder %s1624_s23, 1 }
   0xe   : > { %p1710_p6 = por %p2020_p3, %p83_p2  ;;  %p188_p7 = scmp.lt.s32.totalorder %s1624_s23, 9 }
   0xf   : > { %s1626_s28 = smov [#allocation8]   ;;  %p1278_p10 = scmp.lt.s32.totalorder %s1624_s23, 8 }
  0x10   : > { %s2028_s26 = scalar_select %p1710_p6, 1, 0 }
  0x11   : > { %p1715_p8 = pnand %p1166_p5, %p188_p7  ;;  %s216_s29 = sshll.u32 %s1626_s28, 4  ;;  %s1719_s29 = int_to_ptr.vmem [resolvable:$true] %s216_s29 }
  0x12   : > { %p1730_p12 = pnand %p1278_p10, %p79_p4  ;;  %s1627_s7 = smov [#allocation11]  }
  0x13   : > { %s2029_s27 = scalar_select %p1715_p8, 1, 0 }
  0x14   : > { %p1258_p9 = pneg %p1715_p8  ;;  %s230_s8 = sshll.u32 %s1627_s7, 4  ;;  %s1734_s8 = int_to_ptr.vmem [resolvable:$true] %s230_s8 }
  0x15   : > { %s2031_s6 = scalar_select %p1730_p12, 1, 0 }
  0x16   : > { %p1726_p11 = pnand %p1258_p9, %p2020_p3  ;;  %s1384_s11 = scalar_lea.hbm %s2016_s2, 1536 }
  0x17   : > { %p1385_p13 = scmp.ne.s32.totalorder %s2016_s2, %s1384_s11  ;;  %p1391_p4 = scmp.lt.u32.totalorder %s1384_s11, %s2016_s2 }
  0x18   : > { %p1744_p0 = pneg %p1726_p11 }
  0x1a   : > { %p1387_p1 = pnand %p1744_p0, %p1385_p13 }
  0x1c   : > { %p1388_p2 = pneg %p1387_p1 }
  0x1e   : > { %p1393_p5 = pnand %p1391_p4, %p1388_p2 }
  0x20   : > { %1396 = shalt.err (!%p1393_p5)
}
  0x21   : > { %s1397_s17 = scalar_lea.vmem %s1719_s29, 1536  ;;  %p1405_p3 = scmp.lt.s32.totalorder %s1719_s29, %s1719_s29 }
  0x22   : > { %p1398_p7 = scmp.ne.s32.totalorder %s1719_s29, %s1397_s17  ;;  %p1406_p6 = scmp.lt.s32.totalorder %s1397_s17, %s1397_s17 }
  0x24   : > { %p1400_p9 = pnand %p1398_p7, %p1744_p0  ;;  %p1407_p13 = por %p1406_p6, %p1405_p3 }
  0x26   : > { %p1401_p10 = pneg %p1400_p9 }
  0x28   : > { %p1408_p1 = pnand %p1407_p13, %p1401_p10 }
  0x2a   : > { %1411 = shalt.err (!%p1408_p1)
}
  0x2b   : > { %s2022_s18 = smov 384   ;;  %s2025_s28 = smov 24  }
  0x2c   : > { %1264 = dma.hbm_to_vmem [thread:$0]  (!%p1726_p11), %s2016_s2, 1536, %s1719_s29, [#allocation7], %s2022_s18, %s2022_s18, %s2025_s28  }
  0x2d   : > { %s1412_s12 = scalar_lea.hbm %s2018_s4, 96 }
  0x2e   : > { %p1413_p3 = scmp.ne.s32.totalorder %s2018_s4, %s1412_s12  ;;  %p1419_p4 = scmp.lt.u32.totalorder %s1412_s12, %s2018_s4 }
  0x30   : > { %p1415_p6 = pnand %p1413_p3, %p1744_p0 }
  0x32   : > { %p1416_p2 = pneg %p1415_p6 }
  0x34   : > { %p1421_p5 = pnand %p1419_p4, %p1416_p2 }
  0x36   : > { %1424 = shalt.err (!%p1421_p5)
}
  0x37   : > { %s1425_s29 = scalar_lea.vmem %s1734_s8, 96  ;;  %p1433_p13 = scmp.lt.s32.totalorder %s1734_s8, %s1734_s8 }
  0x38   : > { %p1426_p7 = scmp.ne.s32.totalorder %s1734_s8, %s1425_s29  ;;  %p1434_p1 = scmp.lt.s32.totalorder %s1425_s29, %s1425_s29 }
  0x3a   : > { %p1428_p9 = pnand %p1426_p7, %p1744_p0  ;;  %p1435_p3 = por %p1434_p1, %p1433_p13 }
  0x3c   : > { %p1429_p10 = pneg %p1428_p9 }
  0x3e   : > { %p1436_p6 = pnand %p1435_p3, %p1429_p10 }
  0x40   : > { %1439 = shalt.err (!%p1436_p6)
}
  0x41   : > { %1267 = dma.hbm_to_vmem [thread:$0]  (!%p1726_p11), %s2018_s4, 96, %s1734_s8, [#allocation10]  }
  0x42   : > { %s1630_s10 = smov [#allocation3]   ;;  %s2033_s0 = sld [smem:[#allocation19_spill]] }
  0x43   : > { %s203_s11 = sshll.u32 %s1630_s10, 4  ;;  %s204_s11 = int_to_ptr.vmem [resolvable:$true] %s203_s11 }
  0x48   : > { %s1440_s15 = scalar_lea.hbm %s2033_s0, 256 }
  0x49   : > { %p1441_p2 = scmp.ne.s32.totalorder %s2033_s0, %s1440_s15  ;;  %p1447_p7 = scmp.lt.u32.totalorder %s1440_s15, %s2033_s0 }
  0x4b   : > { %p1443_p4 = pnand %p1441_p2, %p1744_p0 }
  0x4d   : > { %p1444_p5 = pneg %p1443_p4 }
  0x4f   : > { %p1449_p9 = pnand %p1447_p7, %p1444_p5 }
  0x51   : > { %1452 = shalt.err (!%p1449_p9)
}
  0x52   : > { %s1453_s8 = scalar_lea.vmem %s204_s11, 256  ;;  %p1461_p3 = scmp.lt.s32.totalorder %s204_s11, %s204_s11 }
  0x53   : > { %p1454_p10 = scmp.ne.s32.totalorder %s204_s11, %s1453_s8  ;;  %p1462_p6 = scmp.lt.s32.totalorder %s1453_s8, %s1453_s8 }
  0x55   : > { %p1456_p13 = pnand %p1454_p10, %p1744_p0  ;;  %p1463_p8 = por %p1462_p6, %p1461_p3 }
  0x57   : > { %p1457_p1 = pneg %p1456_p13 }
  0x59   : > { %p1464_p12 = pnand %p1463_p8, %p1457_p1 }
  0x5b   : > { %1467 = shalt.err (!%p1464_p12)
}
  0x5c   : > { %s1631_s7 = smov 64   ;;  %s1632_s18 = smov 4  }
  0x5d   : > { %1261 = dma.hbm_to_vmem [thread:$0]  (!%p1726_p11), %s2033_s0, 256, %s204_s11, [#allocation4], %s1631_s7, %s1631_s7, %s1632_s18  }
  0x5e   : > { %s2026_s10 = sand.u32 1, %s1624_s23   ;;  %s32_s12 = sadd.s32 1, %s1620_s22 }
  0x5f   : > { %s243_s13 = sand.u32 1, %s1612_s20   ;;  %p33_p8 = scmp.ge.s32.totalorder %s32_s12, 8 }
  0x60   : > { %s1171_s15 = sshll.u32 %s243_s13, 4  ;;  %s1226_s16 = sshll.u32 %s1620_s22, 8 }
  0x61   : > { %s2053_s12 = smov (%p33_p8, %s32_s12), 0  ;;  %s1823_s29 = scalar_lea.hbm %s2015_s1, %s1226_s16 }
  0x62   : > { %s245_s11 = scalar_lea.vmem [#allocation6], %s1171_s15  ;;  %s65_s14 = ssub.s32 %s1620_s22, %s2053_s12 }
  0x63   : > { %s254_s8 = sshll.u32 %s245_s11, 4  ;;  %p1829_p11 = scmp.eq.s32.totalorder %s65_s14, 0  ;;  %s1827_s8 = int_to_ptr.vmem [resolvable:$true] %s254_s8 }
  0x64   : > { %s1835_s28 = scalar_lea.sflag [#allocation7], %s2026_s10  ;;  %s1468_s17 = scalar_lea.hbm %s1823_s29, 256 }
  0x65   : > { %p1469_p12 = scmp.ne.s32.totalorder %s1823_s29, %s1468_s17  ;;  %p2035_p0 = scmp.ne.s32.totalorder %s2031_s6, 0 }
  0x66   : > { %s1473_s30 = scalar_lea.hbm %s2015_s1, 2048  ;;  %p1474_p7 = scmp.lt.u32.totalorder %s1823_s29, %s2015_s1 }
  0x67   : > { %p1470_p2 = pneg %p2035_p0  ;;  %p1475_p9 = scmp.lt.u32.totalorder %s1473_s30, %s1468_s17 }
  0x68   : > { %p1477_p13 = scmp.lt.u32.totalorder %s1468_s17, %s1823_s29 }
  0x69   : > { %p1471_p4 = pnand %p1470_p2, %p1469_p12  ;;  %p1476_p10 = por %p1475_p9, %p1474_p7 }
  0x6b   : > { %p1472_p5 = pneg %p1471_p4  ;;  %p1478_p1 = por %p1477_p13, %p1476_p10 }
  0x6d   : > { %p1479_p3 = pnand %p1478_p1, %p1472_p5 }
  0x6f   : > { %1482 = shalt.err (!%p1479_p3)
}
  0x70   : > { %s1483_s10 = scalar_lea.vmem %s1827_s8, 256  ;;  %s1633_s15 = smov [#allocation6]  }
  0x71   : > { %p1484_p6 = scmp.ne.s32.totalorder %s1827_s8, %s1483_s10  ;;  %s1488_s16 = sshll.u32 %s1633_s15, 4  ;;  %s1489_s16 = int_to_ptr.vmem [resolvable:$false] %s1488_s16 }
  0x72   : > { %s1490_s11 = scalar_lea.vmem %s1489_s16, 512  ;;  %p1491_p4 = scmp.lt.s32.totalorder %s1827_s8, %s1489_s16 }
  0x73   : > { %p1486_p8 = pnand %p1484_p6, %p1470_p2  ;;  %p1492_p7 = scmp.lt.s32.totalorder %s1490_s11, %s1483_s10 }
  0x75   : > { %p1487_p12 = pneg %p1486_p8  ;;  %p1493_p9 = por %p1492_p7, %p1491_p4 }
  0x77   : > { %p1494_p10 = pnand %p1493_p9, %p1487_p12 }
  0x79   : > { %1497 = shalt.err (!%p1494_p10)
}
  0x7a   : > { %1271 = dma.hbm_to_vmem [thread:$0]  (!%p2035_p0), %s1823_s29, 256, %s1827_s8, %s1835_s28, %s1631_s7, %s1631_s7, %s1632_s18  }
  0x7b   : > { %s1871_s10 = scalar_select %p1829_p11, %s1612_s20, %s70_s25  }
  0x7c   : > { %s1235_s17 = smul.u32 96, %s243_s13  ;;  %s2036_s28 = sand.u32 1, %s1624_s23  }
  0x7d   : > { %s1236_s30 = smul.u32 1536, %s1620_s22  ;;  %s1885_s7 = scalar_lea.sflag [#allocation10], %s2036_s28 }
  0x7e   : > { %s268_s11 = scalar_lea.vmem [#allocation9], %s1235_s17  ;;  %s1503_s29 = scalar_lea.hbm %s2017_s3, 12288 }
  0x7f   : > { %s1879_s16 = scalar_lea.hbm %s2017_s3, %s1236_s30  ;;  %s275_s0 = sshll.u32 %s268_s11, 4  ;;  %s1881_s0 = int_to_ptr.vmem [resolvable:$true] %s275_s0 }
  0x80   : > { %s1498_s25 = scalar_lea.hbm %s1879_s16, 1536  ;;  %p1504_p1 = scmp.lt.u32.totalorder %s1879_s16, %s2017_s3 }
  0x81   : > { %p1499_p11 = scmp.ne.s32.totalorder %s1879_s16, %s1498_s25  ;;  %p1505_p3 = scmp.lt.u32.totalorder %s1503_s29, %s1498_s25 }
  0x82   : > { %p1507_p8 = scmp.lt.u32.totalorder %s1498_s25, %s1879_s16 }
  0x83   : > { %p1501_p5 = pnand %p1499_p11, %p1470_p2  ;;  %p1506_p6 = por %p1505_p3, %p1504_p1 }
  0x85   : > { %p1502_p13 = pneg %p1501_p5  ;;  %p1508_p12 = por %p1507_p8, %p1506_p6 }
  0x87   : > { %p1509_p4 = pnand %p1508_p12, %p1502_p13 }
  0x89   : > { %1512 = shalt.err (!%p1509_p4)
}
  0x8a   : > { %s1513_s17 = scalar_lea.vmem %s1881_s0, 1536  ;;  %s1634_s30 = smov [#allocation9]  }
  0x8b   : > { %p1514_p7 = scmp.ne.s32.totalorder %s1881_s0, %s1513_s17  ;;  %s1518_s14 = sshll.u32 %s1634_s30, 4  ;;  %s1519_s14 = int_to_ptr.vmem [resolvable:$false] %s1518_s14 }
  0x8c   : > { %s1520_s15 = scalar_lea.vmem %s1519_s14, 3072  ;;  %p1521_p11 = scmp.lt.s32.totalorder %s1881_s0, %s1519_s14 }
  0x8d   : > { %p1516_p9 = pnand %p1514_p7, %p1470_p2  ;;  %p1522_p5 = scmp.lt.s32.totalorder %s1520_s15, %s1513_s17 }
  0x8f   : > { %p1517_p10 = pneg %p1516_p9  ;;  %p1523_p1 = por %p1522_p5, %p1521_p11 }
  0x91   : > { %p1524_p3 = pnand %p1523_p1, %p1517_p10 }
  0x93   : > { %1527 = shalt.err (!%p1524_p3)
}
  0x94   : > { %s2037_s11 = smov 24   ;;  %s2038_s28 = smov 384  }
  0x95   : > { %1274 = dma.hbm_to_vmem [thread:$0]  (!%p2035_p0), %s1879_s16, 1536, %s1881_s0, %s1885_s7, %s2038_s28, %s2038_s28, %s2037_s11  }
  0x96   : > { %p2039_p2 = scmp.ne.s32.totalorder %s2029_s27, 0 }
  0x97   : > { %p2040_p13 = scmp.eq.s32.totalorder (!%p2039_p2), %s1699_s24, 0 }
  0x98   : > { %287 = sbr.rel (%p2039_p2) target bundleno = 698 (0x2ba), region = 40 }
  0x9f   : > { %1579 = dma.done.wait (%p2040_p13), [#allocation4], 256   ;;  %p2041_p6 = pmov %p2040_p13 }
  0xa0   : > { %s293_s6 = sand.u32 1, %s1699_s24   ;;  %s295_s25 = sand.u32 1, %s1608_s19  }
  0xa1   : > { %1581 = vsyncadd (%p2041_p6), [#allocation4], 4294967040  ;;  %s1922_s18 = sshll.u32 %s295_s25, 4  ;;  %s294_s13 = scalar_lea.sflag [#allocation7], %s293_s6 }
  0xa2   : > { %s297_s29 = scalar_lea.vmem [#allocation6], %s1922_s18  ;;  %p2042_p0 = scmp.ne.s32.totalorder %s2028_s26, 0 }
  0xa4   : > { %1583 = dma.done.wait (%p2042_p0), %s294_s13, 256  }
  0xa5   : > { %1585 = vsyncadd (%p2042_p0), %s294_s13, 4294967040  ;;  %p2043_p8 = pmov %p2041_p6 }
  0xa6   : > { %p2044_p12 = pmov %p2041_p6 }
  0xa7   : > { %1587 = dma.done.wait (%p2043_p8), [#allocation7], 1536  }
  0xa8   : > { %1589 = vsyncadd (%p2044_p12), [#allocation7], 4294965760  ;;  %s1237_s0 = smul.u32 96, %s295_s25  ;;  %s307_s27 = scalar_lea.sflag [#allocation10], %s293_s6 }
  0xaa   : > { %s1933_s16 = scalar_lea.vmem [#allocation9], %s1237_s0 }
  0xab   : > { %1591 = dma.done.wait (%p2042_p0), %s307_s27, 1536  }
  0xac   : > { %1593 = vsyncadd (%p2042_p0), %s307_s27, 4294965760  ;;  %p2045_p4 = pmov %p2041_p6 }
  0xae   : > { %1595 = dma.done.wait (%p2045_p4), [#allocation10], 96   ;;  %p2046_p7 = pmov %p2045_p4 }
  0xaf   : > { %p1180_p9 = scmp.ne.s32.totalorder %s1616_s21, 0 }
  0xb0   : > { %1597 = vsyncadd (%p2046_p7), [#allocation10], 4294967200  ;;  %v1344_v0 = vld [vmem:[#allocation8 + $0x4] ss:$24 sps:$4 sm:$0xff] (!%p1180_p9)   ;;  %v1346_v1 = vld [vmem:[#allocation8] ss:$24 sps:$4 sm:$0xff] (!%p1180_p9)   ;;  %v367_v15 = vlaneseq (!%p1180_p9) }
  0xb1   : > { %348 = sbr.rel (%p1180_p9) target bundleno = 420 (0x1a4), region = 64  ;;  %v1635_v2 = vmov (!%p1180_p9), 0   ;;  %474 = vmatprep.subr.bf16.mxu0 (!%p1180_p9), %v1344_v0  ;;  %1227 = vmatprep.subr.bf16.mxu1 (!%p1180_p9), %v1344_v0  ;;  %v1347_v3 = vld [vmem:[#allocation8 + $0x34] ss:$24 sps:$4 sm:$0xff] (!%p1180_p9)   ;;  %v1349_v4 = vld [vmem:[#allocation8 + $0x30] ss:$24 sps:$4 sm:$0xff] (!%p1180_p9)  }
  0xb2   : > { %506 = vmatprep.mubr.bf16.mxu0 (!%p1180_p9), %v1635_v2  ;;  %516 = vmatprep.mubr.bf16.mxu1 (!%p1180_p9), %v1635_v2  ;;  %v1350_v5 = vld [vmem:[#allocation3] sm:$0xff] (!%p1180_p9)   ;;  %v1351_v6 = vld [vmem:[#allocation3 + $0x8] sm:$0xff] (!%p1180_p9)   ;;  %v1352_v7 = vld [vmem:[#allocation8 + $0x8] ss:$24 sps:$4 sm:$0xff] (!%p1180_p9)   ;;  %vm467_vm0 = vcmask (!%p1180_p9), 261120   ;;  %v368_v16 = vshrl.u32 (!%p1180_p9), %v367_v15, 7 }
  0xb3   : > { %475 = vmatpush1.bf16.msra.mxu0 (!%p1180_p9), %v1346_v1  ;;  %1229 = vmatpush1.bf16.msra.mxu1 (!%p1180_p9), %v1346_v1  ;;  %v1354_v8 = vld [vmem:[#allocation8 + $0xc] ss:$24 sps:$4 sm:$0xff] (!%p1180_p9)   ;;  %v1355_v9 = vld [vmem:[#allocation8 + $0x10] ss:$24 sps:$4 sm:$0xff] (!%p1180_p9)   ;;  %v1360_v11 = vld [vmem:[#allocation8 + $0x3c] ss:$24 sps:$4 sm:$0xff] (!%p1180_p9)  }
  0xb4   : > { %476 = vmatprep.subr.bf16.mxu0 (!%p1180_p9), %v1347_v3  ;;  %1228 = vmatprep.subr.bf16.mxu1 (!%p1180_p9), %v1347_v3  ;;  %v1357_v10 = vld [vmem:[#allocation8 + $0x14] ss:$24 sps:$4 sm:$0xff] (!%p1180_p9)   ;;  %v1363_v12 = vld [vmem:[#allocation8 + $0x44] ss:$24 sps:$4 sm:$0xff] (!%p1180_p9)   ;;  %v1358_v13 = vld [vmem:[#allocation8 + $0x38] ss:$24 sps:$4 sm:$0xff] (!%p1180_p9)  }
  0xb5   : > { %v1361_v14 = vld [vmem:[#allocation8 + $0x40] ss:$24 sps:$4 sm:$0xff] (!%p1180_p9)   ;;  %v369_v17 = vsub.s32 (!%p1180_p9), 0, %v368_v16  ;;  %v373_v19 = vsub.s32 (!%p1180_p9), 1, %v368_v16  ;;  %v377_v28 = vsub.s32 (!%p1180_p9), 2, %v368_v16  ;;  %v385_v29 = vsub.s32 (!%p1180_p9), 4, %v368_v16 }
  0xb6   : > { %v365_v18 = vld [vmem:[#allocation11] sm:$0x3f] (!%p1180_p9)  ;;  %v381_v34 = vsub.s32 (!%p1180_p9), 3, %v368_v16  ;;  %v389_v35 = vsub.s32 (!%p1180_p9), 5, %v368_v16 }
  0xb7   : > { %477 = vmatpush1.bf16.msra.mxu0 (!%p1180_p9), %v1349_v4  ;;  %1230 = vmatpush1.bf16.msra.mxu1 (!%p1180_p9), %v1349_v4  ;;  %v370_v20 = vrot.slane (!%p1180_p9), %v365_v18, %v369_v17  ;;  %v374_v21 = vrot.slane (!%p1180_p9), %v365_v18, %v373_v19  ;;  %v378_v42 = vrot.slane (!%p1180_p9), %v365_v18, %v377_v28 }
  0xb8   : > { %527 = vmatprep.subr.bf16.mxu1 %v1354_v8  ;;  %580 = vmatprep.subr.bf16.mxu0 %v1357_v10  ;;  %v386_v43 = vrot.slane %v365_v18, %v385_v29  ;;  %v382_v44 = vrot.slane %v365_v18, %v381_v34  ;;  %v390_v45 = vrot.slane %v365_v18, %v389_v35 }
  0xba   : > { %1195 = vmatmul.mubr.msk.bf16.vlgmr.msra.gmra.mrb[0].mxu0 %vm467_vm0, %v1350_v5  ;;  %1196 = vmatmul.mubr.msk.bf16.vlgmr.msra.gmra.mrb[0].mxu1 %vm467_vm0, %v1351_v6 }
  0xbb   : > { %528 = vmatpush1.bf16.msra.mxu1 %v1352_v7  ;;  %581 = vmatpush1.bf16.msra.mxu0 %v1355_v9 }
  0xbc   : > { %529 = vmatprep.subr.bf16.mxu1 %v1360_v11  ;;  %582 = vmatprep.subr.bf16.mxu0 %v1363_v12 }
  0xbd   : > { %559 = vmatprep.mubr.bf16.mxu1 %v1635_v2  ;;  %612 = vmatprep.mubr.bf16.mxu0 %v1635_v2 }
  0xbf   : > { %530 = vmatpush1.bf16.msra.mxu1 %v1358_v13  ;;  %583 = vmatpush1.bf16.msra.mxu0 %v1361_v14 }
  0xc2   : > { %1197 = vmatmul.mubr.msk.bf16.vlgmr.msra.gmra.mrb[4].mxu1 %vm467_vm0, %v1350_v5  ;;  %1199 = vmatmul.mubr.msk.bf16.vlgmr.msra.gmra.mrb[4].mxu0 %vm467_vm0, %v1350_v5 }
  0xc3   : > { %569 = vmatprep.mubr.bf16.mxu1 %v1635_v2  ;;  %622 = vmatprep.mubr.bf16.mxu0 %v1635_v2 }
  0xca   : > { %1198 = vmatmul.mubr.msk.bf16.gmra.mrb[8].mxu1 %vm467_vm0, %v1351_v6  ;;  %1200 = vmatmul.mubr.msk.bf16.gmra.mrb[8].mxu0 %vm467_vm0, %v1351_v6 }
 0x18d   : > { %v508_v22 = vpop.f32.mrb[0].mxu0  ;;  %v518_v23 = vpop.f32.mrb[0].mxu1 }
 0x18e   : > { %v509_v24 = vadd.f32 %v508_v22, %v370_v20  ;;  %v519_v25 = vadd.f32 %v518_v23, %v370_v20  ;;  %v510_v26 = vpop.f32.mrb[1].mxu0  ;;  %v520_v27 = vpop.f32.mrb[1].mxu1 }
 0x18f   : > { %v511_v30 = vadd.f32 %v510_v26, %v374_v21  ;;  %v521_v31 = vadd.f32 %v520_v27, %v374_v21  ;;  %v512_v32 = vpop.f32.mrb[2].mxu0  ;;  %v522_v33 = vpop.f32.mrb[2].mxu1 }
 0x190   : > { %633 = vst [vmem:[#allocation2] sm:$0xff] %v509_v24  ;;  %645 = vst [vmem:[#allocation2 + $0x60] sm:$0xff] %v519_v25  ;;  %v513_v36 = vadd.f32 %v512_v32, %v370_v20  ;;  %v523_v37 = vadd.f32 %v522_v33, %v370_v20  ;;  %v514_v38 = vpop.f32.mrb[3].mxu0  ;;  %v524_v39 = vpop.f32.mrb[3].mxu1 }
 0x191   : > { %634 = vst [vmem:[#allocation2 + $0x8] sm:$0xff] %v511_v30  ;;  %646 = vst [vmem:[#allocation2 + $0x68] sm:$0xff] %v521_v31  ;;  %v515_v40 = vadd.f32 %v514_v38, %v374_v21  ;;  %v525_v41 = vadd.f32 %v524_v39, %v374_v21 }
 0x192   : > { %639 = vst [vmem:[#allocation2 + $0x30] sm:$0xff] %v513_v36  ;;  %651 = vst [vmem:[#allocation2 + $0x90] sm:$0xff] %v523_v37 }
 0x193   : > { %640 = vst [vmem:[#allocation2 + $0x38] sm:$0xff] %v515_v40  ;;  %652 = vst [vmem:[#allocation2 + $0x98] sm:$0xff] %v525_v41 }
 0x195   : > { %v561_v46 = vpop.f32.mrb[4].mxu1  ;;  %v614_v47 = vpop.f32.mrb[4].mxu0 }
 0x196   : > { %v562_v48 = vadd.f32 %v561_v46, %v378_v42  ;;  %v615_v49 = vadd.f32 %v614_v47, %v386_v43  ;;  %v563_v50 = vpop.f32.mrb[5].mxu1  ;;  %v616_v51 = vpop.f32.mrb[5].mxu0 }
 0x197   : > { %v564_v52 = vadd.f32 %v563_v50, %v382_v44  ;;  %v617_v53 = vadd.f32 %v616_v51, %v390_v45  ;;  %v565_v54 = vpop.f32.mrb[6].mxu1  ;;  %v618_v55 = vpop.f32.mrb[6].mxu0 }
 0x198   : > { %635 = vst [vmem:[#allocation2 + $0x10] sm:$0xff] %v562_v48  ;;  %637 = vst [vmem:[#allocation2 + $0x20] sm:$0xff] %v615_v49  ;;  %v566_v56 = vadd.f32 %v565_v54, %v378_v42  ;;  %v619_v57 = vadd.f32 %v618_v55, %v386_v43  ;;  %v567_v58 = vpop.f32.mrb[7].mxu1  ;;  %v620_v59 = vpop.f32.mrb[7].mxu0 }
 0x199   : > { %636 = vst [vmem:[#allocation2 + $0x18] sm:$0xff] %v564_v52  ;;  %638 = vst [vmem:[#allocation2 + $0x28] sm:$0xff] %v617_v53  ;;  %v568_v60 = vadd.f32 %v567_v58, %v382_v44  ;;  %v621_v61 = vadd.f32 %v620_v59, %v390_v45 }
 0x19a   : > { %641 = vst [vmem:[#allocation2 + $0x40] sm:$0xff] %v566_v56  ;;  %643 = vst [vmem:[#allocation2 + $0x50] sm:$0xff] %v619_v57 }
 0x19b   : > { %642 = vst [vmem:[#allocation2 + $0x48] sm:$0xff] %v568_v60  ;;  %644 = vst [vmem:[#allocation2 + $0x58] sm:$0xff] %v621_v61 }
 0x19d   : > { %v571_v62 = vpop.f32.mrb[8].mxu1  ;;  %v624_v63 = vpop.f32.mrb[8].mxu0 }
 0x19e   : > { %v572_v0 = vadd.f32 %v571_v62, %v378_v42  ;;  %v625_v1 = vadd.f32 %v624_v63, %v386_v43  ;;  %v573_v2 = vpop.f32.mrb[9].mxu1  ;;  %v626_v3 = vpop.f32.mrb[9].mxu0 }
 0x19f   : > { %v574_v4 = vadd.f32 %v573_v2, %v382_v44  ;;  %v627_v5 = vadd.f32 %v626_v3, %v390_v45  ;;  %v575_v6 = vpop.f32.mrb[10].mxu1  ;;  %v628_v7 = vpop.f32.mrb[10].mxu0 }
 0x1a0   : > { %647 = vst [vmem:[#allocation2 + $0x70] sm:$0xff] %v572_v0  ;;  %649 = vst [vmem:[#allocation2 + $0x80] sm:$0xff] %v625_v1  ;;  %v576_v8 = vadd.f32 %v575_v6, %v378_v42  ;;  %v629_v9 = vadd.f32 %v628_v7, %v386_v43  ;;  %v577_v10 = vpop.f32.mrb[11].mxu1  ;;  %v630_v11 = vpop.f32.mrb[11].mxu0 }
 0x1a1   : > { %648 = vst [vmem:[#allocation2 + $0x78] sm:$0xff] %v574_v4  ;;  %650 = vst [vmem:[#allocation2 + $0x88] sm:$0xff] %v627_v5  ;;  %v578_v12 = vadd.f32 %v577_v10, %v382_v44  ;;  %v631_v13 = vadd.f32 %v630_v11, %v390_v45 }
 0x1a2   : > { %653 = vst [vmem:[#allocation2 + $0xa0] sm:$0xff] %v576_v8  ;;  %655 = vst [vmem:[#allocation2 + $0xb0] sm:$0xff] %v629_v9 }
 0x1a3   : > { %654 = vst [vmem:[#allocation2 + $0xa8] sm:$0xff] %v578_v12  ;;  %656 = vst [vmem:[#allocation2 + $0xb8] sm:$0xff] %v631_v13 }
 0x1a4 PF: > { %v1364_v14 = vld [vmem:[%s1933_s16 + $0x4] ss:$24 sps:$4 sm:$0xff]   ;;  %v1366_v15 = vld [vmem:[%s1933_s16] ss:$24 sps:$4 sm:$0xff]   ;;  %v1636_v16 = vmov 0   ;;  %vm767_vm1 = vcmask 261120  }
 0x1a5   : > { %806 = vmatprep.mubr.bf16.mxu0 %v1636_v16  ;;  %816 = vmatprep.mubr.bf16.mxu1 %v1636_v16  ;;  %v1367_v17 = vld [vmem:[%s1933_s16 + $0x34] ss:$24 sps:$4 sm:$0xff]   ;;  %v1369_v18 = vld [vmem:[%s1933_s16 + $0x30] ss:$24 sps:$4 sm:$0xff]   ;;  %v1383_v26 = vld [vmem:[%s1933_s16 + $0x44] ss:$24 sps:$4 sm:$0xff]  }
 0x1a6   : > { %774 = vmatprep.subr.bf16.mxu0 %v1364_v14  ;;  %1231 = vmatprep.subr.bf16.mxu1 %v1364_v14  ;;  %v1370_v19 = vld [vmem:[%s297_s29] sm:$0xff]   ;;  %v1371_v20 = vld [vmem:[%s297_s29 + $0x8] sm:$0xff]   ;;  %p1221_p10 = scmp.ne.s32.totalorder %s1616_s21, 7 }
 0x1a7   : > { %775 = vmatpush1.bf16.msra.mxu0 %v1366_v15  ;;  %1233 = vmatpush1.bf16.msra.mxu1 %v1366_v15  ;;  %v1372_v21 = vld [vmem:[%s1933_s16 + $0x8] ss:$24 sps:$4 sm:$0xff]   ;;  %v1374_v22 = vld [vmem:[%s1933_s16 + $0xc] ss:$24 sps:$4 sm:$0xff]   ;;  %v1380_v25 = vld [vmem:[%s1933_s16 + $0x3c] ss:$24 sps:$4 sm:$0xff]  }
 0x1a8   : > { %776 = vmatprep.subr.bf16.mxu0 %v1367_v17  ;;  %1232 = vmatprep.subr.bf16.mxu1 %v1367_v17  ;;  %v1375_v23 = vld [vmem:[%s1933_s16 + $0x10] ss:$24 sps:$4 sm:$0xff]   ;;  %v1377_v24 = vld [vmem:[%s1933_s16 + $0x14] ss:$24 sps:$4 sm:$0xff]   ;;  %v1381_v28 = vld [vmem:[%s1933_s16 + $0x40] ss:$24 sps:$4 sm:$0xff]  }
 0x1a9   : > { %v1378_v27 = vld [vmem:[%s1933_s16 + $0x38] ss:$24 sps:$4 sm:$0xff]   ;;  %v663_v35 = vld [vmem:[#allocation2 + $0x30] sm:$0xff]  ;;  %v664_v41 = vld [vmem:[#allocation2 + $0x38] sm:$0xff] }
 0x1aa   : > { %v657_v29 = vld [vmem:[#allocation2] sm:$0xff]  ;;  %v658_v31 = vld [vmem:[#allocation2 + $0x8] sm:$0xff]  ;;  %v675_v36 = vld [vmem:[#allocation2 + $0x90] sm:$0xff] }
 0x1ab   : > { %777 = vmatpush1.bf16.msra.mxu0 %v1369_v18  ;;  %1234 = vmatpush1.bf16.msra.mxu1 %v1369_v18  ;;  %v669_v30 = vld [vmem:[#allocation2 + $0x60] sm:$0xff]  ;;  %v670_v32 = vld [vmem:[#allocation2 + $0x68] sm:$0xff]  ;;  %v676_v42 = vld [vmem:[#allocation2 + $0x98] sm:$0xff] }
 0x1ac   : > { %827 = vmatprep.subr.bf16.mxu1 %v1374_v22  ;;  %880 = vmatprep.subr.bf16.mxu0 %v1377_v24  ;;  %v659_v53 = vld [vmem:[#allocation2 + $0x10] sm:$0xff]  ;;  %v661_v54 = vld [vmem:[#allocation2 + $0x20] sm:$0xff]  ;;  %v660_v55 = vld [vmem:[#allocation2 + $0x18] sm:$0xff] }
 0x1ad   : > { %v662_v56 = vld [vmem:[#allocation2 + $0x28] sm:$0xff]  ;;  %v665_v59 = vld [vmem:[#allocation2 + $0x40] sm:$0xff]  ;;  %v667_v60 = vld [vmem:[#allocation2 + $0x50] sm:$0xff] }
 0x1ae   : > { %1215 = vmatmul.mubr.msk.bf16.vlgmr.msra.gmra.mrb[0].mxu0 %vm767_vm1, %v1370_v19  ;;  %1216 = vmatmul.mubr.msk.bf16.vlgmr.msra.gmra.mrb[0].mxu1 %vm767_vm1, %v1371_v20  ;;  %v666_v1 = vld [vmem:[#allocation2 + $0x48] sm:$0xff]  ;;  %v668_v2 = vld [vmem:[#allocation2 + $0x58] sm:$0xff]  ;;  %v671_v13 = vld [vmem:[#allocation2 + $0x70] sm:$0xff] }
 0x1af   : > { %828 = vmatpush1.bf16.msra.mxu1 %v1372_v21  ;;  %881 = vmatpush1.bf16.msra.mxu0 %v1375_v23  ;;  %v673_v14 = vld [vmem:[#allocation2 + $0x80] sm:$0xff]  ;;  %v672_v15 = vld [vmem:[#allocation2 + $0x78] sm:$0xff] }
 0x1b0   : > { %829 = vmatprep.subr.bf16.mxu1 %v1380_v25  ;;  %882 = vmatprep.subr.bf16.mxu0 %v1383_v26  ;;  %v678_v25 = vld [vmem:[#allocation2 + $0xa8] sm:$0xff]  ;;  %v680_v26 = vld [vmem:[#allocation2 + $0xb8] sm:$0xff] }
 0x1b1   : > { %859 = vmatprep.mubr.bf16.mxu1 %v1636_v16  ;;  %912 = vmatprep.mubr.bf16.mxu0 %v1636_v16 }
 0x1b3   : > { %830 = vmatpush1.bf16.msra.mxu1 %v1378_v27  ;;  %883 = vmatpush1.bf16.msra.mxu0 %v1381_v28 }
 0x1b6   : > { %1217 = vmatmul.mubr.msk.bf16.vlgmr.msra.gmra.mrb[4].mxu1 %vm767_vm1, %v1370_v19  ;;  %1219 = vmatmul.mubr.msk.bf16.vlgmr.msra.gmra.mrb[4].mxu0 %vm767_vm1, %v1370_v19  ;;  %v677_v19 = vld [vmem:[#allocation2 + $0xa0] sm:$0xff] }
 0x1b7   : > { %869 = vmatprep.mubr.bf16.mxu1 %v1636_v16  ;;  %922 = vmatprep.mubr.bf16.mxu0 %v1636_v16  ;;  %v674_v16 = vld [vmem:[#allocation2 + $0x88] sm:$0xff] }
 0x1be   : > { %1218 = vmatmul.mubr.msk.bf16.gmra.mrb[8].mxu1 %vm767_vm1, %v1371_v20  ;;  %1220 = vmatmul.mubr.msk.bf16.gmra.mrb[8].mxu0 %vm767_vm1, %v1371_v20  ;;  %v679_v20 = vld [vmem:[#allocation2 + $0xb0] sm:$0xff] }
 0x281   : > { %v808_v33 = vpop.f32.mrb[0].mxu0  ;;  %v818_v34 = vpop.f32.mrb[0].mxu1 }
 0x282   : > { %v933_v37 = vadd.f32 %v808_v33, %v657_v29  ;;  %v945_v38 = vadd.f32 %v818_v34, %v669_v30  ;;  %v810_v39 = vpop.f32.mrb[1].mxu0  ;;  %v820_v40 = vpop.f32.mrb[1].mxu1 }
 0x283   : > { %v934_v43 = vadd.f32 %v810_v39, %v658_v31  ;;  %v946_v44 = vadd.f32 %v820_v40, %v670_v32  ;;  %v812_v45 = vpop.f32.mrb[2].mxu0  ;;  %v822_v46 = vpop.f32.mrb[2].mxu1 }
 0x284   : > { %957 = vst [vmem:[#allocation2] sm:$0xff] %v933_v37  ;;  %969 = vst [vmem:[#allocation2 + $0x60] sm:$0xff] %v945_v38  ;;  %v939_v47 = vadd.f32 %v812_v45, %v663_v35  ;;  %v951_v48 = vadd.f32 %v822_v46, %v675_v36  ;;  %v814_v49 = vpop.f32.mrb[3].mxu0  ;;  %v824_v50 = vpop.f32.mrb[3].mxu1 }
 0x285   : > { %958 = vst [vmem:[#allocation2 + $0x8] sm:$0xff] %v934_v43  ;;  %970 = vst [vmem:[#allocation2 + $0x68] sm:$0xff] %v946_v44  ;;  %v940_v51 = vadd.f32 %v814_v49, %v664_v41  ;;  %v952_v52 = vadd.f32 %v824_v50, %v676_v42 }
 0x286   : > { %963 = vst [vmem:[#allocation2 + $0x30] sm:$0xff] %v939_v47  ;;  %975 = vst [vmem:[#allocation2 + $0x90] sm:$0xff] %v951_v48 }
 0x287   : > { %964 = vst [vmem:[#allocation2 + $0x38] sm:$0xff] %v940_v51  ;;  %976 = vst [vmem:[#allocation2 + $0x98] sm:$0xff] %v952_v52 }
 0x289   : > { %v861_v57 = vpop.f32.mrb[4].mxu1  ;;  %v914_v58 = vpop.f32.mrb[4].mxu0 }
 0x28a   : > { %v935_v61 = vadd.f32 %v861_v57, %v659_v53  ;;  %v937_v62 = vadd.f32 %v914_v58, %v661_v54  ;;  %v863_v63 = vpop.f32.mrb[5].mxu1  ;;  %v916_v0 = vpop.f32.mrb[5].mxu0 }
 0x28b   : > { %v936_v3 = vadd.f32 %v863_v63, %v660_v55  ;;  %v938_v4 = vadd.f32 %v916_v0, %v662_v56  ;;  %v865_v5 = vpop.f32.mrb[6].mxu1  ;;  %v918_v6 = vpop.f32.mrb[6].mxu0  ;;  %v985_v37 = vld [vmem:[#allocation2] sm:$0xff] (!%p1221_p10) }
 0x28c   : > { %959 = vst [vmem:[#allocation2 + $0x10] sm:$0xff] %v935_v61  ;;  %961 = vst [vmem:[#allocation2 + $0x20] sm:$0xff] %v937_v62  ;;  %v941_v7 = vadd.f32 %v865_v5, %v665_v59  ;;  %v943_v8 = vadd.f32 %v918_v6, %v667_v60  ;;  %v867_v9 = vpop.f32.mrb[7].mxu1  ;;  %v920_v10 = vpop.f32.mrb[7].mxu0  ;;  %v986_v38 = vld [vmem:[#allocation2 + $0x8] sm:$0xff] (!%p1221_p10)  ;;  %v997_v49 = vld [vmem:[#allocation2 + $0x60] sm:$0xff] (!%p1221_p10) }
 0x28d   : > { %960 = vst [vmem:[#allocation2 + $0x18] sm:$0xff] %v936_v3  ;;  %962 = vst [vmem:[#allocation2 + $0x28] sm:$0xff] %v938_v4  ;;  %v942_v11 = vadd.f32 %v867_v9, %v666_v1  ;;  %v944_v12 = vadd.f32 %v920_v10, %v668_v2  ;;  %v991_v43 = vld [vmem:[#allocation2 + $0x30] sm:$0xff] (!%p1221_p10)  ;;  %v998_v50 = vld [vmem:[#allocation2 + $0x68] sm:$0xff] (!%p1221_p10) }
 0x28e   : > { %965 = vst [vmem:[#allocation2 + $0x40] sm:$0xff] %v941_v7  ;;  %967 = vst [vmem:[#allocation2 + $0x50] sm:$0xff] %v943_v8  ;;  %v992_v44 = vld [vmem:[#allocation2 + $0x38] sm:$0xff] (!%p1221_p10)  ;;  %v1003_v55 = vld [vmem:[#allocation2 + $0x90] sm:$0xff] (!%p1221_p10) }
 0x28f   : > { %966 = vst [vmem:[#allocation2 + $0x48] sm:$0xff] %v942_v11  ;;  %968 = vst [vmem:[#allocation2 + $0x58] sm:$0xff] %v944_v12  ;;  %v1004_v56 = vld [vmem:[#allocation2 + $0x98] sm:$0xff] (!%p1221_p10) }
 0x290   : > { %1009 = vst [vmem:[#allocation12] sm:$0xff] (!%p1221_p10), %v985_v37  ;;  %1010 = vst [vmem:[#allocation12 + $0x8] sm:$0xff] (!%p1221_p10), %v986_v38 }
 0x291   : > { %v871_v17 = vpop.f32.mrb[8].mxu1  ;;  %v924_v18 = vpop.f32.mrb[8].mxu0  ;;  %984 = sbr.rel (%p1221_p10) target bundleno = 672 (0x2a0), region = 68  ;;  %1015 = vst [vmem:[#allocation12 + $0x30] sm:$0xff] (!%p1221_p10), %v991_v43  ;;  %1016 = vst [vmem:[#allocation12 + $0x38] sm:$0xff] (!%p1221_p10), %v992_v44 }
 0x292   : > { %v947_v21 = vadd.f32 %v871_v17, %v671_v13  ;;  %v949_v22 = vadd.f32 %v924_v18, %v673_v14  ;;  %v873_v23 = vpop.f32.mrb[9].mxu1  ;;  %v926_v24 = vpop.f32.mrb[9].mxu0  ;;  %1021 = vst [vmem:[#allocation12 + $0x60] sm:$0xff] (!%p1221_p10), %v997_v49  ;;  %1022 = vst [vmem:[#allocation12 + $0x68] sm:$0xff] (!%p1221_p10), %v998_v50 }
 0x293   : > { %v948_v27 = vadd.f32 %v873_v23, %v672_v15  ;;  %v950_v28 = vadd.f32 %v926_v24, %v674_v16  ;;  %v875_v29 = vpop.f32.mrb[10].mxu1  ;;  %v928_v30 = vpop.f32.mrb[10].mxu0  ;;  %v987_v39 = vld [vmem:[#allocation2 + $0x10] sm:$0xff] (!%p1221_p10)  ;;  %v989_v41 = vld [vmem:[#allocation2 + $0x20] sm:$0xff] (!%p1221_p10)  ;;  %1027 = vst [vmem:[#allocation12 + $0x90] sm:$0xff] (!%p1221_p10), %v1003_v55  ;;  %1028 = vst [vmem:[#allocation12 + $0x98] sm:$0xff] (!%p1221_p10), %v1004_v56 }
 0x294   : > { %971 = vst [vmem:[#allocation2 + $0x70] sm:$0xff] %v947_v21  ;;  %973 = vst [vmem:[#allocation2 + $0x80] sm:$0xff] %v949_v22  ;;  %v953_v31 = vadd.f32 %v875_v29, %v677_v19  ;;  %v955_v32 = vadd.f32 %v928_v30, %v679_v20  ;;  %v877_v33 = vpop.f32.mrb[11].mxu1  ;;  %v930_v34 = vpop.f32.mrb[11].mxu0  ;;  %v988_v40 = vld [vmem:[#allocation2 + $0x18] sm:$0xff] (!%p1221_p10)  ;;  %v990_v42 = vld [vmem:[#allocation2 + $0x28] sm:$0xff] (!%p1221_p10) }
 0x295   : > { %972 = vst [vmem:[#allocation2 + $0x78] sm:$0xff] %v948_v27  ;;  %974 = vst [vmem:[#allocation2 + $0x88] sm:$0xff] %v950_v28  ;;  %v954_v35 = vadd.f32 %v877_v33, %v678_v25  ;;  %v956_v36 = vadd.f32 %v930_v34, %v680_v26  ;;  %v993_v45 = vld [vmem:[#allocation2 + $0x40] sm:$0xff] (!%p1221_p10)  ;;  %v995_v47 = vld [vmem:[#allocation2 + $0x50] sm:$0xff] (!%p1221_p10) }
 0x296   : > { %977 = vst [vmem:[#allocation2 + $0xa0] sm:$0xff] %v953_v31  ;;  %979 = vst [vmem:[#allocation2 + $0xb0] sm:$0xff] %v955_v32  ;;  %v994_v46 = vld [vmem:[#allocation2 + $0x48] sm:$0xff] (!%p1221_p10)  ;;  %v996_v48 = vld [vmem:[#allocation2 + $0x58] sm:$0xff] (!%p1221_p10) }
 0x297   : > { %978 = vst [vmem:[#allocation2 + $0xa8] sm:$0xff] %v954_v35  ;;  %980 = vst [vmem:[#allocation2 + $0xb8] sm:$0xff] %v956_v36 }
 0x298   : > { %1011 = vst [vmem:[#allocation12 + $0x10] sm:$0xff] %v987_v39  ;;  %1012 = vst [vmem:[#allocation12 + $0x18] sm:$0xff] %v988_v40 }
 0x299   : > { %1013 = vst [vmem:[#allocation12 + $0x20] sm:$0xff] %v989_v41  ;;  %1014 = vst [vmem:[#allocation12 + $0x28] sm:$0xff] %v990_v42 }
 0x29a   : > { %1017 = vst [vmem:[#allocation12 + $0x40] sm:$0xff] %v993_v45  ;;  %1018 = vst [vmem:[#allocation12 + $0x48] sm:$0xff] %v994_v46 }
 0x29b   : > { %1019 = vst [vmem:[#allocation12 + $0x50] sm:$0xff] %v995_v47  ;;  %1020 = vst [vmem:[#allocation12 + $0x58] sm:$0xff] %v996_v48  ;;  %v999_v51 = vld [vmem:[#allocation2 + $0x70] sm:$0xff]  ;;  %v1001_v53 = vld [vmem:[#allocation2 + $0x80] sm:$0xff] }
 0x29c   : > { %1023 = vst [vmem:[#allocation12 + $0x70] sm:$0xff] %v999_v51  ;;  %v1000_v52 = vld [vmem:[#allocation2 + $0x78] sm:$0xff]  ;;  %v1002_v54 = vld [vmem:[#allocation2 + $0x88] sm:$0xff]  ;;  %1025 = vst [vmem:[#allocation12 + $0x80] sm:$0xff] %v1001_v53 }
 0x29d   : > { %1024 = vst [vmem:[#allocation12 + $0x78] sm:$0xff] %v1000_v52  ;;  %1026 = vst [vmem:[#allocation12 + $0x88] sm:$0xff] %v1002_v54  ;;  %v1005_v57 = vld [vmem:[#allocation2 + $0xa0] sm:$0xff]  ;;  %v1007_v59 = vld [vmem:[#allocation2 + $0xb0] sm:$0xff] }
 0x29e   : > { %1029 = vst [vmem:[#allocation12 + $0xa0] sm:$0xff] %v1005_v57  ;;  %v1006_v58 = vld [vmem:[#allocation2 + $0xa8] sm:$0xff]  ;;  %v1008_v60 = vld [vmem:[#allocation2 + $0xb8] sm:$0xff]  ;;  %1031 = vst [vmem:[#allocation12 + $0xb0] sm:$0xff] %v1007_v59 }
 0x29f   : > { %1030 = vst [vmem:[#allocation12 + $0xa8] sm:$0xff] %v1006_v58  ;;  %1032 = vst [vmem:[#allocation12 + $0xb8] sm:$0xff] %v1008_v60 }
 0x2a0 PF: > { %p1282_p11 = scmp.eq.s32.totalorder %s1699_s24, 7  ;;  %s1637_s21 = smov [#allocation12]  }
 0x2a1   : > { %s1043_s26 = sshll.u32 %s1637_s21, 4  ;;  %s1044_s26 = int_to_ptr.vmem [resolvable:$true] %s1043_s26 }
 0x2a2   : > { %s1528_s7 = scalar_lea.vmem %s1044_s26, 3072  ;;  %p1535_p2 = scmp.lt.s32.totalorder %s1044_s26, %s1044_s26 }
 0x2a3   : > { %p1529_p5 = scmp.ne.s32.totalorder %s1044_s26, %s1528_s7  ;;  %p1536_p13 = scmp.lt.s32.totalorder %s1528_s7, %s1528_s7 }
 0x2a5   : > { %p1530_p1 = pnand %p1529_p5, %p1282_p11  ;;  %p1537_p6 = por %p1536_p13, %p1535_p2 }
 0x2a7   : > { %p1531_p3 = pneg %p1530_p1 }
 0x2a9   : > { %p1538_p0 = pnand %p1537_p6, %p1531_p3 }
 0x2ab   : > { %1541 = shalt.err (!%p1538_p0)
}
 0x2ac   : > { %s1542_s17 = scalar_lea.hbm %s2019_s5, 3072 }
 0x2ad   : > { %p1543_p8 = scmp.ne.s32.totalorder %s2019_s5, %s1542_s17  ;;  %p1548_p7 = scmp.lt.u32.totalorder %s1542_s17, %s2019_s5 }
 0x2af   : > { %p1544_p12 = pnand %p1543_p8, %p1282_p11 }
 0x2b1   : > { %p1545_p4 = pneg %p1544_p12 }
 0x2b3   : > { %p1550_p9 = pnand %p1548_p7, %p1545_p4 }
 0x2b5   : > { %1553 = shalt.err (!%p1550_p9)
}
 0x2b6   : > { %s1638_s28 = smov 768   ;;  %s1639_s6 = smov 48  }
 0x2b7   : > { %1255 = dma.vmem_to_hbm [thread:$0]  (%p1282_p11), %s1044_s26, 3072, %s2019_s5, [#allocation5], %s1638_s28, %s1638_s28, %s1639_s6  }
 0x2b8   : > { %1599 = dma.done.wait (%p1282_p11), [#allocation5], 3072  }
 0x2b9   : > { %1601 = vsyncadd (%p1282_p11), [#allocation5], 4294964224 }
 0x2ba PF: > { %s23_s23 = sadd.s32 1, %s1624_s23   ;;  %s2047_s18 = smov %s1608_s19 }
 0x2bb   : > { %p20_p10 = scmp.ge.s32.totalorder %s23_s23, 10   ;;  %s2048_s19 = smov %s1612_s20 }
 0x2bc   : > { %s2049_s20 = smov %s1871_s10  ;;  %s2050_s21 = smov %s1620_s22 }
 0x2bd   : > { %s2051_s22 = smov %s2053_s12  ;;  %22 = sbr.rel (!%p20_p10) target bundleno = 10 (0xa), region = 113 }
 0x2c4   :  { %1059 = vsyncpa [#allocation4], 1 }
 0x2c5   :  { %1061 = vsyncpa [#allocation4 + $0x1], 1 }
 0x2c6   :  { %1062 = vsyncpa [#allocation7], 1 }
 0x2c7   :  { %1064 = vsyncpa [#allocation7 + $0x1], 1 }
 0x2c8   :  { %1065 = vsyncpa [#allocation10], 1 }
 0x2c9   :  { %1067 = vsyncpa [#allocation10 + $0x1], 1 }
 0x2ca   :  { %1068 = vsyncpa [#allocation5], 1 }
 0x2cb   :  { %1070 = vsyncpa [#allocation5 + $0x1], 1 }

// kernel: mutual_forward.5
= control target key start
LH: loop header
LB: loop body
LE: loop exit
PB: predicated region body
PF: predicated region fallthrough
CT: control target
= control target key end

     0   :  { %s5251_s0 = inlined_call_operand.hbm [shape: f32[2,4,32], index: 0, kind: input, shape index: {}]   ;;  %s5252_s1 = inlined_call_operand.hbm [shape: bf16[32,96], index: 1, kind: input, shape index: {}]   ;;  %s5253_s2 = inlined_call_operand.hbm [shape: f32[1,96], index: 2, kind: input, shape index: {}]   ;;  %s5254_s3 = inlined_call_operand.hbm [shape: bf16[32,32], index: 3, kind: input, shape index: {}]   ;;  %s5255_s4 = inlined_call_operand.hbm [shape: f32[1,32], index: 4, kind: input, shape index: {}]   ;;  %s5256_s5 = inlined_call_operand.hbm [shape: bf16[32,2048], index: 5, kind: input, shape index: {}]   ;;  %s5257_s6 = inlined_call_operand.hbm [shape: f32[1,2048], index: 6, kind: input, shape index: {}]   ;;  %s5258_s7 = inlined_call_operand.hbm [shape: bf16[2048,32], index: 7, kind: input, shape index: {}]   ;;  %s5259_s8 = inlined_call_operand.hbm [shape: f32[1,32], index: 8, kind: input, shape index: {}]   ;;  %s5260_s9 = inlined_call_operand.hbm [shape: f32[1,32], index: 9, kind: input, shape index: {}]   ;;  %s5261_s10 = inlined_call_operand.hbm [shape: f32[1,32], index: 10, kind: input, shape index: {}]   ;;  %s5262_s11 = inlined_call_operand.hbm [shape: f32[1,32], index: 11, kind: input, shape index: {}]   ;;  %s5263_s12 = inlined_call_operand.hbm [shape: f32[1,32], index: 12, kind: input, shape index: {}]   ;;  %s5264_s13 = inlined_call_operand.hbm [shape: f32[2,4,32], index: 13, kind: output, shape index: {}]  }
   0x1   :  { %5275 = sst [smem:[#allocation35_spill]] %s5251_s0 }
   0x2   :  { %5276 = sst [smem:[#allocation36_spill]] %s5252_s1 }
   0x3   :  { %5277 = sst [smem:[#allocation37_spill]] %s5253_s2 }
   0x4   :  { %5278 = sst [smem:[#allocation38_spill]] %s5264_s13 }
   0x5   :  { %18 = vsyncpa [#allocation3], 0 }
   0x6   :  { %20 = vsyncpa [#allocation3 + $0x1], 0 }
   0x7   :  { %21 = vsyncpa [#allocation6], 0 }
   0x8   :  { %22 = vsyncpa [#allocation9], 0 }
   0x9   :  { %23 = vsyncpa [#allocation12], 0 }
   0xa   :  { %24 = vsyncpa [#allocation15], 0 }
   0xb   :  { %25 = vsyncpa [#allocation18], 0 }
   0xc   :  { %26 = vsyncpa [#allocation21], 0 }
   0xd   :  { %27 = vsyncpa [#allocation4], 0 }
   0xe   :  { %29 = vsyncpa [#allocation4 + $0x1], 0  ;;  %s4625_s25 = smov 0   ;;  %s4627_s26 = smov 0  }
   0xf   :  { %s4629_s27 = smov 0   ;;  %s4631_s28 = smov 0  }
  0x10 LB: > { %5279 = sst [smem:[#allocation32_spill]] %s4515_s25  ;;  %s4529_s29 = smov [#allocation5]   ;;  %s4527_s28 = sphi %s4631_s28, %s5320_s28   ;;  %s4523_s27 = sphi %s4629_s27, %s5319_s27   ;;  %s4519_s26 = sphi %s4627_s26, %s5318_s26   ;;  %s4515_s25 = sphi %s4625_s25, %s5317_s25  }
  0x11   : > { %s356_s30 = sshll.u32 %s4529_s29, 4  ;;  %s4646_s14 = sadd.s32 4294967295, %s4527_s28   ;;  %s4651_s30 = int_to_ptr.vmem [resolvable:$true] %s356_s30 }
  0x12   : > { %5280 = sst [smem:[#allocation33_spill]] %s4646_s14  ;;  %p3298_p0 = scmp.ge.s32.totalorder %s4527_s28, 1 }
  0x13   : > { %p5272_p1 = scmp.eq.s32.totalorder %s4646_s14, 0  ;;  %p344_p2 = scmp.lt.s32.totalorder %s4527_s28, 3 }
  0x14   : > { %s4530_s16 = smov [#allocation8]   ;;  %s4531_s19 = smov [#allocation11]  }
  0x15   : > { %p4653_p3 = pnand %p3298_p0, %p344_p2  ;;  %s380_s17 = sshll.u32 %s4530_s16, 4  ;;  %s4666_s17 = int_to_ptr.vmem [resolvable:$true] %s380_s17 }
  0x16   : > { %s404_s20 = sshll.u32 %s4531_s19, 4  ;;  %s5284_s1 = sld [smem:[#allocation36_spill]]  ;;  %s4668_s20 = int_to_ptr.vmem [resolvable:$true] %s404_s20 }
  0x17   : > { %s5281_s15 = scalar_select %p4653_p3, 1, 0 }
  0x18   : > { %p3800_p5 = pneg %p4653_p3 }
  0x19   : > { %5282 = sst [smem:[#allocation34_spill]] %s5281_s15 }
  0x1a   : > { %p4662_p6 = pnand %p3800_p5, %p5272_p1 }
  0x1c   : > { %s4071_s23 = scalar_lea.hbm %s5284_s1, 256  ;;  %p4678_p8 = pneg %p4662_p6 }
  0x1d   : > { %p4072_p7 = scmp.ne.s32.totalorder %s5284_s1, %s4071_s23  ;;  %p4078_p11 = scmp.lt.u32.totalorder %s4071_s23, %s5284_s1 }
  0x1f   : > { %p4074_p9 = pnand %p4678_p8, %p4072_p7 }
  0x21   : > { %p4075_p10 = pneg %p4074_p9 }
  0x23   : > { %p4080_p12 = pnand %p4078_p11, %p4075_p10 }
  0x25   : > { %4083 = shalt.err (!%p4080_p12)
}
  0x26   : > { %s4084_s21 = scalar_lea.vmem %s4651_s30, 256  ;;  %p4092_p5 = scmp.lt.s32.totalorder %s4651_s30, %s4651_s30 }
  0x27   : > { %p4085_p13 = scmp.ne.s32.totalorder %s4651_s30, %s4084_s21  ;;  %p4093_p4 = scmp.lt.s32.totalorder %s4084_s21, %s4084_s21 }
  0x29   : > { %p4087_p0 = pnand %p4085_p13, %p4678_p8  ;;  %p4094_p7 = por %p4093_p4, %p4092_p5 }
  0x2b   : > { %p4088_p2 = pneg %p4087_p0 }
  0x2d   : > { %p4095_p9 = pnand %p4094_p7, %p4088_p2 }
  0x2f   : > { %4098 = shalt.err (!%p4095_p9)
}
  0x30   : > { %s4532_s22 = smov 64   ;;  %s5271_s13 = smov 4  }
  0x31   : > { %3803 = dma.hbm_to_vmem [thread:$0]  (!%p4662_p6), %s5284_s1, 256, %s4651_s30, [#allocation6], %s4532_s22, %s4532_s22, %s5271_s13  }
  0x32   : > { %s4099_s21 = scalar_lea.hbm %s5254_s3, 256 }
  0x33   : > { %p4100_p4 = scmp.ne.s32.totalorder %s5254_s3, %s4099_s21  ;;  %p4106_p12 = scmp.lt.u32.totalorder %s4099_s21, %s5254_s3 }
  0x35   : > { %p4102_p10 = pnand %p4100_p4, %p4678_p8 }
  0x37   : > { %p4103_p11 = pneg %p4102_p10 }
  0x39   : > { %p4108_p13 = pnand %p4106_p12, %p4103_p11 }
  0x3b   : > { %4111 = shalt.err (!%p4108_p13)
}
  0x3c   : > { %s4112_s30 = scalar_lea.vmem %s4666_s17, 256  ;;  %p4120_p7 = scmp.lt.s32.totalorder %s4666_s17, %s4666_s17 }
  0x3d   : > { %p4113_p0 = scmp.ne.s32.totalorder %s4666_s17, %s4112_s30  ;;  %p4121_p9 = scmp.lt.s32.totalorder %s4112_s30, %s4112_s30 }
  0x3f   : > { %p4115_p2 = pnand %p4113_p0, %p4678_p8  ;;  %p4122_p4 = por %p4121_p9, %p4120_p7 }
  0x41   : > { %p4116_p5 = pneg %p4115_p2 }
  0x43   : > { %p4123_p10 = pnand %p4122_p4, %p4116_p5 }
  0x45   : > { %4126 = shalt.err (!%p4123_p10)
}
  0x46   : > { %3809 = dma.hbm_to_vmem [thread:$0]  (!%p4662_p6), %s5254_s3, 256, %s4666_s17, [#allocation9], %s4532_s22, %s4532_s22, %s5271_s13  }
  0x47   : > { %s4127_s23 = scalar_lea.hbm %s5256_s5, 4096 }
  0x48   : > { %p4128_p11 = scmp.ne.s32.totalorder %s5256_s5, %s4127_s23  ;;  %p4134_p0 = scmp.lt.u32.totalorder %s4127_s23, %s5256_s5 }
  0x4a   : > { %p4130_p12 = pnand %p4128_p11, %p4678_p8 }
  0x4c   : > { %p4131_p13 = pneg %p4130_p12 }
  0x4e   : > { %p4136_p2 = pnand %p4134_p0, %p4131_p13 }
  0x50   : > { %4139 = shalt.err (!%p4136_p2)
}
  0x51   : > { %s4140_s17 = scalar_lea.vmem %s4668_s20, 4096  ;;  %p4148_p4 = scmp.lt.s32.totalorder %s4668_s20, %s4668_s20 }
  0x52   : > { %p4141_p5 = scmp.ne.s32.totalorder %s4668_s20, %s4140_s17  ;;  %p4149_p10 = scmp.lt.s32.totalorder %s4140_s17, %s4140_s17 }
  0x54   : > { %p4143_p7 = pnand %p4141_p5, %p4678_p8  ;;  %p4150_p11 = por %p4149_p10, %p4148_p4 }
  0x56   : > { %p4144_p9 = pneg %p4143_p7 }
  0x58   : > { %p4151_p12 = pnand %p4150_p11, %p4144_p9 }
  0x5a   : > { %4154 = shalt.err (!%p4151_p12)
}
  0x5b   : > { %s4534_s30 = smov 1024   ;;  %s4535_s14 = smov [#allocation14]  }
  0x5c   : > { %3815 = dma.hbm_to_vmem [thread:$0]  (!%p4662_p6), %s5256_s5, 4096, %s4668_s20, [#allocation12], %s4534_s30, %s4534_s30, %s4532_s22  }
  0x5d   : > { %s428_s15 = sshll.u32 %s4535_s14, 4  ;;  %s4536_s23 = smov [#allocation17]   ;;  %s429_s15 = int_to_ptr.vmem [resolvable:$true] %s428_s15 }
  0x5e   : > { %s453_s24 = sshll.u32 %s4536_s23, 4  ;;  %s4155_s21 = scalar_lea.hbm %s5258_s7, 16384  ;;  %s4752_s24 = int_to_ptr.vmem [resolvable:$true] %s453_s24 }
  0x5f   : > { %p4156_p13 = scmp.ne.s32.totalorder %s5258_s7, %s4155_s21  ;;  %p4162_p5 = scmp.lt.u32.totalorder %s4155_s21, %s5258_s7 }
  0x61   : > { %p4158_p0 = pnand %p4156_p13, %p4678_p8 }
  0x63   : > { %p4159_p2 = pneg %p4158_p0 }
  0x65   : > { %p4164_p7 = pnand %p4162_p5, %p4159_p2 }
  0x67   : > { %4167 = shalt.err (!%p4164_p7)
}
  0x68   : > { %s4168_s30 = scalar_lea.vmem %s429_s15, 16384  ;;  %p4176_p11 = scmp.lt.s32.totalorder %s429_s15, %s429_s15 }
  0x69   : > { %p4169_p9 = scmp.ne.s32.totalorder %s429_s15, %s4168_s30  ;;  %p4177_p12 = scmp.lt.s32.totalorder %s4168_s30, %s4168_s30 }
  0x6b   : > { %p4171_p4 = pnand %p4169_p9, %p4678_p8  ;;  %p4178_p1 = por %p4177_p12, %p4176_p11 }
  0x6d   : > { %p4172_p10 = pneg %p4171_p4 }
  0x6f   : > { %p4179_p3 = pnand %p4178_p1, %p4172_p10 }
  0x71   : > { %4182 = shalt.err (!%p4179_p3)
}
  0x72   : > { %s5286_s13 = smov 4   ;;  %s4183_s19 = scalar_lea.hbm %s5260_s9, 16 }
  0x73   : > { %3821 = dma.hbm_to_vmem [thread:$0]  (!%p4662_p6), %s5258_s7, 16384, %s429_s15, [#allocation15], %s4532_s22, %s4532_s22, %s5286_s13  }
  0x74   : > { %p4184_p13 = scmp.ne.s32.totalorder %s5260_s9, %s4183_s19  ;;  %p4190_p0 = scmp.lt.u32.totalorder %s4183_s19, %s5260_s9 }
  0x76   : > { %p4186_p1 = pnand %p4184_p13, %p4678_p8 }
  0x78   : > { %p4187_p3 = pneg %p4186_p1 }
  0x7a   : > { %p4192_p2 = pnand %p4190_p0, %p4187_p3 }
  0x7c   : > { %4195 = shalt.err (!%p4192_p2)
}
  0x7d   : > { %s4196_s22 = scalar_lea.vmem %s4752_s24, 16  ;;  %s4203_s15 = scalar_lea.vmem %s4752_s24, 32 }
  0x7e   : > { %p4197_p5 = scmp.ne.s32.totalorder %s4752_s24, %s4196_s22  ;;  %p4204_p4 = scmp.lt.s32.totalorder %s4752_s24, %s4752_s24 }
  0x7f   : > { %p4205_p10 = scmp.lt.s32.totalorder %s4203_s15, %s4196_s22 }
  0x80   : > { %p4199_p7 = pnand %p4197_p5, %p4678_p8 }
  0x81   : > { %p4206_p11 = por %p4205_p10, %p4204_p4 }
  0x82   : > { %p4200_p9 = pneg %p4199_p7 }
  0x84   : > { %p4207_p12 = pnand %p4206_p11, %p4200_p9 }
  0x86   : > { %4210 = shalt.err (!%p4207_p12)
}
  0x87   : > { %3827 = dma.hbm_to_vmem [thread:$0]  (!%p4662_p6), %s5260_s9, 16, %s4752_s24, [#allocation18]  }
  0x88   : > { %s4537_s25 = smov [#allocation20]   ;;  %s4538_s23 = smov [#allocation7]  }
  0x89   : > { %s475_s14 = sshll.u32 %s4537_s25, 4  ;;  %s370_s29 = sshll.u32 %s4538_s23, 4  ;;  %s476_s14 = int_to_ptr.vmem [resolvable:$true] %s475_s14  ;;  %s4799_s29 = int_to_ptr.vmem [resolvable:$true] %s370_s29 }
  0x8a   : > { %s4211_s17 = scalar_lea.hbm %s5262_s11, 16 }
  0x8b   : > { %p4212_p13 = scmp.ne.s32.totalorder %s5262_s11, %s4211_s17  ;;  %p4218_p0 = scmp.lt.u32.totalorder %s4211_s17, %s5262_s11 }
  0x8d   : > { %p4214_p1 = pnand %p4212_p13, %p4678_p8 }
  0x8f   : > { %p4215_p3 = pneg %p4214_p1 }
  0x91   : > { %p4220_p2 = pnand %p4218_p0, %p4215_p3 }
  0x93   : > { %4223 = shalt.err (!%p4220_p2)
}
  0x94   : > { %s4224_s15 = scalar_lea.vmem %s476_s14, 16  ;;  %s4231_s30 = scalar_lea.vmem %s476_s14, 32 }
  0x95   : > { %p4225_p5 = scmp.ne.s32.totalorder %s476_s14, %s4224_s15  ;;  %p4232_p4 = scmp.lt.s32.totalorder %s476_s14, %s476_s14 }
  0x96   : > { %p4233_p10 = scmp.lt.s32.totalorder %s4231_s30, %s4224_s15 }
  0x97   : > { %p4227_p7 = pnand %p4225_p5, %p4678_p8 }
  0x98   : > { %p4234_p11 = por %p4233_p10, %p4232_p4 }
  0x99   : > { %p4228_p9 = pneg %p4227_p7 }
  0x9b   : > { %p4235_p12 = pnand %p4234_p11, %p4228_p9 }
  0x9d   : > { %4238 = shalt.err (!%p4235_p12)
}
  0x9e   : > { %3833 = dma.hbm_to_vmem [thread:$0]  (!%p4662_p6), %s5262_s11, 16, %s476_s14, [#allocation21]  }
  0x9f   : > { %s5287_s2 = sld [smem:[#allocation37_spill]] }
  0xa5   : > { %s4239_s21 = scalar_lea.hbm %s5287_s2, 16 }
  0xa6   : > { %p4240_p13 = scmp.ne.s32.totalorder %s5287_s2, %s4239_s21  ;;  %p4246_p0 = scmp.lt.u32.totalorder %s4239_s21, %s5287_s2 }
  0xa8   : > { %p4242_p1 = pnand %p4240_p13, %p4678_p8 }
  0xaa   : > { %p4243_p3 = pneg %p4242_p1 }
  0xac   : > { %p4248_p2 = pnand %p4246_p0, %p4243_p3 }
  0xae   : > { %4251 = shalt.err (!%p4248_p2)
}
  0xaf   : > { %s4252_s14 = scalar_lea.vmem %s4799_s29, 16  ;;  %s4259_s24 = scalar_lea.vmem %s4799_s29, 32 }
  0xb0   : > { %p4253_p5 = scmp.ne.s32.totalorder %s4799_s29, %s4252_s14  ;;  %p4260_p4 = scmp.lt.s32.totalorder %s4799_s29, %s4799_s29 }
  0xb1   : > { %p4261_p10 = scmp.lt.s32.totalorder %s4259_s24, %s4252_s14 }
  0xb2   : > { %p4255_p7 = pnand %p4253_p5, %p4678_p8 }
  0xb3   : > { %p4262_p11 = por %p4261_p10, %p4260_p4 }
  0xb4   : > { %p4256_p9 = pneg %p4255_p7 }
  0xb6   : > { %p4263_p12 = pnand %p4262_p11, %p4256_p9 }
  0xb8   : > { %4266 = shalt.err (!%p4263_p12)
}
  0xb9   : > { %3806 = dma.hbm_to_vmem [thread:$0]  (!%p4662_p6), %s5287_s2, 16, %s4799_s29, [#allocation6]  }
  0xba   : > { %s4539_s13 = smov [#allocation10]   ;;  %s4540_s23 = smov [#allocation13]  }
  0xbb   : > { %s394_s25 = sshll.u32 %s4539_s13, 4  ;;  %s418_s19 = sshll.u32 %s4540_s23, 4  ;;  %s395_s25 = int_to_ptr.vmem [resolvable:$true] %s394_s25  ;;  %s4843_s19 = int_to_ptr.vmem [resolvable:$true] %s418_s19 }
  0xbc   : > { %s4267_s0 = scalar_lea.hbm %s5255_s4, 16 }
  0xbd   : > { %p4268_p13 = scmp.ne.s32.totalorder %s5255_s4, %s4267_s0  ;;  %p4274_p0 = scmp.lt.u32.totalorder %s4267_s0, %s5255_s4 }
  0xbf   : > { %p4270_p1 = pnand %p4268_p13, %p4678_p8 }
  0xc1   : > { %p4271_p3 = pneg %p4270_p1 }
  0xc3   : > { %p4276_p2 = pnand %p4274_p0, %p4271_p3 }
  0xc5   : > { %4279 = shalt.err (!%p4276_p2)
}
  0xc6   : > { %s4280_s24 = scalar_lea.vmem %s395_s25, 16  ;;  %s4287_s15 = scalar_lea.vmem %s395_s25, 32 }
  0xc7   : > { %p4281_p5 = scmp.ne.s32.totalorder %s395_s25, %s4280_s24  ;;  %p4288_p4 = scmp.lt.s32.totalorder %s395_s25, %s395_s25 }
  0xc8   : > { %p4289_p10 = scmp.lt.s32.totalorder %s4287_s15, %s4280_s24 }
  0xc9   : > { %p4283_p7 = pnand %p4281_p5, %p4678_p8 }
  0xca   : > { %p4290_p11 = por %p4289_p10, %p4288_p4 }
  0xcb   : > { %p4284_p9 = pneg %p4283_p7 }
  0xcd   : > { %p4291_p12 = pnand %p4290_p11, %p4284_p9 }
  0xcf   : > { %4294 = shalt.err (!%p4291_p12)
}
  0xd0   : > { %3812 = dma.hbm_to_vmem [thread:$0]  (!%p4662_p6), %s5255_s4, 16, %s395_s25, [#allocation9]  }
  0xd1   : > { %s4295_s17 = scalar_lea.hbm %s5257_s6, 256 }
  0xd2   : > { %p4296_p13 = scmp.ne.s32.totalorder %s5257_s6, %s4295_s17  ;;  %p4302_p0 = scmp.lt.u32.totalorder %s4295_s17, %s5257_s6 }
  0xd4   : > { %p4298_p1 = pnand %p4296_p13, %p4678_p8 }
  0xd6   : > { %p4299_p3 = pneg %p4298_p1 }
  0xd8   : > { %p4304_p2 = pnand %p4302_p0, %p4299_p3 }
  0xda   : > { %4307 = shalt.err (!%p4304_p2)
}
  0xdb   : > { %s4308_s25 = scalar_lea.vmem %s4843_s19, 256  ;;  %p4316_p4 = scmp.lt.s32.totalorder %s4843_s19, %s4843_s19 }
  0xdc   : > { %p4309_p5 = scmp.ne.s32.totalorder %s4843_s19, %s4308_s25  ;;  %p4317_p10 = scmp.lt.s32.totalorder %s4308_s25, %s4308_s25 }
  0xde   : > { %p4311_p7 = pnand %p4309_p5, %p4678_p8  ;;  %p4318_p11 = por %p4317_p10, %p4316_p4 }
  0xe0   : > { %p4312_p9 = pneg %p4311_p7 }
  0xe2   : > { %p4319_p12 = pnand %p4318_p11, %p4312_p9 }
  0xe4   : > { %4322 = shalt.err (!%p4319_p12)
}
  0xe5   : > { %3818 = dma.hbm_to_vmem [thread:$0]  (!%p4662_p6), %s5257_s6, 256, %s4843_s19, [#allocation12]  }
  0xe6   : > { %s4541_s15 = smov [#allocation16]   ;;  %s4542_s13 = smov [#allocation19]  }
  0xe7   : > { %s442_s30 = sshll.u32 %s4541_s15, 4  ;;  %s464_s23 = sshll.u32 %s4542_s13, 4  ;;  %s443_s30 = int_to_ptr.vmem [resolvable:$true] %s442_s30  ;;  %s4886_s23 = int_to_ptr.vmem [resolvable:$true] %s464_s23 }
  0xe8   : > { %s4323_s0 = scalar_lea.hbm %s5259_s8, 16 }
  0xe9   : > { %p4324_p13 = scmp.ne.s32.totalorder %s5259_s8, %s4323_s0  ;;  %p4330_p0 = scmp.lt.u32.totalorder %s4323_s0, %s5259_s8 }
  0xeb   : > { %p4326_p1 = pnand %p4324_p13, %p4678_p8 }
  0xed   : > { %p4327_p3 = pneg %p4326_p1 }
  0xef   : > { %p4332_p2 = pnand %p4330_p0, %p4327_p3 }
  0xf1   : > { %4335 = shalt.err (!%p4332_p2)
}
  0xf2   : > { %s4336_s25 = scalar_lea.vmem %s443_s30, 16  ;;  %s4343_s29 = scalar_lea.vmem %s443_s30, 32 }
  0xf3   : > { %p4337_p5 = scmp.ne.s32.totalorder %s443_s30, %s4336_s25  ;;  %p4344_p4 = scmp.lt.s32.totalorder %s443_s30, %s443_s30 }
  0xf4   : > { %p4345_p10 = scmp.lt.s32.totalorder %s4343_s29, %s4336_s25 }
  0xf5   : > { %p4339_p7 = pnand %p4337_p5, %p4678_p8 }
  0xf6   : > { %p4346_p11 = por %p4345_p10, %p4344_p4 }
  0xf7   : > { %p4340_p9 = pneg %p4339_p7 }
  0xf9   : > { %p4347_p12 = pnand %p4346_p11, %p4340_p9 }
  0xfb   : > { %4350 = shalt.err (!%p4347_p12)
}
  0xfc   : > { %3824 = dma.hbm_to_vmem [thread:$0]  (!%p4662_p6), %s5259_s8, 16, %s443_s30, [#allocation15]  }
  0xfd   : > { %s4351_s17 = scalar_lea.hbm %s5261_s10, 16 }
  0xfe   : > { %p4352_p13 = scmp.ne.s32.totalorder %s5261_s10, %s4351_s17  ;;  %p4358_p0 = scmp.lt.u32.totalorder %s4351_s17, %s5261_s10 }
 0x100   : > { %p4354_p1 = pnand %p4352_p13, %p4678_p8 }
 0x102   : > { %p4355_p3 = pneg %p4354_p1 }
 0x104   : > { %p4360_p2 = pnand %p4358_p0, %p4355_p3 }
 0x106   : > { %4363 = shalt.err (!%p4360_p2)
}
 0x107   : > { %s4364_s30 = scalar_lea.vmem %s4886_s23, 16  ;;  %s4371_s19 = scalar_lea.vmem %s4886_s23, 32 }
 0x108   : > { %p4365_p5 = scmp.ne.s32.totalorder %s4886_s23, %s4364_s30  ;;  %p4372_p4 = scmp.lt.s32.totalorder %s4886_s23, %s4886_s23 }
 0x109   : > { %p4373_p10 = scmp.lt.s32.totalorder %s4371_s19, %s4364_s30 }
 0x10a   : > { %p4367_p7 = pnand %p4365_p5, %p4678_p8 }
 0x10b   : > { %p4374_p11 = por %p4373_p10, %p4372_p4 }
 0x10c   : > { %p4368_p9 = pneg %p4367_p7 }
 0x10e   : > { %p4375_p12 = pnand %p4374_p11, %p4368_p9 }
 0x110   : > { %4378 = shalt.err (!%p4375_p12)
}
 0x111   : > { %3830 = dma.hbm_to_vmem [thread:$0]  (!%p4662_p6), %s5261_s10, 16, %s4886_s23, [#allocation18]  }
 0x112   : > { %s4543_s24 = smov [#allocation22]   ;;  %s4379_s17 = scalar_lea.hbm %s5263_s12, 16 }
 0x113   : > { %s486_s15 = sshll.u32 %s4543_s24, 4  ;;  %p4380_p13 = scmp.ne.s32.totalorder %s5263_s12, %s4379_s17  ;;  %s487_s15 = int_to_ptr.vmem [resolvable:$true] %s486_s15 }
 0x114   : > { %p4386_p0 = scmp.lt.u32.totalorder %s4379_s17, %s5263_s12 }
 0x115   : > { %p4382_p1 = pnand %p4380_p13, %p4678_p8 }
 0x117   : > { %p4383_p3 = pneg %p4382_p1 }
 0x119   : > { %p4388_p2 = pnand %p4386_p0, %p4383_p3 }
 0x11b   : > { %4391 = shalt.err (!%p4388_p2)
}
 0x11c   : > { %s4392_s23 = scalar_lea.vmem %s487_s15, 16  ;;  %s4399_s30 = scalar_lea.vmem %s487_s15, 32 }
 0x11d   : > { %p4393_p5 = scmp.ne.s32.totalorder %s487_s15, %s4392_s23  ;;  %p4400_p4 = scmp.lt.s32.totalorder %s487_s15, %s487_s15 }
 0x11e   : > { %p4401_p10 = scmp.lt.s32.totalorder %s4399_s30, %s4392_s23 }
 0x11f   : > { %p4395_p7 = pnand %p4393_p5, %p4678_p8 }
 0x120   : > { %p4402_p11 = por %p4401_p10, %p4400_p4 }
 0x121   : > { %p4396_p9 = pneg %p4395_p7 }
 0x123   : > { %p4403_p12 = pnand %p4402_p11, %p4396_p9 }
 0x125   : > { %4406 = shalt.err (!%p4403_p12)
}
 0x126   : > { %s5288_s16 = sld [smem:[#allocation32_spill]]  ;;  %s5289_s29 = sld [smem:[#allocation33_spill]] }
 0x127   : > { %3836 = dma.hbm_to_vmem [thread:$0]  (!%p4662_p6), %s5263_s12, 16, %s487_s15, [#allocation21]  }
 0x128   : > { %s3297_s24 = sadd.s32 4294967294, %s4527_s28   ;;  %s4950_s18 = sadd.s32 1, %s4527_s28  }
 0x129   : > { %s42_s13 = sadd.s32 1, %s4523_s27  ;;  %s39_s21 = ssub.s32 %s4527_s28, %s4950_s18 }
 0x12a   : > { %p49_p8 = scmp.ne.s32.totalorder %s4523_s27, %s4519_s26  ;;  %p40_p13 = scmp.eq.s32.totalorder %s39_s21, 0 }
 0x12b   : > { %p50_p1 = scmp.eq.s32.totalorder %s4527_s28, 0  ;;  %p337_p9 = scmp.eq.s32.totalorder %s3297_s24, 1 }
 0x12c   : > { %p55_p3 = scmp.ne.s32.totalorder %s4519_s26, %s5288_s16  ;;  %p331_p0 = scmp.eq.s32.totalorder %s5289_s29, 1 }
 0x12d   : > { %s4962_s17 = scalar_select %p40_p13, %s4523_s27, %s42_s13  }
 0x12e   : > { %p51_p2 = por %p50_p1, %p49_p8  ;;  %p5290_p5 = scmp.eq.s32.totalorder %s5289_s29, 0 }
 0x12f   : > { %p4970_p6 = por %p331_p0, %p49_p8  ;;  %p3857_p4 = scmp.lt.s32.totalorder %s4527_s28, 2 }
 0x130   : > { %p4966_p7 = por %p5290_p5, %p55_p3  ;;  %s497_s20 = sand.u32 1, %s4523_s27  }
 0x131   : > { %s5292_s15 = scalar_select %p4970_p6, 1, 0 }
 0x132   : > { %p4976_p10 = por %p337_p9, %p55_p3  ;;  %s3312_s14 = sshll.u32 %s497_s20, 2 }
 0x133   : > { %s3313_s23 = sshll.u32 %s4527_s28, 6  ;;  %s5294_s25 = sld [smem:[#allocation35_spill]] }
 0x134   : > { %s5293_s22 = scalar_select %p4976_p10, 1, 0 }
 0x135   : > { %s501_s13 = scalar_lea.vmem [#allocation2], %s3312_s14  ;;  %p4986_p11 = pnand %p3857_p4, %p51_p2 }
 0x136   : > { %s508_s21 = sshll.u32 %s501_s13, 4  ;;  %s498_s1 = scalar_lea.sflag [#allocation3], %s497_s20  ;;  %s4990_s21 = int_to_ptr.vmem [resolvable:$true] %s508_s21 }
 0x137   : > { %p4409_p8 = pneg %p4986_p11 }
 0x139   : > { %s5295_s16 = smov %s5294_s25  ;;  %s4984_s29 = scalar_lea.hbm %s5294_s25, %s3313_s23 }
 0x13a   : > { %s4407_s2 = scalar_lea.hbm %s4984_s29, 64  ;;  %s4412_s30 = scalar_lea.hbm %s5295_s16, 128 }
 0x13b   : > { %p4408_p12 = scmp.ne.s32.totalorder %s4984_s29, %s4407_s2  ;;  %p4413_p3 = scmp.lt.u32.totalorder %s4984_s29, %s5295_s16 }
 0x13c   : > { %p4414_p0 = scmp.lt.u32.totalorder %s4412_s30, %s4407_s2  ;;  %p4416_p5 = scmp.lt.u32.totalorder %s4407_s2, %s4984_s29 }
 0x13d   : > { %p4410_p13 = pnand %p4409_p8, %p4408_p12 }
 0x13e   : > { %p4415_p2 = por %p4414_p0, %p4413_p3 }
 0x13f   : > { %p4411_p1 = pneg %p4410_p13 }
 0x140   : > { %p4417_p9 = por %p4416_p5, %p4415_p2 }
 0x142   : > { %p4418_p4 = pnand %p4417_p9, %p4411_p1 }
 0x144   : > { %4421 = shalt.err (!%p4418_p4)
}
 0x145   : > { %s4422_s20 = scalar_lea.vmem %s4990_s21, 64  ;;  %s4544_s13 = smov [#allocation2]  }
 0x146   : > { %p4423_p12 = scmp.ne.s32.totalorder %s4990_s21, %s4422_s20  ;;  %s4427_s23 = sshll.u32 %s4544_s13, 4  ;;  %s4428_s23 = int_to_ptr.vmem [resolvable:$false] %s4427_s23 }
 0x147   : > { %s4429_s14 = scalar_lea.vmem %s4428_s23, 128  ;;  %p4430_p6 = scmp.lt.s32.totalorder %s4990_s21, %s4428_s23 }
 0x148   : > { %p4425_p13 = pnand %p4423_p12, %p4409_p8  ;;  %p4431_p3 = scmp.lt.s32.totalorder %s4429_s14, %s4422_s20 }
 0x14a   : > { %p4426_p10 = pneg %p4425_p13  ;;  %p4432_p0 = por %p4431_p3, %p4430_p6 }
 0x14c   : > { %p4433_p2 = pnand %p4432_p0, %p4426_p10 }
 0x14e   : > { %4436 = shalt.err (!%p4433_p2)
}
 0x14f   : > { %3840 = dma.hbm_to_vmem [thread:$0]  (!%p4986_p11), %s4984_s29, 64, %s4990_s21, %s498_s1  }
 0x150   : > { %s5297_s2 = sld [smem:[#allocation34_spill]] }
 0x156   : > { %p5298_p1 = scmp.ne.s32.totalorder %s5297_s2, 0 }
 0x157   : > { %s5020_s30 = sand.u32 (!%p5298_p1), 1, %s4519_s26  }
 0x158   : > { %517 = sbr.rel (%p5298_p1) target bundleno = 3117 (0xc2d), region = 72  ;;  %s3315_s19 = sshll.u32 (!%p5298_p1), %s5020_s30, 2 }
 0x159   : > { %s520_s25 = scalar_lea.sflag (!%p5298_p1), [#allocation3], %s5020_s30  ;;  %s523_s20 = scalar_lea.vmem (!%p5298_p1), [#allocation2], %s3315_s19 }
 0x15f   : > { %4482 = dma.done.wait (%p4966_p7), %s520_s25, 64  }
 0x160   : > { %4484 = vsyncadd (%p4966_p7), %s520_s25, 4294967232  ;;  %s5299_s1 = sld [smem:[#allocation33_spill]] }
 0x166   : > { %p5300_p6 = scmp.eq.s32.totalorder %s5299_s1, 0 }
 0x168   : > { %4486 = dma.done.wait (%p5300_p6), [#allocation6], 272   ;;  %p5301_p10 = pmov %p5300_p6 }
 0x169   : > { %p5302_p11 = pmov %p5300_p6 }
 0x16a   : > { %4488 = vsyncadd (%p5301_p10), [#allocation6], 4294967024 }
 0x16b   : > { %4490 = dma.done.wait (%p5302_p11), [#allocation9], 272   ;;  %p5303_p8 = pmov %p5300_p6 }
 0x16c   : > { %p5304_p5 = pmov %p5300_p6 }
 0x16d   : > { %4492 = vsyncadd (%p5303_p8), [#allocation9], 4294967024 }
 0x16e   : > { %4494 = dma.done.wait (%p5304_p5), [#allocation12], 4352   ;;  %p5305_p9 = pmov %p5304_p5 }
 0x16f   : > { %p5306_p7 = pmov %p5304_p5 }
 0x170   : > { %4496 = vsyncadd (%p5305_p9), [#allocation12], 4294962944 }
 0x171   : > { %4498 = dma.done.wait (%p5306_p7), [#allocation15], 16400   ;;  %p5307_p4 = pmov %p5304_p5 }
 0x173   : > { %4500 = vsyncadd (%p5307_p4), [#allocation15], 4294950896  ;;  %p5308_p12 = pmov %p5307_p4 }
 0x174   : > { %p5309_p13 = pmov %p5307_p4 }
 0x175   : > { %4502 = dma.done.wait (%p5308_p12), [#allocation18], 32  }
 0x176   : > { %4504 = vsyncadd (%p5309_p13), [#allocation18], 4294967264  ;;  %p5310_p3 = pmov %p5307_p4 }
 0x178   : > { %4506 = dma.done.wait (%p5310_p3), [#allocation21], 32   ;;  %p5311_p0 = pmov %p5310_p3 }
 0x179   : > { %v4545_v0 = vmov 0.0   ;;  %vm4546_vm0 = vmmov 0   ;;  %v3927_v1 = vld [vmem:[#allocation5] sm:$0xff]   ;;  %v3928_v2 = vld [vmem:[#allocation5 + $0x8] sm:$0xff]   ;;  %v5060_v3 = vld [vmem:[%s523_s20] sm:$0xf] }
 0x17a   : > { %4508 = vsyncadd (%p5311_p0), [#allocation21], 4294967264  ;;  %3708 = vmatprep.subr.bf16.mxu0 %v4545_v0  ;;  %3712 = vmatprep.mubr.msk.bf16.mxu0 %vm4546_vm0, %v4545_v0  ;;  %vm940_vm1 = vcmask 261120   ;;  %v921_v4 = vpack.c.bf16 %v5060_v3, %v5060_v3  ;;  %v3329_v5 = vld [vmem:[#allocation7] ss:$0 sm:$0xff]  ;;  %s4547_s0 = smov 96  }
 0x17b   : > { %3716 = vmatprep.subr.bf16.mxu1 %v4545_v0  ;;  %3718 = vmatprep.mubr.msk.bf16.mxu1 %vm4546_vm0, %v4545_v0  ;;  %s4548_s29 = smov 112   ;;  %s4549_s21 = smov 80   ;;  %vm1022_vm2 = vcmask 130048   ;;  %vm1067_vm3 = vcmask 27648   ;;  %vm1087_vm4 = vcmask 1041408   ;;  %vm1083_vm5 = vcmask 31744  }
 0x17c   : > { %3709 = vmatpush3.bf16.msra.mxu0 %v3927_v1  ;;  %s4550_s24 = smov 48   ;;  %s4551_s13 = smov 64   ;;  %v3929_v55 = vld [vmem:[#allocation8] sm:$0xff]   ;;  %v3930_v56 = vld [vmem:[#allocation8 + $0x8] sm:$0xff]   ;;  %vm1341_vm6 = vcmask 257024  }
 0x17d   : > { %3710 = vmatprep.subr.bf16.mxu0 %v4545_v0  ;;  %s4552_s23 = smov 16   ;;  %s3515_s14 = sshll.u32 %s5299_s1, 6 }
 0x17e   : > { %s613_s2 = scalar_lea.vmem [#allocation23], %s3315_s19  ;;  %p5313_p1 = scmp.ne.s32.totalorder %s5292_s15, 0 }
 0x17f   : > { %s3113_s25 = sshll.u32 %s613_s2, 4  ;;  %s4554_s19 = smov [#allocation23]   ;;  %s5208_s25 = int_to_ptr.vmem [resolvable:$true] %s3113_s25 }
 0x180   : > { %3711 = vmatpush3.bf16.msra.mxu0 %v3928_v2  ;;  %s4441_s1 = sshll.u32 %s4554_s19, 4  ;;  %s4442_s1 = int_to_ptr.vmem [resolvable:$false] %s4441_s1 }
 0x181   : > { %3728 = vmatprep.subr.bf16.mxu0 %v4545_v0  ;;  %p4444_p11 = scmp.lt.s32.totalorder %s5208_s25, %s4442_s1 }
 0x183   : > { %3713 = vmatmul.mubr.msk.bf16.vlgmr.msra.gmra.mrb[0].mxu0 %vm940_vm1, %v921_v4 }
 0x184   : > { %3730 = vmatprep.mubr.msk.bf16.mxu0 %vm4546_vm0, %v4545_v0 }
 0x256   : > { %v978_v6 = vpop.f32.mrb[0].mxu0 }
 0x257   : > { %v979_v7 = vadd.f32 %v3329_v5, %v978_v6  ;;  %v3714_v8 = vpop.f32.mrb[1].mxu0  ;;  %v3337_v6 = vld [vmem:[#allocation10] ss:$0 sm:$0xff] }
 0x258   : > { %v981_v9 = vpop.f32.mrb[2].mxu0 }
 0x259   : > { %v1020_v10 = vpack.c.bf16 %v979_v7, %v979_v7  ;;  %985 = vrot.lane.b32.xlu0 %v979_v7, %s4547_s0  ;;  %v3715_v11 = vpop.f32.mrb[3].mxu0 }
 0x25b   : > { %1167 = vrot.lane.b32.xlu1 %v1020_v10, %s4548_s29  ;;  %s5312_s29 = sld [smem:[#allocation38_spill]] }
 0x25d   : > { %1131 = vrot.lane.b32.xlu0 %v979_v7, %s4549_s21 }
 0x261   : > { %s5206_s21 = scalar_lea.hbm %s5312_s29, %s3515_s14 }
 0x2cb   : > { %v986_v12 = vpop.permute.xlu0 %985 }
 0x2cc   : > { %988 = vxpose.xlu1.b32.start.end [1/1] (short) (narrow) %v986_v12, 16 }
 0x2cd   : > { %v1168_v14 = vpop.permute.xlu1 %1167 }
 0x2cf   : > { %v1132_v13 = vpop.permute.xlu0 %1131 }
 0x2d0   : > { %1134 = vxpose.xlu0.b32.start.end [1/1] (short) (narrow) %v1132_v13, 16 }
 0x34c   : > { %v1004_v15 = vpop.trf.xlu1 }
 0x350   : > { %v1150_v16 = vpop.trf.xlu0  ;;  %v1005_v17 = vpop.trf.xlu1 }
 0x351   : > { %v1021_v18 = vpack.c.bf16 %v1005_v17, %v1004_v15 }
 0x353   : > { %3717 = vmatpush3.bf16.msra.mxu1 %v1021_v18  ;;  %v626_v18 = vld [vmem:[#allocation11] sm:$0xff] }
 0x354   : > { %v1151_v19 = vpop.trf.xlu0  ;;  %3722 = vmatprep.subr.bf16.mxu1 %v4545_v0 }
 0x355   : > { %v1166_v20 = vpack.c.bf16 %v1151_v19, %v1150_v16  ;;  %v634_v19 = vld [vmem:[#allocation11 + $0x40] sm:$0xff] }
 0x356   : > { %3719 = vmatmul.mubr.msk.bf16.vlgmr.msra.gmra.mrb[0].mxu1 %vm1022_vm2, %v1020_v10 }
 0x357   : > { %3729 = vmatpush3.bf16.msra.mxu0 %v1166_v20  ;;  %3724 = vmatprep.mubr.msk.bf16.mxu1 %vm4546_vm0, %v4545_v0  ;;  %v627_v20 = vld [vmem:[#allocation11 + $0x8] sm:$0xff] }
 0x358   : > { %3740 = vmatprep.subr.bf16.mxu0 %v4545_v0 }
 0x35a   : > { %3731 = vmatmul.mubr.msk.bf16.vlgmr.msra.gmra.mrb[4].mxu0 %vm1022_vm2, %v1168_v14 }
 0x35b   : > { %3744 = vmatprep.mubr.msk.bf16.mxu0 %vm4546_vm0, %v4545_v0  ;;  %3741 = vmatpush3.bf16.msra.mxu0 %v3929_v55 }
 0x35c   : > { %3742 = vmatprep.subr.bf16.mxu0 %v4545_v0 }
 0x35f   : > { %3743 = vmatpush3.bf16.msra.mxu0 %v3930_v56 }
 0x429   : > { %v1060_v21 = vpop.f32.mrb[0].mxu1 }
 0x42a   : > { %v1066_v22 = vmul.f32 0.25, %v1060_v21  ;;  %v3720_v23 = vpop.f32.mrb[1].mxu1  ;;  %v3344_v21 = vcombine.high %v626_v18, %v634_v19 }
 0x42b   : > { %v1063_v24 = vpop.f32.mrb[2].mxu1  ;;  %v3343_v23 = vcombine.low %v626_v18, %v634_v19  ;;  %v648_v19 = vld [vmem:[#allocation11 + $0xb0] sm:$0xff] }
 0x42c   : > { %v3721_v25 = vpop.f32.mrb[3].mxu1  ;;  %v1068_v26 = vsel %vm1067_vm3, %v1066_v22, -inf }
 0x42d   : > { %1069 = vmax.xlane.f32.xlu0 %v1068_v26  ;;  %v1206_v27 = vpop.f32.mrb[4].mxu0  ;;  %v650_v26 = vld [vmem:[#allocation11 + $0xc0] sm:$0xff] }
 0x42e   : > { %v1212_v28 = vmul.f32 0.25, %v1206_v27  ;;  %v3732_v29 = vpop.f32.mrb[5].mxu0  ;;  %v643_v27 = vld [vmem:[#allocation11 + $0x88] sm:$0xff] }
 0x42f   : > { %v1209_v30 = vpop.f32.mrb[6].mxu0  ;;  %v651_v29 = vld [vmem:[#allocation11 + $0xc8] sm:$0xff] }
 0x430   : > { %v3733_v31 = vpop.f32.mrb[7].mxu0  ;;  %v1213_v32 = vsel %vm1067_vm3, %v1212_v28, -inf }
 0x431   : > { %1214 = vmax.xlane.f32.xlu1 %v1213_v32  ;;  %v3361_v31 = vcombine.low %v643_v27, %v651_v29  ;;  %v3362_v32 = vcombine.high %v643_v27, %v651_v29  ;;  %v3932_v29 = vld [vmem:[#allocation14 + $0xc0] sm:$0xff]  }
 0x4ba   : > { %v1070_v33 = vpop.xlane.xlu0 %1069 }
 0x4bb   : > { %v1071_v34 = vsub.f32 %v1066_v22, %v1070_v33  ;;  %v635_v22 = vld [vmem:[#allocation11 + $0x48] sm:$0xff]  ;;  %v628_v33 = vld [vmem:[#allocation11 + $0x10] sm:$0xff] }
 0x4bc   : > { %v3345_v24 = vcombine.low %v627_v20, %v635_v22  ;;  %v3346_v25 = vcombine.high %v627_v20, %v635_v22  ;;  %v656_v20 = vld [vmem:[#allocation11 + $0xf0] sm:$0xff]  ;;  %v657_v22 = vld [vmem:[#allocation11 + $0xf8] sm:$0xff] }
 0x4bd   : > { %v1072_v35 = vmul.f32 1.442695, %v1071_v34  ;;  %v636_v34 = vld [vmem:[#allocation11 + $0x50] sm:$0xff] }
 0x4be   : > { %v1215_v36 = vpop.xlane.xlu1 %1214  ;;  %1657 = vmatprep.subr.bf16.mxu0 %v3346_v25  ;;  %v3372_v25 = vcombine.high %v648_v19, %v656_v20 }
 0x4bf   : > { %4059 = vpow2.f32 %v1072_v35  ;;  %v1216_v37 = vsub.f32 %v1212_v28, %v1215_v36  ;;  %v629_v35 = vld [vmem:[#allocation11 + $0x18] sm:$0xff]  ;;  %v4553_v36 = vmov 0  }
 0x4c1   : > { %v1217_v38 = vmul.f32 1.442695, %v1216_v37  ;;  %v3348_v37 = vcombine.high %v628_v33, %v636_v34 }
 0x4c3   : > { %4061 = vpow2.f32 %v1217_v38  ;;  %v637_v38 = vld [vmem:[#allocation11 + $0x58] sm:$0xff] }
 0x4c9   : > { %v4060_v39 = vpop.eup %4059 }
 0x4ca   : > { %v1074_v40 = vsel %vm1067_vm3, %v4060_v39, 0.0 }
 0x4cb   : > { %1075 = vadd.xlane.f32.xlu0 %v1074_v40  ;;  %v3349_v40 = vcombine.low %v629_v35, %v637_v38 }
 0x4cd   : > { %v4062_v41 = vpop.eup %4061 }
 0x4ce   : > { %v1219_v42 = vsel %vm1067_vm3, %v4062_v41, 0.0 }
 0x4cf   : > { %1220 = vadd.xlane.f32.xlu1 %v1219_v42 }
 0x4e0   : > { %1225 = vrot.lane.b32.xlu1 %v1020_v10, %s4550_s24  ;;  %s3100_s24 = scalar_lea.sflag [#allocation4], %s5020_s30 }
 0x4e1   : > { %1081 = vrot.lane.b32.xlu0 %v1020_v10, %s4551_s13  ;;  %s4437_s13 = scalar_lea.vmem %s5208_s25, 64 }
 0x4e2   : > { %p4438_p2 = scmp.ne.s32.totalorder %s5208_s25, %s4437_s13 }
 0x4e4   : > { %p4439_p6 = pnand %p4438_p2, %p5313_p1 }
 0x4e6   : > { %p4440_p10 = pneg %p4439_p6 }
 0x558   : > { %v1076_v43 = vpop.xlane.xlu0 %1075 }
 0x559   : > { %4063 = vrcp.f32 %v1076_v43 }
 0x55c   : > { %v1082_v44 = vpop.permute.xlu0 %1081  ;;  %v1221_v45 = vpop.xlane.xlu1 %1220 }
 0x55d   : > { %v1089_v46 = vsel %vm1087_vm4, %v1082_v44, 0  ;;  %4065 = vrcp.f32 %v1221_v45 }
 0x55e   : > { %3723 = vmatpush3.bf16.msra.mxu1 %v1089_v46  ;;  %v3341_v46 = vld [vmem:[#allocation17] ss:$0 sm:$0xff] }
 0x55f   : > { %3734 = vmatprep.subr.bf16.mxu1 %v4545_v0 }
 0x560   : > { %v1226_v49 = vpop.permute.xlu1 %1225 }
 0x561   : > { %v1231_v52 = vsel %vm1087_vm4, %v1226_v49, 0 }
 0x563   : > { %v4064_v47 = vpop.eup %4063 }
 0x564   : > { %v1078_v48 = vmul.f32 %v4064_v47, %v4060_v39  ;;  %v3347_v39 = vcombine.low %v628_v33, %v636_v34  ;;  %v3936_v33 = vld [vmem:[#allocation14 + $0xc8] sm:$0xff]  }
 0x565   : > { %v3937_v34 = vld [vmem:[#allocation14 + $0x8] sm:$0xff]  }
 0x566   : > { %v1079_v50 = vpack.c.bf16 %v1078_v48, %v1078_v48  ;;  %v3342_v48 = vld [vmem:[#allocation19] ss:$0 sm:$0xff] }
 0x567   : > { %v4066_v51 = vpop.eup %4065 }
 0x568   : > { %3725 = vmatmul.mubr.msk.bf16.vlgmr.msra.gmra.mrb[4].mxu1 %vm1083_vm5, %v1079_v50  ;;  %v1223_v53 = vmul.f32 %v4066_v51, %v4062_v41  ;;  %v3350_v41 = vcombine.high %v629_v35, %v637_v38  ;;  %v644_v50 = vld [vmem:[#allocation11 + $0x90] sm:$0xff]  ;;  %v3938_v35 = vld [vmem:[#allocation14 + $0x88] sm:$0xff]   ;;  %v3941_v38 = vld [vmem:[#allocation14 + $0x10] sm:$0xff]  }
 0x569   : > { %3735 = vmatpush3.bf16.msra.mxu1 %v1231_v52  ;;  %3736 = vmatprep.mubr.msk.bf16.mxu1 %vm4546_vm0, %v4545_v0  ;;  %v652_v51 = vld [vmem:[#allocation11 + $0xd0] sm:$0xff]  ;;  %v645_v52 = vld [vmem:[#allocation11 + $0x98] sm:$0xff] }
 0x56a   : > { %v1224_v54 = vpack.c.bf16 %v1223_v53, %v1223_v53  ;;  %1616 = vmatprep.subr.bf16.mxu1 %v3344_v21  ;;  %v653_v53 = vld [vmem:[#allocation11 + $0xd8] sm:$0xff]  ;;  %v3364_v56 = vcombine.high %v644_v50, %v652_v51 }
 0x56b   : > { %v649_v21 = vld [vmem:[#allocation11 + $0xb8] sm:$0xff] }
 0x56c   : > { %v3373_v27 = vcombine.low %v649_v21, %v657_v22 }
 0x570   : > { %3737 = vmatmul.mubr.msk.bf16.vlgmr.msra.gmra.mrb[8].mxu1 %vm1083_vm5, %v1224_v54 }
 0x571   : > { %1617 = vmatpush1.bf16.msra.mxu1 %v3343_v23  ;;  %1648 = vmatprep.mubr.bf16.mxu1 %v4553_v36 }
 0x63b   : > { %v1125_v57 = vpop.f32.mrb[4].mxu1 }
 0x63c   : > { %v3726_v58 = vpop.f32.mrb[5].mxu1 }
 0x63d   : > { %v1128_v59 = vpop.f32.mrb[6].mxu1  ;;  %v630_v58 = vld [vmem:[#allocation11 + $0x20] sm:$0xff] }
 0x63e   : > { %v3727_v60 = vpop.f32.mrb[7].mxu1  ;;  %v638_v59 = vld [vmem:[#allocation11 + $0x60] sm:$0xff] }
 0x63f   : > { %v631_v60 = vld [vmem:[#allocation11 + $0x28] sm:$0xff] }
 0x643   : > { %v1267_v61 = vpop.f32.mrb[8].mxu1 }
 0x644   : > { %1274 = vrot.lane.b32.xlu1 %v1267_v61, %s4552_s23  ;;  %v3738_v62 = vpop.f32.mrb[9].mxu1  ;;  %v639_v61 = vld [vmem:[#allocation11 + $0x68] sm:$0xff]  ;;  %s4443_s23 = scalar_lea.vmem %s4442_s1, 128 }
 0x645   : > { %v1270_v63 = vpop.f32.mrb[10].mxu1  ;;  %v3363_v62 = vcombine.low %v644_v50, %v652_v51  ;;  %v3953_v50 = vld [vmem:[#allocation14 + $0x28] sm:$0xff]   ;;  %p4445_p8 = scmp.lt.s32.totalorder %s4443_s23, %s4437_s13 }
 0x646   : > { %v3739_v1 = vpop.f32.mrb[11].mxu1  ;;  %v3365_v63 = vcombine.low %v645_v52, %v653_v53  ;;  %v3954_v51 = vld [vmem:[#allocation14 + $0xa8] sm:$0xff]  }
 0x647   : > { %v3352_v1 = vcombine.high %v630_v58, %v638_v59  ;;  %p4446_p5 = por %p4445_p8, %p4444_p11 }
 0x649   : > { %p4447_p9 = pnand %p4446_p5, %p4440_p10 }
 0x6b6   : > { %v1275_v2 = vpop.permute.xlu1 %1274 }
 0x6b7   : > { %v1277_v4 = vsel %vm1022_vm2, %v1125_v57, %v1275_v2  ;;  %v3366_v57 = vcombine.high %v645_v52, %v653_v53  ;;  %v3354_v2 = vcombine.high %v631_v60, %v639_v61  ;;  %v3955_v52 = vld [vmem:[#allocation14 + $0x70] sm:$0xff]  }
 0x6b8   : > { %v1278_v5 = vpack.c.bf16 %v1277_v4, %v1277_v4  ;;  %v646_v4 = vld [vmem:[#allocation11 + $0xa0] sm:$0xff] }
 0x6b9   : > { %v3956_v53 = vld [vmem:[#allocation14 + $0xf0] sm:$0xff]  }
 0x6ba   : > { %3745 = vmatmul.mubr.msk.bf16.vlgmr.msra.gmra.mrb[8].mxu0 %vm940_vm1, %v1278_v5  ;;  %v654_v5 = vld [vmem:[#allocation11 + $0xe0] sm:$0xff] }
 0x6bb   : > { %1658 = vmatpush1.bf16.msra.mxu0 %v3345_v24  ;;  %1689 = vmatprep.mubr.bf16.mxu0 %v4553_v36 }
 0x6bc   : > { %1659 = vmatprep.subr.bf16.mxu0 %v3362_v32  ;;  %v3935_v32 = vld [vmem:[#allocation14 + $0x48] sm:$0xff]  }
 0x6bf   : > { %1660 = vmatpush1.bf16.msra.mxu0 %v3361_v31  ;;  %v3934_v31 = vld [vmem:[#allocation14 + $0x80] sm:$0xff]  }
 0x6c0   : > { %1739 = vmatprep.subr.bf16.mxu0 %v3350_v41  ;;  %v3944_v41 = vld [vmem:[#allocation14 + $0xd8] sm:$0xff]  }
 0x78d   : > { %v1334_v0 = vpop.f32.mrb[8].mxu0 }
 0x78e   : > { %v1335_v7 = vadd.f32 %v3337_v6, %v1334_v0  ;;  %v3746_v8 = vpop.f32.mrb[9].mxu0  ;;  %v647_v6 = vld [vmem:[#allocation11 + $0xa8] sm:$0xff] }
 0x78f   : > { %v1337_v9 = vpop.f32.mrb[10].mxu0  ;;  %v655_v0 = vld [vmem:[#allocation11 + $0xe8] sm:$0xff]  ;;  %v3353_v8 = vcombine.low %v631_v60, %v639_v61  ;;  %v3963_v61 = vld [vmem:[#allocation14 + $0x140] sm:$0xff]  }
 0x790   : > { %v3747_v10 = vpop.f32.mrb[11].mxu0  ;;  %v1340_v11 = vadd.f32 %v1335_v7, %v5060_v3  ;;  %v642_v3 = vld [vmem:[#allocation11 + $0x80] sm:$0xff]  ;;  %v3351_v7 = vcombine.low %v630_v58, %v638_v59  ;;  %v3368_v9 = vcombine.high %v646_v4, %v654_v5  ;;  %v3960_v58 = vld [vmem:[#allocation14 + $0xf8] sm:$0xff]  }
 0x791   : > { %v3360_v28 = vcombine.high %v642_v3, %v650_v26  ;;  %v3359_v30 = vcombine.low %v642_v3, %v650_v26  ;;  %v3370_v10 = vcombine.high %v647_v6, %v655_v0  ;;  %v3374_v3 = vcombine.high %v649_v21, %v657_v22  ;;  %v3961_v59 = vld [vmem:[#allocation14 + $0x38] sm:$0xff]  }
 0x792   : > { %v1342_v12 = vsel %vm1341_vm6, %v1340_v11, 0.0  ;;  %v3371_v26 = vcombine.low %v648_v19, %v656_v20  ;;  %v3962_v60 = vld [vmem:[#allocation14 + $0xb8] sm:$0xff]  }
 0x793   : > { %1343 = vadd.xlane.f32.xlu0 %v1342_v12  ;;  %1618 = vmatprep.subr.bf16.mxu1 %v3360_v28  ;;  %v640_v12 = vld [vmem:[#allocation11 + $0x70] sm:$0xff] }
 0x794   : > { %1619 = vmatpush1.bf16.msra.mxu1 %v3359_v30  ;;  %v3931_v28 = vld [vmem:[#allocation14 + $0x40] sm:$0xff]  }
 0x795   : > { %1698 = vmatprep.subr.bf16.mxu1 %v3348_v37  ;;  %v3933_v30 = vld [vmem:[#allocation14] sm:$0xff]   ;;  %v3940_v37 = vld [vmem:[#allocation14 + $0xd0] sm:$0xff]  }
 0x820   : > { %v1344_v13 = vpop.xlane.xlu0 %1343 }
 0x821   : > { %v1346_v14 = vmul.f32 0.03125, %v1344_v13  ;;  %v633_v13 = vld [vmem:[#allocation11 + $0x38] sm:$0xff] }
 0x823   : > { %v1347_v15 = vsub.f32 %v1340_v11, %v1346_v14  ;;  %v632_v11 = vld [vmem:[#allocation11 + $0x30] sm:$0xff]  ;;  %v641_v14 = vld [vmem:[#allocation11 + $0x78] sm:$0xff] }
 0x824   : > { %v3358_v18 = vcombine.high %v633_v13, %v641_v14  ;;  %v3355_v23 = vcombine.low %v632_v11, %v640_v12  ;;  %v3357_v24 = vcombine.low %v633_v13, %v641_v14 }
 0x825   : > { %v1348_v16 = vmul.f32 %v1347_v15, %v1347_v15 }
 0x827   : > { %v1349_v17 = vsel %vm1341_vm6, %v1348_v16, 0.0  ;;  %v3369_v16 = vcombine.low %v647_v6, %v655_v0 }
 0x828   : > { %1350 = vadd.xlane.f32.xlu1 %v1349_v17  ;;  %v3356_v17 = vcombine.high %v632_v11, %v640_v12 }
 0x8b5   : > { %v1351_v42 = vpop.xlane.xlu1 %1350 }
 0x8b6   : > { %v1352_v43 = vmul.f32 0.03125, %v1351_v42  ;;  %v3945_v42 = vld [vmem:[#allocation14 + $0x18] sm:$0xff]  }
 0x8b8   : > { %v1353_v44 = vadd.f32 1e-05, %v1352_v43  ;;  %v3946_v43 = vld [vmem:[#allocation14 + $0x98] sm:$0xff]  }
 0x8ba   : > { %4067 = vrsqrt.f32 %v1353_v44  ;;  %v3947_v44 = vld [vmem:[#allocation14 + $0x60] sm:$0xff]  }
 0x8c4   : > { %v4068_v45 = vpop.eup %4067 }
 0x8c5   : > { %v1355_v47 = vmul.f32 %v4068_v45, %v1347_v15  ;;  %v3367_v15 = vcombine.low %v646_v4, %v654_v5  ;;  %v3948_v45 = vld [vmem:[#allocation14 + $0xe0] sm:$0xff]   ;;  %v5123_v4 = vld [vmem:[#allocation13 + $0x8] sm:$0xff] }
 0x8c7   : > { %v1362_v49 = vmul.f32 %v3341_v46, %v1355_v47  ;;  %v3949_v46 = vld [vmem:[#allocation14 + $0x20] sm:$0xff]  }
 0x8c8   : > { %v3950_v47 = vld [vmem:[#allocation14 + $0xa0] sm:$0xff]  }
 0x8c9   : > { %v5092_v54 = vadd.f32 %v3342_v48, %v1362_v49  ;;  %v3951_v48 = vld [vmem:[#allocation14 + $0x68] sm:$0xff]  }
 0x8ca   : > { %v3952_v49 = vld [vmem:[#allocation14 + $0xe8] sm:$0xff]  }
 0x8cb   : > { %v5096_v55 = vpack.c.bf16 %v5092_v54, %v5092_v54 }
 0x8cd   : > { %3375 = vmatmul.mubr.msk.bf16.vlgmr.msra.gmra.mrb[12].mxu1 %vm940_vm1, %v5096_v55  ;;  %3376 = vmatmul.mubr.msk.bf16.vlgmr.msra.gmra.mrb[12].mxu0 %vm940_vm1, %v5096_v55 }
 0x8ce   : > { %1699 = vmatpush1.bf16.msra.mxu1 %v3347_v39  ;;  %1740 = vmatpush1.bf16.msra.mxu0 %v3349_v40  ;;  %v3942_v39 = vld [vmem:[#allocation14 + $0x90] sm:$0xff]   ;;  %v3943_v40 = vld [vmem:[#allocation14 + $0x58] sm:$0xff]  }
 0x8cf   : > { %1700 = vmatprep.subr.bf16.mxu1 %v3364_v56  ;;  %1741 = vmatprep.subr.bf16.mxu0 %v3366_v57  ;;  %v3958_v56 = vld [vmem:[#allocation14 + $0xb0] sm:$0xff]   ;;  %v3959_v57 = vld [vmem:[#allocation14 + $0x78] sm:$0xff]  }
 0x8d0   : > { %1730 = vmatprep.mubr.bf16.mxu1 %v4553_v36  ;;  %1771 = vmatprep.mubr.bf16.mxu0 %v4553_v36 }
 0x8d2   : > { %1701 = vmatpush1.bf16.msra.mxu1 %v3363_v62  ;;  %1742 = vmatpush1.bf16.msra.mxu0 %v3365_v63  ;;  %v3964_v62 = vld [vmem:[#allocation14 + $0x1c0] sm:$0xff]   ;;  %v1373_v63 = vlaneseq }
 0x8d3   : > { %1780 = vmatprep.subr.bf16.mxu1 %v3352_v1  ;;  %1821 = vmatprep.subr.bf16.mxu0 %v3354_v2 }
 0x8d4   : > { %v5120_v1 = vshrl.u32 %v1373_v63, 7  ;;  %v3974_v63 = vld [vmem:[#allocation14 + $0x190] sm:$0xff]  }
 0x8d5   : > { %3377 = vmatmul.mubr.msk.bf16.vlgmr.msra.gmra.mrb[16].mxu1 %vm940_vm1, %v5096_v55  ;;  %3378 = vmatmul.mubr.msk.bf16.vlgmr.msra.gmra.mrb[16].mxu0 %vm940_vm1, %v5096_v55 }
 0x8d6   : > { %1781 = vmatpush1.bf16.msra.mxu1 %v3351_v7  ;;  %1822 = vmatpush1.bf16.msra.mxu0 %v3353_v8  ;;  %v1399_v2 = vsub.s32 6, %v5120_v1  ;;  %v1375_v6 = vsub.s32 0, %v5120_v1  ;;  %v1383_v0 = vsub.s32 2, %v5120_v1  ;;  %v5132_v7 = vld [vmem:[#allocation13] sm:$0xff]  ;;  %v1379_v8 = vsub.s32 1, %v5120_v1 }
 0x8d7   : > { %1782 = vmatprep.subr.bf16.mxu1 %v3368_v9  ;;  %1823 = vmatprep.subr.bf16.mxu0 %v3370_v10  ;;  %v1387_v9 = vsub.s32 3, %v5120_v1 }
 0x8d8   : > { %1812 = vmatprep.mubr.bf16.mxu1 %v4553_v36  ;;  %1853 = vmatprep.mubr.bf16.mxu0 %v4553_v36  ;;  %v5128_v5 = vrot.slane %v5123_v4, %v1399_v2  ;;  %v1376_v10 = vrot.slane %v5132_v7, %v1375_v6  ;;  %v1384_v11 = vrot.slane %v5132_v7, %v1383_v0 }
 0x8d9   : > { %v1380_v12 = vrot.slane %v5132_v7, %v1379_v8  ;;  %v1388_v13 = vrot.slane %v5132_v7, %v1387_v9 }
 0x8da   : > { %1783 = vmatpush1.bf16.msra.mxu1 %v3367_v15  ;;  %1824 = vmatpush1.bf16.msra.mxu0 %v3369_v16 }
 0x8db   : > { %1862 = vmatprep.subr.bf16.mxu1 %v3356_v17  ;;  %1903 = vmatprep.subr.bf16.mxu0 %v3358_v18 }
 0x8dd   : > { %3379 = vmatmul.mubr.msk.bf16.vlgmr.msra.gmra.mrb[20].mxu1 %vm940_vm1, %v5096_v55  ;;  %3380 = vmatmul.mubr.msk.bf16.vlgmr.msra.gmra.mrb[20].mxu0 %vm940_vm1, %v5096_v55 }
 0x8de   : > { %1863 = vmatpush1.bf16.msra.mxu1 %v3355_v23  ;;  %1904 = vmatpush1.bf16.msra.mxu0 %v3357_v24  ;;  %v1395_v24 = vsub.s32 5, %v5120_v1 }
 0x8df   : > { %1864 = vmatprep.subr.bf16.mxu1 %v3372_v25  ;;  %1905 = vmatprep.subr.bf16.mxu0 %v3374_v3  ;;  %v1403_v25 = vsub.s32 7, %v5120_v1 }
 0x8e0   : > { %1894 = vmatprep.mubr.bf16.mxu1 %v4553_v36  ;;  %1935 = vmatprep.mubr.bf16.mxu0 %v4553_v36  ;;  %v3939_v36 = vld [vmem:[#allocation14 + $0x50] sm:$0xff]  }
 0x8e2   : > { %1865 = vmatpush1.bf16.msra.mxu1 %v3371_v26  ;;  %1906 = vmatpush1.bf16.msra.mxu0 %v3373_v27 }
 0x8e3   : > { %3532 = vmatprep.subr.bf16.mxu1 %v3931_v28  ;;  %3554 = vmatprep.subr.bf16.mxu0 %v3932_v29 }
 0x8e5   : > { %3381 = vmatmul.mubr.msk.bf16.vlgmr.msra.gmra.mrb[24].mxu1 %vm940_vm1, %v5096_v55  ;;  %3382 = vmatmul.mubr.msk.bf16.vlgmr.msra.gmra.mrb[24].mxu0 %vm940_vm1, %v5096_v55  ;;  %v3957_v55 = vld [vmem:[#allocation14 + $0x30] sm:$0xff]  }
 0x8e6   : > { %3533 = vmatpush3.bf16.msra.mxu1 %v3933_v30  ;;  %3555 = vmatpush3.bf16.msra.mxu0 %v3934_v31 }
 0x8e7   : > { %3534 = vmatprep.subr.bf16.mxu1 %v3935_v32  ;;  %3556 = vmatprep.subr.bf16.mxu0 %v3936_v33  ;;  %v1396_v33 = vrot.slane %v5132_v7, %v1395_v24 }
 0x8ea   : > { %3535 = vmatpush3.bf16.msra.mxu1 %v3937_v34  ;;  %3557 = vmatpush3.bf16.msra.mxu0 %v3938_v35  ;;  %v1404_v34 = vrot.slane %v5132_v7, %v1403_v25  ;;  %v3965_v35 = vld [vmem:[#allocation14 + $0x100] sm:$0xff]  }
 0x8eb   : > { %3536 = vmatprep.subr.bf16.mxu1 %v3939_v36  ;;  %3558 = vmatprep.subr.bf16.mxu0 %v3940_v37  ;;  %v3966_v36 = vld [vmem:[#allocation14 + $0x180] sm:$0xff]  }
 0x8ee   : > { %3537 = vmatpush3.bf16.msra.mxu1 %v3941_v38  ;;  %3559 = vmatpush3.bf16.msra.mxu0 %v3942_v39  ;;  %v3967_v39 = vld [vmem:[#allocation14 + $0x148] sm:$0xff]  }
 0x8ef   : > { %3538 = vmatprep.subr.bf16.mxu1 %v3943_v40  ;;  %3560 = vmatprep.subr.bf16.mxu0 %v3944_v41  ;;  %v3968_v40 = vld [vmem:[#allocation14 + $0x1c8] sm:$0xff]  }
 0x8f2   : > { %3539 = vmatpush3.bf16.msra.mxu1 %v3945_v42  ;;  %3561 = vmatpush3.bf16.msra.mxu0 %v3946_v43 }
 0x8f3   : > { %3540 = vmatprep.subr.bf16.mxu1 %v3947_v44  ;;  %3562 = vmatprep.subr.bf16.mxu0 %v3948_v45 }
 0x8f6   : > { %3541 = vmatpush3.bf16.msra.mxu1 %v3949_v46  ;;  %3563 = vmatpush3.bf16.msra.mxu0 %v3950_v47 }
 0x8f7   : > { %3542 = vmatprep.subr.bf16.mxu1 %v3951_v48  ;;  %3564 = vmatprep.subr.bf16.mxu0 %v3952_v49  ;;  %v3969_v49 = vld [vmem:[#allocation14 + $0x108] sm:$0xff]  }
 0x8fa   : > { %3543 = vmatpush3.bf16.msra.mxu1 %v3953_v50  ;;  %3565 = vmatpush3.bf16.msra.mxu0 %v3954_v51  ;;  %v3970_v50 = vld [vmem:[#allocation14 + $0x188] sm:$0xff]  }
 0x8fb   : > { %3544 = vmatprep.subr.bf16.mxu1 %v3955_v52  ;;  %3566 = vmatprep.subr.bf16.mxu0 %v3956_v53  ;;  %v3971_v53 = vld [vmem:[#allocation14 + $0x150] sm:$0xff]  }
 0x8fe   : > { %3545 = vmatpush3.bf16.msra.mxu1 %v3957_v55  ;;  %3567 = vmatpush3.bf16.msra.mxu0 %v3958_v56  ;;  %v3972_v55 = vld [vmem:[#allocation14 + $0x1d0] sm:$0xff]  }
 0x8ff   : > { %3546 = vmatprep.subr.bf16.mxu1 %v3959_v57  ;;  %3568 = vmatprep.subr.bf16.mxu0 %v3960_v58  ;;  %v1408_v58 = vrot.slane %v5123_v4, %v1375_v6 }
 0x902   : > { %3547 = vmatpush3.bf16.msra.mxu1 %v3961_v59  ;;  %3569 = vmatpush3.bf16.msra.mxu0 %v3962_v60  ;;  %v1416_v59 = vrot.slane %v5123_v4, %v1383_v0 }
 0x903   : > { %3576 = vmatprep.subr.bf16.mxu1 %v3963_v61  ;;  %3598 = vmatprep.subr.bf16.mxu0 %v3964_v62  ;;  %v3973_v62 = vld [vmem:[#allocation14 + $0x110] sm:$0xff]  }
 0x9a0   : > { %v1650_v14 = vpop.f32.mrb[12].mxu1  ;;  %v1691_v15 = vpop.f32.mrb[12].mxu0 }
 0x9a1   : > { %v1651_v16 = vadd.f32 %v1650_v14, %v1376_v10  ;;  %v1692_v17 = vadd.f32 %v1691_v15, %v1384_v11  ;;  %v1652_v18 = vpop.f32.mrb[13].mxu1  ;;  %v1693_v19 = vpop.f32.mrb[13].mxu0  ;;  %v3975_v10 = vld [vmem:[#allocation14 + $0x158] sm:$0xff]  }
 0x9a2   : > { %v1653_v20 = vadd.f32 %v1652_v18, %v1380_v12  ;;  %v1694_v21 = vadd.f32 %v1693_v19, %v1388_v13  ;;  %v1654_v22 = vpop.f32.mrb[14].mxu1  ;;  %v1695_v23 = vpop.f32.mrb[14].mxu0  ;;  %v3976_v11 = vld [vmem:[#allocation14 + $0x1d8] sm:$0xff]  }
 0x9a3   : > { %v1944_v3 = vmax.f32 %v1651_v16, 0.0  ;;  %v1946_v26 = vmax.f32 %v1692_v17, 0.0  ;;  %v1655_v27 = vpop.f32.mrb[15].mxu1  ;;  %v1696_v28 = vpop.f32.mrb[15].mxu0  ;;  %v3977_v18 = vld [vmem:[#allocation14 + $0x118] sm:$0xff]   ;;  %v3979_v23 = vld [vmem:[#allocation14 + $0x160] sm:$0xff]  }
 0x9a4   : > { %v1945_v29 = vmax.f32 %v1653_v20, 0.0  ;;  %v1947_v30 = vmax.f32 %v1694_v21, 0.0  ;;  %v3978_v19 = vld [vmem:[#allocation14 + $0x198] sm:$0xff]   ;;  %v1391_v20 = vsub.s32 4, %v5120_v1  ;;  %v3981_v27 = vld [vmem:[#allocation14 + $0x120] sm:$0xff]  }
 0x9a5   : > { %v1960_v37 = vpack.c.bf16 %v1944_v3, %v1944_v3  ;;  %v1962_v38 = vpack.c.bf16 %v1946_v26, %v1946_v26  ;;  %v3980_v3 = vld [vmem:[#allocation14 + $0x1e0] sm:$0xff]   ;;  %v4026_v1 = vld [vmem:[#allocation14 + $0x2b8] sm:$0xff]  }
 0x9a6   : > { %v1961_v31 = vpack.c.bf16 %v1945_v29, %v1945_v29  ;;  %v1963_v32 = vpack.c.bf16 %v1947_v30, %v1947_v30  ;;  %v1424_v26 = vrot.slane %v5123_v4, %v1391_v20  ;;  %v3982_v28 = vld [vmem:[#allocation14 + $0x1a0] sm:$0xff]   ;;  %v3983_v29 = vld [vmem:[#allocation14 + $0x168] sm:$0xff]  }
 0x9a7   : > { %v3984_v30 = vld [vmem:[#allocation14 + $0x1e8] sm:$0xff]  }
 0x9a8   : > { %v5152_v41 = vpop.f32.mrb[16].mxu1  ;;  %v5154_v42 = vpop.f32.mrb[16].mxu0  ;;  %2782 = vmatprep.mubr.bf16.mxu1 %v1961_v31  ;;  %2822 = vmatprep.mubr.bf16.mxu0 %v1963_v32 }
 0x9a9   : > { %v1734_v43 = vpop.f32.mrb[17].mxu1  ;;  %v1775_v44 = vpop.f32.mrb[17].mxu0  ;;  %2783 = vmatmul.mubr.bf16.vlgmr.msra.gmra.mrb[28].mxu1 %v1960_v37  ;;  %2823 = vmatmul.mubr.bf16.vlgmr.msra.gmra.mrb[28].mxu0 %v1962_v38 }
 0x9aa   : > { %v1735_v45 = vadd.f32 %v1734_v43, %v1396_v33  ;;  %v1776_v46 = vadd.f32 %v1775_v44, %v1404_v34  ;;  %3577 = vmatpush3.bf16.msra.mxu1 %v3965_v35  ;;  %3599 = vmatpush3.bf16.msra.mxu0 %v3966_v36  ;;  %v1736_v47 = vpop.f32.mrb[18].mxu1  ;;  %v1777_v48 = vpop.f32.mrb[18].mxu0  ;;  %v1392_v43 = vrot.slane %v5132_v7, %v1391_v20  ;;  %v4006_v20 = vld [vmem:[#allocation14 + $0x290] sm:$0xff]  }
 0x9ab   : > { %v1737_v51 = vpop.f32.mrb[19].mxu1  ;;  %v1778_v52 = vpop.f32.mrb[19].mxu0  ;;  %3578 = vmatprep.subr.bf16.mxu1 %v3967_v39  ;;  %3600 = vmatprep.subr.bf16.mxu0 %v3968_v40  ;;  %v3985_v39 = vld [vmem:[#allocation14 + $0x128] sm:$0xff]   ;;  %v1400_v44 = vrot.slane %v5132_v7, %v1399_v2  ;;  %v3988_v47 = vld [vmem:[#allocation14 + $0x1f0] sm:$0xff]   ;;  %v1412_v48 = vrot.slane %v5123_v4, %v1379_v8  ;;  %v3993_v8 = vld [vmem:[#allocation14 + $0x138] sm:$0xff]  }
 0x9ac   : > { %v1949_v56 = vmax.f32 %v1735_v45, 0.0  ;;  %v1951_v57 = vmax.f32 %v1776_v46, 0.0  ;;  %v3986_v40 = vld [vmem:[#allocation14 + $0x1a8] sm:$0xff]   ;;  %v3990_v51 = vld [vmem:[#allocation14 + $0x1b0] sm:$0xff]   ;;  %v1733_v2 = vadd.f32 %v5152_v41, %v1392_v43  ;;  %v3991_v52 = vld [vmem:[#allocation14 + $0x178] sm:$0xff]   ;;  %v1436_v43 = vrot.slane %v5123_v4, %v1403_v25 }
 0x9ad   : > { %v1774_v7 = vadd.f32 %v5154_v42, %v1400_v44  ;;  %v3997_v42 = vld [vmem:[#allocation14 + $0x200] sm:$0xff]   ;;  %v4021_v44 = vld [vmem:[#allocation14 + $0x230] sm:$0xff]  }
 0x9ae   : > { %v1965_v60 = vpack.c.bf16 %v1949_v56, %v1949_v56  ;;  %v1967_v61 = vpack.c.bf16 %v1951_v57, %v1951_v57  ;;  %3579 = vmatpush3.bf16.msra.mxu1 %v3969_v49  ;;  %3601 = vmatpush3.bf16.msra.mxu0 %v3970_v50  ;;  %v1420_v49 = vrot.slane %v5123_v4, %v1387_v9  ;;  %v3989_v50 = vld [vmem:[#allocation14 + $0x130] sm:$0xff]   ;;  %v3994_v57 = vld [vmem:[#allocation14 + $0x1b8] sm:$0xff]  }
 0x9af   : > { %3580 = vmatprep.subr.bf16.mxu1 %v3971_v53  ;;  %3602 = vmatprep.subr.bf16.mxu0 %v3972_v55  ;;  %v3992_v53 = vld [vmem:[#allocation14 + $0x1f8] sm:$0xff]   ;;  %v1950_v9 = vmax.f32 %v1774_v7, 0.0  ;;  %v4029_v7 = vld [vmem:[#allocation14 + $0x300] sm:$0xff]  }
 0x9b0   : > { %v1814_v12 = vpop.f32.mrb[20].mxu1  ;;  %v1855_v13 = vpop.f32.mrb[20].mxu0  ;;  %2862 = vmatprep.mubr.bf16.mxu1 %v1965_v60  ;;  %2902 = vmatprep.mubr.bf16.mxu0 %v1967_v61  ;;  %v3996_v60 = vld [vmem:[#allocation14 + $0x2c0] sm:$0xff]  }
 0x9b1   : > { %v5158_v14 = vadd.f32 %v1814_v12, %v1408_v58  ;;  %v5160_v15 = vadd.f32 %v1855_v13, %v1416_v59  ;;  %v1816_v6 = vpop.f32.mrb[21].mxu1  ;;  %v1857_v0 = vpop.f32.mrb[21].mxu0  ;;  %v1948_v58 = vmax.f32 %v1733_v2, 0.0  ;;  %v3995_v59 = vld [vmem:[#allocation14 + $0x240] sm:$0xff]   ;;  %v3999_v12 = vld [vmem:[#allocation14 + $0x248] sm:$0xff]  }
 0x9b2   : > { %3581 = vmatpush3.bf16.msra.mxu1 %v3973_v62  ;;  %3603 = vmatpush3.bf16.msra.mxu0 %v3974_v63  ;;  %v1818_v16 = vpop.f32.mrb[22].mxu1  ;;  %v1859_v17 = vpop.f32.mrb[22].mxu0  ;;  %v1817_v55 = vadd.f32 %v1816_v6, %v1412_v48  ;;  %v1858_v56 = vadd.f32 %v1857_v0, %v1420_v49  ;;  %v1966_v63 = vpack.c.bf16 %v1950_v9, %v1950_v9  ;;  %v4000_v13 = vld [vmem:[#allocation14 + $0x2c8] sm:$0xff]   ;;  %v4025_v49 = vld [vmem:[#allocation14 + $0x238] sm:$0xff]   ;;  %v4037_v9 = vld [vmem:[#allocation14 + $0x310] sm:$0xff]  }
 0x9b3   : > { %v1819_v21 = vpop.f32.mrb[23].mxu1  ;;  %v1860_v22 = vpop.f32.mrb[23].mxu0  ;;  %3582 = vmatprep.subr.bf16.mxu1 %v3975_v10  ;;  %3604 = vmatprep.subr.bf16.mxu0 %v3976_v11  ;;  %v1964_v62 = vpack.c.bf16 %v1948_v58, %v1948_v58  ;;  %v3998_v10 = vld [vmem:[#allocation14 + $0x280] sm:$0xff]   ;;  %v4001_v0 = vld [vmem:[#allocation14 + $0x208] sm:$0xff]   ;;  %v4003_v17 = vld [vmem:[#allocation14 + $0x250] sm:$0xff]   ;;  %v1954_v25 = vmax.f32 %v5160_v15, 0.0 }
 0x9b4   : > { %v1953_v61 = vmax.f32 %v1817_v55, 0.0  ;;  %v1955_v41 = vmax.f32 %v1858_v56, 0.0  ;;  %v4002_v16 = vld [vmem:[#allocation14 + $0x288] sm:$0xff]   ;;  %v4007_v21 = vld [vmem:[#allocation14 + $0x258] sm:$0xff]   ;;  %v4036_v58 = vld [vmem:[#allocation14 + $0x3d0] sm:$0xff]  }
 0x9b5   : > { %v4008_v22 = vld [vmem:[#allocation14 + $0x2d8] sm:$0xff]   ;;  %v4032_v55 = vld [vmem:[#allocation14 + $0x3c8] sm:$0xff]  }
 0x9b6   : > { %3583 = vmatpush3.bf16.msra.mxu1 %v3977_v18  ;;  %3605 = vmatpush3.bf16.msra.mxu0 %v3978_v19  ;;  %v1969_v11 = vpack.c.bf16 %v1953_v61, %v1953_v61  ;;  %v1971_v6 = vpack.c.bf16 %v1955_v41, %v1955_v41  ;;  %v4004_v18 = vld [vmem:[#allocation14 + $0x2d0] sm:$0xff]   ;;  %v4033_v15 = vld [vmem:[#allocation14 + $0x308] sm:$0xff]   ;;  %v4040_v61 = vld [vmem:[#allocation14 + $0x3d8] sm:$0xff]  }
 0x9b7   : > { %3584 = vmatprep.subr.bf16.mxu1 %v3979_v23  ;;  %3606 = vmatprep.subr.bf16.mxu0 %v3980_v3  ;;  %v4005_v19 = vld [vmem:[#allocation14 + $0x210] sm:$0xff]   ;;  %v4009_v23 = vld [vmem:[#allocation14 + $0x218] sm:$0xff]  }
 0x9b8   : > { %v1896_v31 = vpop.f32.mrb[24].mxu1  ;;  %v1937_v32 = vpop.f32.mrb[24].mxu0  ;;  %v4010_v3 = vld [vmem:[#allocation14 + $0x298] sm:$0xff]  }
 0x9b9   : > { %v5164_v33 = vadd.f32 %v1896_v31, %v1424_v26  ;;  %v5167_v34 = vadd.f32 %v1937_v32, %v5128_v5  ;;  %v5169_v35 = vpop.f32.mrb[25].mxu1  ;;  %v5171_v36 = vpop.f32.mrb[25].mxu0  ;;  %v3987_v5 = vld [vmem:[#allocation14 + $0x170] sm:$0xff]   ;;  %v4011_v26 = vld [vmem:[#allocation14 + $0x260] sm:$0xff]   ;;  %v4016_v31 = vld [vmem:[#allocation14 + $0x2e8] sm:$0xff]  }
 0x9ba   : > { %3585 = vmatpush3.bf16.msra.mxu1 %v3981_v27  ;;  %3607 = vmatpush3.bf16.msra.mxu0 %v3982_v28  ;;  %v1900_v37 = vpop.f32.mrb[26].mxu1  ;;  %v1941_v38 = vpop.f32.mrb[26].mxu0  ;;  %v4012_v27 = vld [vmem:[#allocation14 + $0x2e0] sm:$0xff]   ;;  %v4017_v32 = vld [vmem:[#allocation14 + $0x228] sm:$0xff]   ;;  %v1940_v48 = vadd.f32 %v5171_v36, %v1436_v43  ;;  %v1970_v36 = vpack.c.bf16 %v1954_v25, %v1954_v25  ;;  %v4041_v41 = vld [vmem:[#allocation14 + $0x318] sm:$0xff]  }
 0x9bb   : > { %v1901_v45 = vpop.f32.mrb[27].mxu1  ;;  %v1942_v46 = vpop.f32.mrb[27].mxu0  ;;  %3586 = vmatprep.subr.bf16.mxu1 %v3983_v29  ;;  %3608 = vmatprep.subr.bf16.mxu0 %v3984_v30  ;;  %v4013_v28 = vld [vmem:[#allocation14 + $0x220] sm:$0xff]   ;;  %v4015_v30 = vld [vmem:[#allocation14 + $0x268] sm:$0xff]   ;;  %v4019_v38 = vld [vmem:[#allocation14 + $0x270] sm:$0xff]  }
 0x9bc   : > { %v4014_v29 = vld [vmem:[#allocation14 + $0x2a0] sm:$0xff]   ;;  %v4018_v37 = vld [vmem:[#allocation14 + $0x2a8] sm:$0xff]   ;;  %v4022_v45 = vld [vmem:[#allocation14 + $0x2b0] sm:$0xff]   ;;  %v1959_v2 = vmax.f32 %v1940_v48, 0.0 }
 0x9bd   : > { %v4023_v46 = vld [vmem:[#allocation14 + $0x278] sm:$0xff]  }
 0x9be   : > { %3587 = vmatpush3.bf16.msra.mxu1 %v3985_v39  ;;  %3609 = vmatpush3.bf16.msra.mxu0 %v3986_v40  ;;  %v4020_v39 = vld [vmem:[#allocation14 + $0x2f0] sm:$0xff]   ;;  %v1428_v40 = vrot.slane %v5123_v4, %v1395_v24  ;;  %v1952_v24 = vmax.f32 %v5158_v14, 0.0  ;;  %v4027_v4 = vld [vmem:[#allocation14 + $0x340] sm:$0xff]   ;;  %v1975_v56 = vpack.c.bf16 %v1959_v2, %v1959_v2 }
 0x9bf   : > { %3588 = vmatprep.subr.bf16.mxu1 %v3987_v5  ;;  %3610 = vmatprep.subr.bf16.mxu0 %v3988_v47  ;;  %v4024_v5 = vld [vmem:[#allocation14 + $0x2f8] sm:$0xff]  }
 0x9c0   : > { %v1899_v47 = vadd.f32 %v5169_v35, %v1428_v40  ;;  %v4030_v35 = vld [vmem:[#allocation14 + $0x380] sm:$0xff]  }
 0x9c2   : > { %3589 = vmatpush3.bf16.msra.mxu1 %v3989_v50  ;;  %3611 = vmatpush3.bf16.msra.mxu0 %v3990_v51  ;;  %v4028_v50 = vld [vmem:[#allocation14 + $0x3c0] sm:$0xff]   ;;  %v1957_v51 = vmax.f32 %v1899_v47, 0.0 }
 0x9c3   : > { %3590 = vmatprep.subr.bf16.mxu1 %v3991_v52  ;;  %3612 = vmatprep.subr.bf16.mxu0 %v3992_v53  ;;  %v1968_v52 = vpack.c.bf16 %v1952_v24, %v1952_v24  ;;  %v4031_v53 = vld [vmem:[#allocation14 + $0x348] sm:$0xff]  }
 0x9c4   : > { %v1973_v14 = vpack.c.bf16 %v1957_v51, %v1957_v51 }
 0x9c6   : > { %3591 = vmatpush3.bf16.msra.mxu1 %v3993_v8  ;;  %3613 = vmatpush3.bf16.msra.mxu0 %v3994_v57  ;;  %v4034_v8 = vld [vmem:[#allocation14 + $0x388] sm:$0xff]   ;;  %v4035_v57 = vld [vmem:[#allocation14 + $0x350] sm:$0xff]  }
 0x9c7   : > { %3620 = vmatprep.subr.bf16.mxu1 %v3995_v59  ;;  %3642 = vmatprep.subr.bf16.mxu0 %v3996_v60  ;;  %v4038_v59 = vld [vmem:[#allocation14 + $0x390] sm:$0xff]   ;;  %v4039_v60 = vld [vmem:[#allocation14 + $0x358] sm:$0xff]  }
 0x9c9   : > { %2863 = vmatmul.mubr.bf16.vlgmr.msra.gmra.mrb[32].mxu1 %v1964_v62  ;;  %2903 = vmatmul.mubr.bf16.vlgmr.msra.gmra.mrb[32].mxu0 %v1966_v63  ;;  %v4043_v62 = vld [vmem:[#allocation14 + $0x360] sm:$0xff]  }
 0x9ca   : > { %3621 = vmatpush3.bf16.msra.mxu1 %v3997_v42  ;;  %2942 = vmatprep.mubr.bf16.mxu1 %v1969_v11  ;;  %v4042_v42 = vld [vmem:[#allocation14 + $0x398] sm:$0xff]   ;;  %v4044_v63 = vld [vmem:[#allocation14 + $0x3e0] sm:$0xff]  }
 0x9cb   : > { %3643 = vmatpush3.bf16.msra.mxu0 %v3998_v10  ;;  %2982 = vmatprep.mubr.bf16.mxu0 %v1971_v6  ;;  %v4045_v10 = vld [vmem:[#allocation14 + $0x320] sm:$0xff]   ;;  %v4049_v6 = vld [vmem:[#allocation14 + $0x328] sm:$0xff]  }
 0x9cc   : > { %3622 = vmatprep.subr.bf16.mxu1 %v3999_v12  ;;  %3644 = vmatprep.subr.bf16.mxu0 %v4000_v13  ;;  %v4046_v11 = vld [vmem:[#allocation14 + $0x3a0] sm:$0xff]   ;;  %v4047_v12 = vld [vmem:[#allocation14 + $0x368] sm:$0xff]  }
 0x9cd   : > { %v4048_v13 = vld [vmem:[#allocation14 + $0x3e8] sm:$0xff]  }
 0x9ce   : > { %3623 = vmatpush3.bf16.msra.mxu1 %v4001_v0  ;;  %v4050_v0 = vld [vmem:[#allocation14 + $0x3a8] sm:$0xff]  }
 0x9cf   : > { %3645 = vmatpush3.bf16.msra.mxu0 %v4002_v16  ;;  %3624 = vmatprep.subr.bf16.mxu1 %v4003_v17  ;;  %v4051_v16 = vld [vmem:[#allocation14 + $0x370] sm:$0xff]  }
 0x9d0   : > { %3646 = vmatprep.subr.bf16.mxu0 %v4004_v18  ;;  %v4052_v17 = vld [vmem:[#allocation14 + $0x3f0] sm:$0xff]  }
 0x9d1   : > { %v4053_v18 = vld [vmem:[#allocation14 + $0x330] sm:$0xff]  }
 0x9d2   : > { %3625 = vmatpush3.bf16.msra.mxu1 %v4005_v19  ;;  %v4054_v19 = vld [vmem:[#allocation14 + $0x3b0] sm:$0xff]  }
 0x9d3   : > { %3647 = vmatpush3.bf16.msra.mxu0 %v4006_v20  ;;  %3626 = vmatprep.subr.bf16.mxu1 %v4007_v21  ;;  %v4055_v20 = vld [vmem:[#allocation14 + $0x378] sm:$0xff]  }
 0x9d4   : > { %3648 = vmatprep.subr.bf16.mxu0 %v4008_v22  ;;  %v4056_v21 = vld [vmem:[#allocation14 + $0x3f8] sm:$0xff]  }
 0x9d5   : > { %v4057_v22 = vld [vmem:[#allocation14 + $0x338] sm:$0xff]  }
 0x9d6   : > { %3627 = vmatpush3.bf16.msra.mxu1 %v4009_v23  ;;  %v1956_v23 = vmax.f32 %v5164_v33, 0.0 }
 0x9d7   : > { %3649 = vmatpush3.bf16.msra.mxu0 %v4010_v3  ;;  %3628 = vmatprep.subr.bf16.mxu1 %v4011_v26  ;;  %v4058_v3 = vld [vmem:[#allocation14 + $0x3b8] sm:$0xff]   ;;  %v1958_v26 = vmax.f32 %v5167_v34, 0.0 }
 0x9d8   : > { %3650 = vmatprep.subr.bf16.mxu0 %v4012_v27  ;;  %v1972_v27 = vpack.c.bf16 %v1956_v23, %v1956_v23 }
 0x9da   : > { %3629 = vmatpush3.bf16.msra.mxu1 %v4013_v28  ;;  %v1974_v28 = vpack.c.bf16 %v1958_v26, %v1958_v26 }
 0x9db   : > { %3651 = vmatpush3.bf16.msra.mxu0 %v4014_v29  ;;  %3630 = vmatprep.subr.bf16.mxu1 %v4015_v30 }
 0x9dc   : > { %3652 = vmatprep.subr.bf16.mxu0 %v4016_v31  ;;  %v3383_v31 = vld [vmem:[#allocation16] ss:$0 sm:$0xff] }
 0x9de   : > { %3631 = vmatpush3.bf16.msra.mxu1 %v4017_v32 }
 0x9df   : > { %3653 = vmatpush3.bf16.msra.mxu0 %v4018_v37  ;;  %3632 = vmatprep.subr.bf16.mxu1 %v4019_v38 }
 0x9e0   : > { %3654 = vmatprep.subr.bf16.mxu0 %v4020_v39 }
 0x9e2   : > { %3633 = vmatpush3.bf16.msra.mxu1 %v4021_v44 }
 0x9e3   : > { %3655 = vmatpush3.bf16.msra.mxu0 %v4022_v45  ;;  %3634 = vmatprep.subr.bf16.mxu1 %v4023_v46 }
 0x9e4   : > { %3656 = vmatprep.subr.bf16.mxu0 %v4024_v5 }
 0x9e6   : > { %3635 = vmatpush3.bf16.msra.mxu1 %v4025_v49 }
 0x9e7   : > { %3657 = vmatpush3.bf16.msra.mxu0 %v4026_v1  ;;  %3664 = vmatprep.subr.bf16.mxu1 %v4027_v4 }
 0x9e8   : > { %3686 = vmatprep.subr.bf16.mxu0 %v4028_v50 }
 0x9e9   : > { %2943 = vmatmul.mubr.bf16.vlgmr.msra.gmra.mrb[36].mxu1 %v1968_v52 }
 0x9ea   : > { %2983 = vmatmul.mubr.bf16.vlgmr.msra.gmra.mrb[36].mxu0 %v1970_v36  ;;  %3665 = vmatpush3.bf16.msra.mxu1 %v4029_v7 }
 0x9eb   : > { %3022 = vmatprep.mubr.bf16.mxu1 %v1973_v14  ;;  %3687 = vmatpush3.bf16.msra.mxu0 %v4030_v35 }
 0x9ec   : > { %3062 = vmatprep.mubr.bf16.mxu0 %v1975_v56  ;;  %3666 = vmatprep.subr.bf16.mxu1 %v4031_v53 }
 0x9ed   : > { %3688 = vmatprep.subr.bf16.mxu0 %v4032_v55 }
 0x9ee   : > { %3667 = vmatpush3.bf16.msra.mxu1 %v4033_v15 }
 0x9ef   : > { %3689 = vmatpush3.bf16.msra.mxu0 %v4034_v8  ;;  %3668 = vmatprep.subr.bf16.mxu1 %v4035_v57 }
 0x9f0   : > { %3690 = vmatprep.subr.bf16.mxu0 %v4036_v58 }
 0x9f2   : > { %3669 = vmatpush3.bf16.msra.mxu1 %v4037_v9 }
 0x9f3   : > { %3691 = vmatpush3.bf16.msra.mxu0 %v4038_v59  ;;  %3670 = vmatprep.subr.bf16.mxu1 %v4039_v60 }
 0x9f4   : > { %3692 = vmatprep.subr.bf16.mxu0 %v4040_v61 }
 0x9f6   : > { %3671 = vmatpush3.bf16.msra.mxu1 %v4041_v41 }
 0x9f7   : > { %3693 = vmatpush3.bf16.msra.mxu0 %v4042_v42  ;;  %3672 = vmatprep.subr.bf16.mxu1 %v4043_v62 }
 0x9f8   : > { %3694 = vmatprep.subr.bf16.mxu0 %v4044_v63 }
 0x9fa   : > { %3673 = vmatpush3.bf16.msra.mxu1 %v4045_v10 }
 0x9fb   : > { %3695 = vmatpush3.bf16.msra.mxu0 %v4046_v11  ;;  %3674 = vmatprep.subr.bf16.mxu1 %v4047_v12 }
 0x9fc   : > { %3696 = vmatprep.subr.bf16.mxu0 %v4048_v13 }
 0x9fe   : > { %3675 = vmatpush3.bf16.msra.mxu1 %v4049_v6 }
 0x9ff   : > { %3697 = vmatpush3.bf16.msra.mxu0 %v4050_v0  ;;  %3676 = vmatprep.subr.bf16.mxu1 %v4051_v16 }
 0xa00   : > { %3698 = vmatprep.subr.bf16.mxu0 %v4052_v17 }
 0xa02   : > { %3677 = vmatpush3.bf16.msra.mxu1 %v4053_v18 }
 0xa03   : > { %3699 = vmatpush3.bf16.msra.mxu0 %v4054_v19  ;;  %3678 = vmatprep.subr.bf16.mxu1 %v4055_v20 }
 0xa04   : > { %3700 = vmatprep.subr.bf16.mxu0 %v4056_v21 }
 0xa06   : > { %3679 = vmatpush3.bf16.msra.mxu1 %v4057_v22 }
 0xa07   : > { %3701 = vmatpush3.bf16.msra.mxu0 %v4058_v3 }
 0xa09   : > { %3023 = vmatmul.mubr.bf16.vlgmr.msra.gmra.mrb[40].mxu1 %v1972_v27  ;;  %v3513_v27 = vld [vmem:[#allocation22] ss:$0 sm:$0xff] }
 0xa0a   : > { %3063 = vmatmul.mubr.bf16.vlgmr.msra.gmra.mrb[40].mxu0 %v1974_v28 }
 0xa7c   : > { %v3548_v29 = vpop.f32.mrb[28].mxu1  ;;  %v3570_v30 = vpop.f32.mrb[28].mxu0 }
 0xa7d   : > { %v3549_v32 = vpop.f32.mrb[29].mxu1  ;;  %v3571_v37 = vpop.f32.mrb[29].mxu0 }
 0xa7e   : > { %v3550_v38 = vadd.f32 %v3549_v32, %v3548_v29  ;;  %v3572_v39 = vadd.f32 %v3571_v37, %v3570_v30  ;;  %v3551_v33 = vpop.f32.mrb[30].mxu1  ;;  %v3573_v40 = vpop.f32.mrb[30].mxu0 }
 0xa7f   : > { %v3552_v43 = vpop.f32.mrb[31].mxu1  ;;  %v3574_v44 = vpop.f32.mrb[31].mxu0 }
 0xa80   : > { %v2785_v45 = vadd.f32 %v3550_v38, %v3383_v31 }
 0xa82   : > { %v2825_v34 = vadd.f32 %v3572_v39, %v2785_v45 }
 0xa9c   : > { %v3592_v46 = vpop.f32.mrb[32].mxu1  ;;  %v3614_v5 = vpop.f32.mrb[32].mxu0 }
 0xa9d   : > { %v3593_v47 = vpop.f32.mrb[33].mxu1  ;;  %v3615_v48 = vpop.f32.mrb[33].mxu0 }
 0xa9e   : > { %v3594_v49 = vadd.f32 %v3593_v47, %v3592_v46  ;;  %v3616_v24 = vadd.f32 %v3615_v48, %v3614_v5  ;;  %v3595_v1 = vpop.f32.mrb[34].mxu1  ;;  %v3617_v4 = vpop.f32.mrb[34].mxu0 }
 0xa9f   : > { %v3596_v25 = vpop.f32.mrb[35].mxu1  ;;  %v3618_v50 = vpop.f32.mrb[35].mxu0 }
 0xaa0   : > { %v2865_v51 = vadd.f32 %v3594_v49, %v2825_v34 }
 0xaa2   : > { %v2905_v2 = vadd.f32 %v3616_v24, %v2865_v51 }
 0xabc   : > { %v3636_v7 = vpop.f32.mrb[36].mxu1 }
 0xabd   : > { %v3658_v52 = vpop.f32.mrb[36].mxu0  ;;  %v3637_v35 = vpop.f32.mrb[37].mxu1 }
 0xabe   : > { %v3638_v36 = vadd.f32 %v3637_v35, %v3636_v7  ;;  %v3659_v53 = vpop.f32.mrb[37].mxu0  ;;  %v3639_v14 = vpop.f32.mrb[38].mxu1 }
 0xabf   : > { %v3660_v55 = vadd.f32 %v3659_v53, %v3658_v52  ;;  %v3661_v56 = vpop.f32.mrb[38].mxu0  ;;  %v3640_v15 = vpop.f32.mrb[39].mxu1 }
 0xac0   : > { %v2945_v8 = vadd.f32 %v3638_v36, %v2905_v2  ;;  %v3662_v57 = vpop.f32.mrb[39].mxu0 }
 0xac2   : > { %v2985_v58 = vadd.f32 %v3660_v55, %v2945_v8 }
 0xadc   : > { %v3680_v9 = vpop.f32.mrb[40].mxu1 }
 0xadd   : > { %v3702_v59 = vpop.f32.mrb[40].mxu0  ;;  %v3681_v60 = vpop.f32.mrb[41].mxu1 }
 0xade   : > { %v3682_v61 = vadd.f32 %v3681_v60, %v3680_v9  ;;  %v3703_v41 = vpop.f32.mrb[41].mxu0  ;;  %v3683_v42 = vpop.f32.mrb[42].mxu1 }
 0xadf   : > { %v3704_v62 = vadd.f32 %v3703_v41, %v3702_v59  ;;  %v3705_v63 = vpop.f32.mrb[42].mxu0  ;;  %v3684_v10 = vpop.f32.mrb[43].mxu1 }
 0xae0   : > { %v3025_v11 = vadd.f32 %v3682_v61, %v2985_v58  ;;  %v3706_v12 = vpop.f32.mrb[43].mxu0 }
 0xae2   : > { %v3065_v13 = vadd.f32 %v3704_v62, %v3025_v11 }
 0xae4   : > { %v3070_v6 = vadd.f32 %v3065_v13, %v5092_v54  ;;  %v3512_v54 = vld [vmem:[#allocation20] ss:$0 sm:$0xff] }
 0xae6   : > { %v3071_v0 = vsel %vm1341_vm6, %v3070_v6, 0.0 }
 0xae7   : > { %3072 = vadd.xlane.f32.xlu0 %v3071_v0 }
 0xb74   : > { %v3073_v16 = vpop.xlane.xlu0 %3072 }
 0xb75   : > { %v3074_v17 = vmul.f32 0.03125, %v3073_v16 }
 0xb77   : > { %v3075_v18 = vsub.f32 %v3070_v6, %v3074_v17 }
 0xb79   : > { %v3076_v19 = vmul.f32 %v3075_v18, %v3075_v18 }
 0xb7b   : > { %v3077_v20 = vsel %vm1341_vm6, %v3076_v19, 0.0 }
 0xb7c   : > { %3078 = vadd.xlane.f32.xlu0 %v3077_v20 }
 0xc09   : > { %v3079_v21 = vpop.xlane.xlu0 %3078 }
 0xc0a   : > { %v3080_v22 = vmul.f32 0.03125, %v3079_v21 }
 0xc0c   : > { %v3081_v23 = vadd.f32 1e-05, %v3080_v22 }
 0xc0e   : > { %4069 = vrsqrt.f32 %v3081_v23 }
 0xc18   : > { %v4070_v3 = vpop.eup %4069 }
 0xc19   : > { %v3083_v26 = vmul.f32 %v4070_v3, %v3075_v18 }
 0xc1b   : > { %v3090_v28 = vmul.f32 %v3512_v54, %v3083_v26 }
 0xc1d   : > { %v3097_v29 = vadd.f32 %v3513_v27, %v3090_v28 }
 0xc1f   : > { %3098 = vst.msk [vmem:[%s613_s2] sm:$0xf] %vm1341_vm6, %v3097_v29 }
 0xc20   : > { %4450 = shalt.err (!%p4447_p9)
}
 0xc21   : > { %s4451_s30 = scalar_lea.hbm %s5206_s21, 64  ;;  %s4455_s20 = scalar_lea.hbm %s5312_s29, 128 }
 0xc22   : > { %p4452_p7 = scmp.ne.s32.totalorder %s5206_s21, %s4451_s30  ;;  %p4456_p13 = scmp.lt.u32.totalorder %s5206_s21, %s5312_s29 }
 0xc23   : > { %p4457_p3 = scmp.lt.u32.totalorder %s4455_s20, %s4451_s30  ;;  %p4459_p2 = scmp.lt.u32.totalorder %s4451_s30, %s5206_s21 }
 0xc24   : > { %p4453_p4 = pnand %p4452_p7, %p5313_p1 }
 0xc25   : > { %p4458_p0 = por %p4457_p3, %p4456_p13 }
 0xc26   : > { %p4454_p12 = pneg %p4453_p4 }
 0xc27   : > { %p4460_p6 = por %p4459_p2, %p4458_p0 }
 0xc29   : > { %p4461_p10 = pnand %p4460_p6, %p4454_p12 }
 0xc2b   : > { %4464 = shalt.err (!%p4461_p10)
}
 0xc2c   : > { %3798 = dma.vmem_to_hbm [thread:$0]  (%p5313_p1), %s5208_s25, 64, %s5206_s21, %s3100_s24  }
 0xc2d PF: > { %s5314_s13 = sld [smem:[#allocation32_spill]]  ;;  %p5315_p11 = scmp.ne.s32.totalorder %s5293_s22, 0 }
 0xc2e   : > { %p5316_p8 = scmp.ge.s32.totalorder %s4527_s28, 2 }
 0xc30   : > { %p3842_p5 = pnand %p5316_p8, %p5315_p11 }
 0xc33   : > { %s3125_s1 = sand.u32 1, %s5314_s13  }
 0xc34   : > { %s3126_s23 = scalar_lea.sflag [#allocation4], %s3125_s1 }
 0xc35   : > { %4510 = dma.done.wait (!%p3842_p5), %s3126_s23, 64  }
 0xc36   : > { %4512 = vsyncadd (!%p3842_p5), %s3126_s23, 4294967232  ;;  %p32_p9 = scmp.ge.s32.totalorder %s4950_s18, 4   ;;  %s5317_s25 = smov %s4519_s26 }
 0xc37   : > { %s5318_s26 = smov %s4523_s27  ;;  %s5319_s27 = smov %s4962_s17 }
 0xc38   : > { %s5320_s28 = smov %s4950_s18  ;;  %34 = sbr.rel (!%p32_p9) target bundleno = 16 (0x10), region = 165 }
 0xc3f   :  { %3131 = vsyncpa [#allocation3], 1 }
 0xc40   :  { %3133 = vsyncpa [#allocation3 + $0x1], 1 }
 0xc41   :  { %3134 = vsyncpa [#allocation6], 1 }
 0xc42   :  { %3135 = vsyncpa [#allocation9], 1 }
 0xc43   :  { %3136 = vsyncpa [#allocation12], 1 }
 0xc44   :  { %3137 = vsyncpa [#allocation15], 1 }
 0xc45   :  { %3138 = vsyncpa [#allocation18], 1 }
 0xc46   :  { %3139 = vsyncpa [#allocation21], 1 }
 0xc47   :  { %3140 = vsyncpa [#allocation4], 1 }
 0xc48   :  { %3142 = vsyncpa [#allocation4 + $0x1], 1 }

// kernel: mutual_forward.8
= control target key start
LH: loop header
LB: loop body
LE: loop exit
PB: predicated region body
PF: predicated region fallthrough
CT: control target
= control target key end

     0   :  { %10 = vsyncpa [#allocation3], 0  ;;  %s2036_s0 = inlined_call_operand.hbm [shape: bf16[32,768], index: 0, kind: input, shape index: {}]   ;;  %s2037_s1 = inlined_call_operand.hbm [shape: bf16[32,768], index: 1, kind: input, shape index: {}]   ;;  %s2038_s2 = inlined_call_operand.hbm [shape: bf16[768,128], index: 2, kind: input, shape index: {}]   ;;  %s2039_s3 = inlined_call_operand.hbm [shape: f32[1,128], index: 3, kind: input, shape index: {}]   ;;  %s2040_s4 = inlined_call_operand.hbm [shape: bf16[768,128], index: 4, kind: input, shape index: {}]   ;;  %s2041_s5 = inlined_call_operand.hbm [shape: f32[32,128], index: 5, kind: output, shape index: {}]  }
   0x1   :  { %11 = vsyncpa [#allocation6], 0 }
   0x2   :  { %12 = vsyncpa [#allocation9], 0 }
   0x3   :  { %13 = vsyncpa [#allocation4], 0  ;;  %s1901_s18 = smov [#allocation5]   ;;  %s1902_s20 = smov [#allocation8]  }
   0x4   :  { %s31_s19 = sshll.u32 %s1901_s18, 4  ;;  %s56_s21 = sshll.u32 %s1902_s20, 4  ;;  %s32_s19 = int_to_ptr.vmem [resolvable:$true] %s31_s19  ;;  %s1943_s21 = int_to_ptr.vmem [resolvable:$true] %s56_s21 }
   0x5   :  { %s1761_s24 = scalar_lea.hbm %s2037_s1, 1536 }
   0x6   :  { %p1762_p0 = scmp.ne.s32.totalorder %s2037_s1, %s1761_s24  ;;  %p1765_p1 = scmp.lt.u32.totalorder %s1761_s24, %s2037_s1 }
   0x8   :  { %p1767_p2 = pnand %p1765_p1, %p1762_p0 }
   0xa   :  { %1770 = shalt.err (!%p1767_p2)
}
   0xb   :  { %s1771_s29 = scalar_lea.vmem %s32_s19, 1536  ;;  %p1776_p4 = scmp.lt.s32.totalorder %s32_s19, %s32_s19 }
   0xc   :  { %p1772_p3 = scmp.ne.s32.totalorder %s32_s19, %s1771_s29  ;;  %p1777_p5 = scmp.lt.s32.totalorder %s1771_s29, %s1771_s29 }
   0xe   :  { %p1778_p6 = por %p1777_p5, %p1776_p4 }
  0x10   :  { %p1779_p7 = pnand %p1778_p6, %p1772_p3 }
  0x12   :  { %1782 = shalt.err (!%p1779_p7)
}
  0x13   :  { %s1903_s30 = smov 384   ;;  %s1904_s6 = smov 24  }
  0x14   :  { %37 = dma.hbm_to_vmem [thread:$0]  %s2037_s1, 1536, %s32_s19, [#allocation6], %s1903_s30, %s1903_s30, %s1904_s6  }
  0x15   :  { %s1783_s11 = scalar_lea.hbm %s2039_s3, 16 }
  0x16   :  { %p1784_p8 = scmp.ne.s32.totalorder %s2039_s3, %s1783_s11  ;;  %p1787_p9 = scmp.lt.u32.totalorder %s1783_s11, %s2039_s3 }
  0x18   :  { %p1789_p10 = pnand %p1787_p9, %p1784_p8 }
  0x1a   :  { %1792 = shalt.err (!%p1789_p10)
}
  0x1b   :  { %s1793_s16 = scalar_lea.vmem %s1943_s21, 16  ;;  %s1797_s1 = scalar_lea.vmem %s1943_s21, 32 }
  0x1c   :  { %p1794_p11 = scmp.ne.s32.totalorder %s1943_s21, %s1793_s16  ;;  %p1798_p12 = scmp.lt.s32.totalorder %s1943_s21, %s1943_s21 }
  0x1d   :  { %p1799_p13 = scmp.lt.s32.totalorder %s1797_s1, %s1793_s16 }
  0x1f   :  { %p1800_p0 = por %p1799_p13, %p1798_p12 }
  0x21   :  { %p1801_p1 = pnand %p1800_p0, %p1794_p11 }
  0x23   :  { %1804 = shalt.err (!%p1801_p1)
}
  0x24   :  { %59 = dma.hbm_to_vmem [thread:$0]  %s2039_s3, 16, %s1943_s21, [#allocation9]  }
  0x25   :  { %s1905_s19 = smov [#allocation2]   ;;  %s1906_s22 = smov [#allocation7]  }
  0x26   :  { %s19_s20 = sshll.u32 %s1905_s19, 4  ;;  %s43_s23 = sshll.u32 %s1906_s22, 4  ;;  %s20_s20 = int_to_ptr.vmem [resolvable:$true] %s19_s20  ;;  %s1978_s23 = int_to_ptr.vmem [resolvable:$true] %s43_s23 }
  0x27   :  { %s1805_s26 = scalar_lea.hbm %s2036_s0, 1536 }
  0x28   :  { %p1806_p2 = scmp.ne.s32.totalorder %s2036_s0, %s1805_s26  ;;  %p1809_p3 = scmp.lt.u32.totalorder %s1805_s26, %s2036_s0 }
  0x2a   :  { %p1811_p4 = pnand %p1809_p3, %p1806_p2 }
  0x2c   :  { %1814 = shalt.err (!%p1811_p4)
}
  0x2d   :  { %s1815_s3 = scalar_lea.vmem %s20_s20, 1536  ;;  %p1820_p6 = scmp.lt.s32.totalorder %s20_s20, %s20_s20 }
  0x2e   :  { %p1816_p5 = scmp.ne.s32.totalorder %s20_s20, %s1815_s3  ;;  %p1821_p7 = scmp.lt.s32.totalorder %s1815_s3, %s1815_s3 }
  0x30   :  { %p1822_p8 = por %p1821_p7, %p1820_p6 }
  0x32   :  { %p1823_p9 = pnand %p1822_p8, %p1816_p5 }
  0x34   :  { %1826 = shalt.err (!%p1823_p9)
}
  0x35   :  { %25 = dma.hbm_to_vmem [thread:$0]  %s2036_s0, 1536, %s20_s20, [#allocation3], %s1903_s30, %s1903_s30, %s1904_s6  }
  0x36   :  { %s1827_s11 = scalar_lea.hbm %s2038_s2, 6144 }
  0x37   :  { %p1828_p10 = scmp.ne.s32.totalorder %s2038_s2, %s1827_s11  ;;  %p1831_p11 = scmp.lt.u32.totalorder %s1827_s11, %s2038_s2 }
  0x39   :  { %p1833_p12 = pnand %p1831_p11, %p1828_p10 }
  0x3b   :  { %1836 = shalt.err (!%p1833_p12)
}
  0x3c   :  { %s1837_s16 = scalar_lea.vmem %s1978_s23, 6144  ;;  %p1842_p0 = scmp.lt.s32.totalorder %s1978_s23, %s1978_s23 }
  0x3d   :  { %p1838_p13 = scmp.ne.s32.totalorder %s1978_s23, %s1837_s16  ;;  %p1843_p1 = scmp.lt.s32.totalorder %s1837_s16, %s1837_s16 }
  0x3f   :  { %p1844_p2 = por %p1843_p1, %p1842_p0 }
  0x41   :  { %p1845_p3 = pnand %p1844_p2, %p1838_p13 }
  0x43   :  { %1848 = shalt.err (!%p1845_p3)
}
  0x44   :  { %s1907_s0 = smov 64   ;;  %s1908_s30 = smov 4  }
  0x45   :  { %49 = dma.hbm_to_vmem [thread:$0]  %s2038_s2, 6144, %s1978_s23, [#allocation6], %s1907_s0, %s1907_s0, %s1908_s30  }
  0x46   :  { %s1909_s17 = smov [#allocation10]   ;;  %s1849_s22 = scalar_lea.hbm %s2040_s4, 6144 }
  0x47   :  { %s65_s18 = sshll.u32 %s1909_s17, 4  ;;  %p1850_p4 = scmp.ne.s32.totalorder %s2040_s4, %s1849_s22  ;;  %s66_s18 = int_to_ptr.vmem [resolvable:$true] %s65_s18 }
  0x48   :  { %p1853_p5 = scmp.lt.u32.totalorder %s1849_s22, %s2040_s4 }
  0x4a   :  { %p1855_p6 = pnand %p1853_p5, %p1850_p4 }
  0x4c   :  { %1858 = shalt.err (!%p1855_p6)
}
  0x4d   :  { %s1859_s28 = scalar_lea.vmem %s66_s18, 6144  ;;  %p1864_p8 = scmp.lt.s32.totalorder %s66_s18, %s66_s18 }
  0x4e   :  { %p1860_p7 = scmp.ne.s32.totalorder %s66_s18, %s1859_s28  ;;  %p1865_p9 = scmp.lt.s32.totalorder %s1859_s28, %s1859_s28 }
  0x50   :  { %p1866_p10 = por %p1865_p9, %p1864_p8 }
  0x52   :  { %p1867_p11 = pnand %p1866_p10, %p1860_p7 }
  0x54   :  { %1870 = shalt.err (!%p1867_p11)
}
  0x55   :  { %71 = dma.hbm_to_vmem [thread:$0]  %s2040_s4, 6144, %s66_s18, [#allocation9], %s1907_s0, %s1907_s0, %s1908_s30  }
  0x56   :  { %1893 = dma.done.wait [#allocation3], 1536  }
  0x57   :  { %1894 = vsyncadd [#allocation3], 4294965760 }
  0x58   :  { %1895 = dma.done.wait [#allocation6], 7680  }
  0x59   :  { %1896 = vsyncadd [#allocation6], 4294959616 }
  0x5a   :  { %1897 = dma.done.wait [#allocation9], 6160  }
  0x5b   :  { %1898 = vsyncadd [#allocation9], 4294961136  ;;  %v1629_v0 = vld [vmem:[#allocation7 + $0x40] sm:$0xff]   ;;  %v1633_v4 = vld [vmem:[#allocation7 + $0x48] sm:$0xff]   ;;  %s1910_s4 = smov [#allocation11]  }
  0x5c   :  { %v1630_v1 = vld [vmem:[#allocation7 + $0xc0] sm:$0xff]   ;;  %1449 = vmatprep.subr.bf16.mxu0 %v1629_v0  ;;  %v1634_v5 = vld [vmem:[#allocation7 + $0xc8] sm:$0xff]   ;;  %v1637_v8 = vld [vmem:[#allocation7 + $0x50] sm:$0xff]   ;;  %s1314_s29 = sshll.u32 %s1910_s4, 4  ;;  %s1315_s29 = int_to_ptr.vmem [resolvable:$true] %s1314_s29 }
  0x5d   :  { %v1631_v2 = vld [vmem:[#allocation7] sm:$0xff]   ;;  %1477 = vmatprep.subr.bf16.mxu1 %v1630_v1  ;;  %v1635_v6 = vld [vmem:[#allocation7 + $0x8] sm:$0xff]   ;;  %v1638_v9 = vld [vmem:[#allocation7 + $0xd0] sm:$0xff]   ;;  %s1871_s7 = scalar_lea.vmem %s1315_s29, 512  ;;  %p1876_p13 = scmp.lt.s32.totalorder %s1315_s29, %s1315_s29 }
  0x5e   :  { %v1632_v3 = vld [vmem:[#allocation7 + $0x80] sm:$0xff]   ;;  %1450 = vmatpush3.bf16.msra.mxu0 %v1631_v2  ;;  %v1636_v7 = vld [vmem:[#allocation7 + $0x88] sm:$0xff]   ;;  %v1639_v10 = vld [vmem:[#allocation7 + $0x10] sm:$0xff]   ;;  %p1872_p12 = scmp.ne.s32.totalorder %s1315_s29, %s1871_s7  ;;  %p1877_p0 = scmp.lt.s32.totalorder %s1871_s7, %s1871_s7 }
  0x5f   :  { %1478 = vmatpush3.bf16.msra.mxu1 %v1632_v3  ;;  %1451 = vmatprep.subr.bf16.mxu0 %v1633_v4  ;;  %v1640_v11 = vld [vmem:[#allocation7 + $0x90] sm:$0xff]   ;;  %v1641_v12 = vld [vmem:[#allocation7 + $0x58] sm:$0xff]   ;;  %v1645_v16 = vld [vmem:[#allocation7 + $0x60] sm:$0xff]  }
  0x60   :  { %1479 = vmatprep.subr.bf16.mxu1 %v1634_v5  ;;  %v1642_v13 = vld [vmem:[#allocation7 + $0xd8] sm:$0xff]   ;;  %v1646_v17 = vld [vmem:[#allocation7 + $0xe0] sm:$0xff]   ;;  %v1649_v20 = vld [vmem:[#allocation7 + $0x68] sm:$0xff]   ;;  %p1878_p1 = por %p1877_p0, %p1876_p13 }
  0x61   :  { %v1643_v14 = vld [vmem:[#allocation7 + $0x18] sm:$0xff]   ;;  %v1647_v18 = vld [vmem:[#allocation7 + $0x20] sm:$0xff]   ;;  %v1650_v21 = vld [vmem:[#allocation7 + $0xe8] sm:$0xff]  }
  0x62   :  { %1452 = vmatpush3.bf16.msra.mxu0 %v1635_v6  ;;  %v1644_v15 = vld [vmem:[#allocation7 + $0x98] sm:$0xff]   ;;  %v1648_v19 = vld [vmem:[#allocation7 + $0xa0] sm:$0xff]   ;;  %v1651_v22 = vld [vmem:[#allocation7 + $0x28] sm:$0xff]   ;;  %p1879_p2 = pnand %p1878_p1, %p1872_p12 }
  0x63   :  { %1480 = vmatpush3.bf16.msra.mxu1 %v1636_v7  ;;  %1453 = vmatprep.subr.bf16.mxu0 %v1637_v8  ;;  %v1652_v23 = vld [vmem:[#allocation7 + $0xa8] sm:$0xff]   ;;  %v1653_v24 = vld [vmem:[#allocation7 + $0x70] sm:$0xff]   ;;  %v1657_v28 = vld [vmem:[#allocation7 + $0x78] sm:$0xff]  }
  0x64   :  { %1481 = vmatprep.subr.bf16.mxu1 %v1638_v9  ;;  %v1654_v25 = vld [vmem:[#allocation7 + $0xf0] sm:$0xff]   ;;  %v1658_v29 = vld [vmem:[#allocation7 + $0xf8] sm:$0xff]   ;;  %v1664_v34 = vld [vmem:[#allocation5 + $0x8] ss:$24 sps:$4 sm:$0xff]  }
  0x65   :  { %v1655_v26 = vld [vmem:[#allocation7 + $0x30] sm:$0xff]   ;;  %v1659_v30 = vld [vmem:[#allocation7 + $0x38] sm:$0xff]   ;;  %v1666_v35 = vld [vmem:[#allocation5 + $0xc] ss:$24 sps:$4 sm:$0xff]  }
  0x66   :  { %1454 = vmatpush3.bf16.msra.mxu0 %v1639_v10  ;;  %v1656_v27 = vld [vmem:[#allocation7 + $0xb0] sm:$0xff]   ;;  %v1660_v31 = vld [vmem:[#allocation7 + $0xb8] sm:$0xff]   ;;  %v1667_v36 = vld [vmem:[#allocation7 + $0x140] sm:$0xff]   ;;  %632 = vmatprep.mubr.bf16.mxu1 %v1666_v35 }
  0x67   :  { %1482 = vmatpush3.bf16.msra.mxu1 %v1640_v11  ;;  %1455 = vmatprep.subr.bf16.mxu0 %v1641_v12  ;;  %v1661_v32 = vld [vmem:[#allocation5] ss:$24 sps:$4 sm:$0xff]   ;;  %v1663_v33 = vld [vmem:[#allocation5 + $0x4] ss:$24 sps:$4 sm:$0xff]   ;;  %v1671_v40 = vld [vmem:[#allocation7 + $0x148] sm:$0xff]  }
  0x68   :  { %1483 = vmatprep.subr.bf16.mxu1 %v1642_v13  ;;  %583 = vmatprep.mubr.bf16.mxu0 %v1663_v33  ;;  %v1668_v37 = vld [vmem:[#allocation10 + $0x40] sm:$0xff]   ;;  %v1672_v41 = vld [vmem:[#allocation10 + $0x48] sm:$0xff]   ;;  %v1676_v45 = vld [vmem:[#allocation10 + $0x50] sm:$0xff]  }
  0x69   :  { %v1669_v38 = vld [vmem:[#allocation7 + $0x100] sm:$0xff]   ;;  %v1673_v42 = vld [vmem:[#allocation7 + $0x108] sm:$0xff]   ;;  %v1675_v44 = vld [vmem:[#allocation7 + $0x150] sm:$0xff]  }
  0x6a   :  { %1456 = vmatpush3.bf16.msra.mxu0 %v1643_v14  ;;  %v1670_v39 = vld [vmem:[#allocation10] sm:$0xff]   ;;  %v1674_v43 = vld [vmem:[#allocation10 + $0x8] sm:$0xff]   ;;  %v1678_v47 = vld [vmem:[#allocation10 + $0x10] sm:$0xff]  }
  0x6b   :  { %1484 = vmatpush3.bf16.msra.mxu1 %v1644_v15  ;;  %1457 = vmatprep.subr.bf16.mxu0 %v1645_v16  ;;  %v1677_v46 = vld [vmem:[#allocation7 + $0x110] sm:$0xff]   ;;  %v1679_v48 = vld [vmem:[#allocation7 + $0x158] sm:$0xff]   ;;  %v1683_v52 = vld [vmem:[#allocation7 + $0x160] sm:$0xff]  }
  0x6c   :  { %1485 = vmatprep.subr.bf16.mxu1 %v1646_v17  ;;  %v1680_v49 = vld [vmem:[#allocation10 + $0x58] sm:$0xff]   ;;  %v1684_v53 = vld [vmem:[#allocation10 + $0x60] sm:$0xff]   ;;  %v1688_v57 = vld [vmem:[#allocation10 + $0x68] sm:$0xff]  }
  0x6d   :  { %v1681_v50 = vld [vmem:[#allocation7 + $0x118] sm:$0xff]   ;;  %v1685_v54 = vld [vmem:[#allocation7 + $0x120] sm:$0xff]   ;;  %v1687_v56 = vld [vmem:[#allocation7 + $0x168] sm:$0xff]  }
  0x6e   :  { %1458 = vmatpush3.bf16.msra.mxu0 %v1647_v18  ;;  %v1682_v51 = vld [vmem:[#allocation10 + $0x18] sm:$0xff]   ;;  %v1686_v55 = vld [vmem:[#allocation10 + $0x20] sm:$0xff]   ;;  %v1689_v58 = vld [vmem:[#allocation5 + $0x34] ss:$24 sps:$4 sm:$0xff]  }
  0x6f   :  { %1486 = vmatpush3.bf16.msra.mxu1 %v1648_v19  ;;  %1459 = vmatprep.subr.bf16.mxu0 %v1649_v20  ;;  %v1691_v59 = vld [vmem:[#allocation7 + $0x128] sm:$0xff]   ;;  %v1694_v62 = vld [vmem:[#allocation5 + $0x3c] ss:$24 sps:$4 sm:$0xff]   ;;  %v1696_v63 = vld [vmem:[#allocation5 + $0x38] ss:$24 sps:$4 sm:$0xff]  }
  0x70   :  { %1487 = vmatprep.subr.bf16.mxu1 %v1650_v21  ;;  %v1692_v60 = vld [vmem:[#allocation10 + $0x28] sm:$0xff]   ;;  %v1698_v1 = vld [vmem:[#allocation10 + $0x70] sm:$0xff]   ;;  %v1702_v5 = vld [vmem:[#allocation10 + $0x78] sm:$0xff]  }
  0x71   :  { %v1693_v61 = vld [vmem:[#allocation5 + $0x30] ss:$24 sps:$4 sm:$0xff]   ;;  %v1701_v4 = vld [vmem:[#allocation7 + $0x178] sm:$0xff]   ;;  %v1707_v9 = vld [vmem:[#allocation5 + $0x14] ss:$24 sps:$4 sm:$0xff]  }
  0x72   :  { %1460 = vmatpush3.bf16.msra.mxu0 %v1651_v22  ;;  %v1697_v0 = vld [vmem:[#allocation7 + $0x170] sm:$0xff]   ;;  %v1703_v6 = vld [vmem:[#allocation7 + $0x138] sm:$0xff]   ;;  %v1711_v12 = vld [vmem:[#allocation10 + $0xc0] sm:$0xff]  }
  0x73   :  { %1488 = vmatpush3.bf16.msra.mxu1 %v1652_v23  ;;  %1461 = vmatprep.subr.bf16.mxu0 %v1653_v24  ;;  %v1699_v2 = vld [vmem:[#allocation7 + $0x130] sm:$0xff]   ;;  %v1704_v7 = vld [vmem:[#allocation10 + $0x38] sm:$0xff]   ;;  %v1712_v13 = vld [vmem:[#allocation10 + $0x140] sm:$0xff]  }
  0x74   :  { %1489 = vmatprep.subr.bf16.mxu1 %v1654_v25  ;;  %v1700_v3 = vld [vmem:[#allocation10 + $0x30] sm:$0xff]   ;;  %v1710_v11 = vld [vmem:[#allocation2 + $0x4] ss:$24 sps:$4 sm:$0xff]   ;;  %v1715_v16 = vld [vmem:[#allocation10 + $0xc8] sm:$0xff]  }
  0x75   :  { %v1705_v8 = vld [vmem:[#allocation5 + $0x10] ss:$24 sps:$4 sm:$0xff]   ;;  %v1708_v10 = vld [vmem:[#allocation2] ss:$24 sps:$4 sm:$0xff]   ;;  %v1719_v20 = vld [vmem:[#allocation5 + $0x44] ss:$24 sps:$4 sm:$0xff]  }
  0x76   :  { %1462 = vmatpush3.bf16.msra.mxu0 %v1655_v26  ;;  %v1713_v14 = vld [vmem:[#allocation10 + $0x80] sm:$0xff]   ;;  %v1716_v17 = vld [vmem:[#allocation10 + $0x148] sm:$0xff]   ;;  %v1722_v22 = vld [vmem:[#allocation10 + $0xd0] sm:$0xff]  }
  0x77   :  { %1490 = vmatpush3.bf16.msra.mxu1 %v1656_v27  ;;  %1463 = vmatprep.subr.bf16.mxu0 %v1657_v28  ;;  %v1714_v15 = vld [vmem:[#allocation10 + $0x100] sm:$0xff]   ;;  %v1717_v18 = vld [vmem:[#allocation10 + $0x88] sm:$0xff]   ;;  %v1723_v23 = vld [vmem:[#allocation10 + $0x150] sm:$0xff]  }
  0x78   :  { %1491 = vmatprep.subr.bf16.mxu1 %v1658_v29  ;;  %v1718_v19 = vld [vmem:[#allocation10 + $0x108] sm:$0xff]   ;;  %v1721_v21 = vld [vmem:[#allocation5 + $0x40] ss:$24 sps:$4 sm:$0xff]  }
  0x79   :  { %v1724_v24 = vld [vmem:[#allocation10 + $0x90] sm:$0xff]   ;;  %v1726_v26 = vld [vmem:[#allocation10 + $0xd8] sm:$0xff]   ;;  %v1733_v33 = vld [vmem:[#allocation10 + $0x120] sm:$0xff]  }
  0x7a   :  { %1464 = vmatpush3.bf16.msra.mxu0 %v1659_v30  ;;  %v1725_v25 = vld [vmem:[#allocation10 + $0x110] sm:$0xff]   ;;  %v1727_v27 = vld [vmem:[#allocation10 + $0x158] sm:$0xff]   ;;  %v1730_v30 = vld [vmem:[#allocation10 + $0xe0] sm:$0xff]  }
  0x7b   :  { %1492 = vmatpush3.bf16.msra.mxu1 %v1660_v31  ;;  %1505 = vmatprep.subr.bf16.mxu0 %v1667_v36  ;;  %v1728_v28 = vld [vmem:[#allocation10 + $0x98] sm:$0xff]   ;;  %v1731_v31 = vld [vmem:[#allocation10 + $0x160] sm:$0xff]   ;;  %v1735_v35 = vld [vmem:[#allocation10 + $0x168] sm:$0xff]  }
  0x7c   :  { %1533 = vmatprep.subr.bf16.mxu1 %v1668_v37  ;;  %v1729_v29 = vld [vmem:[#allocation10 + $0x118] sm:$0xff]   ;;  %v1736_v36 = vld [vmem:[#allocation10 + $0xa8] sm:$0xff]  }
  0x7d   :  { %584 = vmatmul.mubr.bf16.vlgmr.msra.gmra.mrb[0].mxu0 %v1661_v32  ;;  %v1732_v32 = vld [vmem:[#allocation10 + $0xa0] sm:$0xff]   ;;  %v1737_v37 = vld [vmem:[#allocation10 + $0x128] sm:$0xff]  }
  0x7e   :  { %633 = vmatmul.mubr.bf16.vlgmr.msra.gmra.mrb[0].mxu1 %v1664_v34  ;;  %1506 = vmatpush3.bf16.msra.mxu0 %v1669_v38  ;;  %v1734_v34 = vld [vmem:[#allocation10 + $0xe8] sm:$0xff]  }
  0x7f   :  { %1534 = vmatpush3.bf16.msra.mxu1 %v1670_v39  ;;  %1507 = vmatprep.subr.bf16.mxu0 %v1671_v40  ;;  %v1738_v38 = vld [vmem:[#allocation2 + $0x34] ss:$24 sps:$4 sm:$0xff]   ;;  %v1740_v39 = vld [vmem:[#allocation2 + $0x30] ss:$24 sps:$4 sm:$0xff]  }
  0x80   :  { %1535 = vmatprep.subr.bf16.mxu1 %v1672_v41  ;;  %591 = vmatprep.mubr.bf16.mxu0 %v1689_v58  ;;  %v1741_v40 = vld [vmem:[#allocation10 + $0xf0] sm:$0xff]   ;;  %v1328_v58 = vld [vmem:[#allocation8] ss:$0 sm:$0xff] }
  0x81   :  { %640 = vmatprep.mubr.bf16.mxu1 %v1694_v62  ;;  %v1742_v41 = vld [vmem:[#allocation10 + $0x170] sm:$0xff]  }
  0x82   :  { %1508 = vmatpush3.bf16.msra.mxu0 %v1673_v42  ;;  %v1743_v42 = vld [vmem:[#allocation10 + $0xb0] sm:$0xff]  }
  0x83   :  { %1536 = vmatpush3.bf16.msra.mxu1 %v1674_v43  ;;  %1509 = vmatprep.subr.bf16.mxu0 %v1675_v44  ;;  %v1744_v43 = vld [vmem:[#allocation10 + $0x130] sm:$0xff]   ;;  %v1745_v44 = vld [vmem:[#allocation10 + $0xf8] sm:$0xff]  }
  0x84   :  { %1537 = vmatprep.subr.bf16.mxu1 %v1676_v45  ;;  %v1746_v45 = vld [vmem:[#allocation10 + $0x178] sm:$0xff]  }
  0x85   :  { %592 = vmatmul.mubr.bf16.gmra.mrb[4].mxu0 %v1693_v61 }
  0x86   :  { %1510 = vmatpush3.bf16.msra.mxu0 %v1677_v46  ;;  %641 = vmatmul.mubr.bf16.gmra.mrb[4].mxu1 %v1696_v63  ;;  %v1747_v46 = vld [vmem:[#allocation10 + $0xb8] sm:$0xff]  }
  0x87   :  { %1538 = vmatpush3.bf16.msra.mxu1 %v1678_v47  ;;  %1511 = vmatprep.subr.bf16.mxu0 %v1679_v48  ;;  %v1748_v47 = vld [vmem:[#allocation10 + $0x138] sm:$0xff]  }
  0x88   :  { %1539 = vmatprep.subr.bf16.mxu1 %v1680_v49  ;;  %681 = vmatprep.mubr.bf16.mxu0 %v1707_v9  ;;  %v1749_v48 = vld [vmem:[#allocation2 + $0x8] ss:$24 sps:$4 sm:$0xff]   ;;  %v1751_v49 = vld [vmem:[#allocation2 + $0xc] ss:$24 sps:$4 sm:$0xff]  }
  0x89   :  { %1186 = vmatprep.mubr.bf16.mxu1 %v1710_v11 }
  0x8a   :  { %1512 = vmatpush3.bf16.msra.mxu0 %v1681_v50  ;;  %v1752_v50 = vld [vmem:[#allocation2 + $0x10] ss:$24 sps:$4 sm:$0xff]  }
  0x8b   :  { %1540 = vmatpush3.bf16.msra.mxu1 %v1682_v51  ;;  %1513 = vmatprep.subr.bf16.mxu0 %v1683_v52  ;;  %v1754_v51 = vld [vmem:[#allocation2 + $0x14] ss:$24 sps:$4 sm:$0xff]  }
  0x8c   :  { %1541 = vmatprep.subr.bf16.mxu1 %v1684_v53  ;;  %v1755_v52 = vld [vmem:[#allocation2 + $0x3c] ss:$24 sps:$4 sm:$0xff]  }
  0x8d   :  { %v1757_v53 = vld [vmem:[#allocation2 + $0x44] ss:$24 sps:$4 sm:$0xff]  }
  0x8e   :  { %1514 = vmatpush3.bf16.msra.mxu0 %v1685_v54  ;;  %v1759_v54 = vld [vmem:[#allocation2 + $0x38] ss:$24 sps:$4 sm:$0xff]  }
  0x8f   :  { %1542 = vmatpush3.bf16.msra.mxu1 %v1686_v55  ;;  %1515 = vmatprep.subr.bf16.mxu0 %v1687_v56  ;;  %v1760_v55 = vld [vmem:[#allocation2 + $0x40] ss:$24 sps:$4 sm:$0xff]  }
  0x90   :  { %1543 = vmatprep.subr.bf16.mxu1 %v1688_v57 }
  0x92   :  { %1516 = vmatpush3.bf16.msra.mxu0 %v1691_v59 }
  0x93   :  { %1544 = vmatpush3.bf16.msra.mxu1 %v1692_v60  ;;  %1517 = vmatprep.subr.bf16.mxu0 %v1697_v0 }
  0x94   :  { %1545 = vmatprep.subr.bf16.mxu1 %v1698_v1 }
  0x96   :  { %1518 = vmatpush3.bf16.msra.mxu0 %v1699_v2 }
  0x97   :  { %1546 = vmatpush3.bf16.msra.mxu1 %v1700_v3  ;;  %1519 = vmatprep.subr.bf16.mxu0 %v1701_v4 }
  0x98   :  { %1547 = vmatprep.subr.bf16.mxu1 %v1702_v5 }
  0x9a   :  { %1520 = vmatpush3.bf16.msra.mxu0 %v1703_v6 }
  0x9b   :  { %1548 = vmatpush3.bf16.msra.mxu1 %v1704_v7  ;;  %1561 = vmatprep.subr.bf16.mxu0 %v1711_v12 }
  0x9c   :  { %1589 = vmatprep.subr.bf16.mxu1 %v1712_v13 }
  0x9d   :  { %682 = vmatmul.mubr.bf16.vlgmr.msra.gmra.mrb[8].mxu0 %v1705_v8 }
  0x9e   :  { %1187 = vmatmul.mubr.bf16.vlgmr.msra.gmra.mrb[8].mxu1 %v1708_v10  ;;  %1562 = vmatpush3.bf16.msra.mxu0 %v1713_v14 }
  0x9f   :  { %1590 = vmatpush3.bf16.msra.mxu1 %v1714_v15  ;;  %1563 = vmatprep.subr.bf16.mxu0 %v1715_v16 }
  0xa0   :  { %1591 = vmatprep.subr.bf16.mxu1 %v1716_v17  ;;  %689 = vmatprep.mubr.bf16.mxu0 %v1719_v20 }
  0xa1   :  { %1194 = vmatprep.mubr.bf16.mxu1 %v1738_v38 }
  0xa2   :  { %1564 = vmatpush3.bf16.msra.mxu0 %v1717_v18 }
  0xa3   :  { %1592 = vmatpush3.bf16.msra.mxu1 %v1718_v19  ;;  %1565 = vmatprep.subr.bf16.mxu0 %v1722_v22 }
  0xa4   :  { %1593 = vmatprep.subr.bf16.mxu1 %v1723_v23 }
  0xa5   :  { %690 = vmatmul.mubr.bf16.gmra.mrb[12].mxu0 %v1721_v21 }
  0xa6   :  { %1566 = vmatpush3.bf16.msra.mxu0 %v1724_v24  ;;  %1195 = vmatmul.mubr.bf16.gmra.mrb[12].mxu1 %v1740_v39 }
  0xa7   :  { %1594 = vmatpush3.bf16.msra.mxu1 %v1725_v25  ;;  %1567 = vmatprep.subr.bf16.mxu0 %v1726_v26 }
  0xa8   :  { %1595 = vmatprep.subr.bf16.mxu1 %v1727_v27  ;;  %1235 = vmatprep.mubr.bf16.mxu0 %v1751_v49 }
  0xa9   :  { %1284 = vmatprep.mubr.bf16.mxu1 %v1754_v51 }
  0xaa   :  { %1568 = vmatpush3.bf16.msra.mxu0 %v1728_v28 }
  0xab   :  { %1596 = vmatpush3.bf16.msra.mxu1 %v1729_v29  ;;  %1569 = vmatprep.subr.bf16.mxu0 %v1730_v30 }
  0xac   :  { %1597 = vmatprep.subr.bf16.mxu1 %v1731_v31 }
  0xae   :  { %1570 = vmatpush3.bf16.msra.mxu0 %v1732_v32 }
  0xaf   :  { %1598 = vmatpush3.bf16.msra.mxu1 %v1733_v33  ;;  %1571 = vmatprep.subr.bf16.mxu0 %v1734_v34 }
  0xb0   :  { %1599 = vmatprep.subr.bf16.mxu1 %v1735_v35 }
  0xb2   :  { %1572 = vmatpush3.bf16.msra.mxu0 %v1736_v36 }
  0xb3   :  { %1600 = vmatpush3.bf16.msra.mxu1 %v1737_v37  ;;  %1573 = vmatprep.subr.bf16.mxu0 %v1741_v40 }
  0xb4   :  { %1601 = vmatprep.subr.bf16.mxu1 %v1742_v41 }
  0xb6   :  { %1574 = vmatpush3.bf16.msra.mxu0 %v1743_v42 }
  0xb7   :  { %1602 = vmatpush3.bf16.msra.mxu1 %v1744_v43  ;;  %1575 = vmatprep.subr.bf16.mxu0 %v1745_v44 }
  0xb8   :  { %1603 = vmatprep.subr.bf16.mxu1 %v1746_v45 }
  0xba   :  { %1576 = vmatpush3.bf16.msra.mxu0 %v1747_v46 }
  0xbb   :  { %1604 = vmatpush3.bf16.msra.mxu1 %v1748_v47 }
  0xbd   :  { %1236 = vmatmul.mubr.bf16.vlgmr.msra.gmra.mrb[16].mxu0 %v1749_v48 }
  0xbe   :  { %1285 = vmatmul.mubr.bf16.vlgmr.msra.gmra.mrb[16].mxu1 %v1752_v50  ;;  %1243 = vmatprep.mubr.bf16.mxu0 %v1755_v52 }
  0xbf   :  { %1292 = vmatprep.mubr.bf16.mxu1 %v1757_v53 }
  0xc5   :  { %1244 = vmatmul.mubr.bf16.gmra.mrb[20].mxu0 %v1759_v54 }
  0xc6   :  { %1293 = vmatmul.mubr.bf16.gmra.mrb[20].mxu1 %v1760_v55 }
 0x150   :  { %v1465_v56 = vpop.f32.mrb[0].mxu0 }
 0x151   :  { %v1493_v57 = vpop.f32.mrb[0].mxu1  ;;  %v1466_v59 = vpop.f32.mrb[1].mxu0 }
 0x152   :  { %v1467_v60 = vadd.f32 %v1466_v59, %v1465_v56  ;;  %v1494_v61 = vpop.f32.mrb[1].mxu1  ;;  %v1468_v62 = vpop.f32.mrb[2].mxu0 }
 0x153   :  { %v1495_v63 = vadd.f32 %v1494_v61, %v1493_v57  ;;  %v1496_v0 = vpop.f32.mrb[2].mxu1  ;;  %v1469_v1 = vpop.f32.mrb[3].mxu0 }
 0x154   :  { %v586_v2 = vadd.f32 %v1467_v60, %v1328_v58  ;;  %v1470_v3 = vadd.f32 %v1469_v1, %v1468_v62  ;;  %v1497_v4 = vpop.f32.mrb[3].mxu1 }
 0x155   :  { %v1498_v5 = vadd.f32 %v1497_v4, %v1496_v0 }
 0x156   :  { %v635_v6 = vadd.f32 %v1495_v63, %v586_v2  ;;  %v589_v7 = vadd.f32 %v1470_v3, %v1328_v58 }
 0x158   :  { %v638_v8 = vadd.f32 %v1498_v5, %v589_v7  ;;  %v1471_v9 = vpop.f32.mrb[4].mxu0 }
 0x159   :  { %v1472_v10 = vpop.f32.mrb[5].mxu0  ;;  %v1499_v13 = vpop.f32.mrb[4].mxu1 }
 0x15a   :  { %v1473_v11 = vadd.f32 %v1472_v10, %v1471_v9  ;;  %v1474_v12 = vpop.f32.mrb[6].mxu0  ;;  %v1500_v15 = vpop.f32.mrb[5].mxu1 }
 0x15b   :  { %v1475_v14 = vpop.f32.mrb[7].mxu0  ;;  %v1501_v18 = vadd.f32 %v1500_v15, %v1499_v13  ;;  %v1502_v19 = vpop.f32.mrb[6].mxu1 }
 0x15c   :  { %v594_v16 = vadd.f32 %v1473_v11, %v1328_v58  ;;  %v1476_v17 = vadd.f32 %v1475_v14, %v1474_v12  ;;  %v1503_v20 = vpop.f32.mrb[7].mxu1 }
 0x15d   :  { %v1504_v23 = vadd.f32 %v1503_v20, %v1502_v19 }
 0x15e   :  { %v597_v21 = vadd.f32 %v1476_v17, %v1328_v58  ;;  %v643_v22 = vadd.f32 %v1501_v18, %v594_v16 }
 0x160   :  { %v646_v24 = vadd.f32 %v1504_v23, %v597_v21 }
 0x170   :  { %v1521_v25 = vpop.f32.mrb[8].mxu0 }
 0x171   :  { %v1549_v26 = vpop.f32.mrb[8].mxu1  ;;  %v1522_v27 = vpop.f32.mrb[9].mxu0 }
 0x172   :  { %v1523_v28 = vadd.f32 %v1522_v27, %v1521_v25  ;;  %v1550_v29 = vpop.f32.mrb[9].mxu1  ;;  %v1524_v30 = vpop.f32.mrb[10].mxu0 }
 0x173   :  { %v1551_v31 = vadd.f32 %v1550_v29, %v1549_v26  ;;  %v1552_v32 = vpop.f32.mrb[10].mxu1  ;;  %v1525_v33 = vpop.f32.mrb[11].mxu0 }
 0x174   :  { %v684_v34 = vadd.f32 %v1523_v28, %v635_v6  ;;  %v1526_v35 = vadd.f32 %v1525_v33, %v1524_v30  ;;  %v1553_v36 = vpop.f32.mrb[11].mxu1 }
 0x175   :  { %v1554_v37 = vadd.f32 %v1553_v36, %v1552_v32 }
 0x176   :  { %v687_v38 = vadd.f32 %v1526_v35, %v638_v8 }
 0x178   :  { %v1527_v39 = vpop.f32.mrb[12].mxu0 }
 0x179   :  { %v1528_v40 = vpop.f32.mrb[13].mxu0  ;;  %v1555_v47 = vpop.f32.mrb[12].mxu1 }
 0x17a   :  { %v1529_v41 = vadd.f32 %v1528_v40, %v1527_v39  ;;  %v1530_v42 = vpop.f32.mrb[14].mxu0  ;;  %v1556_v48 = vpop.f32.mrb[13].mxu1 }
 0x17b   :  { %v1531_v43 = vpop.f32.mrb[15].mxu0  ;;  %v1557_v49 = vadd.f32 %v1556_v48, %v1555_v47  ;;  %v1558_v50 = vpop.f32.mrb[14].mxu1 }
 0x17c   :  { %v692_v44 = vadd.f32 %v1529_v41, %v643_v22  ;;  %v1532_v45 = vadd.f32 %v1531_v43, %v1530_v42  ;;  %v1559_v51 = vpop.f32.mrb[15].mxu1 }
 0x17d   :  { %v1560_v52 = vadd.f32 %v1559_v51, %v1558_v50 }
 0x17e   :  { %v695_v46 = vadd.f32 %v1532_v45, %v646_v24 }
 0x190   :  { %v1577_v53 = vpop.f32.mrb[16].mxu0 }
 0x191   :  { %v1578_v54 = vpop.f32.mrb[17].mxu0  ;;  %v1605_v55 = vpop.f32.mrb[16].mxu1 }
 0x192   :  { %v1579_v56 = vadd.f32 %v1578_v54, %v1577_v53  ;;  %v1580_v57 = vpop.f32.mrb[18].mxu0  ;;  %v1606_v58 = vpop.f32.mrb[17].mxu1 }
 0x193   :  { %v1581_v59 = vpop.f32.mrb[19].mxu0  ;;  %v1607_v61 = vadd.f32 %v1606_v58, %v1605_v55  ;;  %v1608_v62 = vpop.f32.mrb[18].mxu1 }
 0x194   :  { %v1238_v60 = vadd.f32 %v1579_v56, %v1551_v31  ;;  %v1582_v63 = vadd.f32 %v1581_v59, %v1580_v57  ;;  %v1609_v0 = vpop.f32.mrb[19].mxu1 }
 0x195   :  { %v1610_v3 = vadd.f32 %v1609_v0, %v1608_v62 }
 0x196   :  { %v1287_v1 = vadd.f32 %v1607_v61, %v1238_v60  ;;  %v1241_v2 = vadd.f32 %v1582_v63, %v1554_v37 }
 0x198   :  { %v1301_v4 = vadd.f32 %v1287_v1, %v684_v34  ;;  %v1290_v5 = vadd.f32 %v1610_v3, %v1241_v2  ;;  %v1583_v6 = vpop.f32.mrb[20].mxu0 }
 0x199   :  { %v1584_v7 = vpop.f32.mrb[21].mxu0  ;;  %v1611_v9 = vpop.f32.mrb[20].mxu1 }
 0x19a   :  { %1305 = vst [vmem:[#allocation11] sm:$0xff] %v1301_v4  ;;  %v1302_v8 = vadd.f32 %v1290_v5, %v687_v38  ;;  %v1585_v10 = vadd.f32 %v1584_v7, %v1583_v6  ;;  %v1586_v11 = vpop.f32.mrb[22].mxu0  ;;  %v1612_v12 = vpop.f32.mrb[21].mxu1 }
 0x19b   :  { %v1587_v13 = vpop.f32.mrb[23].mxu0  ;;  %v1613_v15 = vadd.f32 %v1612_v12, %v1611_v9  ;;  %v1614_v16 = vpop.f32.mrb[22].mxu1 }
 0x19c   :  { %1306 = vst [vmem:[#allocation11 + $0x8] sm:$0xff] %v1302_v8  ;;  %v1246_v14 = vadd.f32 %v1585_v10, %v1557_v49  ;;  %v1588_v17 = vadd.f32 %v1587_v13, %v1586_v11  ;;  %v1615_v18 = vpop.f32.mrb[23].mxu1 }
 0x19d   :  { %v1616_v21 = vadd.f32 %v1615_v18, %v1614_v16 }
 0x19e   :  { %v1295_v19 = vadd.f32 %v1613_v15, %v1246_v14  ;;  %v1249_v20 = vadd.f32 %v1588_v17, %v1560_v52 }
 0x1a0   :  { %v1303_v22 = vadd.f32 %v1295_v19, %v692_v44  ;;  %v1298_v23 = vadd.f32 %v1616_v21, %v1249_v20 }
 0x1a2   :  { %1307 = vst [vmem:[#allocation11 + $0x10] sm:$0xff] %v1303_v22  ;;  %v1304_v24 = vadd.f32 %v1298_v23, %v695_v46 }
 0x1a4   :  { %1308 = vst [vmem:[#allocation11 + $0x18] sm:$0xff] %v1304_v24 }
 0x1a5   :  { %1882 = shalt.err (!%p1879_p2)
}
 0x1a6   :  { %s1883_s8 = scalar_lea.hbm %s2041_s5, 512 }
 0x1a7   :  { %p1884_p3 = scmp.ne.s32.totalorder %s2041_s5, %s1883_s8  ;;  %p1887_p4 = scmp.lt.u32.totalorder %s1883_s8, %s2041_s5 }
 0x1a9   :  { %p1889_p5 = pnand %p1887_p4, %p1884_p3 }
 0x1ab   :  { %1892 = shalt.err (!%p1889_p5)
}
 0x1ac   :  { %s1911_s13 = smov 128   ;;  %s1912_s14 = smov 8  }
 0x1ad   :  { %1320 = dma.vmem_to_hbm [thread:$0]  %s1315_s29, 512, %s2041_s5, [#allocation4], %s1911_s13, %s1911_s13, %s1912_s14  }
 0x1ae   :  { %1899 = dma.done.wait [#allocation4], 512  }
 0x1af   :  { %1900 = vsyncadd [#allocation4], 4294966784 }
 0x1b0   :  { %1324 = vsyncpa [#allocation3], 1 }
 0x1b1   :  { %1325 = vsyncpa [#allocation6], 1 }
 0x1b2   :  { %1326 = vsyncpa [#allocation9], 1 }
 0x1b3   :  { %1327 = vsyncpa [#allocation4], 1 }

// kernel: mutual_forward.9
= control target key start
LH: loop header
LB: loop body
LE: loop exit
PB: predicated region body
PF: predicated region fallthrough
CT: control target
= control target key end

     0   :  { %s6289_s0 = inlined_call_operand.hbm [shape: f32[2,4,64], index: 0, kind: input, shape index: {}]   ;;  %s6290_s1 = inlined_call_operand.hbm [shape: bf16[64,192], index: 1, kind: input, shape index: {}]   ;;  %s6291_s2 = inlined_call_operand.hbm [shape: f32[1,192], index: 2, kind: input, shape index: {}]   ;;  %s6292_s3 = inlined_call_operand.hbm [shape: bf16[64,64], index: 3, kind: input, shape index: {}]   ;;  %s6293_s4 = inlined_call_operand.hbm [shape: f32[1,64], index: 4, kind: input, shape index: {}]   ;;  %s6294_s5 = inlined_call_operand.hbm [shape: bf16[64,2048], index: 5, kind: input, shape index: {}]   ;;  %s6295_s6 = inlined_call_operand.hbm [shape: f32[1,2048], index: 6, kind: input, shape index: {}]   ;;  %s6296_s7 = inlined_call_operand.hbm [shape: bf16[2048,64], index: 7, kind: input, shape index: {}]   ;;  %s6297_s8 = inlined_call_operand.hbm [shape: f32[1,64], index: 8, kind: input, shape index: {}]   ;;  %s6298_s9 = inlined_call_operand.hbm [shape: f32[1,64], index: 9, kind: input, shape index: {}]   ;;  %s6299_s10 = inlined_call_operand.hbm [shape: f32[1,64], index: 10, kind: input, shape index: {}]   ;;  %s6300_s11 = inlined_call_operand.hbm [shape: f32[1,64], index: 11, kind: input, shape index: {}]   ;;  %s6301_s12 = inlined_call_operand.hbm [shape: f32[1,64], index: 12, kind: input, shape index: {}]   ;;  %s6302_s13 = inlined_call_operand.hbm [shape: bf16[64,64], index: 13, kind: input, shape index: {}]   ;;  %s6303_s14 = inlined_call_operand.hbm [shape: f32[1,64], index: 14, kind: input, shape index: {}]   ;;  %s6304_s15 = inlined_call_operand.hbm [shape: bf16[64,128], index: 15, kind: input, shape index: {}]   ;;  %s6305_s16 = inlined_call_operand.hbm [shape: f32[1,128], index: 16, kind: input, shape index: {}]   ;;  %s6306_s17 = inlined_call_operand.hbm [shape: f32[2,4,128], index: 17, kind: output, shape index: {}]  }
   0x1   :  { %6324 = sst [smem:[#allocation46_spill]] %s6289_s0 }
   0x2   :  { %6325 = sst [smem:[#allocation47_spill]] %s6290_s1 }
   0x3   :  { %6326 = sst [smem:[#allocation48_spill]] %s6291_s2 }
   0x4   :  { %6327 = sst [smem:[#allocation49_spill]] %s6292_s3 }
   0x5   :  { %6328 = sst [smem:[#allocation50_spill]] %s6305_s16 }
   0x6   :  { %6329 = sst [smem:[#allocation51_spill]] %s6306_s17 }
   0x7   :  { %22 = vsyncpa [#allocation3], 0 }
   0x8   :  { %24 = vsyncpa [#allocation3 + $0x1], 0 }
   0x9   :  { %25 = vsyncpa [#allocation6], 0 }
   0xa   :  { %26 = vsyncpa [#allocation9], 0 }
   0xb   :  { %27 = vsyncpa [#allocation12], 0 }
   0xc   :  { %28 = vsyncpa [#allocation15], 0 }
   0xd   :  { %29 = vsyncpa [#allocation18], 0 }
   0xe   :  { %30 = vsyncpa [#allocation21], 0 }
   0xf   :  { %31 = vsyncpa [#allocation24], 0 }
  0x10   :  { %32 = vsyncpa [#allocation27], 0 }
  0x11   :  { %33 = vsyncpa [#allocation4], 0 }
  0x12   :  { %35 = vsyncpa [#allocation4 + $0x1], 0  ;;  %s5538_s24 = smov 0   ;;  %s5540_s25 = smov 0  }
  0x13   :  { %s5542_s26 = smov 0   ;;  %s5544_s27 = smov 0  }
  0x14 LB: > { %6330 = sst [smem:[#allocation40_spill]] %s5405_s24  ;;  %s5419_s28 = smov [#allocation5]   ;;  %s5417_s27 = sphi %s5544_s27, %s5948_s27   ;;  %s5413_s26 = sphi %s5542_s26, %s6385_s26   ;;  %s5409_s25 = sphi %s5540_s25, %s6384_s25   ;;  %s5405_s24 = sphi %s5538_s24, %s6381_s24  }
  0x15   : > { %6331 = sst [smem:[#allocation41_spill]] %s5409_s25  ;;  %s446_s29 = sshll.u32 %s5419_s28, 4  ;;  %s5564_s29 = int_to_ptr.vmem [resolvable:$true] %s446_s29 }
  0x16   : > { %6332 = sst [smem:[#allocation42_spill]] %s5413_s26  ;;  %s5559_s0 = sadd.s32 4294967295, %s5417_s27  }
  0x17   : > { %6333 = sst [smem:[#allocation43_spill]] %s5417_s27  ;;  %p3913_p0 = scmp.ge.s32.totalorder %s5417_s27, 1 }
  0x18   : > { %6334 = sst [smem:[#allocation44_spill]] %s5559_s0  ;;  %p6319_p1 = scmp.eq.s32.totalorder %s5559_s0, 0 }
  0x19   : > { %p434_p2 = scmp.lt.s32.totalorder %s5417_s27, 3  ;;  %s5420_s18 = smov [#allocation8]  }
  0x1a   : > { %s470_s19 = sshll.u32 %s5420_s18, 4  ;;  %s5421_s20 = smov [#allocation11]   ;;  %s5579_s19 = int_to_ptr.vmem [resolvable:$true] %s470_s19 }
  0x1b   : > { %p5566_p3 = pnand %p3913_p0, %p434_p2  ;;  %s5581_s21 = sshll.u32 %s5421_s20, 4  ;;  %s495_s21 = int_to_ptr.vmem [resolvable:$true] %s5581_s21 }
  0x1c   : > { %s6338_s28 = sld [smem:[#allocation47_spill]] }
  0x1d   : > { %s6335_s30 = scalar_select %p5566_p3, 1, 0 }
  0x1e   : > { %p4525_p5 = pneg %p5566_p3 }
  0x1f   : > { %6336 = sst [smem:[#allocation45_spill]] %s6335_s30 }
  0x20   : > { %p5575_p6 = pnand %p4525_p5, %p6319_p1 }
  0x22   : > { %s4841_s17 = scalar_lea.hbm %s6338_s28, 1024  ;;  %p5591_p8 = pneg %p5575_p6 }
  0x23   : > { %p4842_p7 = scmp.ne.s32.totalorder %s6338_s28, %s4841_s17  ;;  %p4848_p11 = scmp.lt.u32.totalorder %s4841_s17, %s6338_s28 }
  0x25   : > { %p4844_p9 = pnand %p5591_p8, %p4842_p7 }
  0x27   : > { %p4845_p10 = pneg %p4844_p9 }
  0x29   : > { %p4850_p12 = pnand %p4848_p11, %p4845_p10 }
  0x2b   : > { %4853 = shalt.err (!%p4850_p12)
}
  0x2c   : > { %s4854_s24 = scalar_lea.vmem %s5564_s29, 1024  ;;  %p4862_p5 = scmp.lt.s32.totalorder %s5564_s29, %s5564_s29 }
  0x2d   : > { %p4855_p13 = scmp.ne.s32.totalorder %s5564_s29, %s4854_s24  ;;  %p4863_p4 = scmp.lt.s32.totalorder %s4854_s24, %s4854_s24 }
  0x2f   : > { %p4857_p0 = pnand %p4855_p13, %p5591_p8  ;;  %p4864_p7 = por %p4863_p4, %p4862_p5 }
  0x31   : > { %p4858_p2 = pneg %p4857_p0 }
  0x33   : > { %p4865_p9 = pnand %p4864_p7, %p4858_p2 }
  0x35   : > { %4868 = shalt.err (!%p4865_p9)
}
  0x36   : > { %s5422_s30 = smov 128   ;;  %s5423_s17 = smov 8  }
  0x37   : > { %4528 = dma.hbm_to_vmem [thread:$0]  (!%p5575_p6), %s6338_s28, 1024, %s5564_s29, [#allocation6], %s5422_s30, %s5422_s30, %s5423_s17  }
  0x38   : > { %s6340_s3 = sld [smem:[#allocation49_spill]] }
  0x3e   : > { %s4869_s25 = scalar_lea.hbm %s6340_s3, 512 }
  0x3f   : > { %p4870_p4 = scmp.ne.s32.totalorder %s6340_s3, %s4869_s25  ;;  %p4876_p12 = scmp.lt.u32.totalorder %s4869_s25, %s6340_s3 }
  0x41   : > { %p4872_p10 = pnand %p4870_p4, %p5591_p8 }
  0x43   : > { %p4873_p11 = pneg %p4872_p10 }
  0x45   : > { %p4878_p13 = pnand %p4876_p12, %p4873_p11 }
  0x47   : > { %4881 = shalt.err (!%p4878_p13)
}
  0x48   : > { %s4882_s29 = scalar_lea.vmem %s5579_s19, 512  ;;  %p4890_p7 = scmp.lt.s32.totalorder %s5579_s19, %s5579_s19 }
  0x49   : > { %p4883_p0 = scmp.ne.s32.totalorder %s5579_s19, %s4882_s29  ;;  %p4891_p9 = scmp.lt.s32.totalorder %s4882_s29, %s4882_s29 }
  0x4b   : > { %p4885_p2 = pnand %p4883_p0, %p5591_p8  ;;  %p4892_p4 = por %p4891_p9, %p4890_p7 }
  0x4d   : > { %p4886_p5 = pneg %p4885_p2 }
  0x4f   : > { %p4893_p10 = pnand %p4892_p4, %p4886_p5 }
  0x51   : > { %4896 = shalt.err (!%p4893_p10)
}
  0x52   : > { %s5424_s26 = smov 64   ;;  %s6321_s16 = smov 4  }
  0x53   : > { %4534 = dma.hbm_to_vmem [thread:$0]  (!%p5575_p6), %s6340_s3, 512, %s5579_s19, [#allocation9], %s5424_s26, %s5424_s26, %s6321_s16  }
  0x54   : > { %s4897_s0 = scalar_lea.hbm %s6294_s5, 8192 }
  0x55   : > { %p4898_p11 = scmp.ne.s32.totalorder %s6294_s5, %s4897_s0  ;;  %p4904_p0 = scmp.lt.u32.totalorder %s4897_s0, %s6294_s5 }
  0x57   : > { %p4900_p12 = pnand %p4898_p11, %p5591_p8 }
  0x59   : > { %p4901_p13 = pneg %p4900_p12 }
  0x5b   : > { %p4906_p2 = pnand %p4904_p0, %p4901_p13 }
  0x5d   : > { %4909 = shalt.err (!%p4906_p2)
}
  0x5e   : > { %s4910_s29 = scalar_lea.vmem %s495_s21, 8192  ;;  %p4918_p4 = scmp.lt.s32.totalorder %s495_s21, %s495_s21 }
  0x5f   : > { %p4911_p5 = scmp.ne.s32.totalorder %s495_s21, %s4910_s29  ;;  %p4919_p10 = scmp.lt.s32.totalorder %s4910_s29, %s4910_s29 }
  0x61   : > { %p4913_p7 = pnand %p4911_p5, %p5591_p8  ;;  %p4920_p1 = por %p4919_p10, %p4918_p4 }
  0x63   : > { %p4914_p9 = pneg %p4913_p7 }
  0x65   : > { %p4921_p3 = pnand %p4920_p1, %p4914_p9 }
  0x67   : > { %4924 = shalt.err (!%p4921_p3)
}
  0x68   : > { %s5426_s19 = smov 1024   ;;  %s5427_s30 = smov [#allocation14]  }
  0x69   : > { %4540 = dma.hbm_to_vmem [thread:$0]  (!%p5575_p6), %s6294_s5, 8192, %s495_s21, [#allocation12], %s5426_s19, %s5426_s19, %s5424_s26  }
  0x6a   : > { %s518_s17 = sshll.u32 %s5427_s30, 4  ;;  %s5428_s0 = smov [#allocation17]   ;;  %s519_s17 = int_to_ptr.vmem [resolvable:$true] %s518_s17 }
  0x6b   : > { %s543_s22 = sshll.u32 %s5428_s0, 4  ;;  %s4925_s24 = scalar_lea.hbm %s6296_s7, 16384  ;;  %s5658_s22 = int_to_ptr.vmem [resolvable:$true] %s543_s22 }
  0x6c   : > { %p4926_p1 = scmp.ne.s32.totalorder %s6296_s7, %s4925_s24  ;;  %p4932_p12 = scmp.lt.u32.totalorder %s4925_s24, %s6296_s7 }
  0x6e   : > { %p4928_p3 = pnand %p4926_p1, %p5591_p8 }
  0x70   : > { %p4929_p11 = pneg %p4928_p3 }
  0x72   : > { %p4934_p13 = pnand %p4932_p12, %p4929_p11 }
  0x74   : > { %4937 = shalt.err (!%p4934_p13)
}
  0x75   : > { %s4938_s19 = scalar_lea.vmem %s519_s17, 16384  ;;  %p4946_p7 = scmp.lt.s32.totalorder %s519_s17, %s519_s17 }
  0x76   : > { %p4939_p0 = scmp.ne.s32.totalorder %s519_s17, %s4938_s19  ;;  %p4947_p9 = scmp.lt.s32.totalorder %s4938_s19, %s4938_s19 }
  0x78   : > { %p4941_p2 = pnand %p4939_p0, %p5591_p8  ;;  %p4948_p4 = por %p4947_p9, %p4946_p7 }
  0x7a   : > { %p4942_p5 = pneg %p4941_p2 }
  0x7c   : > { %p4949_p10 = pnand %p4948_p4, %p4942_p5 }
  0x7e   : > { %4952 = shalt.err (!%p4949_p10)
}
  0x7f   : > { %s6341_s16 = smov 4   ;;  %s4953_s20 = scalar_lea.hbm %s6298_s9, 16 }
  0x80   : > { %4546 = dma.hbm_to_vmem [thread:$0]  (!%p5575_p6), %s6296_s7, 16384, %s519_s17, [#allocation15], %s5424_s26, %s5424_s26, %s6341_s16  }
  0x81   : > { %p4954_p1 = scmp.ne.s32.totalorder %s6298_s9, %s4953_s20  ;;  %p4960_p12 = scmp.lt.u32.totalorder %s4953_s20, %s6298_s9 }
  0x83   : > { %p4956_p3 = pnand %p4954_p1, %p5591_p8 }
  0x85   : > { %p4957_p11 = pneg %p4956_p3 }
  0x87   : > { %p4962_p13 = pnand %p4960_p12, %p4957_p11 }
  0x89   : > { %4965 = shalt.err (!%p4962_p13)
}
  0x8a   : > { %s4966_s17 = scalar_lea.vmem %s5658_s22, 16  ;;  %s4973_s19 = scalar_lea.vmem %s5658_s22, 32 }
  0x8b   : > { %p4967_p0 = scmp.ne.s32.totalorder %s5658_s22, %s4966_s17  ;;  %p4974_p7 = scmp.lt.s32.totalorder %s5658_s22, %s5658_s22 }
  0x8c   : > { %p4975_p9 = scmp.lt.s32.totalorder %s4973_s19, %s4966_s17 }
  0x8d   : > { %p4969_p2 = pnand %p4967_p0, %p5591_p8 }
  0x8e   : > { %p4976_p4 = por %p4975_p9, %p4974_p7 }
  0x8f   : > { %p4970_p5 = pneg %p4969_p2 }
  0x91   : > { %p4977_p10 = pnand %p4976_p4, %p4970_p5 }
  0x93   : > { %4980 = shalt.err (!%p4977_p10)
}
  0x94   : > { %4552 = dma.hbm_to_vmem [thread:$0]  (!%p5575_p6), %s6298_s9, 16, %s5658_s22, [#allocation18]  }
  0x95   : > { %s5429_s0 = smov [#allocation20]   ;;  %s5430_s20 = smov [#allocation23]  }
  0x96   : > { %s565_s23 = sshll.u32 %s5429_s0, 4  ;;  %s586_s24 = sshll.u32 %s5430_s20, 4  ;;  %s566_s23 = int_to_ptr.vmem [resolvable:$true] %s565_s23  ;;  %s5705_s24 = int_to_ptr.vmem [resolvable:$true] %s586_s24 }
  0x97   : > { %s4981_s21 = scalar_lea.hbm %s6300_s11, 16 }
  0x98   : > { %p4982_p1 = scmp.ne.s32.totalorder %s6300_s11, %s4981_s21  ;;  %p4988_p12 = scmp.lt.u32.totalorder %s4981_s21, %s6300_s11 }
  0x9a   : > { %p4984_p3 = pnand %p4982_p1, %p5591_p8 }
  0x9c   : > { %p4985_p11 = pneg %p4984_p3 }
  0x9e   : > { %p4990_p13 = pnand %p4988_p12, %p4985_p11 }
  0xa0   : > { %4993 = shalt.err (!%p4990_p13)
}
  0xa1   : > { %s4994_s30 = scalar_lea.vmem %s566_s23, 16  ;;  %s5001_s0 = scalar_lea.vmem %s566_s23, 32 }
  0xa2   : > { %p4995_p0 = scmp.ne.s32.totalorder %s566_s23, %s4994_s30  ;;  %p5002_p7 = scmp.lt.s32.totalorder %s566_s23, %s566_s23 }
  0xa3   : > { %p5003_p9 = scmp.lt.s32.totalorder %s5001_s0, %s4994_s30 }
  0xa4   : > { %p4997_p2 = pnand %p4995_p0, %p5591_p8 }
  0xa5   : > { %p5004_p4 = por %p5003_p9, %p5002_p7 }
  0xa6   : > { %p4998_p5 = pneg %p4997_p2 }
  0xa8   : > { %p5005_p10 = pnand %p5004_p4, %p4998_p5 }
  0xaa   : > { %5008 = shalt.err (!%p5005_p10)
}
  0xab   : > { %4558 = dma.hbm_to_vmem [thread:$0]  (!%p5575_p6), %s6300_s11, 16, %s566_s23, [#allocation21]  }
  0xac   : > { %s5009_s17 = scalar_lea.hbm %s6302_s13, 512 }
  0xad   : > { %p5010_p1 = scmp.ne.s32.totalorder %s6302_s13, %s5009_s17  ;;  %p5016_p12 = scmp.lt.u32.totalorder %s5009_s17, %s6302_s13 }
  0xaf   : > { %p5012_p3 = pnand %p5010_p1, %p5591_p8 }
  0xb1   : > { %p5013_p11 = pneg %p5012_p3 }
  0xb3   : > { %p5018_p13 = pnand %p5016_p12, %p5013_p11 }
  0xb5   : > { %5021 = shalt.err (!%p5018_p13)
}
  0xb6   : > { %s5022_s23 = scalar_lea.vmem %s5705_s24, 512  ;;  %p5030_p7 = scmp.lt.s32.totalorder %s5705_s24, %s5705_s24 }
  0xb7   : > { %p5023_p0 = scmp.ne.s32.totalorder %s5705_s24, %s5022_s23  ;;  %p5031_p9 = scmp.lt.s32.totalorder %s5022_s23, %s5022_s23 }
  0xb9   : > { %p5025_p2 = pnand %p5023_p0, %p5591_p8  ;;  %p5032_p4 = por %p5031_p9, %p5030_p7 }
  0xbb   : > { %p5026_p5 = pneg %p5025_p2 }
  0xbd   : > { %p5033_p10 = pnand %p5032_p4, %p5026_p5 }
  0xbf   : > { %5036 = shalt.err (!%p5033_p10)
}
  0xc0   : > { %4564 = dma.hbm_to_vmem [thread:$0]  (!%p5575_p6), %s6302_s13, 512, %s5705_s24, [#allocation24], %s5424_s26, %s5424_s26, %s6341_s16  }
  0xc1   : > { %s5431_s29 = smov [#allocation26]   ;;  %s5432_s21 = smov [#allocation7]  }
  0xc2   : > { %s610_s25 = sshll.u32 %s5431_s29, 4  ;;  %s460_s17 = sshll.u32 %s5432_s21, 4  ;;  %s611_s25 = int_to_ptr.vmem [resolvable:$true] %s610_s25  ;;  %s5751_s17 = int_to_ptr.vmem [resolvable:$true] %s460_s17 }
  0xc3   : > { %s5037_s22 = scalar_lea.hbm %s6304_s15, 512 }
  0xc4   : > { %p5038_p1 = scmp.ne.s32.totalorder %s6304_s15, %s5037_s22  ;;  %p5044_p12 = scmp.lt.u32.totalorder %s5037_s22, %s6304_s15 }
  0xc6   : > { %p5040_p3 = pnand %p5038_p1, %p5591_p8 }
  0xc8   : > { %p5041_p11 = pneg %p5040_p3 }
  0xca   : > { %p5046_p13 = pnand %p5044_p12, %p5041_p11 }
  0xcc   : > { %5049 = shalt.err (!%p5046_p13)
}
  0xcd   : > { %s5050_s20 = scalar_lea.vmem %s611_s25, 512  ;;  %p5058_p7 = scmp.lt.s32.totalorder %s611_s25, %s611_s25 }
  0xce   : > { %p5051_p0 = scmp.ne.s32.totalorder %s611_s25, %s5050_s20  ;;  %p5059_p9 = scmp.lt.s32.totalorder %s5050_s20, %s5050_s20 }
  0xd0   : > { %p5053_p2 = pnand %p5051_p0, %p5591_p8  ;;  %p5060_p4 = por %p5059_p9, %p5058_p7 }
  0xd2   : > { %p5054_p5 = pneg %p5053_p2 }
  0xd4   : > { %p5061_p10 = pnand %p5060_p4, %p5054_p5 }
  0xd6   : > { %5064 = shalt.err (!%p5061_p10)
}
  0xd7   : > { %4570 = dma.hbm_to_vmem [thread:$0]  (!%p5575_p6), %s6304_s15, 512, %s611_s25, [#allocation27], %s5424_s26, %s5424_s26, %s6341_s16  }
  0xd8   : > { %s6342_s2 = sld [smem:[#allocation48_spill]] }
  0xde   : > { %s5065_s22 = scalar_lea.hbm %s6342_s2, 32 }
  0xdf   : > { %p5066_p1 = scmp.ne.s32.totalorder %s6342_s2, %s5065_s22  ;;  %p5072_p12 = scmp.lt.u32.totalorder %s5065_s22, %s6342_s2 }
  0xe1   : > { %p5068_p3 = pnand %p5066_p1, %p5591_p8 }
  0xe3   : > { %p5069_p11 = pneg %p5068_p3 }
  0xe5   : > { %p5074_p13 = pnand %p5072_p12, %p5069_p11 }
  0xe7   : > { %5077 = shalt.err (!%p5074_p13)
}
  0xe8   : > { %s5078_s26 = scalar_lea.vmem %s5751_s17, 32  ;;  %p5086_p7 = scmp.lt.s32.totalorder %s5751_s17, %s5751_s17 }
  0xe9   : > { %p5079_p0 = scmp.ne.s32.totalorder %s5751_s17, %s5078_s26  ;;  %p5087_p9 = scmp.lt.s32.totalorder %s5078_s26, %s5078_s26 }
  0xeb   : > { %p5081_p2 = pnand %p5079_p0, %p5591_p8  ;;  %p5088_p4 = por %p5087_p9, %p5086_p7 }
  0xed   : > { %p5082_p5 = pneg %p5081_p2 }
  0xef   : > { %p5089_p10 = pnand %p5088_p4, %p5082_p5 }
  0xf1   : > { %5092 = shalt.err (!%p5089_p10)
}
  0xf2   : > { %4531 = dma.hbm_to_vmem [thread:$0]  (!%p5575_p6), %s6342_s2, 32, %s5751_s17, [#allocation6]  }
  0xf3   : > { %s5433_s20 = smov [#allocation10]   ;;  %s5434_s21 = smov [#allocation13]  }
  0xf4   : > { %s484_s29 = sshll.u32 %s5433_s20, 4  ;;  %s508_s19 = sshll.u32 %s5434_s21, 4  ;;  %s485_s29 = int_to_ptr.vmem [resolvable:$true] %s484_s29  ;;  %s5797_s19 = int_to_ptr.vmem [resolvable:$true] %s508_s19 }
  0xf5   : > { %s5093_s30 = scalar_lea.hbm %s6293_s4, 16 }
  0xf6   : > { %p5094_p1 = scmp.ne.s32.totalorder %s6293_s4, %s5093_s30  ;;  %p5100_p12 = scmp.lt.u32.totalorder %s5093_s30, %s6293_s4 }
  0xf8   : > { %p5096_p3 = pnand %p5094_p1, %p5591_p8 }
  0xfa   : > { %p5097_p11 = pneg %p5096_p3 }
  0xfc   : > { %p5102_p13 = pnand %p5100_p12, %p5097_p11 }
  0xfe   : > { %5105 = shalt.err (!%p5102_p13)
}
  0xff   : > { %s5106_s26 = scalar_lea.vmem %s485_s29, 16  ;;  %s5113_s16 = scalar_lea.vmem %s485_s29, 32 }
 0x100   : > { %p5107_p0 = scmp.ne.s32.totalorder %s485_s29, %s5106_s26  ;;  %p5114_p7 = scmp.lt.s32.totalorder %s485_s29, %s485_s29 }
 0x101   : > { %p5115_p9 = scmp.lt.s32.totalorder %s5113_s16, %s5106_s26 }
 0x102   : > { %p5109_p2 = pnand %p5107_p0, %p5591_p8 }
 0x103   : > { %p5116_p4 = por %p5115_p9, %p5114_p7 }
 0x104   : > { %p5110_p5 = pneg %p5109_p2 }
 0x106   : > { %p5117_p10 = pnand %p5116_p4, %p5110_p5 }
 0x108   : > { %5120 = shalt.err (!%p5117_p10)
}
 0x109   : > { %4537 = dma.hbm_to_vmem [thread:$0]  (!%p5575_p6), %s6293_s4, 16, %s485_s29, [#allocation9]  }
 0x10a   : > { %s5121_s22 = scalar_lea.hbm %s6295_s6, 256 }
 0x10b   : > { %p5122_p1 = scmp.ne.s32.totalorder %s6295_s6, %s5121_s22  ;;  %p5128_p12 = scmp.lt.u32.totalorder %s5121_s22, %s6295_s6 }
 0x10d   : > { %p5124_p3 = pnand %p5122_p1, %p5591_p8 }
 0x10f   : > { %p5125_p11 = pneg %p5124_p3 }
 0x111   : > { %p5130_p13 = pnand %p5128_p12, %p5125_p11 }
 0x113   : > { %5133 = shalt.err (!%p5130_p13)
}
 0x114   : > { %s5134_s29 = scalar_lea.vmem %s5797_s19, 256  ;;  %p5142_p7 = scmp.lt.s32.totalorder %s5797_s19, %s5797_s19 }
 0x115   : > { %p5135_p0 = scmp.ne.s32.totalorder %s5797_s19, %s5134_s29  ;;  %p5143_p9 = scmp.lt.s32.totalorder %s5134_s29, %s5134_s29 }
 0x117   : > { %p5137_p2 = pnand %p5135_p0, %p5591_p8  ;;  %p5144_p4 = por %p5143_p9, %p5142_p7 }
 0x119   : > { %p5138_p5 = pneg %p5137_p2 }
 0x11b   : > { %p5145_p10 = pnand %p5144_p4, %p5138_p5 }
 0x11d   : > { %5148 = shalt.err (!%p5145_p10)
}
 0x11e   : > { %4543 = dma.hbm_to_vmem [thread:$0]  (!%p5575_p6), %s6295_s6, 256, %s5797_s19, [#allocation12]  }
 0x11f   : > { %s5435_s16 = smov [#allocation16]   ;;  %s5436_s20 = smov [#allocation19]  }
 0x120   : > { %s532_s25 = sshll.u32 %s5435_s16, 4  ;;  %s554_s21 = sshll.u32 %s5436_s20, 4  ;;  %s533_s25 = int_to_ptr.vmem [resolvable:$true] %s532_s25  ;;  %s5840_s21 = int_to_ptr.vmem [resolvable:$true] %s554_s21 }
 0x121   : > { %s5149_s30 = scalar_lea.hbm %s6297_s8, 16 }
 0x122   : > { %p5150_p1 = scmp.ne.s32.totalorder %s6297_s8, %s5149_s30  ;;  %p5156_p12 = scmp.lt.u32.totalorder %s5149_s30, %s6297_s8 }
 0x124   : > { %p5152_p3 = pnand %p5150_p1, %p5591_p8 }
 0x126   : > { %p5153_p11 = pneg %p5152_p3 }
 0x128   : > { %p5158_p13 = pnand %p5156_p12, %p5153_p11 }
 0x12a   : > { %5161 = shalt.err (!%p5158_p13)
}
 0x12b   : > { %s5162_s29 = scalar_lea.vmem %s533_s25, 16  ;;  %s5169_s17 = scalar_lea.vmem %s533_s25, 32 }
 0x12c   : > { %p5163_p0 = scmp.ne.s32.totalorder %s533_s25, %s5162_s29  ;;  %p5170_p7 = scmp.lt.s32.totalorder %s533_s25, %s533_s25 }
 0x12d   : > { %p5171_p9 = scmp.lt.s32.totalorder %s5169_s17, %s5162_s29 }
 0x12e   : > { %p5165_p2 = pnand %p5163_p0, %p5591_p8 }
 0x12f   : > { %p5172_p4 = por %p5171_p9, %p5170_p7 }
 0x130   : > { %p5166_p5 = pneg %p5165_p2 }
 0x132   : > { %p5173_p10 = pnand %p5172_p4, %p5166_p5 }
 0x134   : > { %5176 = shalt.err (!%p5173_p10)
}
 0x135   : > { %4549 = dma.hbm_to_vmem [thread:$0]  (!%p5575_p6), %s6297_s8, 16, %s533_s25, [#allocation15]  }
 0x136   : > { %s5177_s22 = scalar_lea.hbm %s6299_s10, 16 }
 0x137   : > { %p5178_p1 = scmp.ne.s32.totalorder %s6299_s10, %s5177_s22  ;;  %p5184_p12 = scmp.lt.u32.totalorder %s5177_s22, %s6299_s10 }
 0x139   : > { %p5180_p3 = pnand %p5178_p1, %p5591_p8 }
 0x13b   : > { %p5181_p11 = pneg %p5180_p3 }
 0x13d   : > { %p5186_p13 = pnand %p5184_p12, %p5181_p11 }
 0x13f   : > { %5189 = shalt.err (!%p5186_p13)
}
 0x140   : > { %s5190_s25 = scalar_lea.vmem %s5840_s21, 16  ;;  %s5197_s19 = scalar_lea.vmem %s5840_s21, 32 }
 0x141   : > { %p5191_p0 = scmp.ne.s32.totalorder %s5840_s21, %s5190_s25  ;;  %p5198_p7 = scmp.lt.s32.totalorder %s5840_s21, %s5840_s21 }
 0x142   : > { %p5199_p9 = scmp.lt.s32.totalorder %s5197_s19, %s5190_s25 }
 0x143   : > { %p5193_p2 = pnand %p5191_p0, %p5591_p8 }
 0x144   : > { %p5200_p4 = por %p5199_p9, %p5198_p7 }
 0x145   : > { %p5194_p5 = pneg %p5193_p2 }
 0x147   : > { %p5201_p10 = pnand %p5200_p4, %p5194_p5 }
 0x149   : > { %5204 = shalt.err (!%p5201_p10)
}
 0x14a   : > { %4555 = dma.hbm_to_vmem [thread:$0]  (!%p5575_p6), %s6299_s10, 16, %s5840_s21, [#allocation18]  }
 0x14b   : > { %s5437_s26 = smov [#allocation22]   ;;  %s5438_s20 = smov [#allocation25]  }
 0x14c   : > { %s576_s16 = sshll.u32 %s5437_s26, 4  ;;  %s600_s27 = sshll.u32 %s5438_s20, 4  ;;  %s577_s16 = int_to_ptr.vmem [resolvable:$true] %s576_s16  ;;  %s5884_s27 = int_to_ptr.vmem [resolvable:$true] %s600_s27 }
 0x14d   : > { %s5205_s23 = scalar_lea.hbm %s6301_s12, 16 }
 0x14e   : > { %p5206_p1 = scmp.ne.s32.totalorder %s6301_s12, %s5205_s23  ;;  %p5212_p12 = scmp.lt.u32.totalorder %s5205_s23, %s6301_s12 }
 0x150   : > { %p5208_p3 = pnand %p5206_p1, %p5591_p8 }
 0x152   : > { %p5209_p11 = pneg %p5208_p3 }
 0x154   : > { %p5214_p13 = pnand %p5212_p12, %p5209_p11 }
 0x156   : > { %5217 = shalt.err (!%p5214_p13)
}
 0x157   : > { %s5218_s19 = scalar_lea.vmem %s577_s16, 16  ;;  %s5225_s29 = scalar_lea.vmem %s577_s16, 32 }
 0x158   : > { %p5219_p0 = scmp.ne.s32.totalorder %s577_s16, %s5218_s19  ;;  %p5226_p7 = scmp.lt.s32.totalorder %s577_s16, %s577_s16 }
 0x159   : > { %p5227_p9 = scmp.lt.s32.totalorder %s5225_s29, %s5218_s19 }
 0x15a   : > { %p5221_p2 = pnand %p5219_p0, %p5591_p8 }
 0x15b   : > { %p5228_p4 = por %p5227_p9, %p5226_p7 }
 0x15c   : > { %p5222_p5 = pneg %p5221_p2 }
 0x15e   : > { %p5229_p10 = pnand %p5228_p4, %p5222_p5 }
 0x160   : > { %5232 = shalt.err (!%p5229_p10)
}
 0x161   : > { %4561 = dma.hbm_to_vmem [thread:$0]  (!%p5575_p6), %s6301_s12, 16, %s577_s16, [#allocation21]  }
 0x162   : > { %s5233_s30 = scalar_lea.hbm %s6303_s14, 16 }
 0x163   : > { %p5234_p1 = scmp.ne.s32.totalorder %s6303_s14, %s5233_s30  ;;  %p5240_p12 = scmp.lt.u32.totalorder %s5233_s30, %s6303_s14 }
 0x165   : > { %p5236_p3 = pnand %p5234_p1, %p5591_p8 }
 0x167   : > { %p5237_p11 = pneg %p5236_p3 }
 0x169   : > { %p5242_p13 = pnand %p5240_p12, %p5237_p11 }
 0x16b   : > { %5245 = shalt.err (!%p5242_p13)
}
 0x16c   : > { %s5246_s16 = scalar_lea.vmem %s5884_s27, 16  ;;  %s5253_s21 = scalar_lea.vmem %s5884_s27, 32 }
 0x16d   : > { %p5247_p0 = scmp.ne.s32.totalorder %s5884_s27, %s5246_s16  ;;  %p5254_p7 = scmp.lt.s32.totalorder %s5884_s27, %s5884_s27 }
 0x16e   : > { %p5255_p9 = scmp.lt.s32.totalorder %s5253_s21, %s5246_s16 }
 0x16f   : > { %p5249_p2 = pnand %p5247_p0, %p5591_p8 }
 0x170   : > { %p5256_p4 = por %p5255_p9, %p5254_p7 }
 0x171   : > { %p5250_p5 = pneg %p5249_p2 }
 0x173   : > { %p5257_p10 = pnand %p5256_p4, %p5250_p5 }
 0x175   : > { %5260 = shalt.err (!%p5257_p10)
}
 0x176   : > { %4567 = dma.hbm_to_vmem [thread:$0]  (!%p5575_p6), %s6303_s14, 16, %s5884_s27, [#allocation24]  }
 0x177   : > { %s5439_s17 = smov [#allocation28]   ;;  %s6343_s30 = sld [smem:[#allocation50_spill]] }
 0x178   : > { %s624_s26 = sshll.u32 %s5439_s17, 4  ;;  %s625_s26 = int_to_ptr.vmem [resolvable:$true] %s624_s26 }
 0x17d   : > { %s5261_s23 = scalar_lea.hbm %s6343_s30, 16 }
 0x17e   : > { %p5262_p1 = scmp.ne.s32.totalorder %s6343_s30, %s5261_s23  ;;  %p5268_p12 = scmp.lt.u32.totalorder %s5261_s23, %s6343_s30 }
 0x180   : > { %p5264_p3 = pnand %p5262_p1, %p5591_p8 }
 0x182   : > { %p5265_p11 = pneg %p5264_p3 }
 0x184   : > { %p5270_p13 = pnand %p5268_p12, %p5265_p11 }
 0x186   : > { %5273 = shalt.err (!%p5270_p13)
}
 0x187   : > { %s5274_s27 = scalar_lea.vmem %s625_s26, 16  ;;  %s5281_s21 = scalar_lea.vmem %s625_s26, 32 }
 0x188   : > { %p5275_p0 = scmp.ne.s32.totalorder %s625_s26, %s5274_s27  ;;  %p5282_p7 = scmp.lt.s32.totalorder %s625_s26, %s625_s26 }
 0x189   : > { %p5283_p9 = scmp.lt.s32.totalorder %s5281_s21, %s5274_s27 }
 0x18a   : > { %p5277_p2 = pnand %p5275_p0, %p5591_p8 }
 0x18b   : > { %p5284_p4 = por %p5283_p9, %p5282_p7 }
 0x18c   : > { %p5278_p5 = pneg %p5277_p2 }
 0x18e   : > { %p5285_p10 = pnand %p5284_p4, %p5278_p5 }
 0x190   : > { %5288 = shalt.err (!%p5285_p10)
}
 0x191   : > { %s6344_s17 = sld [smem:[#allocation43_spill]]  ;;  %s6345_s20 = sld [smem:[#allocation42_spill]] }
 0x192   : > { %s6346_s22 = sld [smem:[#allocation41_spill]]  ;;  %s6347_s18 = sld [smem:[#allocation40_spill]] }
 0x193   : > { %s6348_s23 = sld [smem:[#allocation44_spill]] }
 0x194   : > { %4573 = dma.hbm_to_vmem [thread:$0]  (!%p5575_p6), %s6343_s30, 16, %s625_s26, [#allocation27]  }
 0x197   : > { %s3912_s0 = sadd.s32 4294967294, %s6344_s17   ;;  %s5948_s27 = sadd.s32 1, %s6344_s17  }
 0x198   : > { %s48_s1 = sadd.s32 1, %s6345_s20  ;;  %s45_s24 = ssub.s32 %s6344_s17, %s5948_s27 }
 0x199   : > { %p55_p8 = scmp.ne.s32.totalorder %s6345_s20, %s6346_s22  ;;  %p46_p1 = scmp.eq.s32.totalorder %s45_s24, 0 }
 0x19a   : > { %p56_p3 = scmp.eq.s32.totalorder %s6344_s17, 0  ;;  %p61_p11 = scmp.ne.s32.totalorder %s6346_s22, %s6347_s18 }
 0x19b   : > { %p421_p12 = scmp.eq.s32.totalorder %s6348_s23, 1  ;;  %p6349_p0 = scmp.eq.s32.totalorder %s6348_s23, 0 }
 0x19c   : > { %s5960_s25 = scalar_select %p46_p1, %s6345_s20, %s48_s1  }
 0x19d   : > { %p57_p13 = por %p56_p3, %p55_p8  ;;  %p5964_p2 = por %p6349_p0, %p61_p11 }
 0x19e   : > { %p5968_p6 = por %p421_p12, %p55_p8  ;;  %p427_p5 = scmp.eq.s32.totalorder %s3912_s0, 1 }
 0x19f   : > { %p4598_p7 = scmp.lt.s32.totalorder %s6344_s17, 2  ;;  %s635_s21 = sand.u32 1, %s6345_s20  }
 0x1a0   : > { %s6351_s26 = scalar_select %p5968_p6, 1, 0 }
 0x1a1   : > { %p5974_p9 = por %p427_p5, %p61_p11  ;;  %s3931_s29 = sshll.u32 %s635_s21, 2 }
 0x1a2   : > { %s3932_s22 = sshll.u32 %s6344_s17, 6  ;;  %s6353_s23 = sld [smem:[#allocation46_spill]] }
 0x1a3   : > { %s6352_s19 = scalar_select %p5974_p9, 1, 0 }
 0x1a4   : > { %s639_s2 = scalar_lea.vmem [#allocation2], %s3931_s29  ;;  %p5984_p4 = pnand %p4598_p7, %p57_p13 }
 0x1a5   : > { %s646_s3 = sshll.u32 %s639_s2, 4  ;;  %s636_s17 = scalar_lea.sflag [#allocation3], %s635_s21  ;;  %s5988_s3 = int_to_ptr.vmem [resolvable:$true] %s646_s3 }
 0x1a6   : > { %p5291_p8 = pneg %p5984_p4 }
 0x1a8   : > { %s5982_s24 = scalar_lea.hbm %s6353_s23, %s3932_s22  ;;  %s5294_s2 = scalar_lea.hbm %s6353_s23, 128 }
 0x1a9   : > { %s5289_s20 = scalar_lea.hbm %s5982_s24, 64  ;;  %p5295_p11 = scmp.lt.u32.totalorder %s5982_s24, %s6353_s23 }
 0x1aa   : > { %p5290_p10 = scmp.ne.s32.totalorder %s5982_s24, %s5289_s20  ;;  %p5296_p12 = scmp.lt.u32.totalorder %s5294_s2, %s5289_s20 }
 0x1ab   : > { %p5298_p0 = scmp.lt.u32.totalorder %s5289_s20, %s5982_s24 }
 0x1ac   : > { %p5292_p1 = pnand %p5291_p8, %p5290_p10  ;;  %p5297_p13 = por %p5296_p12, %p5295_p11 }
 0x1ae   : > { %p5293_p3 = pneg %p5292_p1  ;;  %p5299_p5 = por %p5298_p0, %p5297_p13 }
 0x1b0   : > { %p5300_p7 = pnand %p5299_p5, %p5293_p3 }
 0x1b2   : > { %5303 = shalt.err (!%p5300_p7)
}
 0x1b3   : > { %s5304_s21 = scalar_lea.vmem %s5988_s3, 64  ;;  %s5440_s22 = smov [#allocation2]  }
 0x1b4   : > { %p5305_p10 = scmp.ne.s32.totalorder %s5988_s3, %s5304_s21  ;;  %s5309_s29 = sshll.u32 %s5440_s22, 4  ;;  %s5310_s29 = int_to_ptr.vmem [resolvable:$false] %s5309_s29 }
 0x1b5   : > { %s5311_s18 = scalar_lea.vmem %s5310_s29, 128  ;;  %p5312_p6 = scmp.lt.s32.totalorder %s5988_s3, %s5310_s29 }
 0x1b6   : > { %p5307_p1 = pnand %p5305_p10, %p5291_p8  ;;  %p5313_p11 = scmp.lt.s32.totalorder %s5311_s18, %s5304_s21 }
 0x1b8   : > { %p5308_p9 = pneg %p5307_p1  ;;  %p5314_p12 = por %p5313_p11, %p5312_p6 }
 0x1ba   : > { %p5315_p13 = pnand %p5314_p12, %p5308_p9 }
 0x1bc   : > { %5318 = shalt.err (!%p5315_p13)
}
 0x1bd   : > { %4577 = dma.hbm_to_vmem [thread:$0]  (!%p5984_p4), %s5982_s24, 64, %s5988_s3, %s636_s17  }
 0x1be   : > { %s6355_s20 = sld [smem:[#allocation45_spill]] }
 0x1c4   : > { %p6356_p3 = scmp.ne.s32.totalorder %s6355_s20, 0 }
 0x1c5   : > { %s6357_s2 = sld [smem:[#allocation41_spill]] (!%p6356_p3) }
 0x1c6   : > { %655 = sbr.rel (%p6356_p3) target bundleno = 4253 (0x109d), region = 88 }
 0x1cb   : > { %s6018_s1 = sand.u32 (!%p6356_p3), 1, %s6357_s2  }
 0x1cc   : > { %s3934_s22 = sshll.u32 (!%p6356_p3), %s6018_s1, 2  ;;  %s658_s21 = scalar_lea.sflag (!%p6356_p3), [#allocation3], %s6018_s1 }
 0x1cd   : > { %s6024_s29 = scalar_lea.vmem [#allocation2], %s3934_s22 }
 0x1ce   : > { %5364 = dma.done.wait (%p5964_p2), %s658_s21, 64  }
 0x1cf   : > { %5366 = vsyncadd (%p5964_p2), %s658_s21, 4294967232  ;;  %s6358_s3 = sld [smem:[#allocation44_spill]] }
 0x1d5   : > { %p6359_p6 = scmp.eq.s32.totalorder %s6358_s3, 0 }
 0x1d7   : > { %5368 = dma.done.wait (%p6359_p6), [#allocation6], 1056   ;;  %p6360_p9 = pmov %p6359_p6 }
 0x1d8   : > { %p6361_p4 = pmov %p6359_p6 }
 0x1d9   : > { %5370 = vsyncadd (%p6360_p9), [#allocation6], 4294966240 }
 0x1da   : > { %5372 = dma.done.wait (%p6361_p4), [#allocation9], 528   ;;  %p6362_p8 = pmov %p6361_p4 }
 0x1db   : > { %p6363_p0 = pmov %p6361_p4 }
 0x1dc   : > { %5374 = vsyncadd (%p6362_p8), [#allocation9], 4294966768 }
 0x1dd   : > { %5376 = dma.done.wait (%p6363_p0), [#allocation12], 8448   ;;  %p6364_p5 = pmov %p6363_p0 }
 0x1de   : > { %p6365_p2 = pmov %p6363_p0 }
 0x1df   : > { %5378 = vsyncadd (%p6364_p5), [#allocation12], 4294958848 }
 0x1e0   : > { %5380 = dma.done.wait (%p6365_p2), [#allocation15], 16400   ;;  %p6366_p7 = pmov %p6363_p0 }
 0x1e1   : > { %p6367_p10 = pmov %p6363_p0 }
 0x1e2   : > { %5382 = vsyncadd (%p6366_p7), [#allocation15], 4294950896 }
 0x1e3   : > { %5384 = dma.done.wait (%p6367_p10), [#allocation18], 32   ;;  %p6368_p1 = pmov %p6363_p0 }
 0x1e4   : > { %p6369_p11 = pmov %p6363_p0 }
 0x1e5   : > { %5386 = vsyncadd (%p6368_p1), [#allocation18], 4294967264 }
 0x1e6   : > { %5388 = dma.done.wait (%p6369_p11), [#allocation21], 32   ;;  %p6370_p12 = pmov %p6363_p0 }
 0x1e7   : > { %p6371_p13 = pmov %p6363_p0 }
 0x1e8   : > { %5390 = vsyncadd (%p6370_p12), [#allocation21], 4294967264 }
 0x1e9   : > { %5392 = dma.done.wait (%p6371_p13), [#allocation24], 528   ;;  %p6372_p3 = pmov %p6363_p0 }
 0x1ea   : > { %p6373_p6 = pmov %p6363_p0 }
 0x1eb   : > { %5394 = vsyncadd (%p6372_p3), [#allocation24], 4294966768 }
 0x1ec   : > { %5396 = dma.done.wait (%p6373_p6), [#allocation27], 528   ;;  %p6374_p9 = pmov %p6363_p0 }
 0x1ed   : > { %v5441_v0 = vmov 0   ;;  %v4675_v1 = vld [vmem:[#allocation5 + $0x4] ss:$8 sps:$4 sm:$0xff]   ;;  %v4677_v2 = vld [vmem:[#allocation5] ss:$8 sps:$4 sm:$0xff]   ;;  %vm1175_vm0 = vcmask 523264   ;;  %v1125_v11 = vlaneseq }
 0x1ee   : > { %5398 = vsyncadd (%p6374_p9), [#allocation27], 4294966768  ;;  %1211 = vmatprep.mubr.bf16.mxu0 %v5441_v0  ;;  %1179 = vmatprep.subr.bf16.mxu0 %v4675_v1  ;;  %v4678_v3 = vld [vmem:[#allocation5 + $0x14] ss:$8 sps:$4 sm:$0xff]   ;;  %v4680_v4 = vld [vmem:[#allocation5 + $0x10] ss:$8 sps:$4 sm:$0xff]  }
 0x1ef   : > { %1180 = vmatpush1.bf16.msra.mxu0 %v4677_v2  ;;  %v4681_v5 = vld [vmem:[#allocation5 + $0x24] ss:$8 sps:$4 sm:$0xff]   ;;  %v4683_v6 = vld [vmem:[#allocation5 + $0x20] ss:$8 sps:$4 sm:$0xff]   ;;  %v4684_v7 = vld [vmem:[#allocation5 + $0x34] ss:$8 sps:$4 sm:$0xff]  }
 0x1f0   : > { %1181 = vmatprep.subr.bf16.mxu0 %v4678_v3  ;;  %v4686_v8 = vld [vmem:[#allocation5 + $0x30] ss:$8 sps:$4 sm:$0xff]   ;;  %v6069_v12 = vshrl.u32 %v1125_v11, 7  ;;  %v786_v14 = vld [vmem:[#allocation7] sm:$0x3]  ;;  %s5442_s16 = smov 64  }
 0x1f1   : > { %v6064_v9 = vld [vmem:[%s6024_s29] sm:$0xf]  ;;  %v5443_v22 = vmov 0.0   ;;  %vm5444_vm1 = vmmov 0   ;;  %s5445_s24 = smov 96   ;;  %vm1322_vm2 = vcmask 1041408  }
 0x1f2   : > { %v1123_v10 = vpack.c.bf16 %v6064_v9, %v6064_v9  ;;  %v6072_v13 = vsub.s32 0, %v6069_v12  ;;  %4393 = vmatprep.subr.bf16.mxu1 %v5443_v22  ;;  %4397 = vmatprep.mubr.msk.bf16.mxu1 %vm5444_vm1, %v5443_v22  ;;  %v6083_v25 = vsub.s32 1, %v6069_v12  ;;  %vm1259_vm3 = vcmask 261120   ;;  %s5446_s0 = smov 32   ;;  %s4189_s17 = sshll.u32 %s6358_s3, 6 }
 0x1f3   : > { %1182 = vmatpush1.bf16.msra.mxu0 %v4680_v4  ;;  %vm1304_vm4 = vcmask 27648   ;;  %vm1318_vm5 = vcmask 31744   ;;  %vm1591_vm6 = vcmask 519168   ;;  %s775_s18 = scalar_lea.vmem [#allocation29], %s3934_s22  ;;  %s6375_s29 = sld [smem:[#allocation51_spill]] }
 0x1f4   : > { %1183 = vmatprep.subr.bf16.mxu0 %v4681_v5  ;;  %v1128_v15 = vrot.slane %v786_v14, %v6072_v13  ;;  %v1132_v28 = vrot.slane %v786_v14, %v6083_v25  ;;  %s3690_s20 = sshll.u32 %s775_s18, 4  ;;  %s3677_s3 = scalar_lea.sflag [#allocation4], %s6018_s1  ;;  %s6247_s20 = int_to_ptr.vmem [resolvable:$true] %s3690_s20 }
 0x1f5   : > { %p6376_p8 = scmp.ne.s32.totalorder %s6351_s26, 0  ;;  %s5447_s22 = smov [#allocation29]  }
 0x1f7   : > { %1184 = vmatpush1.bf16.msra.mxu0 %v4683_v6 }
 0x1f8   : > { %1185 = vmatprep.subr.bf16.mxu0 %v4684_v7 }
 0x1fb   : > { %1186 = vmatpush1.bf16.msra.mxu0 %v4686_v8 }
 0x1fc   : > { %4421 = vmatprep.subr.bf16.mxu0 %v5443_v22 }
 0x1fe   : > { %3960 = vmatmul.mubr.msk.bf16.vlgmr.msra.gmra.mrb[0].mxu0 %vm1175_vm0, %v1123_v10 }
 0x1ff   : > { %4429 = vmatprep.mubr.msk.bf16.mxu0 %vm5444_vm1, %v5443_v22 }
 0x2d1   : > { %v1213_v16 = vpop.f32.mrb[0].mxu0 }
 0x2d2   : > { %v1214_v17 = vadd.f32 %v1213_v16, %v1128_v15  ;;  %v1215_v18 = vpop.f32.mrb[1].mxu0 }
 0x2d3   : > { %v1217_v19 = vpop.f32.mrb[2].mxu0  ;;  %v1216_v30 = vadd.f32 %v1215_v18, %v1132_v28 }
 0x2d4   : > { %v1218_v20 = vpop.f32.mrb[3].mxu0  ;;  %1221 = vrot.lane.b32.xlu0 %v1214_v17, %s5442_s16  ;;  %v1256_v23 = vpack.c.bf16 %v1214_v17, %v1214_v17  ;;  %v4687_v19 = vld [vmem:[#allocation8] sm:$0xff]   ;;  %s6245_s16 = scalar_lea.hbm %s6375_s29, %s4189_s17 }
 0x2d5   : > { %v1317_v33 = vpack.c.bf16 %v1216_v30, %v1216_v30  ;;  %4422 = vmatpush3.bf16.msra.mxu0 %v4687_v19  ;;  %v4688_v20 = vld [vmem:[#allocation8 + $0x8] sm:$0xff]  }
 0x2d6   : > { %4423 = vmatprep.subr.bf16.mxu0 %v5443_v22 }
 0x2d7   : > { %v1324_v34 = vsel %vm1322_vm2, %v1317_v33, 0 }
 0x2d9   : > { %4424 = vmatpush3.bf16.msra.mxu0 %v4688_v20  ;;  %v807_v20 = vld [vmem:[#allocation11 + $0x58] sm:$0xff] }
 0x2da   : > { %4425 = vmatprep.subr.bf16.mxu0 %v5443_v22 }
 0x346   : > { %v1222_v21 = vpop.permute.xlu0 %1221 }
 0x347   : > { %1224 = vxpose.xlu0.b32.start.end [1/1] (short) (narrow) %v1222_v21, 32  ;;  %v4689_v21 = vld [vmem:[#allocation8 + $0x10] sm:$0xff]  }
 0x348   : > { %4426 = vmatpush3.bf16.msra.mxu0 %v4689_v21 }
 0x349   : > { %4427 = vmatprep.subr.bf16.mxu0 %v5443_v22 }
 0x37c   : > { %1404 = vrot.lane.b32.xlu0 %v1256_v23, %s5445_s24 }
 0x3c7   : > { %v1240_v24 = vpop.trf.xlu0 }
 0x3cb   : > { %v1241_v26 = vpop.trf.xlu0 }
 0x3cc   : > { %v1257_v27 = vpack.c.bf16 %v1241_v26, %v1240_v24 }
 0x3ce   : > { %4394 = vmatpush3.bf16.msra.mxu1 %v1257_v27 }
 0x3cf   : > { %v1242_v29 = vpop.trf.xlu0  ;;  %4395 = vmatprep.subr.bf16.mxu1 %v5443_v22 }
 0x3d3   : > { %v1243_v31 = vpop.trf.xlu0 }
 0x3d4   : > { %v1258_v32 = vpack.c.bf16 %v1243_v31, %v1242_v29 }
 0x3d6   : > { %4396 = vmatpush3.bf16.msra.mxu1 %v1258_v32  ;;  %v3965_v32 = vld [vmem:[#allocation10] ss:$0 sm:$0xff] }
 0x3d7   : > { %4401 = vmatprep.subr.bf16.mxu1 %v5443_v22 }
 0x3d9   : > { %4398 = vmatmul.mubr.msk.bf16.vlgmr.msra.gmra.mrb[0].mxu1 %vm1259_vm3, %v1256_v23  ;;  %v4690_v23 = vld [vmem:[#allocation8 + $0x18] sm:$0xff]  }
 0x3da   : > { %4402 = vmatpush3.bf16.msra.mxu1 %v1324_v34  ;;  %4403 = vmatprep.mubr.msk.bf16.mxu1 %vm5444_vm1, %v5443_v22 }
 0x3db   : > { %4407 = vmatprep.subr.bf16.mxu1 %v5443_v22  ;;  %4428 = vmatpush3.bf16.msra.mxu0 %v4690_v23 }
 0x3ee   : > { %v1405_v57 = vpop.permute.xlu0 %1404 }
 0x4ac   : > { %v1297_v35 = vpop.f32.mrb[0].mxu1 }
 0x4ad   : > { %v1303_v36 = vmul.f32 0.17677669, %v1297_v35  ;;  %v4399_v37 = vpop.f32.mrb[1].mxu1 }
 0x4ae   : > { %v1300_v38 = vpop.f32.mrb[2].mxu1 }
 0x4af   : > { %v4400_v39 = vpop.f32.mrb[3].mxu1  ;;  %v1305_v40 = vsel %vm1304_vm4, %v1303_v36, -inf }
 0x4b0   : > { %1306 = vmax.xlane.f32.xlu1 %v1305_v40 }
 0x4c1   : > { %1366 = vrot.lane.b32.xlu1 %v1214_v17, %s5446_s0 }
 0x53d   : > { %v1307_v41 = vpop.xlane.xlu1 %1306 }
 0x53e   : > { %v1308_v42 = vsub.f32 %v1303_v36, %v1307_v41 }
 0x540   : > { %v1309_v43 = vmul.f32 1.442695, %v1308_v42 }
 0x541   : > { %v1367_v46 = vpop.permute.xlu1 %1366 }
 0x542   : > { %4827 = vpow2.f32 %v1309_v43 }
 0x54c   : > { %v4828_v44 = vpop.eup %4827 }
 0x54d   : > { %v1311_v45 = vsel %vm1304_vm4, %v4828_v44, 0.0 }
 0x54e   : > { %1312 = vadd.xlane.f32.xlu1 %v1311_v45  ;;  %v796_v45 = vld [vmem:[#allocation11] sm:$0xff] }
 0x581   : > { %1369 = vxpose.xlu1.b32.start.end [1/1] (short) (narrow) %v1367_v46, 32  ;;  %v804_v46 = vld [vmem:[#allocation11 + $0x40] sm:$0xff] }
 0x5db   : > { %v1313_v47 = vpop.xlane.xlu1 %1312 }
 0x5dc   : > { %4829 = vrcp.f32 %v1313_v47  ;;  %v797_v47 = vld [vmem:[#allocation11 + $0x8] sm:$0xff] }
 0x5e6   : > { %v4830_v48 = vpop.eup %4829 }
 0x5e7   : > { %v1315_v49 = vmul.f32 %v4830_v48, %v4828_v44  ;;  %v3974_v48 = vcombine.high %v796_v45, %v804_v46 }
 0x5e9   : > { %v1316_v50 = vpack.c.bf16 %v1315_v49, %v1315_v49  ;;  %v805_v49 = vld [vmem:[#allocation11 + $0x48] sm:$0xff] }
 0x5eb   : > { %4404 = vmatmul.mubr.msk.bf16.vlgmr.msra.gmra.mrb[4].mxu1 %vm1318_vm5, %v1316_v50  ;;  %v3973_v50 = vcombine.low %v796_v45, %v804_v46  ;;  %v831_v45 = vld [vmem:[#allocation11 + $0x118] sm:$0xff] }
 0x5ec   : > { %4411 = vmatprep.mubr.msk.bf16.mxu1 %vm5444_vm1, %v5443_v22  ;;  %v839_v46 = vld [vmem:[#allocation11 + $0x158] sm:$0xff] }
 0x601   : > { %v1385_v51 = vpop.trf.xlu1 }
 0x605   : > { %v1386_v52 = vpop.trf.xlu1 }
 0x606   : > { %v1401_v53 = vpack.c.bf16 %v1386_v52, %v1385_v51  ;;  %v3976_v51 = vcombine.high %v797_v47, %v805_v49  ;;  %v812_v52 = vld [vmem:[#allocation11 + $0x80] sm:$0xff] }
 0x608   : > { %4408 = vmatpush3.bf16.msra.mxu1 %v1401_v53  ;;  %2067 = vmatprep.subr.bf16.mxu0 %v3976_v51  ;;  %v820_v53 = vld [vmem:[#allocation11 + $0xc0] sm:$0xff]  ;;  %v847_v51 = vld [vmem:[#allocation11 + $0x198] sm:$0xff] }
 0x609   : > { %v1387_v54 = vpop.trf.xlu1  ;;  %4409 = vmatprep.subr.bf16.mxu1 %v5443_v22 }
 0x60d   : > { %v1388_v55 = vpop.trf.xlu1 }
 0x60e   : > { %v1402_v56 = vpack.c.bf16 %v1388_v55, %v1387_v54  ;;  %v813_v54 = vld [vmem:[#allocation11 + $0x88] sm:$0xff]  ;;  %v3990_v55 = vcombine.high %v812_v52, %v820_v53 }
 0x610   : > { %4410 = vmatpush3.bf16.msra.mxu1 %v1402_v56  ;;  %v821_v56 = vld [vmem:[#allocation11 + $0xc8] sm:$0xff] }
 0x611   : > { %4415 = vmatprep.subr.bf16.mxu1 %v5443_v22 }
 0x613   : > { %4412 = vmatmul.mubr.msk.bf16.vlgmr.msra.gmra.mrb[8].mxu1 %vm1259_vm3, %v1405_v57  ;;  %v3989_v57 = vcombine.low %v812_v52, %v820_v53  ;;  %v855_v52 = vld [vmem:[#allocation11 + $0x1d8] sm:$0xff] }
 0x614   : > { %4417 = vmatprep.mubr.msk.bf16.mxu1 %vm5444_vm1, %v5443_v22 }
 0x6be   : > { %v1360_v58 = vpop.f32.mrb[4].mxu1 }
 0x6bf   : > { %v4405_v59 = vpop.f32.mrb[5].mxu1 }
 0x6c0   : > { %v1363_v60 = vpop.f32.mrb[6].mxu1  ;;  %v3992_v59 = vcombine.high %v813_v54, %v821_v56 }
 0x6c1   : > { %v4406_v61 = vpop.f32.mrb[7].mxu1  ;;  %v828_v60 = vld [vmem:[#allocation11 + $0x100] sm:$0xff] }
 0x6c2   : > { %v836_v61 = vld [vmem:[#allocation11 + $0x140] sm:$0xff] }
 0x6e6   : > { %v1443_v62 = vpop.f32.mrb[8].mxu1 }
 0x6e7   : > { %v1449_v63 = vmul.f32 0.17677669, %v1443_v62  ;;  %v4413_v1 = vpop.f32.mrb[9].mxu1  ;;  %v829_v62 = vld [vmem:[#allocation11 + $0x108] sm:$0xff] }
 0x6e8   : > { %v1446_v2 = vpop.f32.mrb[10].mxu1  ;;  %v837_v1 = vld [vmem:[#allocation11 + $0x148] sm:$0xff] }
 0x6e9   : > { %v4414_v3 = vpop.f32.mrb[11].mxu1  ;;  %v1450_v4 = vsel %vm1304_vm4, %v1449_v63, -inf  ;;  %v4005_v2 = vcombine.low %v828_v60, %v836_v61 }
 0x6ea   : > { %1451 = vmax.xlane.f32.xlu0 %v1450_v4  ;;  %v4007_v3 = vcombine.low %v829_v62, %v837_v1  ;;  %v4008_v4 = vcombine.high %v829_v62, %v837_v1  ;;  %v4027_v62 = vcombine.low %v847_v51, %v855_v52 }
 0x700   : > { %1463 = vrot.lane.b32.xlu0 %v1317_v33, %s5445_s24  ;;  %s5319_s24 = scalar_lea.vmem %s6247_s20, 64 }
 0x701   : > { %p5320_p4 = scmp.ne.s32.totalorder %s6247_s20, %s5319_s24 }
 0x703   : > { %p5321_p0 = pnand %p5320_p4, %p6376_p8 }
 0x705   : > { %p5322_p5 = pneg %p5321_p0 }
 0x777   : > { %v1452_v5 = vpop.xlane.xlu0 %1451 }
 0x778   : > { %v1453_v6 = vsub.f32 %v1449_v63, %v1452_v5  ;;  %v4006_v63 = vcombine.high %v828_v60, %v836_v61  ;;  %v844_v5 = vld [vmem:[#allocation11 + $0x180] sm:$0xff]  ;;  %v809_v60 = vld [vmem:[#allocation11 + $0x68] sm:$0xff] }
 0x77a   : > { %v1454_v7 = vmul.f32 1.442695, %v1453_v6  ;;  %v852_v6 = vld [vmem:[#allocation11 + $0x1c0] sm:$0xff] }
 0x77b   : > { %v1464_v8 = vpop.permute.xlu0 %1463 }
 0x77c   : > { %4831 = vpow2.f32 %v1454_v7  ;;  %v1469_v10 = vsel %vm1322_vm2, %v1464_v8, 0  ;;  %v845_v7 = vld [vmem:[#allocation11 + $0x188] sm:$0xff]  ;;  %v4022_v8 = vcombine.high %v844_v5, %v852_v6 }
 0x77d   : > { %4416 = vmatpush3.bf16.msra.mxu1 %v1469_v10  ;;  %v853_v10 = vld [vmem:[#allocation11 + $0x1c8] sm:$0xff] }
 0x77e   : > { %2026 = vmatprep.subr.bf16.mxu1 %v3974_v48 }
 0x786   : > { %v4832_v11 = vpop.eup %4831 }
 0x787   : > { %v1456_v14 = vsel %vm1304_vm4, %v4832_v11, 0.0 }
 0x788   : > { %1457 = vadd.xlane.f32.xlu1 %v1456_v14  ;;  %v4023_v14 = vcombine.low %v845_v7, %v853_v10 }
 0x815   : > { %v1458_v15 = vpop.xlane.xlu1 %1457 }
 0x816   : > { %4833 = vrcp.f32 %v1458_v15  ;;  %v4024_v15 = vcombine.high %v845_v7, %v853_v10 }
 0x820   : > { %v4834_v16 = vpop.eup %4833 }
 0x821   : > { %v1460_v17 = vmul.f32 %v4834_v16, %v4832_v11  ;;  %v4021_v11 = vcombine.low %v844_v5, %v852_v6  ;;  %v798_v16 = vld [vmem:[#allocation11 + $0x10] sm:$0xff]  ;;  %v825_v5 = vld [vmem:[#allocation11 + $0xe8] sm:$0xff] }
 0x823   : > { %v1461_v18 = vpack.c.bf16 %v1460_v17, %v1460_v17  ;;  %v806_v17 = vld [vmem:[#allocation11 + $0x50] sm:$0xff] }
 0x824   : > { %v3978_v19 = vcombine.high %v798_v16, %v806_v17  ;;  %v3977_v21 = vcombine.low %v798_v16, %v806_v17  ;;  %v841_v16 = vld [vmem:[#allocation11 + $0x168] sm:$0xff] }
 0x825   : > { %4418 = vmatmul.mubr.msk.bf16.vlgmr.msra.gmra.mrb[12].mxu1 %vm1318_vm5, %v1461_v18  ;;  %v799_v18 = vld [vmem:[#allocation11 + $0x18] sm:$0xff] }
 0x826   : > { %2058 = vmatprep.mubr.bf16.mxu1 %v5441_v0  ;;  %2027 = vmatpush1.bf16.msra.mxu1 %v3973_v50  ;;  %v3979_v23 = vcombine.low %v799_v18, %v807_v20  ;;  %v846_v50 = vld [vmem:[#allocation11 + $0x190] sm:$0xff] }
 0x827   : > { %2028 = vmatprep.subr.bf16.mxu1 %v3990_v55 }
 0x82a   : > { %2029 = vmatpush1.bf16.msra.mxu1 %v3989_v57  ;;  %v800_v57 = vld [vmem:[#allocation11 + $0x20] sm:$0xff] }
 0x82b   : > { %2030 = vmatprep.subr.bf16.mxu1 %v4006_v63 }
 0x82e   : > { %2031 = vmatpush1.bf16.msra.mxu1 %v4005_v2  ;;  %v816_v2 = vld [vmem:[#allocation11 + $0xa0] sm:$0xff] }
 0x82f   : > { %2032 = vmatprep.subr.bf16.mxu1 %v4022_v8 }
 0x832   : > { %2033 = vmatpush1.bf16.msra.mxu1 %v4021_v11  ;;  %v832_v11 = vld [vmem:[#allocation11 + $0x120] sm:$0xff] }
 0x833   : > { %2108 = vmatprep.subr.bf16.mxu1 %v3978_v19 }
 0x8f8   : > { %v1505_v24 = vpop.f32.mrb[12].mxu1 }
 0x8f9   : > { %1512 = vrot.lane.b32.xlu0 %v1505_v24, %s5446_s0  ;;  %v4419_v26 = vpop.f32.mrb[13].mxu1  ;;  %v3980_v24 = vcombine.high %v799_v18, %v807_v20  ;;  %s5323_s0 = sshll.u32 %s5447_s22, 4  ;;  %s5324_s0 = int_to_ptr.vmem [resolvable:$false] %s5323_s0 }
 0x8fa   : > { %v1508_v27 = vpop.f32.mrb[14].mxu1  ;;  %s5325_s2 = scalar_lea.vmem %s5324_s0, 128  ;;  %p5326_p2 = scmp.lt.s32.totalorder %s6247_s20, %s5324_s0 }
 0x8fb   : > { %v4420_v28 = vpop.f32.mrb[15].mxu1  ;;  %p5327_p7 = scmp.lt.s32.totalorder %s5325_s2, %s5319_s24 }
 0x8fd   : > { %p5328_p10 = por %p5327_p7, %p5326_p2 }
 0x8ff   : > { %p5329_p1 = pnand %p5328_p10, %p5322_p5 }
 0x96b   : > { %v1513_v29 = vpop.permute.xlu0 %1512 }
 0x96c   : > { %v1515_v30 = vsel %vm1259_vm3, %v1360_v58, %v1513_v29  ;;  %v3991_v58 = vcombine.low %v813_v54, %v821_v56  ;;  %v4011_v54 = vcombine.low %v831_v45, %v839_v46  ;;  %v4028_v56 = vcombine.high %v847_v51, %v855_v52  ;;  %v843_v51 = vld [vmem:[#allocation11 + $0x178] sm:$0xff] }
 0x96d   : > { %v1516_v31 = vpack.c.bf16 %v1515_v30, %v1515_v30  ;;  %v3971_v30 = vld [vmem:[#allocation17] ss:$0 sm:$0xff] }
 0x96f   : > { %4430 = vmatmul.mubr.msk.bf16.vlgmr.msra.gmra.mrb[4].mxu0 %vm1175_vm0, %v1516_v31 }
 0x970   : > { %2099 = vmatprep.mubr.bf16.mxu0 %v5441_v0 }
 0xa42   : > { %v1584_v33 = vpop.f32.mrb[4].mxu0 }
 0xa43   : > { %v1585_v34 = vadd.f32 %v3965_v32, %v1584_v33  ;;  %v4431_v35 = vpop.f32.mrb[5].mxu0  ;;  %v3972_v32 = vld [vmem:[#allocation19] ss:$0 sm:$0xff] }
 0xa44   : > { %v1587_v36 = vpop.f32.mrb[6].mxu0  ;;  %v822_v35 = vld [vmem:[#allocation11 + $0xd0] sm:$0xff] }
 0xa45   : > { %v4432_v37 = vpop.f32.mrb[7].mxu0  ;;  %v1590_v38 = vadd.f32 %v1585_v34, %v6064_v9  ;;  %v3975_v9 = vcombine.low %v797_v47, %v805_v49  ;;  %v814_v34 = vld [vmem:[#allocation11 + $0x90] sm:$0xff]  ;;  %v815_v36 = vld [vmem:[#allocation11 + $0x98] sm:$0xff]  ;;  %v4012_v49 = vcombine.high %v831_v45, %v839_v46 }
 0xa46   : > { %v823_v37 = vld [vmem:[#allocation11 + $0xd8] sm:$0xff] }
 0xa47   : > { %v1592_v39 = vsel %vm1591_vm6, %v1590_v38, 0.0  ;;  %2068 = vmatpush1.bf16.msra.mxu0 %v3975_v9  ;;  %v3995_v47 = vcombine.low %v815_v36, %v823_v37  ;;  %v854_v9 = vld [vmem:[#allocation11 + $0x1d0] sm:$0xff]  ;;  %v827_v45 = vld [vmem:[#allocation11 + $0xf8] sm:$0xff] }
 0xa48   : > { %1593 = vadd.xlane.f32.xlu0 %v1592_v39  ;;  %2069 = vmatprep.subr.bf16.mxu0 %v3992_v59  ;;  %v4026_v55 = vcombine.high %v846_v50, %v854_v9  ;;  %v801_v59 = vld [vmem:[#allocation11 + $0x28] sm:$0xff]  ;;  %v4025_v61 = vcombine.low %v846_v50, %v854_v9  ;;  %v842_v50 = vld [vmem:[#allocation11 + $0x170] sm:$0xff]  ;;  %v835_v9 = vld [vmem:[#allocation11 + $0x138] sm:$0xff] }
 0xa49   : > { %v3984_v1 = vcombine.high %v801_v59, %v809_v60  ;;  %v3983_v7 = vcombine.low %v801_v59, %v809_v60  ;;  %v859_v59 = vld [vmem:[#allocation11 + $0x1f8] sm:$0xff] }
 0xa4b   : > { %2070 = vmatpush1.bf16.msra.mxu0 %v3991_v58  ;;  %v808_v58 = vld [vmem:[#allocation11 + $0x60] sm:$0xff] }
 0xa4c   : > { %2071 = vmatprep.subr.bf16.mxu0 %v4008_v4  ;;  %v3982_v63 = vcombine.high %v800_v57, %v808_v58  ;;  %v817_v4 = vld [vmem:[#allocation11 + $0xa8] sm:$0xff]  ;;  %v3981_v6 = vcombine.low %v800_v57, %v808_v58  ;;  %v858_v57 = vld [vmem:[#allocation11 + $0x1f0] sm:$0xff]  ;;  %v851_v58 = vld [vmem:[#allocation11 + $0x1b8] sm:$0xff] }
 0xa4d   : > { %v4000_v10 = vcombine.high %v817_v4, %v825_v5  ;;  %v3999_v18 = vcombine.low %v817_v4, %v825_v5  ;;  %v4692_v4 = vld [vmem:[#allocation14 + $0xc0] sm:$0xff]  }
 0xa4e   : > { %v4693_v5 = vld [vmem:[#allocation14] sm:$0xff]  }
 0xa4f   : > { %2072 = vmatpush1.bf16.msra.mxu0 %v4007_v3  ;;  %v824_v3 = vld [vmem:[#allocation11 + $0xe0] sm:$0xff] }
 0xa50   : > { %2073 = vmatprep.subr.bf16.mxu0 %v4024_v15  ;;  %v3998_v8 = vcombine.high %v816_v2, %v824_v3  ;;  %v833_v15 = vld [vmem:[#allocation11 + $0x128] sm:$0xff]  ;;  %v3997_v17 = vcombine.low %v816_v2, %v824_v3  ;;  %v4035_v2 = vcombine.low %v851_v58, %v859_v59  ;;  %v4691_v3 = vld [vmem:[#allocation14 + $0x40] sm:$0xff]  }
 0xa51   : > { %v4016_v20 = vcombine.high %v833_v15, %v841_v16 }
 0xa53   : > { %2074 = vmatpush1.bf16.msra.mxu0 %v4023_v14  ;;  %v840_v14 = vld [vmem:[#allocation11 + $0x160] sm:$0xff] }
 0xa54   : > { %2149 = vmatprep.subr.bf16.mxu0 %v3980_v24  ;;  %v4014_v19 = vcombine.high %v832_v11, %v840_v14  ;;  %v849_v24 = vld [vmem:[#allocation11 + $0x1a8] sm:$0xff] }
 0xad5   : > { %v1594_v40 = vpop.xlane.xlu0 %1593 }
 0xad6   : > { %v1596_v41 = vmul.f32 0.015625, %v1594_v40  ;;  %v3994_v40 = vcombine.high %v814_v34, %v822_v35 }
 0xad8   : > { %v6119_v42 = vsub.f32 %v1590_v38, %v1596_v41  ;;  %v3996_v41 = vcombine.high %v815_v36, %v823_v37 }
 0xada   : > { %v1598_v43 = vmul.f32 %v6119_v42, %v6119_v42 }
 0xadc   : > { %v1599_v44 = vsel %vm1591_vm6, %v1598_v43, 0.0  ;;  %v830_v43 = vld [vmem:[#allocation11 + $0x110] sm:$0xff] }
 0xadd   : > { %1600 = vadd.xlane.f32.xlu1 %v1599_v44  ;;  %v838_v44 = vld [vmem:[#allocation11 + $0x150] sm:$0xff] }
 0xade   : > { %v4010_v48 = vcombine.high %v830_v43, %v838_v44  ;;  %v4009_v53 = vcombine.low %v830_v43, %v838_v44  ;;  %v826_v43 = vld [vmem:[#allocation11 + $0xf0] sm:$0xff]  ;;  %v819_v44 = vld [vmem:[#allocation11 + $0xb8] sm:$0xff] }
 0xb6a   : > { %v1601_v26 = vpop.xlane.xlu1 %1600 }
 0xb6b   : > { %v1602_v27 = vmul.f32 0.015625, %v1601_v26  ;;  %v857_v26 = vld [vmem:[#allocation11 + $0x1e8] sm:$0xff] }
 0xb6c   : > { %v4031_v36 = vcombine.low %v849_v24, %v857_v26 }
 0xb6d   : > { %v1603_v28 = vadd.f32 1e-05, %v1602_v27  ;;  %v4013_v27 = vcombine.low %v832_v11, %v840_v14  ;;  %v4699_v11 = vld [vmem:[#allocation14 + $0x50] sm:$0xff]  }
 0xb6e   : > { %v4700_v14 = vld [vmem:[#allocation14 + $0xd0] sm:$0xff]  }
 0xb6f   : > { %4835 = vrsqrt.f32 %v1603_v28  ;;  %v4015_v28 = vcombine.low %v833_v15, %v841_v16  ;;  %v4701_v15 = vld [vmem:[#allocation14 + $0x10] sm:$0xff]  }
 0xb70   : > { %v4702_v16 = vld [vmem:[#allocation14 + $0x90] sm:$0xff]  }
 0xb79   : > { %v4836_v29 = vpop.eup %4835 }
 0xb7a   : > { %v1605_v31 = vmul.f32 %v4836_v29, %v6119_v42  ;;  %v3993_v42 = vcombine.low %v814_v34, %v822_v35  ;;  %v811_v34 = vld [vmem:[#allocation11 + $0x78] sm:$0xff] }
 0xb7c   : > { %v1612_v33 = vmul.f32 %v3971_v30, %v1605_v31  ;;  %v4032_v30 = vcombine.high %v849_v24, %v857_v26  ;;  %v802_v31 = vld [vmem:[#allocation11 + $0x30] sm:$0xff]  ;;  %v4711_v26 = vld [vmem:[#allocation14 + $0x68] sm:$0xff]  }
 0xb7d   : > { %v4710_v24 = vld [vmem:[#allocation14 + $0xa0] sm:$0xff]  }
 0xb7e   : > { %v6125_v38 = vadd.f32 %v3972_v32, %v1612_v33  ;;  %v810_v32 = vld [vmem:[#allocation11 + $0x70] sm:$0xff]  ;;  %v803_v33 = vld [vmem:[#allocation11 + $0x38] sm:$0xff] }
 0xb7f   : > { %v3986_v37 = vcombine.high %v802_v31, %v810_v32  ;;  %v3985_v46 = vcombine.low %v802_v31, %v810_v32  ;;  %v4716_v31 = vld [vmem:[#allocation14 + $0xf0] sm:$0xff]  }
 0xb80   : > { %v6129_v39 = vpack.c.bf16 %v6125_v38, %v6125_v38  ;;  %v4717_v32 = vld [vmem:[#allocation14 + $0x30] sm:$0xff]  }
 0xb82   : > { %4037 = vmatmul.mubr.msk.bf16.vlgmr.msra.gmra.mrb[16].mxu1 %vm1175_vm0, %v6129_v39  ;;  %4038 = vmatmul.mubr.msk.bf16.vlgmr.msra.gmra.mrb[8].mxu0 %vm1175_vm0, %v6129_v39 }
 0xb83   : > { %2109 = vmatpush1.bf16.msra.mxu1 %v3977_v21  ;;  %2150 = vmatpush1.bf16.msra.mxu0 %v3979_v23  ;;  %v848_v21 = vld [vmem:[#allocation11 + $0x1a0] sm:$0xff] }
 0xb84   : > { %2110 = vmatprep.subr.bf16.mxu1 %v3994_v40  ;;  %2151 = vmatprep.subr.bf16.mxu0 %v3996_v41  ;;  %v856_v23 = vld [vmem:[#allocation11 + $0x1e0] sm:$0xff]  ;;  %v3988_v40 = vcombine.high %v803_v33, %v811_v34  ;;  %v818_v41 = vld [vmem:[#allocation11 + $0xb0] sm:$0xff] }
 0xb85   : > { %2140 = vmatprep.mubr.bf16.mxu1 %v5441_v0  ;;  %2181 = vmatprep.mubr.bf16.mxu0 %v5441_v0  ;;  %v4030_v29 = vcombine.high %v848_v21, %v856_v23  ;;  %v4029_v35 = vcombine.low %v848_v21, %v856_v23  ;;  %v4001_v52 = vcombine.low %v818_v41, %v826_v43  ;;  %v4708_v21 = vld [vmem:[#allocation14 + $0xe0] sm:$0xff]  }
 0xb86   : > { %v4709_v23 = vld [vmem:[#allocation14 + $0x20] sm:$0xff]  }
 0xb87   : > { %2111 = vmatpush1.bf16.msra.mxu1 %v3993_v42  ;;  %2152 = vmatpush1.bf16.msra.mxu0 %v3995_v47  ;;  %v3987_v42 = vcombine.low %v803_v33, %v811_v34  ;;  %v4002_v47 = vcombine.high %v818_v41, %v826_v43  ;;  %v4718_v33 = vld [vmem:[#allocation14 + $0xb0] sm:$0xff]   ;;  %v4719_v34 = vld [vmem:[#allocation14 + $0x78] sm:$0xff]   ;;  %v4724_v41 = vld [vmem:[#allocation14 + $0x1c0] sm:$0xff]   ;;  %v1649_v43 = vsub.s32 6, %v6069_v12 }
 0xb88   : > { %2112 = vmatprep.subr.bf16.mxu1 %v4010_v48  ;;  %2153 = vmatprep.subr.bf16.mxu0 %v4012_v49  ;;  %v4004_v48 = vcombine.high %v819_v44, %v827_v45  ;;  %v834_v49 = vld [vmem:[#allocation11 + $0x130] sm:$0xff] }
 0xb89   : > { %v4017_v60 = vcombine.low %v834_v49, %v842_v50 }
 0xb8b   : > { %2113 = vmatpush1.bf16.msra.mxu1 %v4009_v53  ;;  %2154 = vmatpush1.bf16.msra.mxu0 %v4011_v54  ;;  %v4003_v53 = vcombine.low %v819_v44, %v827_v45  ;;  %v4018_v54 = vcombine.high %v834_v49, %v842_v50  ;;  %v6154_v44 = vld [vmem:[#allocation13 + $0x8] sm:$0xff] }
 0xb8c   : > { %2114 = vmatprep.subr.bf16.mxu1 %v4026_v55  ;;  %2155 = vmatprep.subr.bf16.mxu0 %v4028_v56  ;;  %v4020_v55 = vcombine.high %v835_v9, %v843_v51  ;;  %v850_v56 = vld [vmem:[#allocation11 + $0x1b0] sm:$0xff]  ;;  %v6159_v45 = vrot.slane %v6154_v44, %v1649_v43 }
 0xb8f   : > { %2115 = vmatpush1.bf16.msra.mxu1 %v4025_v61  ;;  %2156 = vmatpush1.bf16.msra.mxu0 %v4027_v62  ;;  %v4019_v61 = vcombine.low %v835_v9, %v843_v51  ;;  %v4034_v62 = vcombine.high %v850_v56, %v858_v57 }
 0xb90   : > { %2190 = vmatprep.subr.bf16.mxu1 %v3982_v63  ;;  %2231 = vmatprep.subr.bf16.mxu0 %v3984_v1  ;;  %v4036_v63 = vcombine.high %v851_v58, %v859_v59  ;;  %v4033_v1 = vcombine.low %v850_v56, %v858_v57 }
 0xb92   : > { %4039 = vmatmul.mubr.msk.bf16.vlgmr.msra.gmra.mrb[20].mxu1 %vm1175_vm0, %v6129_v39  ;;  %4040 = vmatmul.mubr.msk.bf16.vlgmr.msra.gmra.mrb[12].mxu0 %vm1175_vm0, %v6129_v39 }
 0xb93   : > { %2191 = vmatpush1.bf16.msra.mxu1 %v3981_v6  ;;  %2232 = vmatpush1.bf16.msra.mxu0 %v3983_v7  ;;  %v4695_v6 = vld [vmem:[#allocation14 + $0x48] sm:$0xff]  }
 0xb94   : > { %2192 = vmatprep.subr.bf16.mxu1 %v3998_v8  ;;  %2233 = vmatprep.subr.bf16.mxu0 %v4000_v10  ;;  %v4696_v7 = vld [vmem:[#allocation14 + $0xc8] sm:$0xff]  }
 0xb95   : > { %2222 = vmatprep.mubr.bf16.mxu1 %v5441_v0  ;;  %2263 = vmatprep.mubr.bf16.mxu0 %v5441_v0  ;;  %v4697_v8 = vld [vmem:[#allocation14 + $0x8] sm:$0xff]  }
 0xb96   : > { %v4698_v10 = vld [vmem:[#allocation14 + $0x88] sm:$0xff]  }
 0xb97   : > { %2193 = vmatpush1.bf16.msra.mxu1 %v3997_v17  ;;  %2234 = vmatpush1.bf16.msra.mxu0 %v3999_v18  ;;  %v4703_v17 = vld [vmem:[#allocation14 + $0x58] sm:$0xff]  }
 0xb98   : > { %2194 = vmatprep.subr.bf16.mxu1 %v4014_v19  ;;  %2235 = vmatprep.subr.bf16.mxu0 %v4016_v20  ;;  %v4704_v18 = vld [vmem:[#allocation14 + $0xd8] sm:$0xff]   ;;  %v4707_v20 = vld [vmem:[#allocation14 + $0x60] sm:$0xff]  }
 0xb99   : > { %v4705_v19 = vld [vmem:[#allocation14 + $0x18] sm:$0xff]  }
 0xb9b   : > { %2195 = vmatpush1.bf16.msra.mxu1 %v4013_v27  ;;  %2236 = vmatpush1.bf16.msra.mxu0 %v4015_v28  ;;  %v4712_v27 = vld [vmem:[#allocation14 + $0xe8] sm:$0xff]  }
 0xb9c   : > { %2196 = vmatprep.subr.bf16.mxu1 %v4030_v29  ;;  %2237 = vmatprep.subr.bf16.mxu0 %v4032_v30  ;;  %v4713_v28 = vld [vmem:[#allocation14 + $0x28] sm:$0xff]   ;;  %v4715_v30 = vld [vmem:[#allocation14 + $0x70] sm:$0xff]  }
 0xb9d   : > { %v4714_v29 = vld [vmem:[#allocation14 + $0xa8] sm:$0xff]  }
 0xb9f   : > { %2197 = vmatpush1.bf16.msra.mxu1 %v4029_v35  ;;  %2238 = vmatpush1.bf16.msra.mxu0 %v4031_v36  ;;  %v4720_v35 = vld [vmem:[#allocation14 + $0xf8] sm:$0xff]  }
 0xba0   : > { %2272 = vmatprep.subr.bf16.mxu1 %v3986_v37  ;;  %2313 = vmatprep.subr.bf16.mxu0 %v3988_v40  ;;  %v4721_v36 = vld [vmem:[#allocation14 + $0x38] sm:$0xff]   ;;  %v4723_v40 = vld [vmem:[#allocation14 + $0x140] sm:$0xff]  }
 0xba1   : > { %v4722_v37 = vld [vmem:[#allocation14 + $0xb8] sm:$0xff]  }
 0xba2   : > { %4041 = vmatmul.mubr.msk.bf16.vlgmr.msra.gmra.mrb[24].mxu1 %vm1175_vm0, %v6129_v39  ;;  %4042 = vmatmul.mubr.msk.bf16.vlgmr.msra.gmra.mrb[16].mxu0 %vm1175_vm0, %v6129_v39 }
 0xba3   : > { %2273 = vmatpush1.bf16.msra.mxu1 %v3985_v46  ;;  %2314 = vmatpush1.bf16.msra.mxu0 %v3987_v42  ;;  %v1633_v46 = vsub.s32 2, %v6069_v12  ;;  %v6162_v42 = vld [vmem:[#allocation13] sm:$0xff] }
 0xba4   : > { %2274 = vmatprep.subr.bf16.mxu1 %v4002_v47  ;;  %2315 = vmatprep.subr.bf16.mxu0 %v4004_v48  ;;  %v1637_v47 = vsub.s32 3, %v6069_v12  ;;  %v1626_v48 = vrot.slane %v6162_v42, %v6072_v13  ;;  %v1630_v50 = vrot.slane %v6162_v42, %v6083_v25 }
 0xba5   : > { %2304 = vmatprep.mubr.bf16.mxu1 %v5441_v0  ;;  %2345 = vmatprep.mubr.bf16.mxu0 %v5441_v0  ;;  %v4694_v0 = vld [vmem:[#allocation14 + $0x80] sm:$0xff]   ;;  %v1634_v49 = vrot.slane %v6162_v42, %v1633_v46 }
 0xba6   : > { %v1638_v9 = vrot.slane %v6162_v42, %v1637_v47 }
 0xba7   : > { %2275 = vmatpush1.bf16.msra.mxu1 %v4001_v52  ;;  %2316 = vmatpush1.bf16.msra.mxu0 %v4003_v53 }
 0xba8   : > { %2276 = vmatprep.subr.bf16.mxu1 %v4018_v54  ;;  %2317 = vmatprep.subr.bf16.mxu0 %v4020_v55 }
 0xbab   : > { %2277 = vmatpush1.bf16.msra.mxu1 %v4017_v60  ;;  %2318 = vmatpush1.bf16.msra.mxu0 %v4019_v61 }
 0xbac   : > { %2278 = vmatprep.subr.bf16.mxu1 %v4034_v62  ;;  %2319 = vmatprep.subr.bf16.mxu0 %v4036_v63 }
 0xbaf   : > { %2279 = vmatpush1.bf16.msra.mxu1 %v4033_v1  ;;  %2320 = vmatpush1.bf16.msra.mxu0 %v4035_v2 }
 0xbb0   : > { %4207 = vmatprep.subr.bf16.mxu1 %v4691_v3  ;;  %4229 = vmatprep.subr.bf16.mxu0 %v4692_v4 }
 0xbb2   : > { %4043 = vmatmul.mubr.msk.bf16.vlgmr.msra.gmra.mrb[28].mxu1 %vm1175_vm0, %v6129_v39  ;;  %4044 = vmatmul.mubr.msk.bf16.vlgmr.msra.gmra.mrb[20].mxu0 %vm1175_vm0, %v6129_v39  ;;  %v4706_v39 = vld [vmem:[#allocation14 + $0x98] sm:$0xff]  }
 0xbb3   : > { %4208 = vmatpush3.bf16.msra.mxu1 %v4693_v5  ;;  %4230 = vmatpush3.bf16.msra.mxu0 %v4694_v0  ;;  %v4725_v0 = vld [vmem:[#allocation14 + $0x100] sm:$0xff]  }
 0xbb4   : > { %4209 = vmatprep.subr.bf16.mxu1 %v4695_v6  ;;  %4231 = vmatprep.subr.bf16.mxu0 %v4696_v7  ;;  %v4726_v6 = vld [vmem:[#allocation14 + $0x180] sm:$0xff]  }
 0xbb7   : > { %4210 = vmatpush3.bf16.msra.mxu1 %v4697_v8  ;;  %4232 = vmatpush3.bf16.msra.mxu0 %v4698_v10  ;;  %v4727_v10 = vld [vmem:[#allocation14 + $0x148] sm:$0xff]  }
 0xbb8   : > { %4211 = vmatprep.subr.bf16.mxu1 %v4699_v11  ;;  %4233 = vmatprep.subr.bf16.mxu0 %v4700_v14  ;;  %v4728_v11 = vld [vmem:[#allocation14 + $0x1c8] sm:$0xff]  }
 0xbb9   : > { %v4729_v14 = vld [vmem:[#allocation14 + $0x108] sm:$0xff]  }
 0xbbb   : > { %4212 = vmatpush3.bf16.msra.mxu1 %v4701_v15  ;;  %4234 = vmatpush3.bf16.msra.mxu0 %v4702_v16  ;;  %v4730_v15 = vld [vmem:[#allocation14 + $0x188] sm:$0xff]   ;;  %v1645_v16 = vsub.s32 5, %v6069_v12 }
 0xbbc   : > { %4213 = vmatprep.subr.bf16.mxu1 %v4703_v17  ;;  %4235 = vmatprep.subr.bf16.mxu0 %v4704_v18  ;;  %v1653_v17 = vsub.s32 7, %v6069_v12  ;;  %v4731_v18 = vld [vmem:[#allocation14 + $0x150] sm:$0xff]  }
 0xbbf   : > { %4214 = vmatpush3.bf16.msra.mxu1 %v4705_v19  ;;  %4236 = vmatpush3.bf16.msra.mxu0 %v4706_v39  ;;  %v4732_v19 = vld [vmem:[#allocation14 + $0x1d0] sm:$0xff]   ;;  %v1646_v39 = vrot.slane %v6162_v42, %v1645_v16 }
 0xbc0   : > { %4215 = vmatprep.subr.bf16.mxu1 %v4707_v20  ;;  %4237 = vmatprep.subr.bf16.mxu0 %v4708_v21  ;;  %v1654_v20 = vrot.slane %v6162_v42, %v1653_v17  ;;  %v4733_v21 = vld [vmem:[#allocation14 + $0x110] sm:$0xff]  }
 0xbc3   : > { %4216 = vmatpush3.bf16.msra.mxu1 %v4709_v23  ;;  %4238 = vmatpush3.bf16.msra.mxu0 %v4710_v24  ;;  %v4734_v23 = vld [vmem:[#allocation14 + $0x190] sm:$0xff]   ;;  %v4735_v24 = vld [vmem:[#allocation14 + $0x158] sm:$0xff]  }
 0xbc4   : > { %4217 = vmatprep.subr.bf16.mxu1 %v4711_v26  ;;  %4239 = vmatprep.subr.bf16.mxu0 %v4712_v27  ;;  %v4736_v26 = vld [vmem:[#allocation14 + $0x1d8] sm:$0xff]  }
 0xbc7   : > { %4218 = vmatpush3.bf16.msra.mxu1 %v4713_v28  ;;  %4240 = vmatpush3.bf16.msra.mxu0 %v4714_v29 }
 0xbc8   : > { %4219 = vmatprep.subr.bf16.mxu1 %v4715_v30  ;;  %4241 = vmatprep.subr.bf16.mxu0 %v4716_v31 }
 0xbcb   : > { %4220 = vmatpush3.bf16.msra.mxu1 %v4717_v32  ;;  %4242 = vmatpush3.bf16.msra.mxu0 %v4718_v33 }
 0xbcc   : > { %4221 = vmatprep.subr.bf16.mxu1 %v4719_v34  ;;  %4243 = vmatprep.subr.bf16.mxu0 %v4720_v35  ;;  %v4737_v35 = vld [vmem:[#allocation14 + $0x118] sm:$0xff]  }
 0xbcf   : > { %4222 = vmatpush3.bf16.msra.mxu1 %v4721_v36  ;;  %4244 = vmatpush3.bf16.msra.mxu0 %v4722_v37  ;;  %v4738_v36 = vld [vmem:[#allocation14 + $0x198] sm:$0xff]  }
 0xbd0   : > { %4251 = vmatprep.subr.bf16.mxu1 %v4723_v40  ;;  %4273 = vmatprep.subr.bf16.mxu0 %v4724_v41  ;;  %v4739_v41 = vld [vmem:[#allocation14 + $0x160] sm:$0xff]  }
 0xc55   : > { %v2060_v51 = vpop.f32.mrb[16].mxu1  ;;  %v2101_v52 = vpop.f32.mrb[8].mxu0 }
 0xc56   : > { %v2061_v53 = vadd.f32 %v2060_v51, %v1626_v48  ;;  %v2102_v54 = vadd.f32 %v2101_v52, %v1634_v49  ;;  %v2062_v55 = vpop.f32.mrb[17].mxu1  ;;  %v2103_v56 = vpop.f32.mrb[9].mxu0  ;;  %v4740_v48 = vld [vmem:[#allocation14 + $0x1e0] sm:$0xff]  }
 0xc57   : > { %v2063_v57 = vadd.f32 %v2062_v55, %v1630_v50  ;;  %v2104_v58 = vadd.f32 %v2103_v56, %v1638_v9  ;;  %v2064_v59 = vpop.f32.mrb[18].mxu1  ;;  %v2105_v60 = vpop.f32.mrb[10].mxu0  ;;  %v4741_v52 = vld [vmem:[#allocation14 + $0x120] sm:$0xff]   ;;  %v4743_v55 = vld [vmem:[#allocation14 + $0x168] sm:$0xff]  }
 0xc58   : > { %v2354_v61 = vmax.f32 %v2061_v53, 0.0  ;;  %v2356_v62 = vmax.f32 %v2102_v54, 0.0  ;;  %v2065_v63 = vpop.f32.mrb[19].mxu1  ;;  %v2106_v1 = vpop.f32.mrb[11].mxu0  ;;  %v4742_v53 = vld [vmem:[#allocation14 + $0x1a0] sm:$0xff]   ;;  %v1641_v54 = vsub.s32 4, %v6069_v12  ;;  %v1650_v60 = vrot.slane %v6162_v42, %v1649_v43 }
 0xc59   : > { %v2355_v2 = vmax.f32 %v2063_v57, 0.0  ;;  %v2357_v3 = vmax.f32 %v2104_v58, 0.0  ;;  %v4744_v56 = vld [vmem:[#allocation14 + $0x1e8] sm:$0xff]   ;;  %v1666_v63 = vrot.slane %v6154_v44, %v1633_v46  ;;  %v1662_v1 = vrot.slane %v6154_v44, %v6083_v25  ;;  %v4786_v12 = vld [vmem:[#allocation14 + $0x2b8] sm:$0xff]  }
 0xc5a   : > { %v2370_v7 = vpack.c.bf16 %v2354_v61, %v2354_v61  ;;  %v2372_v8 = vpack.c.bf16 %v2356_v62, %v2356_v62  ;;  %v4745_v57 = vld [vmem:[#allocation14 + $0x128] sm:$0xff]   ;;  %v1642_v59 = vrot.slane %v6162_v42, %v1641_v54  ;;  %v4747_v61 = vld [vmem:[#allocation14 + $0x170] sm:$0xff]  }
 0xc5b   : > { %v2371_v4 = vpack.c.bf16 %v2355_v2, %v2355_v2  ;;  %v2373_v5 = vpack.c.bf16 %v2357_v3, %v2357_v3  ;;  %v4746_v58 = vld [vmem:[#allocation14 + $0x1a8] sm:$0xff]   ;;  %v4748_v62 = vld [vmem:[#allocation14 + $0x1f0] sm:$0xff]   ;;  %v1670_v2 = vrot.slane %v6154_v44, %v1637_v47  ;;  %v4753_v47 = vld [vmem:[#allocation14 + $0x138] sm:$0xff]  }
 0xc5c   : > { %v4749_v3 = vld [vmem:[#allocation14 + $0x130] sm:$0xff]  }
 0xc5d   : > { %3192 = vmatprep.mubr.bf16.mxu1 %v2371_v4  ;;  %3232 = vmatprep.mubr.bf16.mxu0 %v2373_v5  ;;  %v4750_v4 = vld [vmem:[#allocation14 + $0x1b0] sm:$0xff]   ;;  %v4751_v5 = vld [vmem:[#allocation14 + $0x178] sm:$0xff]  }
 0xc5e   : > { %3193 = vmatmul.mubr.bf16.vlgmr.msra.gmra.mrb[32].mxu1 %v2370_v7  ;;  %3233 = vmatmul.mubr.bf16.vlgmr.msra.gmra.mrb[24].mxu0 %v2372_v8 }
 0xc5f   : > { %4252 = vmatpush3.bf16.msra.mxu1 %v4725_v0  ;;  %4274 = vmatpush3.bf16.msra.mxu0 %v4726_v6  ;;  %v4752_v0 = vld [vmem:[#allocation14 + $0x1f8] sm:$0xff]  }
 0xc60   : > { %4253 = vmatprep.subr.bf16.mxu1 %v4727_v10  ;;  %4275 = vmatprep.subr.bf16.mxu0 %v4728_v11 }
 0xc63   : > { %4254 = vmatpush3.bf16.msra.mxu1 %v4729_v14  ;;  %4276 = vmatpush3.bf16.msra.mxu0 %v4730_v15 }
 0xc64   : > { %4255 = vmatprep.subr.bf16.mxu1 %v4731_v18  ;;  %4277 = vmatprep.subr.bf16.mxu0 %v4732_v19  ;;  %v4754_v18 = vld [vmem:[#allocation14 + $0x1b8] sm:$0xff]  }
 0xc65   : > { %v2142_v27 = vpop.f32.mrb[20].mxu1  ;;  %v2183_v28 = vpop.f32.mrb[12].mxu0 }
 0xc66   : > { %v2144_v29 = vpop.f32.mrb[21].mxu1  ;;  %v2185_v30 = vpop.f32.mrb[13].mxu0  ;;  %v2143_v43 = vadd.f32 %v2142_v27, %v1642_v59  ;;  %v2184_v42 = vadd.f32 %v2183_v28, %v1650_v60  ;;  %v4757_v28 = vld [vmem:[#allocation14 + $0x200] sm:$0xff]  }
 0xc67   : > { %v2145_v31 = vadd.f32 %v2144_v29, %v1646_v39  ;;  %v2186_v32 = vadd.f32 %v2185_v30, %v1654_v20  ;;  %v2146_v33 = vpop.f32.mrb[22].mxu1  ;;  %v2187_v34 = vpop.f32.mrb[14].mxu0  ;;  %4256 = vmatpush3.bf16.msra.mxu1 %v4733_v21  ;;  %4278 = vmatpush3.bf16.msra.mxu0 %v4734_v23  ;;  %v4755_v23 = vld [vmem:[#allocation14 + $0x240] sm:$0xff]  }
 0xc68   : > { %v2147_v37 = vpop.f32.mrb[23].mxu1  ;;  %v2188_v40 = vpop.f32.mrb[15].mxu0  ;;  %4257 = vmatprep.subr.bf16.mxu1 %v4735_v24  ;;  %4279 = vmatprep.subr.bf16.mxu0 %v4736_v26  ;;  %v2358_v19 = vmax.f32 %v2143_v43, 0.0  ;;  %v2360_v39 = vmax.f32 %v2184_v42, 0.0  ;;  %v4756_v24 = vld [vmem:[#allocation14 + $0x2c0] sm:$0xff]   ;;  %v4759_v33 = vld [vmem:[#allocation14 + $0x248] sm:$0xff]  }
 0xc69   : > { %v2359_v49 = vmax.f32 %v2145_v31, 0.0  ;;  %v2361_v50 = vmax.f32 %v2186_v32, 0.0  ;;  %v4758_v31 = vld [vmem:[#allocation14 + $0x280] sm:$0xff]   ;;  %v4760_v34 = vld [vmem:[#allocation14 + $0x2c8] sm:$0xff]   ;;  %v4763_v40 = vld [vmem:[#allocation14 + $0x250] sm:$0xff]  }
 0xc6a   : > { %v2374_v29 = vpack.c.bf16 %v2358_v19, %v2358_v19  ;;  %v2376_v30 = vpack.c.bf16 %v2360_v39, %v2360_v39  ;;  %v4762_v37 = vld [vmem:[#allocation14 + $0x288] sm:$0xff]   ;;  %v4785_v39 = vld [vmem:[#allocation14 + $0x238] sm:$0xff]  }
 0xc6b   : > { %v2375_v9 = vpack.c.bf16 %v2359_v49, %v2359_v49  ;;  %v2377_v51 = vpack.c.bf16 %v2361_v50, %v2361_v50  ;;  %4258 = vmatpush3.bf16.msra.mxu1 %v4737_v35  ;;  %4280 = vmatpush3.bf16.msra.mxu0 %v4738_v36  ;;  %v4761_v36 = vld [vmem:[#allocation14 + $0x208] sm:$0xff]   ;;  %v4765_v49 = vld [vmem:[#allocation14 + $0x210] sm:$0xff]  }
 0xc6c   : > { %4259 = vmatprep.subr.bf16.mxu1 %v4739_v41  ;;  %4281 = vmatprep.subr.bf16.mxu0 %v4740_v48  ;;  %v4764_v41 = vld [vmem:[#allocation14 + $0x2d0] sm:$0xff]   ;;  %v1674_v48 = vrot.slane %v6154_v44, %v1641_v54  ;;  %v4769_v54 = vld [vmem:[#allocation14 + $0x218] sm:$0xff]   ;;  %v4776_v43 = vld [vmem:[#allocation14 + $0x2e8] sm:$0xff]  }
 0xc6d   : > { %3272 = vmatprep.mubr.bf16.mxu1 %v2375_v9  ;;  %3312 = vmatprep.mubr.bf16.mxu0 %v2377_v51  ;;  %v4766_v50 = vld [vmem:[#allocation14 + $0x290] sm:$0xff]   ;;  %v4767_v9 = vld [vmem:[#allocation14 + $0x258] sm:$0xff]   ;;  %v4777_v42 = vld [vmem:[#allocation14 + $0x228] sm:$0xff]  }
 0xc6f   : > { %4260 = vmatpush3.bf16.msra.mxu1 %v4741_v52  ;;  %4282 = vmatpush3.bf16.msra.mxu0 %v4742_v53  ;;  %v4768_v53 = vld [vmem:[#allocation14 + $0x2d8] sm:$0xff]  }
 0xc70   : > { %4261 = vmatprep.subr.bf16.mxu1 %v4743_v55  ;;  %4283 = vmatprep.subr.bf16.mxu0 %v4744_v56 }
 0xc73   : > { %4262 = vmatpush3.bf16.msra.mxu1 %v4745_v57  ;;  %4284 = vmatpush3.bf16.msra.mxu0 %v4746_v58 }
 0xc74   : > { %4263 = vmatprep.subr.bf16.mxu1 %v4747_v61  ;;  %4285 = vmatprep.subr.bf16.mxu0 %v4748_v62 }
 0xc75   : > { %v6198_v6 = vpop.f32.mrb[24].mxu1  ;;  %v2265_v46 = vpop.f32.mrb[16].mxu0 }
 0xc76   : > { %v6200_v7 = vadd.f32 %v2265_v46, %v1666_v63  ;;  %v2226_v8 = vpop.f32.mrb[25].mxu1  ;;  %v2267_v10 = vpop.f32.mrb[17].mxu0  ;;  %v4770_v63 = vld [vmem:[#allocation14 + $0x298] sm:$0xff]   ;;  %v4779_v46 = vld [vmem:[#allocation14 + $0x270] sm:$0xff]  }
 0xc77   : > { %v2227_v25 = vadd.f32 %v2226_v8, %v1662_v1  ;;  %v2268_v11 = vadd.f32 %v2267_v10, %v1670_v2  ;;  %v2228_v14 = vpop.f32.mrb[26].mxu1  ;;  %v2269_v15 = vpop.f32.mrb[18].mxu0  ;;  %4264 = vmatpush3.bf16.msra.mxu1 %v4749_v3  ;;  %4286 = vmatpush3.bf16.msra.mxu0 %v4750_v4  ;;  %v4771_v1 = vld [vmem:[#allocation14 + $0x260] sm:$0xff]   ;;  %v4775_v4 = vld [vmem:[#allocation14 + $0x268] sm:$0xff]   ;;  %v4780_v8 = vld [vmem:[#allocation14 + $0x2f0] sm:$0xff]   ;;  %v1678_v10 = vrot.slane %v6154_v44, %v1645_v16 }
 0xc78   : > { %v2229_v20 = vpop.f32.mrb[27].mxu1  ;;  %v2270_v21 = vpop.f32.mrb[19].mxu0  ;;  %4265 = vmatprep.subr.bf16.mxu1 %v4751_v5  ;;  %4287 = vmatprep.subr.bf16.mxu0 %v4752_v0  ;;  %v4772_v2 = vld [vmem:[#allocation14 + $0x2e0] sm:$0xff]   ;;  %v1658_v5 = vrot.slane %v6154_v44, %v6072_v13  ;;  %v4778_v0 = vld [vmem:[#allocation14 + $0x2a8] sm:$0xff]   ;;  %v4782_v13 = vld [vmem:[#allocation14 + $0x2b0] sm:$0xff]  }
 0xc79   : > { %v2363_v26 = vmax.f32 %v2227_v25, 0.0  ;;  %v2365_v27 = vmax.f32 %v2268_v11, 0.0  ;;  %v4773_v3 = vld [vmem:[#allocation14 + $0x220] sm:$0xff]   ;;  %v1686_v25 = vrot.slane %v6154_v44, %v1653_v17  ;;  %v4781_v11 = vld [vmem:[#allocation14 + $0x230] sm:$0xff]   ;;  %v4783_v15 = vld [vmem:[#allocation14 + $0x278] sm:$0xff]   ;;  %v2364_v44 = vmax.f32 %v6200_v7, 0.0 }
 0xc7a   : > { %v2225_v14 = vadd.f32 %v6198_v6, %v1658_v5  ;;  %v4787_v16 = vld [vmem:[#allocation14 + $0x340] sm:$0xff]   ;;  %v4793_v7 = vld [vmem:[#allocation14 + $0x308] sm:$0xff]  }
 0xc7b   : > { %4266 = vmatpush3.bf16.msra.mxu1 %v4753_v47  ;;  %4288 = vmatpush3.bf16.msra.mxu0 %v4754_v18  ;;  %v2379_v32 = vpack.c.bf16 %v2363_v26, %v2363_v26  ;;  %v2381_v35 = vpack.c.bf16 %v2365_v27, %v2365_v27  ;;  %v4784_v47 = vld [vmem:[#allocation14 + $0x2f8] sm:$0xff]   ;;  %v4788_v17 = vld [vmem:[#allocation14 + $0x3c0] sm:$0xff]   ;;  %v2380_v27 = vpack.c.bf16 %v2364_v44, %v2364_v44 }
 0xc7c   : > { %4295 = vmatprep.subr.bf16.mxu1 %v4755_v23  ;;  %4317 = vmatprep.subr.bf16.mxu0 %v4756_v24  ;;  %v2362_v20 = vmax.f32 %v2225_v14, 0.0  ;;  %v4789_v23 = vld [vmem:[#allocation14 + $0x300] sm:$0xff]  }
 0xc7d   : > { %v4790_v26 = vld [vmem:[#allocation14 + $0x380] sm:$0xff]  }
 0xc7e   : > { %3273 = vmatmul.mubr.bf16.vlgmr.msra.gmra.mrb[36].mxu1 %v2374_v29  ;;  %3313 = vmatmul.mubr.bf16.vlgmr.msra.gmra.mrb[28].mxu0 %v2376_v30  ;;  %v2378_v24 = vpack.c.bf16 %v2362_v20, %v2362_v20  ;;  %v4792_v30 = vld [vmem:[#allocation14 + $0x3c8] sm:$0xff]  }
 0xc7f   : > { %4296 = vmatpush3.bf16.msra.mxu1 %v4757_v28  ;;  %3352 = vmatprep.mubr.bf16.mxu1 %v2379_v32  ;;  %v4791_v28 = vld [vmem:[#allocation14 + $0x348] sm:$0xff]  }
 0xc80   : > { %4318 = vmatpush3.bf16.msra.mxu0 %v4758_v31  ;;  %3392 = vmatprep.mubr.bf16.mxu0 %v2381_v35  ;;  %v4794_v32 = vld [vmem:[#allocation14 + $0x388] sm:$0xff]   ;;  %v4797_v35 = vld [vmem:[#allocation14 + $0x310] sm:$0xff]  }
 0xc81   : > { %4297 = vmatprep.subr.bf16.mxu1 %v4759_v33  ;;  %4319 = vmatprep.subr.bf16.mxu0 %v4760_v34  ;;  %v4795_v33 = vld [vmem:[#allocation14 + $0x350] sm:$0xff]  }
 0xc82   : > { %v4796_v34 = vld [vmem:[#allocation14 + $0x3d0] sm:$0xff]  }
 0xc83   : > { %4298 = vmatpush3.bf16.msra.mxu1 %v4761_v36  ;;  %v4798_v36 = vld [vmem:[#allocation14 + $0x390] sm:$0xff]  }
 0xc84   : > { %4320 = vmatpush3.bf16.msra.mxu0 %v4762_v37  ;;  %4299 = vmatprep.subr.bf16.mxu1 %v4763_v40  ;;  %v4799_v37 = vld [vmem:[#allocation14 + $0x358] sm:$0xff]  }
 0xc85   : > { %v2306_v51 = vpop.f32.mrb[28].mxu1  ;;  %v2347_v52 = vpop.f32.mrb[20].mxu0  ;;  %4321 = vmatprep.subr.bf16.mxu0 %v4764_v41  ;;  %v4800_v40 = vld [vmem:[#allocation14 + $0x3d8] sm:$0xff]  }
 0xc86   : > { %v6205_v55 = vadd.f32 %v2306_v51, %v1674_v48  ;;  %v6208_v56 = vadd.f32 %v2347_v52, %v6159_v45  ;;  %v2308_v57 = vpop.f32.mrb[29].mxu1  ;;  %v2349_v58 = vpop.f32.mrb[21].mxu0  ;;  %v4774_v45 = vld [vmem:[#allocation14 + $0x2a0] sm:$0xff]   ;;  %v4801_v41 = vld [vmem:[#allocation14 + $0x318] sm:$0xff]   ;;  %v4807_v52 = vld [vmem:[#allocation14 + $0x368] sm:$0xff]  }
 0xc87   : > { %v2310_v59 = vpop.f32.mrb[30].mxu1  ;;  %v2351_v60 = vpop.f32.mrb[22].mxu0  ;;  %4300 = vmatpush3.bf16.msra.mxu1 %v4765_v49  ;;  %v2309_v18 = vadd.f32 %v2308_v57, %v1678_v10  ;;  %v2350_v19 = vadd.f32 %v2349_v58, %v1686_v25  ;;  %v4802_v48 = vld [vmem:[#allocation14 + $0x398] sm:$0xff]   ;;  %v4803_v49 = vld [vmem:[#allocation14 + $0x360] sm:$0xff]   ;;  %v4809_v57 = vld [vmem:[#allocation14 + $0x328] sm:$0xff]  }
 0xc88   : > { %4322 = vmatpush3.bf16.msra.mxu0 %v4766_v50  ;;  %v2311_v61 = vpop.f32.mrb[31].mxu1  ;;  %v2352_v62 = vpop.f32.mrb[23].mxu0  ;;  %4301 = vmatprep.subr.bf16.mxu1 %v4767_v9  ;;  %v4804_v50 = vld [vmem:[#allocation14 + $0x3e0] sm:$0xff]   ;;  %v4810_v58 = vld [vmem:[#allocation14 + $0x3a8] sm:$0xff]   ;;  %v4811_v59 = vld [vmem:[#allocation14 + $0x370] sm:$0xff]  }
 0xc89   : > { %4323 = vmatprep.subr.bf16.mxu0 %v4768_v53  ;;  %v2367_v6 = vmax.f32 %v2309_v18, 0.0  ;;  %v2369_v21 = vmax.f32 %v2350_v19, 0.0  ;;  %v4805_v9 = vld [vmem:[#allocation14 + $0x320] sm:$0xff]   ;;  %v4808_v53 = vld [vmem:[#allocation14 + $0x3e8] sm:$0xff]   ;;  %v4812_v60 = vld [vmem:[#allocation14 + $0x3f0] sm:$0xff]  }
 0xc8a   : > { %v4806_v51 = vld [vmem:[#allocation14 + $0x3a0] sm:$0xff]   ;;  %v4814_v61 = vld [vmem:[#allocation14 + $0x3b0] sm:$0xff]   ;;  %v4815_v62 = vld [vmem:[#allocation14 + $0x378] sm:$0xff]  }
 0xc8b   : > { %4302 = vmatpush3.bf16.msra.mxu1 %v4769_v54  ;;  %v2383_v29 = vpack.c.bf16 %v2367_v6, %v2367_v6  ;;  %v2385_v31 = vpack.c.bf16 %v2369_v21, %v2369_v21  ;;  %v4813_v54 = vld [vmem:[#allocation14 + $0x330] sm:$0xff]  }
 0xc8c   : > { %4324 = vmatpush3.bf16.msra.mxu0 %v4770_v63  ;;  %4303 = vmatprep.subr.bf16.mxu1 %v4771_v1  ;;  %v4816_v63 = vld [vmem:[#allocation14 + $0x3f8] sm:$0xff]  }
 0xc8d   : > { %4325 = vmatprep.subr.bf16.mxu0 %v4772_v2  ;;  %v4817_v1 = vld [vmem:[#allocation14 + $0x338] sm:$0xff]   ;;  %v2366_v2 = vmax.f32 %v6205_v55, 0.0 }
 0xc8f   : > { %4304 = vmatpush3.bf16.msra.mxu1 %v4773_v3  ;;  %v4818_v3 = vld [vmem:[#allocation14 + $0x3b8] sm:$0xff]  }
 0xc90   : > { %4326 = vmatpush3.bf16.msra.mxu0 %v4774_v45  ;;  %4305 = vmatprep.subr.bf16.mxu1 %v4775_v4  ;;  %v2368_v45 = vmax.f32 %v6208_v56, 0.0  ;;  %v2382_v4 = vpack.c.bf16 %v2366_v2, %v2366_v2  ;;  %v4045_v56 = vld [vmem:[#allocation16] ss:$0 sm:$0xff]  ;;  %v4820_v2 = vld [vmem:[#allocation23 + $0x8] sm:$0xff]  }
 0xc91   : > { %4327 = vmatprep.subr.bf16.mxu0 %v4776_v43 }
 0xc92   : > { %v2384_v43 = vpack.c.bf16 %v2368_v45, %v2368_v45 }
 0xc93   : > { %4306 = vmatpush3.bf16.msra.mxu1 %v4777_v42 }
 0xc94   : > { %4328 = vmatpush3.bf16.msra.mxu0 %v4778_v0  ;;  %4307 = vmatprep.subr.bf16.mxu1 %v4779_v46 }
 0xc95   : > { %4329 = vmatprep.subr.bf16.mxu0 %v4780_v8 }
 0xc97   : > { %4308 = vmatpush3.bf16.msra.mxu1 %v4781_v11 }
 0xc98   : > { %4330 = vmatpush3.bf16.msra.mxu0 %v4782_v13  ;;  %4309 = vmatprep.subr.bf16.mxu1 %v4783_v15 }
 0xc99   : > { %4331 = vmatprep.subr.bf16.mxu0 %v4784_v47 }
 0xc9b   : > { %4310 = vmatpush3.bf16.msra.mxu1 %v4785_v39 }
 0xc9c   : > { %4332 = vmatpush3.bf16.msra.mxu0 %v4786_v12  ;;  %4339 = vmatprep.subr.bf16.mxu1 %v4787_v16 }
 0xc9d   : > { %4361 = vmatprep.subr.bf16.mxu0 %v4788_v17 }
 0xc9e   : > { %3353 = vmatmul.mubr.bf16.vlgmr.msra.gmra.mrb[40].mxu1 %v2378_v24 }
 0xc9f   : > { %3393 = vmatmul.mubr.bf16.vlgmr.msra.gmra.mrb[32].mxu0 %v2380_v27  ;;  %4340 = vmatpush3.bf16.msra.mxu1 %v4789_v23 }
 0xca0   : > { %3432 = vmatprep.mubr.bf16.mxu1 %v2383_v29  ;;  %4362 = vmatpush3.bf16.msra.mxu0 %v4790_v26 }
 0xca1   : > { %3472 = vmatprep.mubr.bf16.mxu0 %v2385_v31  ;;  %4341 = vmatprep.subr.bf16.mxu1 %v4791_v28 }
 0xca2   : > { %4363 = vmatprep.subr.bf16.mxu0 %v4792_v30 }
 0xca3   : > { %4342 = vmatpush3.bf16.msra.mxu1 %v4793_v7 }
 0xca4   : > { %4364 = vmatpush3.bf16.msra.mxu0 %v4794_v32  ;;  %4343 = vmatprep.subr.bf16.mxu1 %v4795_v33 }
 0xca5   : > { %4365 = vmatprep.subr.bf16.mxu0 %v4796_v34 }
 0xca7   : > { %4344 = vmatpush3.bf16.msra.mxu1 %v4797_v35 }
 0xca8   : > { %4366 = vmatpush3.bf16.msra.mxu0 %v4798_v36  ;;  %4345 = vmatprep.subr.bf16.mxu1 %v4799_v37 }
 0xca9   : > { %4367 = vmatprep.subr.bf16.mxu0 %v4800_v40 }
 0xcab   : > { %4346 = vmatpush3.bf16.msra.mxu1 %v4801_v41 }
 0xcac   : > { %4368 = vmatpush3.bf16.msra.mxu0 %v4802_v48  ;;  %4347 = vmatprep.subr.bf16.mxu1 %v4803_v49 }
 0xcad   : > { %4369 = vmatprep.subr.bf16.mxu0 %v4804_v50 }
 0xcaf   : > { %4348 = vmatpush3.bf16.msra.mxu1 %v4805_v9 }
 0xcb0   : > { %4370 = vmatpush3.bf16.msra.mxu0 %v4806_v51  ;;  %4349 = vmatprep.subr.bf16.mxu1 %v4807_v52 }
 0xcb1   : > { %4371 = vmatprep.subr.bf16.mxu0 %v4808_v53 }
 0xcb3   : > { %4350 = vmatpush3.bf16.msra.mxu1 %v4809_v57 }
 0xcb4   : > { %4372 = vmatpush3.bf16.msra.mxu0 %v4810_v58  ;;  %4351 = vmatprep.subr.bf16.mxu1 %v4811_v59 }
 0xcb5   : > { %4373 = vmatprep.subr.bf16.mxu0 %v4812_v60 }
 0xcb7   : > { %4352 = vmatpush3.bf16.msra.mxu1 %v4813_v54 }
 0xcb8   : > { %4374 = vmatpush3.bf16.msra.mxu0 %v4814_v61  ;;  %4353 = vmatprep.subr.bf16.mxu1 %v4815_v62 }
 0xcb9   : > { %4375 = vmatprep.subr.bf16.mxu0 %v4816_v63 }
 0xcbb   : > { %4354 = vmatpush3.bf16.msra.mxu1 %v4817_v1  ;;  %v4819_v1 = vld [vmem:[#allocation23] sm:$0xff]  }
 0xcbc   : > { %4376 = vmatpush3.bf16.msra.mxu0 %v4818_v3  ;;  %4433 = vmatprep.subr.bf16.mxu1 %v5443_v22  ;;  %v4821_v3 = vld [vmem:[#allocation23 + $0x10] sm:$0xff]  }
 0xcbd   : > { %4445 = vmatprep.subr.bf16.mxu0 %v5443_v22 }
 0xcbe   : > { %3433 = vmatmul.mubr.bf16.vlgmr.msra.gmra.mrb[44].mxu1 %v2382_v4 }
 0xcbf   : > { %3473 = vmatmul.mubr.bf16.vlgmr.msra.gmra.mrb[36].mxu0 %v2384_v43  ;;  %4441 = vmatprep.mubr.msk.bf16.mxu1 %vm5444_vm1, %v5443_v22 }
 0xcc0   : > { %4453 = vmatprep.mubr.msk.bf16.mxu0 %vm5444_vm1, %v5443_v22  ;;  %4434 = vmatpush3.bf16.msra.mxu1 %v4819_v1 }
 0xcc1   : > { %4435 = vmatprep.subr.bf16.mxu1 %v5443_v22 }
 0xcc4   : > { %4436 = vmatpush3.bf16.msra.mxu1 %v4820_v2 }
 0xcc5   : > { %4437 = vmatprep.subr.bf16.mxu1 %v5443_v22 }
 0xcc8   : > { %4438 = vmatpush3.bf16.msra.mxu1 %v4821_v3 }
 0xcc9   : > { %4439 = vmatprep.subr.bf16.mxu1 %v5443_v22 }
 0xd31   : > { %v4223_v55 = vpop.f32.mrb[32].mxu1  ;;  %v4245_v42 = vpop.f32.mrb[24].mxu0 }
 0xd32   : > { %v4224_v5 = vpop.f32.mrb[33].mxu1  ;;  %v4246_v0 = vpop.f32.mrb[25].mxu0 }
 0xd33   : > { %v4225_v46 = vadd.f32 %v4224_v5, %v4223_v55  ;;  %v4247_v8 = vadd.f32 %v4246_v0, %v4245_v42  ;;  %v4226_v10 = vpop.f32.mrb[34].mxu1  ;;  %v4248_v25 = vpop.f32.mrb[26].mxu0  ;;  %v4174_v42 = vld [vmem:[#allocation20] ss:$0 sm:$0xff]  ;;  %v4175_v5 = vld [vmem:[#allocation22] ss:$0 sm:$0xff] }
 0xd34   : > { %v4227_v11 = vpop.f32.mrb[35].mxu1  ;;  %v4249_v14 = vpop.f32.mrb[27].mxu0  ;;  %v4823_v10 = vld [vmem:[#allocation26] sm:$0xff]   ;;  %v4824_v25 = vld [vmem:[#allocation26 + $0x8] sm:$0xff]  }
 0xd35   : > { %v3195_v13 = vadd.f32 %v4225_v46, %v4045_v56  ;;  %4446 = vmatpush3.bf16.msra.mxu0 %v4823_v10  ;;  %v4825_v11 = vld [vmem:[#allocation26 + $0x10] sm:$0xff]   ;;  %v4826_v14 = vld [vmem:[#allocation26 + $0x18] sm:$0xff]  }
 0xd36   : > { %4447 = vmatprep.subr.bf16.mxu0 %v5443_v22 }
 0xd37   : > { %v3235_v15 = vadd.f32 %v4247_v8, %v3195_v13  ;;  %v4176_v13 = vld [vmem:[#allocation25] ss:$0 sm:$0xff] }
 0xd39   : > { %4448 = vmatpush3.bf16.msra.mxu0 %v4824_v25 }
 0xd3a   : > { %4449 = vmatprep.subr.bf16.mxu0 %v5443_v22 }
 0xd3d   : > { %4450 = vmatpush3.bf16.msra.mxu0 %v4825_v11 }
 0xd3e   : > { %4451 = vmatprep.subr.bf16.mxu0 %v5443_v22 }
 0xd41   : > { %4452 = vmatpush3.bf16.msra.mxu0 %v4826_v14 }
 0xd51   : > { %v4267_v47 = vpop.f32.mrb[36].mxu1  ;;  %v4289_v18 = vpop.f32.mrb[28].mxu0 }
 0xd52   : > { %v4268_v19 = vpop.f32.mrb[37].mxu1  ;;  %v4290_v39 = vpop.f32.mrb[29].mxu0 }
 0xd53   : > { %v4269_v20 = vadd.f32 %v4268_v19, %v4267_v47  ;;  %v4291_v12 = vadd.f32 %v4290_v39, %v4289_v18  ;;  %v4270_v16 = vpop.f32.mrb[38].mxu1  ;;  %v4292_v44 = vpop.f32.mrb[30].mxu0 }
 0xd54   : > { %v4271_v17 = vpop.f32.mrb[39].mxu1  ;;  %v4293_v6 = vpop.f32.mrb[31].mxu0  ;;  %v4182_v16 = vld [vmem:[#allocation28] ss:$0 sm:$0xff] }
 0xd55   : > { %v3275_v21 = vadd.f32 %v4269_v20, %v3235_v15 }
 0xd57   : > { %v3315_v23 = vadd.f32 %v4291_v12, %v3275_v21 }
 0xd71   : > { %v4311_v24 = vpop.f32.mrb[40].mxu1 }
 0xd72   : > { %v4333_v26 = vpop.f32.mrb[32].mxu0  ;;  %v4312_v27 = vpop.f32.mrb[41].mxu1 }
 0xd73   : > { %v4313_v28 = vadd.f32 %v4312_v27, %v4311_v24  ;;  %v4334_v29 = vpop.f32.mrb[33].mxu0  ;;  %v4314_v30 = vpop.f32.mrb[42].mxu1 }
 0xd74   : > { %v4335_v31 = vadd.f32 %v4334_v29, %v4333_v26  ;;  %v4336_v7 = vpop.f32.mrb[34].mxu0  ;;  %v4315_v32 = vpop.f32.mrb[43].mxu1 }
 0xd75   : > { %v3355_v33 = vadd.f32 %v4313_v28, %v3315_v23  ;;  %v4337_v34 = vpop.f32.mrb[35].mxu0 }
 0xd77   : > { %v3395_v35 = vadd.f32 %v4335_v31, %v3355_v33 }
 0xd91   : > { %v4355_v36 = vpop.f32.mrb[44].mxu1 }
 0xd92   : > { %v4377_v37 = vpop.f32.mrb[36].mxu0  ;;  %v4356_v40 = vpop.f32.mrb[45].mxu1 }
 0xd93   : > { %v4357_v41 = vadd.f32 %v4356_v40, %v4355_v36  ;;  %v4378_v48 = vpop.f32.mrb[37].mxu0  ;;  %v4358_v49 = vpop.f32.mrb[46].mxu1 }
 0xd94   : > { %v4379_v50 = vadd.f32 %v4378_v48, %v4377_v37  ;;  %v4380_v9 = vpop.f32.mrb[38].mxu0  ;;  %v4359_v51 = vpop.f32.mrb[47].mxu1 }
 0xd95   : > { %v3435_v52 = vadd.f32 %v4357_v41, %v3395_v35  ;;  %v4381_v53 = vpop.f32.mrb[39].mxu0 }
 0xd97   : > { %v3475_v57 = vadd.f32 %v4379_v50, %v3435_v52 }
 0xd99   : > { %v3480_v58 = vadd.f32 %v3475_v57, %v6125_v38  ;;  %v4822_v38 = vld [vmem:[#allocation23 + $0x18] sm:$0xff]  }
 0xd9a   : > { %4440 = vmatpush3.bf16.msra.mxu1 %v4822_v38 }
 0xd9b   : > { %v3481_v59 = vsel %vm1591_vm6, %v3480_v58, 0.0 }
 0xd9c   : > { %3482 = vadd.xlane.f32.xlu1 %v3481_v59 }
 0xe29   : > { %v3483_v60 = vpop.xlane.xlu1 %3482 }
 0xe2a   : > { %v3484_v54 = vmul.f32 0.015625, %v3483_v60 }
 0xe2c   : > { %v3485_v61 = vsub.f32 %v3480_v58, %v3484_v54 }
 0xe2e   : > { %v3486_v62 = vmul.f32 %v3485_v61, %v3485_v61 }
 0xe30   : > { %v3487_v63 = vsel %vm1591_vm6, %v3486_v62, 0.0 }
 0xe31   : > { %3488 = vadd.xlane.f32.xlu1 %v3487_v63 }
 0xebe   : > { %v3489_v45 = vpop.xlane.xlu1 %3488 }
 0xebf   : > { %v3490_v4 = vmul.f32 0.015625, %v3489_v45 }
 0xec1   : > { %v3491_v43 = vadd.f32 1e-05, %v3490_v4 }
 0xec3   : > { %4837 = vrsqrt.f32 %v3491_v43 }
 0xecd   : > { %v4838_v55 = vpop.eup %4837 }
 0xece   : > { %v3493_v56 = vmul.f32 %v4838_v55, %v3485_v61 }
 0xed0   : > { %v3500_v0 = vmul.f32 %v4174_v42, %v3493_v56 }
 0xed2   : > { %v3507_v46 = vadd.f32 %v4175_v5, %v3500_v0 }
 0xed4   : > { %v3516_v8 = vpack.c.bf16 %v3507_v46, %v3507_v46 }
 0xed6   : > { %4442 = vmatmul.mubr.msk.bf16.vlgmr.msra.gmra.mrb[48].mxu1 %vm1175_vm0, %v3516_v8 }
 0xfa9   : > { %v3585_v15 = vpop.f32.mrb[48].mxu1 }
 0xfaa   : > { %v3586_v47 = vadd.f32 %v4176_v13, %v3585_v15  ;;  %v4443_v18 = vpop.f32.mrb[49].mxu1 }
 0xfab   : > { %v3588_v19 = vpop.f32.mrb[50].mxu1 }
 0xfac   : > { %4839 = vtanh.f32 %v3586_v47  ;;  %v4444_v39 = vpop.f32.mrb[51].mxu1 }
 0xfb6   : > { %v4840_v20 = vpop.eup %4839 }
 0xfb7   : > { %v3600_v12 = vpack.c.bf16 %v4840_v20, %v4840_v20 }
 0xfb9   : > { %4454 = vmatmul.mubr.msk.bf16.vlgmr.msra.gmra.mrb[40].mxu0 %vm1175_vm0, %v3600_v12 }
0x108c   : > { %v3669_v22 = vpop.f32.mrb[40].mxu0 }
0x108d   : > { %v3670_v44 = vadd.f32 %v4182_v16, %v3669_v22  ;;  %v4455_v17 = vpop.f32.mrb[41].mxu0 }
0x108e   : > { %v3672_v6 = vpop.f32.mrb[42].mxu0 }
0x108f   : > { %3675 = vst [vmem:[%s775_s18] sm:$0xf] %v3670_v44  ;;  %v4456_v21 = vpop.f32.mrb[43].mxu0 }
0x1090   : > { %5332 = shalt.err (!%p5329_p1)
}
0x1091   : > { %s5333_s1 = scalar_lea.hbm %s6245_s16, 64  ;;  %s5337_s21 = scalar_lea.hbm %s6375_s29, 128 }
0x1092   : > { %p5334_p11 = scmp.ne.s32.totalorder %s6245_s16, %s5333_s1  ;;  %p5338_p3 = scmp.lt.u32.totalorder %s6245_s16, %s6375_s29 }
0x1093   : > { %p5339_p6 = scmp.lt.u32.totalorder %s5337_s21, %s5333_s1  ;;  %p5341_p4 = scmp.lt.u32.totalorder %s5333_s1, %s6245_s16 }
0x1094   : > { %p5335_p12 = pnand %p5334_p11, %p6376_p8 }
0x1095   : > { %p5340_p9 = por %p5339_p6, %p5338_p3 }
0x1096   : > { %p5336_p13 = pneg %p5335_p12 }
0x1097   : > { %p5342_p0 = por %p5341_p4, %p5340_p9 }
0x1099   : > { %p5343_p5 = pnand %p5342_p0, %p5336_p13 }
0x109b   : > { %5346 = shalt.err (!%p5343_p5)
}
0x109c   : > { %4523 = dma.vmem_to_hbm [thread:$0]  (%p6376_p8), %s6247_s20, 64, %s6245_s16, %s3677_s3  }
0x109d PF: > { %s6377_s24 = sld [smem:[#allocation40_spill]]  ;;  %s6378_s2 = sld [smem:[#allocation43_spill]] }
0x109e   : > { %p6379_p2 = scmp.ne.s32.totalorder %s6352_s19, 0 }
0x10a3   : > { %s3702_s17 = sand.u32 1, %s6377_s24   ;;  %p6380_p7 = scmp.ge.s32.totalorder %s6378_s2, 2 }
0x10a4   : > { %s3703_s18 = scalar_lea.sflag [#allocation4], %s3702_s17 }
0x10a5   : > { %p4579_p10 = pnand %p6380_p7, %p6379_p2 }
0x10a7   : > { %5400 = dma.done.wait (!%p4579_p10), %s3703_s18, 64  }
0x10a8   : > { %5402 = vsyncadd (!%p4579_p10), %s3703_s18, 4294967232  ;;  %s6381_s24 = sld [smem:[#allocation41_spill]]  ;;  %s6382_s1 = sld [smem:[#allocation42_spill]] }
0x10a9   : > { %s6383_s21 = smov %s5960_s25  ;;  %p38_p1 = scmp.ge.s32.totalorder %s5948_s27, 4  }
0x10aa   : > { %s6385_s26 = smov %s6383_s21 }
0x10ab   :  { %40 = sbr.rel (!%p38_p1) target bundleno = 20 (0x14), region = 197 }
0x10ae   : > { %s6384_s25 = smov %s6382_s1 }
0x10b2   :  { %3708 = vsyncpa [#allocation3], 1 }
0x10b3   :  { %3710 = vsyncpa [#allocation3 + $0x1], 1 }
0x10b4   :  { %3711 = vsyncpa [#allocation6], 1 }
0x10b5   :  { %3712 = vsyncpa [#allocation9], 1 }
0x10b6   :  { %3713 = vsyncpa [#allocation12], 1 }
0x10b7   :  { %3714 = vsyncpa [#allocation15], 1 }
0x10b8   :  { %3715 = vsyncpa [#allocation18], 1 }
0x10b9   :  { %3716 = vsyncpa [#allocation21], 1 }
0x10ba   :  { %3717 = vsyncpa [#allocation24], 1 }
0x10bb   :  { %3718 = vsyncpa [#allocation27], 1 }
0x10bc   :  { %3719 = vsyncpa [#allocation4], 1 }
0x10bd   :  { %3721 = vsyncpa [#allocation4 + $0x1], 1 }

</bundles_post_ra>
